<compile_context>
chip_gen: v7x
topology: tpu7x:2x2x1
jax: 0.10.0
libtpu: 0.0.40
codegen_flags: <defaults>
</compile_context>

<pallas_src>
import functools

import jax
import jax.numpy as jnp
import numpy as np
from jax import lax
from jax.experimental import pallas as pl
from jax.experimental.pallas import tpu as pltpu

LRELU_SLOPE = 0.2
KSIZE = 4
IN_EPS = 1e-5
LANE = 128


def _round_up(x, m):
    return ((x + m - 1) // m) * m


# ---------------------------------------------------------------------------
# Pallas kernels
# ---------------------------------------------------------------------------
def _matmul_bias_act_kernel(act, x_ref, w_ref, b_ref, o_ref):
    """o = x @ w + b (+ optional LeakyReLU).  bf16 inputs, f32 accumulation."""
    y = jnp.dot(x_ref[...], w_ref[...], preferred_element_type=jnp.float32)
    y = y + b_ref[...]
    if act:
        y = jnp.where(y >= 0, y, LRELU_SLOPE * y)
    o_ref[...] = y.astype(o_ref.dtype)


def _conv_in_lrelu_kernel(l_valid, eps, x_ref, w_ref, g_ref, b_ref, o_ref):
    """Fused (conv-as-matmul, no bias) + InstanceNorm(affine) + LeakyReLU.

    x_ref holds one sample's full spatial extent (rows >= l_valid are
    zero-padded patch rows -> y rows are exactly zero, so plain sums over the
    padded block give the true per-channel sum / sum-of-squares; we divide by
    the static l_valid).  Padded output rows are junk and sliced off outside.
    """
    y = jnp.dot(x_ref[...], w_ref[...], preferred_element_type=jnp.float32)  # (Lp, TN) f32
    inv_l = 1.0 / l_valid
    mean = jnp.sum(y, axis=0, keepdims=True) * inv_l
    ex2 = jnp.sum(y * y, axis=0, keepdims=True) * inv_l
    var = ex2 - mean * mean                      # biased var, like PyTorch
    z = (y - mean) * lax.rsqrt(var + eps) * g_ref[...] + b_ref[...]
    o_ref[...] = jnp.where(z >= 0, z, LRELU_SLOPE * z).astype(o_ref.dtype)


# ---------------------------------------------------------------------------
# Pallas wrappers
# ---------------------------------------------------------------------------
def matmul_bias_act(a, w, b, act, out_dtype=jnp.bfloat16, tm=512):
    """a: (M, K), w: (K, Cout), b: (Cout,) -> (M, Cout)."""
    M, K = a.shape
    Cout = w.shape[1]
    Coutp = _round_up(Cout, LANE)
    TN = LANE
    if M > tm:
        TM = tm
        Mp = _round_up(M, TM)
    else:
        Mp = _round_up(M, 8)
        TM = Mp
    if Mp != M:
        a = jnp.pad(a, ((0, Mp - M), (0, 0)))
    if Coutp != Cout:
        w = jnp.pad(w, ((0, 0), (0, Coutp - Cout)))
        b = jnp.pad(b, (0, Coutp - Cout))
    out = pl.pallas_call(
        functools.partial(_matmul_bias_act_kernel, act),
        out_shape=jax.ShapeDtypeStruct((Mp, Coutp), out_dtype),
        grid=(Mp // TM, Coutp // TN),
        in_specs=[
            pl.BlockSpec((TM, K), lambda i, j: (i, 0)),
            pl.BlockSpec((K, TN), lambda i, j: (0, j)),
            pl.BlockSpec((1, TN), lambda i, j: (0, j)),
        ],
        out_specs=pl.BlockSpec((TM, TN), lambda i, j: (i, j)),
        compiler_params=pltpu.CompilerParams(
            dimension_semantics=("parallel", "parallel")),
    )(a.astype(jnp.bfloat16), w.astype(jnp.bfloat16),
      b.reshape(1, Coutp).astype(jnp.float32))
    return out[:M, :Cout]


def conv_in_lrelu(patches_nlk, l_valid, wmat, gamma, beta):
    """patches: (N, Lp, K) (rows >= l_valid are zero), wmat: (K, Cout)."""
    N, Lp, K = patches_nlk.shape
    Cout = wmat.shape[1]
    Coutp = _round_up(Cout, LANE)
    TN = LANE
    if Coutp != Cout:
        wmat = jnp.pad(wmat, ((0, 0), (0, Coutp - Cout)))
        gamma = jnp.pad(gamma, (0, Coutp - Cout))
        beta = jnp.pad(beta, (0, Coutp - Cout))
    out = pl.pallas_call(
        functools.partial(_conv_in_lrelu_kernel, float(l_valid), IN_EPS),
        out_shape=jax.ShapeDtypeStruct((N, Lp, Coutp), jnp.bfloat16),
        grid=(N, Coutp // TN),
        in_specs=[
            pl.BlockSpec((None, Lp, K), lambda n, j: (n, 0, 0)),
            pl.BlockSpec((K, TN), lambda n, j: (0, j)),
            pl.BlockSpec((1, TN), lambda n, j: (0, j)),
            pl.BlockSpec((1, TN), lambda n, j: (0, j)),
        ],
        out_specs=pl.BlockSpec((None, Lp, TN), lambda n, j: (n, 0, j)),
        compiler_params=pltpu.CompilerParams(
            dimension_semantics=("parallel", "parallel")),
    )(patches_nlk.astype(jnp.bfloat16), wmat.astype(jnp.bfloat16),
      gamma.reshape(1, Coutp).astype(jnp.float32),
      beta.reshape(1, Coutp).astype(jnp.float32))
    return out[:, :, :Cout] if Coutp != Cout else out


# ---------------------------------------------------------------------------
# Conv glue: reflect pad + im2col (static strides/shapes, bf16 patches)
# ---------------------------------------------------------------------------
def _im2col(x_nhwc, stride, padding):
    x_nhwc = x_nhwc.astype(jnp.bfloat16)
    if padding > 0:
        x_nhwc = jnp.pad(
            x_nhwc,
            ((0, 0), (padding, padding), (padding, padding), (0, 0)),
            mode="reflect",  # matches padding_mode='reflect'
        )
    N, Hp, Wp, Cin = x_nhwc.shape
    OH = (Hp - KSIZE) // stride + 1
    OW = (Wp - KSIZE) // stride + 1
    cols = []
    for kh in range(KSIZE):
        for kw in range(KSIZE):
            cols.append(
                x_nhwc[:,
                       kh: kh + (OH - 1) * stride + 1: stride,
                       kw: kw + (OW - 1) * stride + 1: stride,
                       :])
    # last-axis index = kh*4 + kw; flatten (cin, kh, kw) to match OIHW weights
    patches = jnp.stack(cols, axis=-1)                  # (N, OH, OW, Cin, 16)
    patches = patches.reshape(N, OH * OW, Cin * KSIZE * KSIZE)
    return patches, OH, OW


def _weight_matrix(w_oihw):
    cout, cin = w_oihw.shape[0], w_oihw.shape[1]
    return jnp.transpose(w_oihw, (1, 2, 3, 0)).reshape(cin * KSIZE * KSIZE, cout)


def conv2d_bias_act(x_nhwc, w_oihw, bias, stride, padding, act,
                    out_dtype=jnp.bfloat16, tm=512):
    N = x_nhwc.shape[0]
    Cout = w_oihw.shape[0]
    patches, OH, OW = _im2col(x_nhwc, stride, padding)
    patches = patches.reshape(N * OH * OW, -1)
    out = matmul_bias_act(patches, _weight_matrix(w_oihw), bias, act,
                          out_dtype=out_dtype, tm=tm)
    return out.reshape(N, OH, OW, Cout)


def conv_block(x_nhwc, w_oihw, gamma, beta, stride):
    """Conv(k4, stride, p0, no bias) + InstanceNorm(affine) + LeakyReLU, fused."""
    N = x_nhwc.shape[0]
    Cout = w_oihw.shape[0]
    patches, OH, OW = _im2col(x_nhwc, stride, 0)        # (N, L, K)
    L = OH * OW
    Lp = _round_up(L, 8)
    if Lp != L:
        patches = jnp.pad(patches, ((0, 0), (0, Lp - L), (0, 0)))
    out = conv_in_lrelu(patches, L, _weight_matrix(w_oihw), gamma, beta)
    return out[:, :L, :].reshape(N, OH, OW, Cout)


# ---------------------------------------------------------------------------
# Discriminator forward (matches the PyTorch module structure)
# ---------------------------------------------------------------------------
def init_params(key, in_ch=3, features=(64, 128, 256, 512)):
    keys = iter(jax.random.split(key, 3 * len(features) + 4))

    def conv_w(k, cout, cin):
        scale = 1.0 / np.sqrt(cin * KSIZE * KSIZE)
        return scale * jax.random.normal(k, (cout, cin, KSIZE, KSIZE), jnp.float32)

    params = {
        "w_init": conv_w(next(keys), features[0], in_ch * 2),   # bias=True conv
        "b_init": 0.01 * jax.random.normal(next(keys), (features[0],), jnp.float32),
        "blocks": [],
    }
    c = features[0]
    for f in features[1:]:
        params["blocks"].append({
            "w": conv_w(next(keys), f, c),                       # bias=False conv
            "gamma": 1.0 + 0.1 * jax.random.normal(next(keys), (f,), jnp.float32),
            "beta": 0.1 * jax.random.normal(next(keys), (f,), jnp.float32),
        })
        c = f
    params["w_final"] = conv_w(next(keys), 1, c)                 # bias=True conv
    params["b_final"] = 0.01 * jax.random.normal(next(keys), (1,), jnp.float32)
    return params


def discriminator_forward(params, x_nchw, y_nchw):
    h = jnp.concatenate([x_nchw, y_nchw], axis=1)          # (N, 2C, H, W)
    h = jnp.transpose(h, (0, 2, 3, 1))                     # -> NHWC (C on lanes)
    # initial: Conv(k4 s2 p1 reflect, bias) + LeakyReLU(0.2)
    h = conv2d_bias_act(h, params["w_init"], params["b_init"],
                        stride=2, padding=1, act=True, tm=512)
    # CNN blocks: Conv(k4, stride, p0, no bias) + InstanceNorm(affine) + LeakyReLU
    n_blocks = len(params["blocks"])
    for idx, blk in enumerate(params["blocks"]):
        stride = 1 if idx == n_blocks - 1 else 2           # static Python int
        h = conv_block(h, blk["w"], blk["gamma"], blk["beta"], stride=stride)
    # final: Conv(k4 s1 p1 reflect, bias), no activation
    h = conv2d_bias_act(h, params["w_final"], params["b_final"],
                        stride=1, padding=1, act=False, out_dtype=jnp.float32)
    return jnp.transpose(h, (0, 3, 1, 2))                  # back to NCHW


# ---------------------------------------------------------------------------
# Pure-JAX reference (XLA conv, f32) for correctness checking
# ---------------------------------------------------------------------------
def _ref_conv(x_nchw, w, b, stride, padding):
    if padding > 0:
        x_nchw = jnp.pad(
            x_nchw, ((0, 0), (0, 0), (padding, padding), (padding, padding)),
            mode="reflect")
    out = lax.conv_general_dilated(
        x_nchw, w, window_strides=(stride, stride), padding="VALID",
        dimension_numbers=("NCHW", "OIHW", "NCHW"),
        precision=lax.Precision.HIGHEST)
    if b is not None:
        out = out + b.reshape(1, -1, 1, 1)
    return out


def reference_forward(params, x, y):
    h = jnp.concatenate([x, y], axis=1)
    h = _ref_conv(h, params["w_init"], params["b_init"], 2, 1)
    h = jnp.where(h >= 0, h, LRELU_SLOPE * h)
    n_blocks = len(params["blocks"])
    for idx, blk in enumerate(params["blocks"]):
        stride = 1 if idx == n_blocks - 1 else 2
        h = _ref_conv(h, blk["w"], None, stride, 0)
        mean = jnp.mean(h, axis=(2, 3), keepdims=True)
        var = jnp.mean((h - mean) ** 2, axis=(2, 3), keepdims=True)
        h = (h - mean) * lax.rsqrt(var + IN_EPS)
        h = h * blk["gamma"].reshape(1, -1, 1, 1) + blk["beta"].reshape(1, -1, 1, 1)
        h = jnp.where(h >= 0, h, LRELU_SLOPE * h)
    h = _ref_conv(h, params["w_final"], params["b_final"], 1, 1)
    return h


if __name__ == "__main__":
    key = jax.random.PRNGKey(0)
    kx, ky, kp = jax.random.split(key, 3)

    # The CNNBlock convs use padding=0 (Conv2d default), so spatial size must
    # be >= ~68 for the default 5-layer stack; 70x70 gives a 3x3 patch output.
    N, C, H, W = 2, 3, 70, 70
    x = jax.random.normal(kx, (N, C, H, W), jnp.float32)
    y = jax.random.normal(ky, (N, C, H, W), jnp.float32)
    params = init_params(kp, in_ch=C, features=(64, 128, 256, 512))

    out = jax.jit(discriminator_forward)(params, x, y)
    out = jax.block_until_ready(out)

    ref = reference_forward(params, x, y)
    assert out.shape == ref.shape == (N, 1, 3, 3), out.shape
    assert bool(jnp.all(jnp.isfinite(out)))
    # bf16 MXU matmuls (f32 accumulation) vs f32 HIGHEST reference.
    np.testing.assert_allclose(np.asarray(out), np.asarray(ref), rtol=3e-2, atol=3e-2)

    print("KERNEL_OK")
</pallas_src>

<mosaic_0001>
module attributes {stable_mosaic.version = 11 : i64} {
  func.func @_matmul_bias_act_kernel(%arg0: i32, %arg1: i32, %arg2: memref<512x96xbf16, #tpu.memory_space<vmem>>, %arg3: memref<96x128xbf16, #tpu.memory_space<vmem>>, %arg4: memref<1x128xf32, #tpu.memory_space<vmem>>, %arg5: memref<512x128xbf16, #tpu.memory_space<vmem>>) attributes {dimension_semantics = [#tpu.dimension_semantics<parallel>, #tpu.dimension_semantics<parallel>], iteration_bounds = array<i64: 5, 1>, scalar_prefetch = 0 : i64, scratch_operands = 0 : i64, tpu.core_type = #tpu.core_type<tc>, window_params = [{transform_indices = @transform_0, window_bounds = array<i64: 512, 96>}, {transform_indices = @transform_1, window_bounds = array<i64: 96, 128>}, {transform_indices = @transform_2, window_bounds = array<i64: 1, 128>}, {transform_indices = @transform_3, window_bounds = array<i64: 512, 128>}]} {
    %c0 = arith.constant 0 : index
    %c0_0 = arith.constant 0 : index
    %0 = vector.load %arg2[%c0, %c0_0] : memref<512x96xbf16, #tpu.memory_space<vmem>>, vector<512x96xbf16>
    %c0_1 = arith.constant 0 : index
    %c0_2 = arith.constant 0 : index
    %1 = vector.load %arg3[%c0_1, %c0_2] : memref<96x128xbf16, #tpu.memory_space<vmem>>, vector<96x128xbf16>
    %cst = arith.constant dense<0.000000e+00> : vector<512x128xf32>
    %2 = tpu.matmul %0, %1, %cst {dimension_numbers = #tpu.dot_dimension_numbers<[1], [0], [0], [1], [0, 0, 1, 1], [], []>} : vector<512x96xbf16>, vector<96x128xbf16>, vector<512x128xf32> -> vector<512x128xf32>
    %c0_3 = arith.constant 0 : index
    %c0_4 = arith.constant 0 : index
    %3 = vector.load %arg4[%c0_3, %c0_4] : memref<1x128xf32, #tpu.memory_space<vmem>>, vector<1x128xf32>
    %4 = vector.broadcast %3 : vector<1x128xf32> to vector<512x128xf32>
    %5 = arith.addf %2, %4 : vector<512x128xf32>
    %cst_5 = arith.constant 0.000000e+00 : f32
    %6 = vector.broadcast %cst_5 : f32 to vector<512x128xf32>
    %7 = arith.cmpf oge, %5, %6 : vector<512x128xf32>
    %cst_6 = arith.constant 2.000000e-01 : f32
    %8 = vector.broadcast %cst_6 : f32 to vector<512x128xf32>
    %9 = arith.mulf %8, %5 : vector<512x128xf32>
    %10 = arith.select %7, %5, %9 : vector<512x128xi1>, vector<512x128xf32>
    %11 = arith.truncf %10 : vector<512x128xf32> to vector<512x128xbf16>
    %c0_7 = arith.constant 0 : index
    %c0_8 = arith.constant 0 : index
    %12 = vector.load %arg5[%c0_7, %c0_8] : memref<512x128xbf16, #tpu.memory_space<vmem>>, vector<512x128xbf16>
    tpu.vector_store %arg5[%c0_7, %c0_8], %11 {strides = array<i32>} : memref<512x128xbf16, #tpu.memory_space<vmem>>, vector<512x128xbf16>,
    return
  }
  func.func @transform_0(%arg0: i32, %arg1: i32) -> (i32, i32) {
    %c0_i32 = arith.constant 0 : i32
    %c0_i32_0 = arith.constant 0 : i32
    return %arg0, %c0_i32 : i32, i32
  }
  func.func @transform_1(%arg0: i32, %arg1: i32) -> (i32, i32) {
    %c0_i32 = arith.constant 0 : i32
    %c0_i32_0 = arith.constant 0 : i32
    return %c0_i32, %arg1 : i32, i32
  }
  func.func @transform_2(%arg0: i32, %arg1: i32) -> (i32, i32) {
    %c0_i32 = arith.constant 0 : i32
    %c0_i32_0 = arith.constant 0 : i32
    return %c0_i32, %arg1 : i32, i32
  }
  func.func @transform_3(%arg0: i32, %arg1: i32) -> (i32, i32) {
    %c0_i32 = arith.constant 0 : i32
    return %arg0, %arg1 : i32, i32
  }
}

module attributes {stable_mosaic.version = 11 : i64} {
  func.func @_conv_in_lrelu_kernel(%arg0: i32, %arg1: i32, %arg2: memref<1x256x1024xbf16, #tpu.memory_space<vmem>>, %arg3: memref<1024x128xbf16, #tpu.memory_space<vmem>>, %arg4: memref<1x128xf32, #tpu.memory_space<vmem>>, %arg5: memref<1x128xf32, #tpu.memory_space<vmem>>, %arg6: memref<1x256x128xbf16, #tpu.memory_space<vmem>>) attributes {dimension_semantics = [#tpu.dimension_semantics<parallel>, #tpu.dimension_semantics<parallel>], iteration_bounds = array<i64: 2, 1>, scalar_prefetch = 0 : i64, scratch_operands = 0 : i64, tpu.core_type = #tpu.core_type<tc>, window_params = [{transform_indices = @transform_0, window_bounds = array<i64: 1, 256, 1024>}, {transform_indices = @transform_1, window_bounds = array<i64: 1024, 128>}, {transform_indices = @transform_2, window_bounds = array<i64: 1, 128>}, {transform_indices = @transform_3, window_bounds = array<i64: 1, 128>}, {transform_indices = @transform_4, window_bounds = array<i64: 1, 256, 128>}]} {
    %c0 = arith.constant 0 : index
    %c0_0 = arith.constant 0 : index
    %c0_1 = arith.constant 0 : index
    %0 = vector.load %arg2[%c0, %c0_0, %c0_1] : memref<1x256x1024xbf16, #tpu.memory_space<vmem>>, vector<1x256x1024xbf16>
    %1 = vector.shape_cast %0 : vector<1x256x1024xbf16> to vector<256x1024xbf16>
    %c0_2 = arith.constant 0 : index
    %c0_3 = arith.constant 0 : index
    %2 = vector.load %arg3[%c0_2, %c0_3] : memref<1024x128xbf16, #tpu.memory_space<vmem>>, vector<1024x128xbf16>
    %cst = arith.constant dense<0.000000e+00> : vector<256x128xf32>
    %3 = tpu.matmul %1, %2, %cst {dimension_numbers = #tpu.dot_dimension_numbers<[1], [0], [0], [1], [0, 0, 1, 1], [], []>} : vector<256x1024xbf16>, vector<1024x128xbf16>, vector<256x128xf32> -> vector<256x128xf32>
    %cst_4 = arith.constant dense<0.000000e+00> : vector<128xf32>
    %4 = vector.multi_reduction <add>, %3, %cst_4 [0] : vector<256x128xf32> to vector<128xf32>
    %5 = vector.shape_cast %4 : vector<128xf32> to vector<1x128xf32>
    %cst_5 = arith.constant 3.906250e-03 : f32
    %6 = vector.broadcast %cst_5 : f32 to vector<1x128xf32>
    %7 = arith.mulf %5, %6 : vector<1x128xf32>
    %8 = arith.mulf %3, %3 : vector<256x128xf32>
    %cst_6 = arith.constant dense<0.000000e+00> : vector<128xf32>
    %9 = vector.multi_reduction <add>, %8, %cst_6 [0] : vector<256x128xf32> to vector<128xf32>
    %10 = vector.shape_cast %9 : vector<128xf32> to vector<1x128xf32>
    %cst_7 = arith.constant 3.906250e-03 : f32
    %11 = vector.broadcast %cst_7 : f32 to vector<1x128xf32>
    %12 = arith.mulf %10, %11 : vector<1x128xf32>
    %13 = arith.mulf %7, %7 : vector<1x128xf32>
    %14 = arith.subf %12, %13 : vector<1x128xf32>
    %15 = vector.broadcast %7 : vector<1x128xf32> to vector<256x128xf32>
    %16 = arith.subf %3, %15 : vector<256x128xf32>
    %cst_8 = arith.constant 9.99999974E-6 : f32
    %17 = vector.broadcast %cst_8 : f32 to vector<1x128xf32>
    %18 = arith.addf %14, %17 : vector<1x128xf32>
    %19 = math.rsqrt %18 : vector<1x128xf32>
    %20 = vector.broadcast %19 : vector<1x128xf32> to vector<256x128xf32>
    %21 = arith.mulf %16, %20 : vector<256x128xf32>
    %c0_9 = arith.constant 0 : index
    %c0_10 = arith.constant 0 : index
    %22 = vector.load %arg4[%c0_9, %c0_10] : memref<1x128xf32, #tpu.memory_space<vmem>>, vector<1x128xf32>
    %23 = vector.broadcast %22 : vector<1x128xf32> to vector<256x128xf32>
    %24 = arith.mulf %21, %23 : vector<256x128xf32>
    %c0_11 = arith.constant 0 : index
    %c0_12 = arith.constant 0 : index
    %25 = vector.load %arg5[%c0_11, %c0_12] : memref<1x128xf32, #tpu.memory_space<vmem>>, vector<1x128xf32>
    %26 = vector.broadcast %25 : vector<1x128xf32> to vector<256x128xf32>
    %27 = arith.addf %24, %26 : vector<256x128xf32>
    %cst_13 = arith.constant 0.000000e+00 : f32
    %28 = vector.broadcast %cst_13 : f32 to vector<256x128xf32>
    %29 = arith.cmpf oge, %27, %28 : vector<256x128xf32>
    %cst_14 = arith.constant 2.000000e-01 : f32
    %30 = vector.broadcast %cst_14 : f32 to vector<256x128xf32>
    %31 = arith.mulf %30, %27 : vector<256x128xf32>
    %32 = arith.select %29, %27, %31 : vector<256x128xi1>, vector<256x128xf32>
    %33 = arith.truncf %32 : vector<256x128xf32> to vector<256x128xbf16>
    %c0_15 = arith.constant 0 : index
    %c0_16 = arith.constant 0 : index
    %c0_17 = arith.constant 0 : index
    %34 = vector.load %arg6[%c0_15, %c0_16, %c0_17] : memref<1x256x128xbf16, #tpu.memory_space<vmem>>, vector<1x256x128xbf16>
    %35 = vector.shape_cast %34 : vector<1x256x128xbf16> to vector<256x128xbf16>
    %36 = vector.shape_cast %33 : vector<256x128xbf16> to vector<1x256x128xbf16>
    tpu.vector_store %arg6[%c0_15, %c0_16, %c0_17], %36 {strides = array<i32>} : memref<1x256x128xbf16, #tpu.memory_space<vmem>>, vector<1x256x128xbf16>,
    return
  }
  func.func @transform_0(%arg0: i32, %arg1: i32) -> (i32, i32, i32) {
    %c0_i32 = arith.constant 0 : i32
    %c0_i32_0 = arith.constant 0 : i32
    %c0_i32_1 = arith.constant 0 : i32
    return %arg0, %c0_i32, %c0_i32_0 : i32, i32, i32
  }
  func.func @transform_1(%arg0: i32, %arg1: i32) -> (i32, i32) {
    %c0_i32 = arith.constant 0 : i32
    %c0_i32_0 = arith.constant 0 : i32
    return %c0_i32, %arg1 : i32, i32
  }
  func.func @transform_2(%arg0: i32, %arg1: i32) -> (i32, i32) {
    %c0_i32 = arith.constant 0 : i32
    %c0_i32_0 = arith.constant 0 : i32
    return %c0_i32, %arg1 : i32, i32
  }
  func.func @transform_3(%arg0: i32, %arg1: i32) -> (i32, i32) {
    %c0_i32 = arith.constant 0 : i32
    %c0_i32_0 = arith.constant 0 : i32
    return %c0_i32, %arg1 : i32, i32
  }
  func.func @transform_4(%arg0: i32, %arg1: i32) -> (i32, i32, i32) {
    %c0_i32 = arith.constant 0 : i32
    %c0_i32_0 = arith.constant 0 : i32
    return %arg0, %c0_i32, %arg1 : i32, i32, i32
  }
}

module attributes {stable_mosaic.version = 11 : i64} {
  func.func @_conv_in_lrelu_kernel(%arg0: i32, %arg1: i32, %arg2: memref<1x56x2048xbf16, #tpu.memory_space<vmem>>, %arg3: memref<2048x128xbf16, #tpu.memory_space<vmem>>, %arg4: memref<1x128xf32, #tpu.memory_space<vmem>>, %arg5: memref<1x128xf32, #tpu.memory_space<vmem>>, %arg6: memref<1x56x128xbf16, #tpu.memory_space<vmem>>) attributes {dimension_semantics = [#tpu.dimension_semantics<parallel>, #tpu.dimension_semantics<parallel>], iteration_bounds = array<i64: 2, 2>, scalar_prefetch = 0 : i64, scratch_operands = 0 : i64, tpu.core_type = #tpu.core_type<tc>, window_params = [{transform_indices = @transform_0, window_bounds = array<i64: 1, 56, 2048>}, {transform_indices = @transform_1, window_bounds = array<i64: 2048, 128>}, {transform_indices = @transform_2, window_bounds = array<i64: 1, 128>}, {transform_indices = @transform_3, window_bounds = array<i64: 1, 128>}, {transform_indices = @transform_4, window_bounds = array<i64: 1, 56, 128>}]} {
    %c0 = arith.constant 0 : index
    %c0_0 = arith.constant 0 : index
    %c0_1 = arith.constant 0 : index
    %0 = vector.load %arg2[%c0, %c0_0, %c0_1] : memref<1x56x2048xbf16, #tpu.memory_space<vmem>>, vector<1x56x2048xbf16>
    %1 = vector.shape_cast %0 : vector<1x56x2048xbf16> to vector<56x2048xbf16>
    %c0_2 = arith.constant 0 : index
    %c0_3 = arith.constant 0 : index
    %2 = vector.load %arg3[%c0_2, %c0_3] : memref<2048x128xbf16, #tpu.memory_space<vmem>>, vector<2048x128xbf16>
    %cst = arith.constant dense<0.000000e+00> : vector<56x128xf32>
    %3 = tpu.matmul %1, %2, %cst {dimension_numbers = #tpu.dot_dimension_numbers<[1], [0], [0], [1], [0, 0, 1, 1], [], []>} : vector<56x2048xbf16>, vector<2048x128xbf16>, vector<56x128xf32> -> vector<56x128xf32>
    %cst_4 = arith.constant dense<0.000000e+00> : vector<128xf32>
    %4 = vector.multi_reduction <add>, %3, %cst_4 [0] : vector<56x128xf32> to vector<128xf32>
    %5 = vector.shape_cast %4 : vector<128xf32> to vector<1x128xf32>
    %cst_5 = arith.constant 0.0204081628 : f32
    %6 = vector.broadcast %cst_5 : f32 to vector<1x128xf32>
    %7 = arith.mulf %5, %6 : vector<1x128xf32>
    %8 = arith.mulf %3, %3 : vector<56x128xf32>
    %cst_6 = arith.constant dense<0.000000e+00> : vector<128xf32>
    %9 = vector.multi_reduction <add>, %8, %cst_6 [0] : vector<56x128xf32> to vector<128xf32>
    %10 = vector.shape_cast %9 : vector<128xf32> to vector<1x128xf32>
    %cst_7 = arith.constant 0.0204081628 : f32
    %11 = vector.broadcast %cst_7 : f32 to vector<1x128xf32>
    %12 = arith.mulf %10, %11 : vector<1x128xf32>
    %13 = arith.mulf %7, %7 : vector<1x128xf32>
    %14 = arith.subf %12, %13 : vector<1x128xf32>
    %15 = vector.broadcast %7 : vector<1x128xf32> to vector<56x128xf32>
    %16 = arith.subf %3, %15 : vector<56x128xf32>
    %cst_8 = arith.constant 9.99999974E-6 : f32
    %17 = vector.broadcast %cst_8 : f32 to vector<1x128xf32>
    %18 = arith.addf %14, %17 : vector<1x128xf32>
    %19 = math.rsqrt %18 : vector<1x128xf32>
    %20 = vector.broadcast %19 : vector<1x128xf32> to vector<56x128xf32>
    %21 = arith.mulf %16, %20 : vector<56x128xf32>
    %c0_9 = arith.constant 0 : index
    %c0_10 = arith.constant 0 : index
    %22 = vector.load %arg4[%c0_9, %c0_10] : memref<1x128xf32, #tpu.memory_space<vmem>>, vector<1x128xf32>
    %23 = vector.broadcast %22 : vector<1x128xf32> to vector<56x128xf32>
    %24 = arith.mulf %21, %23 : vector<56x128xf32>
    %c0_11 = arith.constant 0 : index
    %c0_12 = arith.constant 0 : index
    %25 = vector.load %arg5[%c0_11, %c0_12] : memref<1x128xf32, #tpu.memory_space<vmem>>, vector<1x128xf32>
    %26 = vector.broadcast %25 : vector<1x128xf32> to vector<56x128xf32>
    %27 = arith.addf %24, %26 : vector<56x128xf32>
    %cst_13 = arith.constant 0.000000e+00 : f32
    %28 = vector.broadcast %cst_13 : f32 to vector<56x128xf32>
    %29 = arith.cmpf oge, %27, %28 : vector<56x128xf32>
    %cst_14 = arith.constant 2.000000e-01 : f32
    %30 = vector.broadcast %cst_14 : f32 to vector<56x128xf32>
    %31 = arith.mulf %30, %27 : vector<56x128xf32>
    %32 = arith.select %29, %27, %31 : vector<56x128xi1>, vector<56x128xf32>
    %33 = arith.truncf %32 : vector<56x128xf32> to vector<56x128xbf16>
    %c0_15 = arith.constant 0 : index
    %c0_16 = arith.constant 0 : index
    %c0_17 = arith.constant 0 : index
    %34 = vector.load %arg6[%c0_15, %c0_16, %c0_17] : memref<1x56x128xbf16, #tpu.memory_space<vmem>>, vector<1x56x128xbf16>
    %35 = vector.shape_cast %34 : vector<1x56x128xbf16> to vector<56x128xbf16>
    %36 = vector.shape_cast %33 : vector<56x128xbf16> to vector<1x56x128xbf16>
    tpu.vector_store %arg6[%c0_15, %c0_16, %c0_17], %36 {strides = array<i32>} : memref<1x56x128xbf16, #tpu.memory_space<vmem>>, vector<1x56x128xbf16>,
    return
  }
  func.func @transform_0(%arg0: i32, %arg1: i32) -> (i32, i32, i32) {
    %c0_i32 = arith.constant 0 : i32
    %c0_i32_0 = arith.constant 0 : i32
    %c0_i32_1 = arith.constant 0 : i32
    return %arg0, %c0_i32, %c0_i32_0 : i32, i32, i32
  }
  func.func @transform_1(%arg0: i32, %arg1: i32) -> (i32, i32) {
    %c0_i32 = arith.constant 0 : i32
    %c0_i32_0 = arith.constant 0 : i32
    return %c0_i32, %arg1 : i32, i32
  }
  func.func @transform_2(%arg0: i32, %arg1: i32) -> (i32, i32) {
    %c0_i32 = arith.constant 0 : i32
    %c0_i32_0 = arith.constant 0 : i32
    return %c0_i32, %arg1 : i32, i32
  }
  func.func @transform_3(%arg0: i32, %arg1: i32) -> (i32, i32) {
    %c0_i32 = arith.constant 0 : i32
    %c0_i32_0 = arith.constant 0 : i32
    return %c0_i32, %arg1 : i32, i32
  }
  func.func @transform_4(%arg0: i32, %arg1: i32) -> (i32, i32, i32) {
    %c0_i32 = arith.constant 0 : i32
    %c0_i32_0 = arith.constant 0 : i32
    return %arg0, %c0_i32, %arg1 : i32, i32, i32
  }
}

module attributes {stable_mosaic.version = 11 : i64} {
  func.func @_conv_in_lrelu_kernel(%arg0: i32, %arg1: i32, %arg2: memref<1x16x4096xbf16, #tpu.memory_space<vmem>>, %arg3: memref<4096x128xbf16, #tpu.memory_space<vmem>>, %arg4: memref<1x128xf32, #tpu.memory_space<vmem>>, %arg5: memref<1x128xf32, #tpu.memory_space<vmem>>, %arg6: memref<1x16x128xbf16, #tpu.memory_space<vmem>>) attributes {dimension_semantics = [#tpu.dimension_semantics<parallel>, #tpu.dimension_semantics<parallel>], iteration_bounds = array<i64: 2, 4>, scalar_prefetch = 0 : i64, scratch_operands = 0 : i64, tpu.core_type = #tpu.core_type<tc>, window_params = [{transform_indices = @transform_0, window_bounds = array<i64: 1, 16, 4096>}, {transform_indices = @transform_1, window_bounds = array<i64: 4096, 128>}, {transform_indices = @transform_2, window_bounds = array<i64: 1, 128>}, {transform_indices = @transform_3, window_bounds = array<i64: 1, 128>}, {transform_indices = @transform_4, window_bounds = array<i64: 1, 16, 128>}]} {
    %c0 = arith.constant 0 : index
    %c0_0 = arith.constant 0 : index
    %c0_1 = arith.constant 0 : index
    %0 = vector.load %arg2[%c0, %c0_0, %c0_1] : memref<1x16x4096xbf16, #tpu.memory_space<vmem>>, vector<1x16x4096xbf16>
    %1 = vector.shape_cast %0 : vector<1x16x4096xbf16> to vector<16x4096xbf16>
    %c0_2 = arith.constant 0 : index
    %c0_3 = arith.constant 0 : index
    %2 = vector.load %arg3[%c0_2, %c0_3] : memref<4096x128xbf16, #tpu.memory_space<vmem>>, vector<4096x128xbf16>
    %cst = arith.constant dense<0.000000e+00> : vector<16x128xf32>
    %3 = tpu.matmul %1, %2, %cst {dimension_numbers = #tpu.dot_dimension_numbers<[1], [0], [0], [1], [0, 0, 1, 1], [], []>} : vector<16x4096xbf16>, vector<4096x128xbf16>, vector<16x128xf32> -> vector<16x128xf32>
    %cst_4 = arith.constant dense<0.000000e+00> : vector<128xf32>
    %4 = vector.multi_reduction <add>, %3, %cst_4 [0] : vector<16x128xf32> to vector<128xf32>
    %5 = vector.shape_cast %4 : vector<128xf32> to vector<1x128xf32>
    %cst_5 = arith.constant 6.250000e-02 : f32
    %6 = vector.broadcast %cst_5 : f32 to vector<1x128xf32>
    %7 = arith.mulf %5, %6 : vector<1x128xf32>
    %8 = arith.mulf %3, %3 : vector<16x128xf32>
    %cst_6 = arith.constant dense<0.000000e+00> : vector<128xf32>
    %9 = vector.multi_reduction <add>, %8, %cst_6 [0] : vector<16x128xf32> to vector<128xf32>
    %10 = vector.shape_cast %9 : vector<128xf32> to vector<1x128xf32>
    %cst_7 = arith.constant 6.250000e-02 : f32
    %11 = vector.broadcast %cst_7 : f32 to vector<1x128xf32>
    %12 = arith.mulf %10, %11 : vector<1x128xf32>
    %13 = arith.mulf %7, %7 : vector<1x128xf32>
    %14 = arith.subf %12, %13 : vector<1x128xf32>
    %15 = vector.broadcast %7 : vector<1x128xf32> to vector<16x128xf32>
    %16 = arith.subf %3, %15 : vector<16x128xf32>
    %cst_8 = arith.constant 9.99999974E-6 : f32
    %17 = vector.broadcast %cst_8 : f32 to vector<1x128xf32>
    %18 = arith.addf %14, %17 : vector<1x128xf32>
    %19 = math.rsqrt %18 : vector<1x128xf32>
    %20 = vector.broadcast %19 : vector<1x128xf32> to vector<16x128xf32>
    %21 = arith.mulf %16, %20 : vector<16x128xf32>
    %c0_9 = arith.constant 0 : index
    %c0_10 = arith.constant 0 : index
    %22 = vector.load %arg4[%c0_9, %c0_10] : memref<1x128xf32, #tpu.memory_space<vmem>>, vector<1x128xf32>
    %23 = vector.broadcast %22 : vector<1x128xf32> to vector<16x128xf32>
    %24 = arith.mulf %21, %23 : vector<16x128xf32>
    %c0_11 = arith.constant 0 : index
    %c0_12 = arith.constant 0 : index
    %25 = vector.load %arg5[%c0_11, %c0_12] : memref<1x128xf32, #tpu.memory_space<vmem>>, vector<1x128xf32>
    %26 = vector.broadcast %25 : vector<1x128xf32> to vector<16x128xf32>
    %27 = arith.addf %24, %26 : vector<16x128xf32>
    %cst_13 = arith.constant 0.000000e+00 : f32
    %28 = vector.broadcast %cst_13 : f32 to vector<16x128xf32>
    %29 = arith.cmpf oge, %27, %28 : vector<16x128xf32>
    %cst_14 = arith.constant 2.000000e-01 : f32
    %30 = vector.broadcast %cst_14 : f32 to vector<16x128xf32>
    %31 = arith.mulf %30, %27 : vector<16x128xf32>
    %32 = arith.select %29, %27, %31 : vector<16x128xi1>, vector<16x128xf32>
    %33 = arith.truncf %32 : vector<16x128xf32> to vector<16x128xbf16>
    %c0_15 = arith.constant 0 : index
    %c0_16 = arith.constant 0 : index
    %c0_17 = arith.constant 0 : index
    %34 = vector.load %arg6[%c0_15, %c0_16, %c0_17] : memref<1x16x128xbf16, #tpu.memory_space<vmem>>, vector<1x16x128xbf16>
    %35 = vector.shape_cast %34 : vector<1x16x128xbf16> to vector<16x128xbf16>
    %36 = vector.shape_cast %33 : vector<16x128xbf16> to vector<1x16x128xbf16>
    tpu.vector_store %arg6[%c0_15, %c0_16, %c0_17], %36 {strides = array<i32>} : memref<1x16x128xbf16, #tpu.memory_space<vmem>>, vector<1x16x128xbf16>,
    return
  }
  func.func @transform_0(%arg0: i32, %arg1: i32) -> (i32, i32, i32) {
    %c0_i32 = arith.constant 0 : i32
    %c0_i32_0 = arith.constant 0 : i32
    %c0_i32_1 = arith.constant 0 : i32
    return %arg0, %c0_i32, %c0_i32_0 : i32, i32, i32
  }
  func.func @transform_1(%arg0: i32, %arg1: i32) -> (i32, i32) {
    %c0_i32 = arith.constant 0 : i32
    %c0_i32_0 = arith.constant 0 : i32
    return %c0_i32, %arg1 : i32, i32
  }
  func.func @transform_2(%arg0: i32, %arg1: i32) -> (i32, i32) {
    %c0_i32 = arith.constant 0 : i32
    %c0_i32_0 = arith.constant 0 : i32
    return %c0_i32, %arg1 : i32, i32
  }
  func.func @transform_3(%arg0: i32, %arg1: i32) -> (i32, i32) {
    %c0_i32 = arith.constant 0 : i32
    %c0_i32_0 = arith.constant 0 : i32
    return %c0_i32, %arg1 : i32, i32
  }
  func.func @transform_4(%arg0: i32, %arg1: i32) -> (i32, i32, i32) {
    %c0_i32 = arith.constant 0 : i32
    %c0_i32_0 = arith.constant 0 : i32
    return %arg0, %c0_i32, %arg1 : i32, i32, i32
  }
}

module attributes {stable_mosaic.version = 11 : i64} {
  func.func @_matmul_bias_act_kernel(%arg0: i32, %arg1: i32, %arg2: memref<24x8192xbf16, #tpu.memory_space<vmem>>, %arg3: memref<8192x128xbf16, #tpu.memory_space<vmem>>, %arg4: memref<1x128xf32, #tpu.memory_space<vmem>>, %arg5: memref<24x128xf32, #tpu.memory_space<vmem>>) attributes {dimension_semantics = [#tpu.dimension_semantics<parallel>, #tpu.dimension_semantics<parallel>], iteration_bounds = array<i64: 1, 1>, scalar_prefetch = 0 : i64, scratch_operands = 0 : i64, tpu.core_type = #tpu.core_type<tc>, window_params = [{transform_indices = @transform_0, window_bounds = array<i64: 24, 8192>}, {transform_indices = @transform_1, window_bounds = array<i64: 8192, 128>}, {transform_indices = @transform_2, window_bounds = array<i64: 1, 128>}, {transform_indices = @transform_3, window_bounds = array<i64: 24, 128>}]} {
    %c0 = arith.constant 0 : index
    %c0_0 = arith.constant 0 : index
    %0 = vector.load %arg2[%c0, %c0_0] : memref<24x8192xbf16, #tpu.memory_space<vmem>>, vector<24x8192xbf16>
    %c0_1 = arith.constant 0 : index
    %c0_2 = arith.constant 0 : index
    %1 = vector.load %arg3[%c0_1, %c0_2] : memref<8192x128xbf16, #tpu.memory_space<vmem>>, vector<8192x128xbf16>
    %cst = arith.constant dense<0.000000e+00> : vector<24x128xf32>
    %2 = tpu.matmul %0, %1, %cst {dimension_numbers = #tpu.dot_dimension_numbers<[1], [0], [0], [1], [0, 0, 1, 1], [], []>} : vector<24x8192xbf16>, vector<8192x128xbf16>, vector<24x128xf32> -> vector<24x128xf32>
    %c0_3 = arith.constant 0 : index
    %c0_4 = arith.constant 0 : index
    %3 = vector.load %arg4[%c0_3, %c0_4] : memref<1x128xf32, #tpu.memory_space<vmem>>, vector<1x128xf32>
    %4 = vector.broadcast %3 : vector<1x128xf32> to vector<24x128xf32>
    %5 = arith.addf %2, %4 : vector<24x128xf32>
    %c0_5 = arith.constant 0 : index
    %c0_6 = arith.constant 0 : index
    %6 = vector.load %arg5[%c0_5, %c0_6] : memref<24x128xf32, #tpu.memory_space<vmem>>, vector<24x128xf32>
    tpu.vector_store %arg5[%c0_5, %c0_6], %5 {strides = array<i32>} : memref<24x128xf32, #tpu.memory_space<vmem>>, vector<24x128xf32>,
    return
  }
  func.func @transform_0(%arg0: i32, %arg1: i32) -> (i32, i32) {
    %c0_i32 = arith.constant 0 : i32
    %c0_i32_0 = arith.constant 0 : i32
    return %arg0, %c0_i32 : i32, i32
  }
  func.func @transform_1(%arg0: i32, %arg1: i32) -> (i32, i32) {
    %c0_i32 = arith.constant 0 : i32
    %c0_i32_0 = arith.constant 0 : i32
    return %c0_i32, %arg1 : i32, i32
  }
  func.func @transform_2(%arg0: i32, %arg1: i32) -> (i32, i32) {
    %c0_i32 = arith.constant 0 : i32
    %c0_i32_0 = arith.constant 0 : i32
    return %c0_i32, %arg1 : i32, i32
  }
  func.func @transform_3(%arg0: i32, %arg1: i32) -> (i32, i32) {
    %c0_i32 = arith.constant 0 : i32
    return %arg0, %arg1 : i32, i32
  }
}

</mosaic_0001>

<bundles_post_ra>
// kernel: discriminator_forward.5
= control target key start
LH: loop header
LB: loop body
LE: loop exit
PB: predicated region body
PF: predicated region fallthrough
CT: control target
= control target key end

     0   :  { %s2140_s12 = smov 0   ;;  %s2142_s13 = smov 0   ;;  %s2376_s0 = inlined_call_operand.vmem [shape: bf16[2560,96], index: 0, kind: input, shape index: {}]   ;;  %s2377_s1 = inlined_call_operand.vmem [shape: bf16[96,128], index: 1, kind: input, shape index: {}]   ;;  %s2378_s2 = inlined_call_operand.vmem [shape: f32[1,128], index: 2, kind: input, shape index: {}]   ;;  %s2379_s3 = inlined_call_operand.vmem [shape: bf16[2560,128], index: 3, kind: output, shape index: {}]  }
   0x1   :  { %s2144_s14 = smov 0  }
   0x2 LB: > { %s25_s15 = sadd.s32 1, %s2114_s13  ;;  %p1511_p0 = scmp.ge.s32.totalorder %s2118_s14, 1  ;;  %s2118_s14 = sphi %s2144_s14, %s13_s14   ;;  %s2114_s13 = sphi %s2142_s13, %s2381_s13   ;;  %s2110_s12 = sphi %s2140_s12, %s2380_s12  }
   0x3   : > { %p27_p1 = scmp.ge.s32.totalorder %s25_s15, 5  ;;  %p169_p2 = scmp.lt.s32.totalorder %s2118_s14, 6 }
   0x5   : > { %s2383_s15 = smov (%p27_p1, %s25_s15), 0  ;;  %p170_p3 = pnand %p1511_p0, %p169_p2 }
   0x6   : > { %v2058_v0 = vld [vmem:[%s2377_s1] sm:$0xff] (!%p170_p3)   ;;  %s1512_s18 = sshll.u32 (!%p170_p3), %s2110_s12, 6  ;;  %v2059_v1 = vld [vmem:[%s2377_s1 + $0x8] sm:$0xff] (!%p170_p3)   ;;  %v2060_v2 = vld [vmem:[%s2377_s1 + $0x10] sm:$0xff] (!%p170_p3)   ;;  %vm505_vm0 = vcmask (!%p170_p3), 785408  }
   0x7   : > { %173 = sbr.rel (%p170_p3) target bundleno = 320 (0x140), region = 32  ;;  %p204_p4 = scmp.lt.s32.totalorder (!%p170_p3), %s1512_s18, 319  ;;  %1946 = vmatprep.subr.bf16.mxu0 (!%p170_p3), %v2058_v0  ;;  %2022 = vmatprep.subr.bf16.mxu1 (!%p170_p3), %v2058_v0  ;;  %v2061_v3 = vld [vmem:[%s2377_s1 + $0x18] sm:$0xff] (!%p170_p3)   ;;  %v2062_v6 = vld [vmem:[%s2377_s1 + $0x20] sm:$0xff] (!%p170_p3)   ;;  %v2063_v7 = vld [vmem:[%s2377_s1 + $0x28] sm:$0xff] (!%p170_p3)  }
   0x8   : > { %1947 = vmatpush3.bf16.msra.mxu0 (!%p170_p3), %v2058_v0  ;;  %2028 = vmatpush3.bf16.msra.mxu1 (!%p170_p3), %v2058_v0  ;;  %v2253_v38 = vld [vmem:[%s2378_s2] ss:$0 sm:$0xff] (!%p170_p3) }
   0x9   : > { %1948 = vmatprep.subr.bf16.mxu0 (!%p170_p3), %v2059_v1  ;;  %2023 = vmatprep.subr.bf16.mxu1 (!%p170_p3), %v2059_v1 }
   0xc   : > { %1949 = vmatpush3.bf16.msra.mxu0 (!%p170_p3), %v2059_v1  ;;  %2029 = vmatpush3.bf16.msra.mxu1 (!%p170_p3), %v2059_v1 }
   0xd   : > { %1950 = vmatprep.subr.bf16.mxu0 (!%p170_p3), %v2060_v2  ;;  %2024 = vmatprep.subr.bf16.mxu1 (!%p170_p3), %v2060_v2 }
   0xe   : > { %s2385_s18 = smov (!%p204_p4, %s1512_s18), 319 }
   0xf   : > { %s1513_s23 = sshll.u32 %s2385_s18, 2 }
  0x10   : > { %s2178_s28 = scalar_lea.vmem %s2376_s0, %s1513_s23  ;;  %1951 = vmatpush3.bf16.msra.mxu0 %v2060_v2  ;;  %2030 = vmatpush3.bf16.msra.mxu1 %v2060_v2  ;;  %s2270_s10 = scalar_lea.vmem %s2379_s3, %s1513_s23 }
  0x11   : > { %v2064_v4 = vld [vmem:[%s2178_s28] sm:$0xff]   ;;  %1952 = vmatprep.subr.bf16.mxu0 %v2061_v3  ;;  %2025 = vmatprep.subr.bf16.mxu1 %v2061_v3  ;;  %v2066_v8 = vld [vmem:[%s2178_s28 + $0x8] sm:$0xff]   ;;  %v2068_v10 = vld [vmem:[%s2178_s28 + $0x10] sm:$0xff]  }
  0x12   : > { %v2065_v5 = vld [vmem:[%s2178_s28 + $0x80] sm:$0xff]   ;;  %1958 = vmatprep.mubr.msk.bf16.mxu0 %vm505_vm0, %v2064_v4  ;;  %v2067_v9 = vld [vmem:[%s2178_s28 + $0x88] sm:$0xff]   ;;  %v2069_v11 = vld [vmem:[%s2178_s28 + $0x90] sm:$0xff]  }
  0x13   : > { %1990 = vmatprep.mubr.msk.bf16.mxu1 %vm505_vm0, %v2065_v5  ;;  %v2070_v12 = vld [vmem:[%s2178_s28 + $0x18] sm:$0xff]   ;;  %v2072_v14 = vld [vmem:[%s2178_s28 + $0x20] sm:$0xff]   ;;  %v2074_v16 = vld [vmem:[%s2178_s28 + $0x28] sm:$0xff]  }
  0x14   : > { %1953 = vmatpush3.bf16.msra.mxu0 %v2061_v3  ;;  %2031 = vmatpush3.bf16.msra.mxu1 %v2061_v3  ;;  %v2071_v13 = vld [vmem:[%s2178_s28 + $0x98] sm:$0xff]   ;;  %v2073_v15 = vld [vmem:[%s2178_s28 + $0xa0] sm:$0xff]   ;;  %v2075_v17 = vld [vmem:[%s2178_s28 + $0xa8] sm:$0xff]  }
  0x15   : > { %1954 = vmatprep.subr.bf16.mxu0 %v2062_v6  ;;  %2026 = vmatprep.subr.bf16.mxu1 %v2062_v6  ;;  %v2076_v18 = vld [vmem:[%s2178_s28 + $0x30] sm:$0xff]   ;;  %v2078_v20 = vld [vmem:[%s2178_s28 + $0x38] sm:$0xff]   ;;  %v2080_v22 = vld [vmem:[%s2178_s28 + $0x40] sm:$0xff]  }
  0x16   : > { %v2077_v19 = vld [vmem:[%s2178_s28 + $0xb0] sm:$0xff]   ;;  %v2079_v21 = vld [vmem:[%s2178_s28 + $0xb8] sm:$0xff]   ;;  %v2081_v23 = vld [vmem:[%s2178_s28 + $0xc0] sm:$0xff]  }
  0x17   : > { %v2082_v24 = vld [vmem:[%s2178_s28 + $0x48] sm:$0xff]   ;;  %v2084_v26 = vld [vmem:[%s2178_s28 + $0x50] sm:$0xff]   ;;  %v2086_v28 = vld [vmem:[%s2178_s28 + $0x58] sm:$0xff]  }
  0x18   : > { %1955 = vmatpush3.bf16.msra.mxu0 %v2062_v6  ;;  %2032 = vmatpush3.bf16.msra.mxu1 %v2062_v6  ;;  %v2083_v25 = vld [vmem:[%s2178_s28 + $0xc8] sm:$0xff]   ;;  %v2085_v27 = vld [vmem:[%s2178_s28 + $0xd0] sm:$0xff]   ;;  %v2087_v29 = vld [vmem:[%s2178_s28 + $0xd8] sm:$0xff]  }
  0x19   : > { %1956 = vmatprep.subr.bf16.mxu0 %v2063_v7  ;;  %2027 = vmatprep.subr.bf16.mxu1 %v2063_v7  ;;  %v2088_v30 = vld [vmem:[%s2178_s28 + $0x60] sm:$0xff]   ;;  %v2090_v32 = vld [vmem:[%s2178_s28 + $0x68] sm:$0xff]   ;;  %v2092_v34 = vld [vmem:[%s2178_s28 + $0x70] sm:$0xff]  }
  0x1a   : > { %v2089_v31 = vld [vmem:[%s2178_s28 + $0xe0] sm:$0xff]   ;;  %v2091_v33 = vld [vmem:[%s2178_s28 + $0xe8] sm:$0xff]   ;;  %v2093_v35 = vld [vmem:[%s2178_s28 + $0xf0] sm:$0xff]  }
  0x1b   : > { %v2094_v36 = vld [vmem:[%s2178_s28 + $0x78] sm:$0xff]  }
  0x1c   : > { %1957 = vmatpush3.bf16.msra.mxu0 %v2063_v7  ;;  %2033 = vmatpush3.bf16.msra.mxu1 %v2063_v7  ;;  %v2095_v37 = vld [vmem:[%s2178_s28 + $0xf8] sm:$0xff]  }
  0x1f   : > { %1959 = vmatmul.mubr.msk.bf16.vlgmr.msra.gmra.mrb[0].mxu0 %vm505_vm0, %v2066_v8  ;;  %1991 = vmatmul.mubr.msk.bf16.vlgmr.msra.gmra.mrb[0].mxu1 %vm505_vm0, %v2067_v9 }
  0x20   : > { %1962 = vmatprep.mubr.msk.bf16.mxu0 %vm505_vm0, %v2068_v10  ;;  %1994 = vmatprep.mubr.msk.bf16.mxu1 %vm505_vm0, %v2069_v11 }
  0x27   : > { %1963 = vmatmul.mubr.msk.bf16.gmra.mrb[4].mxu0 %vm505_vm0, %v2070_v12  ;;  %1995 = vmatmul.mubr.msk.bf16.gmra.mrb[4].mxu1 %vm505_vm0, %v2071_v13 }
  0x28   : > { %1966 = vmatprep.mubr.msk.bf16.mxu0 %vm505_vm0, %v2072_v14  ;;  %1998 = vmatprep.mubr.msk.bf16.mxu1 %vm505_vm0, %v2073_v15 }
  0x2f   : > { %1967 = vmatmul.mubr.msk.bf16.gmra.mrb[8].mxu0 %vm505_vm0, %v2074_v16  ;;  %1999 = vmatmul.mubr.msk.bf16.gmra.mrb[8].mxu1 %vm505_vm0, %v2075_v17 }
  0x30   : > { %1970 = vmatprep.mubr.msk.bf16.mxu0 %vm505_vm0, %v2076_v18  ;;  %2002 = vmatprep.mubr.msk.bf16.mxu1 %vm505_vm0, %v2077_v19 }
  0x37   : > { %1971 = vmatmul.mubr.msk.bf16.gmra.mrb[12].mxu0 %vm505_vm0, %v2078_v20  ;;  %2003 = vmatmul.mubr.msk.bf16.gmra.mrb[12].mxu1 %vm505_vm0, %v2079_v21 }
  0x38   : > { %1974 = vmatprep.mubr.msk.bf16.mxu0 %vm505_vm0, %v2080_v22  ;;  %2006 = vmatprep.mubr.msk.bf16.mxu1 %vm505_vm0, %v2081_v23 }
  0x3f   : > { %1975 = vmatmul.mubr.msk.bf16.gmra.mrb[16].mxu0 %vm505_vm0, %v2082_v24  ;;  %2007 = vmatmul.mubr.msk.bf16.gmra.mrb[16].mxu1 %vm505_vm0, %v2083_v25 }
  0x40   : > { %1978 = vmatprep.mubr.msk.bf16.mxu0 %vm505_vm0, %v2084_v26  ;;  %2010 = vmatprep.mubr.msk.bf16.mxu1 %vm505_vm0, %v2085_v27 }
  0x47   : > { %1979 = vmatmul.mubr.msk.bf16.gmra.mrb[20].mxu0 %vm505_vm0, %v2086_v28  ;;  %2011 = vmatmul.mubr.msk.bf16.gmra.mrb[20].mxu1 %vm505_vm0, %v2087_v29 }
  0x48   : > { %1982 = vmatprep.mubr.msk.bf16.mxu0 %vm505_vm0, %v2088_v30  ;;  %2014 = vmatprep.mubr.msk.bf16.mxu1 %vm505_vm0, %v2089_v31 }
  0x4f   : > { %1983 = vmatmul.mubr.msk.bf16.gmra.mrb[24].mxu0 %vm505_vm0, %v2090_v32  ;;  %2015 = vmatmul.mubr.msk.bf16.gmra.mrb[24].mxu1 %vm505_vm0, %v2091_v33 }
  0x50   : > { %1986 = vmatprep.mubr.msk.bf16.mxu0 %vm505_vm0, %v2092_v34  ;;  %2018 = vmatprep.mubr.msk.bf16.mxu1 %vm505_vm0, %v2093_v35 }
  0x57   : > { %1987 = vmatmul.mubr.msk.bf16.gmra.mrb[28].mxu0 %vm505_vm0, %v2094_v36  ;;  %2019 = vmatmul.mubr.msk.bf16.gmra.mrb[28].mxu1 %vm505_vm0, %v2095_v37 }
  0xf2   : > { %v1960_v39 = vpop.f32.mrb[0].mxu0  ;;  %v1992_v40 = vpop.f32.mrb[0].mxu1 }
  0xf3   : > { %v645_v41 = vadd.f32 %v1960_v39, %v2253_v38  ;;  %v773_v42 = vadd.f32 %v1992_v40, %v2253_v38  ;;  %v636_v43 = vpop.f32.mrb[1].mxu0  ;;  %v764_v44 = vpop.f32.mrb[1].mxu1 }
  0xf4   : > { %v637_v45 = vadd.f32 %v2253_v38, %v636_v43  ;;  %v765_v46 = vadd.f32 %v2253_v38, %v764_v44  ;;  %v1961_v47 = vpop.f32.mrb[2].mxu0  ;;  %v1993_v48 = vpop.f32.mrb[2].mxu1 }
  0xf5   : > { %vm893_vm1 = vcmp.ge.f32.partialorder %v645_v41, 0.0  ;;  %v957_v49 = vmul.f32 0.2, %v645_v41  ;;  %vm925_vm2 = vcmp.ge.f32.partialorder %v773_v42, 0.0  ;;  %v989_v50 = vmul.f32 0.2, %v773_v42 }
  0xf6   : > { %vm891_vm3 = vcmp.ge.f32.partialorder %v637_v45, 0.0  ;;  %v955_v51 = vmul.f32 0.2, %v637_v45  ;;  %vm923_vm4 = vcmp.ge.f32.partialorder %v765_v46, 0.0  ;;  %v987_v52 = vmul.f32 0.2, %v765_v46 }
  0xf7   : > { %v648_v53 = vadd.f32 %v1961_v47, %v2253_v38  ;;  %v776_v54 = vadd.f32 %v1993_v48, %v2253_v38  ;;  %v639_v55 = vpop.f32.mrb[3].mxu0  ;;  %v767_v56 = vpop.f32.mrb[3].mxu1  ;;  %v1021_v57 = vsel %vm893_vm1, %v645_v41, %v957_v49  ;;  %v1053_v58 = vsel %vm925_vm2, %v773_v42, %v989_v50 }
  0xf8   : > { %v640_v59 = vadd.f32 %v2253_v38, %v639_v55  ;;  %v768_v60 = vadd.f32 %v2253_v38, %v767_v56  ;;  %v1019_v1 = vsel %vm891_vm3, %v637_v45, %v955_v51  ;;  %v1051_v2 = vsel %vm923_vm4, %v765_v46, %v987_v52 }
  0xf9   : > { %vm894_vm5 = vcmp.ge.f32.partialorder %v648_v53, 0.0  ;;  %v958_v61 = vmul.f32 0.2, %v648_v53  ;;  %vm926_vm6 = vcmp.ge.f32.partialorder %v776_v54, 0.0  ;;  %v990_v62 = vmul.f32 0.2, %v776_v54 }
  0xfa   : > { %vm892_vm7 = vcmp.ge.f32.partialorder %v640_v59, 0.0  ;;  %v956_v63 = vmul.f32 0.2, %v640_v59  ;;  %vm924_vm8 = vcmp.ge.f32.partialorder %v768_v60, 0.0  ;;  %v988_v0 = vmul.f32 0.2, %v768_v60 }
  0xfb   : > { %v1022_v3 = vsel %vm894_vm5, %v648_v53, %v958_v61  ;;  %v1054_v4 = vsel %vm926_vm6, %v776_v54, %v990_v62  ;;  %v1964_v5 = vpop.f32.mrb[4].mxu0  ;;  %v1996_v6 = vpop.f32.mrb[4].mxu1 }
  0xfc   : > { %v1725_v7 = vpack.c.bf16 %v1022_v3, %v1021_v57  ;;  %v1805_v8 = vpack.c.bf16 %v1054_v4, %v1053_v58  ;;  %v1020_v9 = vsel %vm892_vm7, %v640_v59, %v956_v63  ;;  %v1052_v10 = vsel %vm924_vm8, %v768_v60, %v988_v0  ;;  %v652_v11 = vpop.f32.mrb[5].mxu0  ;;  %v780_v12 = vpop.f32.mrb[5].mxu1 }
  0xfd   : > { %v1720_v13 = vpack.c.bf16 %v1020_v9, %v1019_v1  ;;  %v1800_v14 = vpack.c.bf16 %v1052_v10, %v1051_v2  ;;  %v661_v15 = vadd.f32 %v1964_v5, %v2253_v38  ;;  %v789_v16 = vadd.f32 %v1996_v6, %v2253_v38  ;;  %v1965_v17 = vpop.f32.mrb[6].mxu0  ;;  %v1997_v18 = vpop.f32.mrb[6].mxu1 }
  0xfe   : > { %1877 = vst [vmem:[%s2270_s10 + $0x8] sm:$0xff] %v1725_v7   ;;  %1893 = vst [vmem:[%s2270_s10 + $0x88] sm:$0xff] %v1805_v8   ;;  %v653_v19 = vadd.f32 %v2253_v38, %v652_v11  ;;  %v781_v20 = vadd.f32 %v2253_v38, %v780_v12  ;;  %v664_v21 = vadd.f32 %v1965_v17, %v2253_v38  ;;  %v655_v23 = vpop.f32.mrb[7].mxu0  ;;  %v783_v24 = vpop.f32.mrb[7].mxu1 }
  0xff   : > { %v792_v22 = vadd.f32 %v1997_v18, %v2253_v38  ;;  %1721 = vst [vmem:[%s2270_s10] sm:$0xff] %v1720_v13   ;;  %1892 = vst [vmem:[%s2270_s10 + $0x80] sm:$0xff] %v1800_v14   ;;  %vm897_vm9 = vcmp.ge.f32.partialorder %v661_v15, 0.0  ;;  %v961_v25 = vmul.f32 0.2, %v661_v15  ;;  %vm929_vm10 = vcmp.ge.f32.partialorder %v789_v16, 0.0 }
 0x100   : > { %v993_v26 = vmul.f32 0.2, %v789_v16  ;;  %vm895_vm11 = vcmp.ge.f32.partialorder %v653_v19, 0.0  ;;  %v959_v27 = vmul.f32 0.2, %v653_v19  ;;  %vm927_vm12 = vcmp.ge.f32.partialorder %v781_v20, 0.0 }
 0x101   : > { %v991_v28 = vmul.f32 0.2, %v781_v20  ;;  %v1025_v29 = vsel %vm897_vm9, %v661_v15, %v961_v25  ;;  %vm898_vm13 = vcmp.ge.f32.partialorder %v664_v21, 0.0  ;;  %v962_v31 = vmul.f32 0.2, %v664_v21 }
 0x102   : > { %v1057_v30 = vsel %vm929_vm10, %v789_v16, %v993_v26  ;;  %v1023_v32 = vsel %vm895_vm11, %v653_v19, %v959_v27  ;;  %vm930_vm14 = vcmp.ge.f32.partialorder %v792_v22, 0.0  ;;  %v994_v34 = vmul.f32 0.2, %v792_v22  ;;  %v1968_v35 = vpop.f32.mrb[8].mxu0  ;;  %v2000_v36 = vpop.f32.mrb[8].mxu1 }
 0x103   : > { %v1055_v33 = vsel %vm927_vm12, %v781_v20, %v991_v28  ;;  %v1026_v37 = vsel %vm898_vm13, %v664_v21, %v962_v31  ;;  %v656_v39 = vadd.f32 %v2253_v38, %v655_v23  ;;  %v784_v40 = vadd.f32 %v2253_v38, %v783_v24  ;;  %v668_v42 = vpop.f32.mrb[9].mxu0  ;;  %v796_v43 = vpop.f32.mrb[9].mxu1 }
 0x104   : > { %v677_v41 = vadd.f32 %v1968_v35, %v2253_v38  ;;  %v1735_v44 = vpack.c.bf16 %v1026_v37, %v1025_v29  ;;  %v1058_v45 = vsel %vm930_vm14, %v792_v22, %v994_v34  ;;  %v805_v46 = vadd.f32 %v2000_v36, %v2253_v38  ;;  %v1969_v48 = vpop.f32.mrb[10].mxu0  ;;  %v2001_v49 = vpop.f32.mrb[10].mxu1 }
 0x105   : > { %v669_v47 = vadd.f32 %v2253_v38, %v668_v42  ;;  %v1815_v50 = vpack.c.bf16 %v1058_v45, %v1057_v30  ;;  %vm896_vm15 = vcmp.ge.f32.partialorder %v656_v39, 0.0  ;;  %v960_v51 = vmul.f32 0.2, %v656_v39  ;;  %v671_v52 = vpop.f32.mrb[11].mxu0  ;;  %v799_v53 = vpop.f32.mrb[11].mxu1 }
 0x106   : > { %vm928_vm0 = vcmp.ge.f32.partialorder %v784_v40, 0.0  ;;  %1879 = vst [vmem:[%s2270_s10 + $0x18] sm:$0xff] %v1735_v44   ;;  %v992_v54 = vmul.f32 0.2, %v784_v40  ;;  %vm901_vm1 = vcmp.ge.f32.partialorder %v677_v41, 0.0  ;;  %vm933_vm2 = vcmp.ge.f32.partialorder %v805_v46, 0.0 }
 0x107   : > { %v965_v55 = vmul.f32 0.2, %v677_v41  ;;  %1895 = vst [vmem:[%s2270_s10 + $0x98] sm:$0xff] %v1815_v50   ;;  %v1024_v56 = vsel %vm896_vm15, %v656_v39, %v960_v51  ;;  %v997_v57 = vmul.f32 0.2, %v805_v46  ;;  %vm899_vm3 = vcmp.ge.f32.partialorder %v669_v47, 0.0 }
 0x108   : > { %v963_v58 = vmul.f32 0.2, %v669_v47  ;;  %v1730_v59 = vpack.c.bf16 %v1024_v56, %v1023_v32  ;;  %v1056_v60 = vsel %vm928_vm0, %v784_v40, %v992_v54  ;;  %v797_v62 = vadd.f32 %v2253_v38, %v796_v43 }
 0x109   : > { %v1029_v61 = vsel %vm901_vm1, %v677_v41, %v965_v55  ;;  %v1810_v63 = vpack.c.bf16 %v1056_v60, %v1055_v33  ;;  %v1061_v0 = vsel %vm933_vm2, %v805_v46, %v997_v57  ;;  %v680_v2 = vadd.f32 %v1969_v48, %v2253_v38 }
 0x10a   : > { %v1027_v1 = vsel %vm899_vm3, %v669_v47, %v963_v58  ;;  %1878 = vst [vmem:[%s2270_s10 + $0x10] sm:$0xff] %v1730_v59   ;;  %vm931_vm4 = vcmp.ge.f32.partialorder %v797_v62, 0.0  ;;  %v995_v3 = vmul.f32 0.2, %v797_v62  ;;  %v808_v4 = vadd.f32 %v2001_v49, %v2253_v38  ;;  %v1972_v6 = vpop.f32.mrb[12].mxu0  ;;  %v2004_v7 = vpop.f32.mrb[12].mxu1 }
 0x10b   : > { %v672_v5 = vadd.f32 %v2253_v38, %v671_v52  ;;  %1894 = vst [vmem:[%s2270_s10 + $0x90] sm:$0xff] %v1810_v63   ;;  %vm902_vm5 = vcmp.ge.f32.partialorder %v680_v2, 0.0  ;;  %v966_v8 = vmul.f32 0.2, %v680_v2  ;;  %v800_v9 = vadd.f32 %v2253_v38, %v799_v53  ;;  %v684_v11 = vpop.f32.mrb[13].mxu0  ;;  %v812_v12 = vpop.f32.mrb[13].mxu1 }
 0x10c   : > { %v693_v10 = vadd.f32 %v1972_v6, %v2253_v38  ;;  %v1059_v13 = vsel %vm931_vm4, %v797_v62, %v995_v3  ;;  %vm934_vm6 = vcmp.ge.f32.partialorder %v808_v4, 0.0  ;;  %v998_v14 = vmul.f32 0.2, %v808_v4  ;;  %v1973_v15 = vpop.f32.mrb[14].mxu0  ;;  %v2005_v16 = vpop.f32.mrb[14].mxu1 }
 0x10d   : > { %vm900_vm7 = vcmp.ge.f32.partialorder %v672_v5, 0.0  ;;  %v1030_v17 = vsel %vm902_vm5, %v680_v2, %v966_v8  ;;  %v964_v18 = vmul.f32 0.2, %v672_v5  ;;  %vm932_vm8 = vcmp.ge.f32.partialorder %v800_v9, 0.0  ;;  %v687_v20 = vpop.f32.mrb[15].mxu0  ;;  %v815_v24 = vpop.f32.mrb[15].mxu1 }
 0x10e   : > { %v996_v19 = vmul.f32 0.2, %v800_v9  ;;  %v1745_v21 = vpack.c.bf16 %v1030_v17, %v1029_v61  ;;  %v1062_v22 = vsel %vm934_vm6, %v808_v4, %v998_v14  ;;  %vm905_vm9 = vcmp.ge.f32.partialorder %v693_v10, 0.0 }
 0x10f   : > { %v969_v23 = vmul.f32 0.2, %v693_v10  ;;  %v1825_v25 = vpack.c.bf16 %v1062_v22, %v1061_v0  ;;  %v1028_v26 = vsel %vm900_vm7, %v672_v5, %v964_v18  ;;  %v821_v28 = vadd.f32 %v2004_v7, %v2253_v38 }
 0x110   : > { %v1060_v27 = vsel %vm932_vm8, %v800_v9, %v996_v19  ;;  %1881 = vst [vmem:[%s2270_s10 + $0x28] sm:$0xff] %v1745_v21   ;;  %v1740_v29 = vpack.c.bf16 %v1028_v26, %v1027_v1  ;;  %v685_v32 = vadd.f32 %v2253_v38, %v684_v11  ;;  %v813_v34 = vadd.f32 %v2253_v38, %v812_v12 }
 0x111   : > { %v1820_v30 = vpack.c.bf16 %v1060_v27, %v1059_v13  ;;  %v1033_v31 = vsel %vm905_vm9, %v693_v10, %v969_v23  ;;  %1897 = vst [vmem:[%s2270_s10 + $0xa8] sm:$0xff] %v1825_v25   ;;  %vm937_vm10 = vcmp.ge.f32.partialorder %v821_v28, 0.0  ;;  %v1001_v33 = vmul.f32 0.2, %v821_v28 }
 0x112   : > { %v696_v35 = vadd.f32 %v1973_v15, %v2253_v38  ;;  %1880 = vst [vmem:[%s2270_s10 + $0x20] sm:$0xff] %v1740_v29   ;;  %vm903_vm11 = vcmp.ge.f32.partialorder %v685_v32, 0.0  ;;  %v967_v36 = vmul.f32 0.2, %v685_v32  ;;  %v824_v37 = vadd.f32 %v2005_v16, %v2253_v38  ;;  %v1976_v40 = vpop.f32.mrb[16].mxu0  ;;  %v2008_v41 = vpop.f32.mrb[16].mxu1 }
 0x113   : > { %1896 = vst [vmem:[%s2270_s10 + $0xa0] sm:$0xff] %v1820_v30   ;;  %v688_v39 = vadd.f32 %v2253_v38, %v687_v20  ;;  %v1065_v42 = vsel %vm937_vm10, %v821_v28, %v1001_v33  ;;  %vm935_vm12 = vcmp.ge.f32.partialorder %v813_v34, 0.0  ;;  %v999_v43 = vmul.f32 0.2, %v813_v34  ;;  %v700_v44 = vpop.f32.mrb[17].mxu0  ;;  %v828_v45 = vpop.f32.mrb[17].mxu1 }
 0x114   : > { %vm906_vm13 = vcmp.ge.f32.partialorder %v696_v35, 0.0  ;;  %v1031_v46 = vsel %vm903_vm11, %v685_v32, %v967_v36  ;;  %v970_v47 = vmul.f32 0.2, %v696_v35  ;;  %vm938_vm14 = vcmp.ge.f32.partialorder %v824_v37, 0.0  ;;  %v1977_v49 = vpop.f32.mrb[18].mxu0  ;;  %v2009_v53 = vpop.f32.mrb[18].mxu1 }
 0x115   : > { %v1002_v48 = vmul.f32 0.2, %v824_v37  ;;  %v1063_v50 = vsel %vm935_vm12, %v813_v34, %v999_v43  ;;  %vm904_vm15 = vcmp.ge.f32.partialorder %v688_v39, 0.0  ;;  %v968_v51 = vmul.f32 0.2, %v688_v39  ;;  %v703_v54 = vpop.f32.mrb[19].mxu0 }
 0x116   : > { %v816_v52 = vadd.f32 %v2253_v38, %v815_v24  ;;  %v1034_v55 = vsel %vm906_vm13, %v696_v35, %v970_v47  ;;  %v709_v57 = vadd.f32 %v1976_v40, %v2253_v38  ;;  %v837_v58 = vadd.f32 %v2008_v41, %v2253_v38  ;;  %v831_v59 = vpop.f32.mrb[19].mxu1 }
 0x117   : > { %v1066_v56 = vsel %vm938_vm14, %v824_v37, %v1002_v48  ;;  %v1755_v60 = vpack.c.bf16 %v1034_v55, %v1033_v31  ;;  %v1032_v62 = vsel %vm904_vm15, %v688_v39, %v968_v51  ;;  %v701_v3 = vadd.f32 %v2253_v38, %v700_v44 }
 0x118   : > { %v1835_v61 = vpack.c.bf16 %v1066_v56, %v1065_v42  ;;  %vm936_vm0 = vcmp.ge.f32.partialorder %v816_v52, 0.0  ;;  %v1750_v63 = vpack.c.bf16 %v1032_v62, %v1031_v46  ;;  %v1000_v0 = vmul.f32 0.2, %v816_v52 }
 0x119   : > { %vm909_vm1 = vcmp.ge.f32.partialorder %v709_v57, 0.0  ;;  %v973_v1 = vmul.f32 0.2, %v709_v57  ;;  %1883 = vst [vmem:[%s2270_s10 + $0x38] sm:$0xff] %v1755_v60   ;;  %vm941_vm2 = vcmp.ge.f32.partialorder %v837_v58, 0.0  ;;  %v829_v4 = vadd.f32 %v2253_v38, %v828_v45 }
 0x11a   : > { %1899 = vst [vmem:[%s2270_s10 + $0xb8] sm:$0xff] %v1835_v61   ;;  %v1005_v2 = vmul.f32 0.2, %v837_v58  ;;  %1882 = vst [vmem:[%s2270_s10 + $0x30] sm:$0xff] %v1750_v63   ;;  %v1064_v5 = vsel %vm936_vm0, %v816_v52, %v1000_v0  ;;  %v712_v7 = vadd.f32 %v1977_v49, %v2253_v38  ;;  %v840_v8 = vadd.f32 %v2009_v53, %v2253_v38  ;;  %v1980_v9 = vpop.f32.mrb[20].mxu0  ;;  %v2012_v10 = vpop.f32.mrb[20].mxu1 }
 0x11b   : > { %v1037_v6 = vsel %vm909_vm1, %v709_v57, %v973_v1  ;;  %v1830_v11 = vpack.c.bf16 %v1064_v5, %v1063_v50  ;;  %vm907_vm3 = vcmp.ge.f32.partialorder %v701_v3, 0.0  ;;  %v971_v13 = vmul.f32 0.2, %v701_v3  ;;  %v716_v14 = vpop.f32.mrb[21].mxu0  ;;  %v844_v15 = vpop.f32.mrb[21].mxu1 }
 0x11c   : > { %v1069_v12 = vsel %vm941_vm2, %v837_v58, %v1005_v2  ;;  %vm939_vm4 = vcmp.ge.f32.partialorder %v829_v4, 0.0  ;;  %v1003_v16 = vmul.f32 0.2, %v829_v4  ;;  %vm910_vm5 = vcmp.ge.f32.partialorder %v712_v7, 0.0  ;;  %v1981_v21 = vpop.f32.mrb[22].mxu0  ;;  %v2013_v22 = vpop.f32.mrb[22].mxu1 }
 0x11d   : > { %v974_v17 = vmul.f32 0.2, %v712_v7  ;;  %1898 = vst [vmem:[%s2270_s10 + $0xb0] sm:$0xff] %v1830_v11   ;;  %v1035_v18 = vsel %vm907_vm3, %v701_v3, %v971_v13  ;;  %vm942_vm6 = vcmp.ge.f32.partialorder %v840_v8, 0.0  ;;  %v1006_v19 = vmul.f32 0.2, %v840_v8 }
 0x11e   : > { %v704_v20 = vadd.f32 %v2253_v38, %v703_v54  ;;  %v1067_v23 = vsel %vm939_vm4, %v829_v4, %v1003_v16  ;;  %v832_v25 = vadd.f32 %v2253_v38, %v831_v59  ;;  %v725_v26 = vadd.f32 %v1980_v9, %v2253_v38  ;;  %v719_v27 = vpop.f32.mrb[23].mxu0  ;;  %v847_v28 = vpop.f32.mrb[23].mxu1 }
 0x11f   : > { %v1038_v24 = vsel %vm910_vm5, %v712_v7, %v974_v17  ;;  %v1070_v30 = vsel %vm942_vm6, %v840_v8, %v1006_v19  ;;  %v853_v36 = vadd.f32 %v2012_v10, %v2253_v38  ;;  %v717_v37 = vadd.f32 %v2253_v38, %v716_v14 }
 0x120   : > { %v1765_v29 = vpack.c.bf16 %v1038_v24, %v1037_v6  ;;  %vm908_vm7 = vcmp.ge.f32.partialorder %v704_v20, 0.0  ;;  %v972_v31 = vmul.f32 0.2, %v704_v20  ;;  %v1845_v32 = vpack.c.bf16 %v1070_v30, %v1069_v12 }
 0x121   : > { %vm940_vm8 = vcmp.ge.f32.partialorder %v832_v25, 0.0  ;;  %v1004_v33 = vmul.f32 0.2, %v832_v25  ;;  %vm913_vm9 = vcmp.ge.f32.partialorder %v725_v26, 0.0  ;;  %v977_v35 = vmul.f32 0.2, %v725_v26 }
 0x122   : > { %1885 = vst [vmem:[%s2270_s10 + $0x48] sm:$0xff] %v1765_v29   ;;  %v1036_v34 = vsel %vm908_vm7, %v704_v20, %v972_v31  ;;  %1901 = vst [vmem:[%s2270_s10 + $0xc8] sm:$0xff] %v1845_v32   ;;  %v845_v41 = vadd.f32 %v2253_v38, %v844_v15  ;;  %v728_v42 = vadd.f32 %v1981_v21, %v2253_v38  ;;  %v1984_v43 = vpop.f32.mrb[24].mxu0  ;;  %v2016_v44 = vpop.f32.mrb[24].mxu1  ;;  %vm945_vm10 = vcmp.ge.f32.partialorder %v853_v36, 0.0 }
 0x123   : > { %v1760_v39 = vpack.c.bf16 %v1036_v34, %v1035_v18  ;;  %v1068_v40 = vsel %vm940_vm8, %v832_v25, %v1004_v33  ;;  %v1009_v46 = vmul.f32 0.2, %v853_v36  ;;  %v732_v47 = vpop.f32.mrb[25].mxu0  ;;  %v860_v48 = vpop.f32.mrb[25].mxu1  ;;  %v1041_v49 = vsel %vm913_vm9, %v725_v26, %v977_v35 }
 0x124   : > { %v1840_v45 = vpack.c.bf16 %v1068_v40, %v1067_v23  ;;  %vm911_vm11 = vcmp.ge.f32.partialorder %v717_v37, 0.0  ;;  %v975_v50 = vmul.f32 0.2, %v717_v37  ;;  %v1007_v51 = vmul.f32 0.2, %v845_v41  ;;  %v1985_v54 = vpop.f32.mrb[26].mxu0 }
 0x125   : > { %1884 = vst [vmem:[%s2270_s10 + $0x40] sm:$0xff] %v1760_v39   ;;  %vm943_vm12 = vcmp.ge.f32.partialorder %v845_v41, 0.0  ;;  %vm914_vm13 = vcmp.ge.f32.partialorder %v728_v42, 0.0  ;;  %v978_v52 = vmul.f32 0.2, %v728_v42  ;;  %v856_v53 = vadd.f32 %v2013_v22, %v2253_v38  ;;  %v2017_v55 = vpop.f32.mrb[26].mxu1 }
 0x126   : > { %1900 = vst [vmem:[%s2270_s10 + $0xc0] sm:$0xff] %v1840_v45   ;;  %v1073_v56 = vsel %vm945_vm10, %v853_v36, %v1009_v46  ;;  %v1039_v57 = vsel %vm911_vm11, %v717_v37, %v975_v50  ;;  %v720_v58 = vadd.f32 %v2253_v38, %v719_v27  ;;  %v848_v59 = vadd.f32 %v2253_v38, %v847_v28  ;;  %v735_v60 = vpop.f32.mrb[27].mxu0  ;;  %v863_v61 = vpop.f32.mrb[27].mxu1 }
 0x127   : > { %v1042_v62 = vsel %vm914_vm13, %v728_v42, %v978_v52  ;;  %vm946_vm14 = vcmp.ge.f32.partialorder %v856_v53, 0.0  ;;  %v1010_v63 = vmul.f32 0.2, %v856_v53  ;;  %v741_v0 = vadd.f32 %v1984_v43, %v2253_v38 }
 0x128   : > { %v1775_v1 = vpack.c.bf16 %v1042_v62, %v1041_v49  ;;  %vm912_vm15 = vcmp.ge.f32.partialorder %v720_v58, 0.0  ;;  %v976_v2 = vmul.f32 0.2, %v720_v58  ;;  %vm944_vm0 = vcmp.ge.f32.partialorder %v848_v59, 0.0 }
 0x129   : > { %v1074_v3 = vsel %vm946_vm14, %v856_v53, %v1010_v63  ;;  %v1008_v4 = vmul.f32 0.2, %v848_v59  ;;  %vm917_vm1 = vcmp.ge.f32.partialorder %v741_v0, 0.0  ;;  %v981_v5 = vmul.f32 0.2, %v741_v0 }
 0x12a   : > { %1887 = vst [vmem:[%s2270_s10 + $0x58] sm:$0xff] %v1775_v1   ;;  %v1855_v6 = vpack.c.bf16 %v1074_v3, %v1073_v56  ;;  %v1040_v7 = vsel %vm912_vm15, %v720_v58, %v976_v2  ;;  %v869_v8 = vadd.f32 %v2016_v44, %v2253_v38  ;;  %v733_v9 = vadd.f32 %v2253_v38, %v732_v47  ;;  %v1988_v10 = vpop.f32.mrb[28].mxu0  ;;  %v2020_v11 = vpop.f32.mrb[28].mxu1 }
 0x12b   : > { %v1071_v12 = vsel %vm943_vm12, %v845_v41, %v1007_v51  ;;  %v1770_v13 = vpack.c.bf16 %v1040_v7, %v1039_v57  ;;  %v1072_v14 = vsel %vm944_vm0, %v848_v59, %v1008_v4  ;;  %v861_v15 = vadd.f32 %v2253_v38, %v860_v48  ;;  %v748_v16 = vpop.f32.mrb[29].mxu0  ;;  %v876_v17 = vpop.f32.mrb[29].mxu1 }
 0x12c   : > { %1903 = vst [vmem:[%s2270_s10 + $0xd8] sm:$0xff] %v1855_v6   ;;  %v1850_v18 = vpack.c.bf16 %v1072_v14, %v1071_v12  ;;  %vm949_vm2 = vcmp.ge.f32.partialorder %v869_v8, 0.0  ;;  %v1013_v19 = vmul.f32 0.2, %v869_v8  ;;  %vm915_vm3 = vcmp.ge.f32.partialorder %v733_v9, 0.0  ;;  %v1989_v20 = vpop.f32.mrb[30].mxu0 }
 0x12d   : > { %v2021_v21 = vpop.f32.mrb[30].mxu1  ;;  %1886 = vst [vmem:[%s2270_s10 + $0x50] sm:$0xff] %v1770_v13   ;;  %v1045_v22 = vsel %vm917_vm1, %v741_v0, %v981_v5  ;;  %v979_v23 = vmul.f32 0.2, %v733_v9  ;;  %vm947_vm4 = vcmp.ge.f32.partialorder %v861_v15, 0.0  ;;  %v744_v24 = vadd.f32 %v1985_v54, %v2253_v38  ;;  %v751_v25 = vpop.f32.mrb[31].mxu0 }
 0x12e   : > { %1902 = vst [vmem:[%s2270_s10 + $0xd0] sm:$0xff] %v1850_v18   ;;  %v1011_v26 = vmul.f32 0.2, %v861_v15  ;;  %v872_v27 = vadd.f32 %v2017_v55, %v2253_v38  ;;  %v736_v28 = vadd.f32 %v2253_v38, %v735_v60  ;;  %v864_v29 = vadd.f32 %v2253_v38, %v863_v61  ;;  %v879_v30 = vpop.f32.mrb[31].mxu1 }
 0x12f   : > { %v1077_v31 = vsel %vm949_vm2, %v869_v8, %v1013_v19  ;;  %v1043_v32 = vsel %vm915_vm3, %v733_v9, %v979_v23  ;;  %vm918_vm5 = vcmp.ge.f32.partialorder %v744_v24, 0.0  ;;  %v982_v33 = vmul.f32 0.2, %v744_v24 }
 0x130   : > { %vm950_vm6 = vcmp.ge.f32.partialorder %v872_v27, 0.0  ;;  %v1014_v34 = vmul.f32 0.2, %v872_v27  ;;  %vm916_vm7 = vcmp.ge.f32.partialorder %v736_v28, 0.0  ;;  %v980_v35 = vmul.f32 0.2, %v736_v28 }
 0x131   : > { %v1046_v36 = vsel %vm918_vm5, %v744_v24, %v982_v33  ;;  %vm948_vm8 = vcmp.ge.f32.partialorder %v864_v29, 0.0  ;;  %v1012_v37 = vmul.f32 0.2, %v864_v29  ;;  %v757_v39 = vadd.f32 %v1988_v10, %v2253_v38 }
 0x132   : > { %v1785_v40 = vpack.c.bf16 %v1046_v36, %v1045_v22  ;;  %v1078_v41 = vsel %vm950_vm6, %v872_v27, %v1014_v34  ;;  %v1044_v42 = vsel %vm916_vm7, %v736_v28, %v980_v35  ;;  %v885_v43 = vadd.f32 %v2020_v11, %v2253_v38 }
 0x133   : > { %v1075_v44 = vsel %vm947_vm4, %v861_v15, %v1011_v26  ;;  %v1865_v45 = vpack.c.bf16 %v1078_v41, %v1077_v31  ;;  %v1780_v46 = vpack.c.bf16 %v1044_v42, %v1043_v32  ;;  %v1076_v47 = vsel %vm948_vm8, %v864_v29, %v1012_v37 }
 0x134   : > { %1889 = vst [vmem:[%s2270_s10 + $0x68] sm:$0xff] %v1785_v40   ;;  %v1860_v48 = vpack.c.bf16 %v1076_v47, %v1075_v44  ;;  %vm921_vm9 = vcmp.ge.f32.partialorder %v757_v39, 0.0  ;;  %v985_v49 = vmul.f32 0.2, %v757_v39  ;;  %v1017_v50 = vmul.f32 0.2, %v885_v43 }
 0x135   : > { %1905 = vst [vmem:[%s2270_s10 + $0xe8] sm:$0xff] %v1865_v45   ;;  %1888 = vst [vmem:[%s2270_s10 + $0x60] sm:$0xff] %v1780_v46   ;;  %v749_v51 = vadd.f32 %v2253_v38, %v748_v16  ;;  %v877_v52 = vadd.f32 %v2253_v38, %v876_v17  ;;  %v760_v53 = vadd.f32 %v1989_v20, %v2253_v38  ;;  %vm953_vm10 = vcmp.ge.f32.partialorder %v885_v43, 0.0 }
 0x136   : > { %v888_v54 = vadd.f32 %v2021_v21, %v2253_v38  ;;  %1904 = vst [vmem:[%s2270_s10 + $0xe0] sm:$0xff] %v1860_v48   ;;  %v752_v55 = vadd.f32 %v2253_v38, %v751_v25  ;;  %v880_v56 = vadd.f32 %v2253_v38, %v879_v30  ;;  %v1049_v57 = vsel %vm921_vm9, %v757_v39, %v985_v49 }
 0x137   : > { %vm919_vm11 = vcmp.ge.f32.partialorder %v749_v51, 0.0  ;;  %v983_v58 = vmul.f32 0.2, %v749_v51  ;;  %v1015_v59 = vmul.f32 0.2, %v877_v52  ;;  %vm922_vm12 = vcmp.ge.f32.partialorder %v760_v53, 0.0 }
 0x138   : > { %v986_v60 = vmul.f32 0.2, %v760_v53  ;;  %vm954_vm13 = vcmp.ge.f32.partialorder %v888_v54, 0.0  ;;  %v1018_v61 = vmul.f32 0.2, %v888_v54  ;;  %v1081_v62 = vsel %vm953_vm10, %v885_v43, %v1017_v50 }
 0x139   : > { %vm951_vm14 = vcmp.ge.f32.partialorder %v877_v52, 0.0  ;;  %vm920_vm15 = vcmp.ge.f32.partialorder %v752_v55, 0.0  ;;  %v984_v63 = vmul.f32 0.2, %v752_v55  ;;  %vm952_vm0 = vcmp.ge.f32.partialorder %v880_v56, 0.0 }
 0x13a   : > { %v1050_v0 = vsel %vm922_vm12, %v760_v53, %v986_v60  ;;  %v1082_v1 = vsel %vm954_vm13, %v888_v54, %v1018_v61  ;;  %v1016_v38 = vmul.f32 0.2, %v880_v56  ;;  %v1047_v2 = vsel %vm919_vm11, %v749_v51, %v983_v58 }
 0x13b   : > { %v1795_v3 = vpack.c.bf16 %v1050_v0, %v1049_v57  ;;  %v1875_v4 = vpack.c.bf16 %v1082_v1, %v1081_v62  ;;  %v1048_v5 = vsel %vm920_vm15, %v752_v55, %v984_v63  ;;  %v1079_v6 = vsel %vm951_vm14, %v877_v52, %v1015_v59 }
 0x13c   : > { %v1790_v7 = vpack.c.bf16 %v1048_v5, %v1047_v2  ;;  %v1080_v8 = vsel %vm952_vm0, %v880_v56, %v1016_v38 }
 0x13d   : > { %1891 = vst [vmem:[%s2270_s10 + $0x78] sm:$0xff] %v1795_v3   ;;  %1907 = vst [vmem:[%s2270_s10 + $0xf8] sm:$0xff] %v1875_v4   ;;  %v1870_v9 = vpack.c.bf16 %v1080_v8, %v1079_v6 }
 0x13e   : > { %1890 = vst [vmem:[%s2270_s10 + $0x70] sm:$0xff] %v1790_v7  }
 0x13f   : > { %1906 = vst [vmem:[%s2270_s10 + $0xf0] sm:$0xff] %v1870_v9  }
 0x140 PF: > { %s13_s14 = sadd.s32 1, %s2118_s14   ;;  %s2380_s12 = smov %s2114_s13 }
 0x141   : > { %p10_p5 = scmp.ge.s32.totalorder %s13_s14, 7   ;;  %s2381_s13 = smov %s2383_s15 }
 0x143   :  { %12 = sbr.rel (!%p10_p5) target bundleno = 2 (0x2), region = 68 }

// kernel: discriminator_forward.6
= control target key start
LH: loop header
LB: loop body
LE: loop exit
PB: predicated region body
PF: predicated region fallthrough
CT: control target
= control target key end

     0   :  { %s3771_s15 = smov 0   ;;  %s3773_s16 = smov 0   ;;  %s4712_s0 = inlined_call_operand.vmem [shape: bf16[2,256,1024], index: 0, kind: input, shape index: {}]   ;;  %s4713_s1 = inlined_call_operand.vmem [shape: bf16[1024,128], index: 1, kind: input, shape index: {}]   ;;  %s4714_s2 = inlined_call_operand.vmem [shape: f32[1,128], index: 2, kind: input, shape index: {}]   ;;  %s4715_s3 = inlined_call_operand.vmem [shape: f32[1,128], index: 3, kind: input, shape index: {}]   ;;  %s4716_s4 = inlined_call_operand.vmem [shape: bf16[2,256,128], index: 4, kind: output, shape index: {}]  }
   0x1   :  { %s3775_s17 = smov 0  }
   0x2 LB: > { %s26_s18 = sadd.s32 1, %s3740_s16  ;;  %p2822_p0 = scmp.ge.s32.totalorder %s3744_s17, 1  ;;  %s3744_s17 = sphi %s3775_s17, %s14_s17   ;;  %s3740_s16 = sphi %s3773_s16, %s4732_s16   ;;  %s3736_s15 = sphi %s3771_s15, %s4731_s15  }
   0x3   : > { %p28_p1 = scmp.ge.s32.totalorder %s26_s18, 2  ;;  %p201_p2 = scmp.lt.s32.totalorder %s3744_s17, 3 }
   0x5   : > { %s4734_s18 = smov (%p28_p1, %s26_s18), 0  ;;  %p202_p3 = pnand %p2822_p0, %p201_p2 }
   0x6   : > { %v3656_v0 = vld [vmem:[%s4713_s1 + $0x40] sm:$0xff] (!%p202_p3)   ;;  %v3660_v4 = vld [vmem:[%s4713_s1 + $0x48] sm:$0xff] (!%p202_p3)   ;;  %v3664_v8 = vld [vmem:[%s4713_s1 + $0x50] sm:$0xff] (!%p202_p3)   ;;  %p240_p4 = scmp.lt.s32.totalorder (!%p202_p3), %s3736_s15, 1 }
   0x7   : > { %205 = sbr.rel (%p202_p3) target bundleno = 600 (0x258), region = 36  ;;  %v3657_v1 = vld [vmem:[%s4713_s1 + $0xc0] sm:$0xff] (!%p202_p3)   ;;  %3184 = vmatprep.subr.bf16.mxu0 (!%p202_p3), %v3656_v0  ;;  %v3661_v5 = vld [vmem:[%s4713_s1 + $0xc8] sm:$0xff] (!%p202_p3)   ;;  %v3665_v9 = vld [vmem:[%s4713_s1 + $0xd0] sm:$0xff] (!%p202_p3)  }
   0x8   : > { %v3658_v2 = vld [vmem:[%s4713_s1] sm:$0xff] (!%p202_p3)   ;;  %3296 = vmatprep.subr.bf16.mxu1 (!%p202_p3), %v3657_v1  ;;  %v3662_v6 = vld [vmem:[%s4713_s1 + $0x8] sm:$0xff] (!%p202_p3)   ;;  %v3666_v10 = vld [vmem:[%s4713_s1 + $0x10] sm:$0xff] (!%p202_p3)  }
   0x9   : > { %v3659_v3 = vld [vmem:[%s4713_s1 + $0x80] sm:$0xff] (!%p202_p3)   ;;  %3185 = vmatpush3.bf16.msra.mxu0 (!%p202_p3), %v3658_v2  ;;  %v3663_v7 = vld [vmem:[%s4713_s1 + $0x88] sm:$0xff] (!%p202_p3)   ;;  %v3667_v11 = vld [vmem:[%s4713_s1 + $0x90] sm:$0xff] (!%p202_p3)  }
   0xa   : > { %3297 = vmatpush3.bf16.msra.mxu1 (!%p202_p3), %v3659_v3  ;;  %3186 = vmatprep.subr.bf16.mxu0 (!%p202_p3), %v3660_v4  ;;  %v3668_v12 = vld [vmem:[%s4713_s1 + $0x58] sm:$0xff] (!%p202_p3)   ;;  %v3672_v16 = vld [vmem:[%s4713_s1 + $0x60] sm:$0xff] (!%p202_p3)   ;;  %v3676_v20 = vld [vmem:[%s4713_s1 + $0x68] sm:$0xff] (!%p202_p3)  }
   0xb   : > { %3298 = vmatprep.subr.bf16.mxu1 (!%p202_p3), %v3661_v5  ;;  %v3669_v13 = vld [vmem:[%s4713_s1 + $0xd8] sm:$0xff] (!%p202_p3)   ;;  %v3673_v17 = vld [vmem:[%s4713_s1 + $0xe0] sm:$0xff] (!%p202_p3)   ;;  %v3677_v21 = vld [vmem:[%s4713_s1 + $0xe8] sm:$0xff] (!%p202_p3)  }
   0xc   : > { %v3670_v14 = vld [vmem:[%s4713_s1 + $0x18] sm:$0xff] (!%p202_p3)   ;;  %v3674_v18 = vld [vmem:[%s4713_s1 + $0x20] sm:$0xff] (!%p202_p3)   ;;  %v3678_v22 = vld [vmem:[%s4713_s1 + $0x28] sm:$0xff] (!%p202_p3)  }
   0xd   : > { %3187 = vmatpush3.bf16.msra.mxu0 (!%p202_p3), %v3662_v6  ;;  %v3671_v15 = vld [vmem:[%s4713_s1 + $0x98] sm:$0xff] (!%p202_p3)   ;;  %v3675_v19 = vld [vmem:[%s4713_s1 + $0xa0] sm:$0xff] (!%p202_p3)   ;;  %v3679_v23 = vld [vmem:[%s4713_s1 + $0xa8] sm:$0xff] (!%p202_p3)  }
   0xe   : > { %3299 = vmatpush3.bf16.msra.mxu1 %v3663_v7  ;;  %3188 = vmatprep.subr.bf16.mxu0 %v3664_v8  ;;  %s4736_s15 = smov (!%p240_p4, %s3736_s15), 1  ;;  %v3680_v24 = vld [vmem:[%s4713_s1 + $0x70] sm:$0xff]   ;;  %v3684_v28 = vld [vmem:[%s4713_s1 + $0x78] sm:$0xff]   ;;  %v3688_v40 = vld [vmem:[%s4713_s1 + $0x140] sm:$0xff]  }
   0xf   : > { %3300 = vmatprep.subr.bf16.mxu1 %v3665_v9  ;;  %v3681_v25 = vld [vmem:[%s4713_s1 + $0xf0] sm:$0xff]   ;;  %s3055_s29 = sshll.u32 %s4736_s15, 10  ;;  %v3685_v29 = vld [vmem:[%s4713_s1 + $0xf8] sm:$0xff]   ;;  %v3689_v41 = vld [vmem:[%s4713_s1 + $0x100] sm:$0xff]   ;;  %s3056_s25 = sshll.u32 %s4736_s15, 7 }
  0x10   : > { %v3682_v26 = vld [vmem:[%s4713_s1 + $0x30] sm:$0xff]   ;;  %s3889_s12 = scalar_lea.vmem %s4712_s0, %s3055_s29  ;;  %v3686_v30 = vld [vmem:[%s4713_s1 + $0x38] sm:$0xff]   ;;  %v3690_v42 = vld [vmem:[%s4713_s1 + $0x1c0] sm:$0xff]   ;;  %s4665_s27 = scalar_lea.vmem %s4716_s4, %s3056_s25 }
  0x11   : > { %3189 = vmatpush3.bf16.msra.mxu0 %v3666_v10  ;;  %v3683_v27 = vld [vmem:[%s4713_s1 + $0xb0] sm:$0xff]   ;;  %v3687_v31 = vld [vmem:[%s4713_s1 + $0xb8] sm:$0xff]   ;;  %v264_v32 = vld [vmem:[%s3889_s12] sm:$0xff] }
  0x12   : > { %3301 = vmatpush3.bf16.msra.mxu1 %v3667_v11  ;;  %3190 = vmatprep.subr.bf16.mxu0 %v3668_v12  ;;  %v268_v33 = vld [vmem:[%s3889_s12 + $0x20] sm:$0xff]  ;;  %v265_v34 = vld [vmem:[%s3889_s12 + $0x8] sm:$0xff]  ;;  %v3696_v2 = vld [vmem:[%s4713_s1 + $0x150] sm:$0xff]  }
  0x13   : > { %3302 = vmatprep.subr.bf16.mxu1 %v3669_v13  ;;  %v2827_v35 = vcombine.low %v264_v32, %v268_v33  ;;  %v2828_v36 = vcombine.high %v264_v32, %v268_v33  ;;  %v269_v37 = vld [vmem:[%s3889_s12 + $0x28] sm:$0xff]  ;;  %v3691_v43 = vld [vmem:[%s4713_s1 + $0x180] sm:$0xff]   ;;  %v3697_v4 = vld [vmem:[%s4713_s1 + $0x110] sm:$0xff]  }
  0x14   : > { %v2829_v38 = vcombine.low %v265_v34, %v269_v37  ;;  %v2830_v39 = vcombine.high %v265_v34, %v269_v37  ;;  %v272_v44 = vld [vmem:[%s3889_s12 + $0x40] sm:$0xff]  ;;  %v273_v47 = vld [vmem:[%s3889_s12 + $0x48] sm:$0xff]  ;;  %v3698_v7 = vld [vmem:[%s4713_s1 + $0x1d0] sm:$0xff]  }
  0x15   : > { %3191 = vmatpush3.bf16.msra.mxu0 %v3670_v14  ;;  %1576 = vmatprep.mubr.bf16.mxu0 %v2828_v36  ;;  %v276_v45 = vld [vmem:[%s3889_s12 + $0x60] sm:$0xff]  ;;  %v277_v48 = vld [vmem:[%s3889_s12 + $0x68] sm:$0xff]  ;;  %v3699_v9 = vld [vmem:[%s4713_s1 + $0x190] sm:$0xff]  }
  0x16   : > { %3303 = vmatpush3.bf16.msra.mxu1 %v3671_v15  ;;  %3192 = vmatprep.subr.bf16.mxu0 %v3672_v16  ;;  %v2836_v46 = vcombine.high %v272_v44, %v276_v45  ;;  %v280_v49 = vld [vmem:[%s3889_s12 + $0x80] sm:$0xff]  ;;  %v2838_v50 = vcombine.high %v273_v47, %v277_v48  ;;  %v281_v52 = vld [vmem:[%s3889_s12 + $0x88] sm:$0xff]  ;;  %v2835_v54 = vcombine.low %v272_v44, %v276_v45  ;;  %v3700_v14 = vld [vmem:[%s4713_s1 + $0x158] sm:$0xff]  }
  0x17   : > { %3304 = vmatprep.subr.bf16.mxu1 %v3673_v17  ;;  %1737 = vmatprep.mubr.bf16.mxu1 %v2830_v39  ;;  %v284_v51 = vld [vmem:[%s3889_s12 + $0xa0] sm:$0xff]  ;;  %v285_v53 = vld [vmem:[%s3889_s12 + $0xa8] sm:$0xff]  ;;  %v2837_v56 = vcombine.low %v273_v47, %v277_v48  ;;  %v3701_v15 = vld [vmem:[%s4713_s1 + $0x118] sm:$0xff]  }
  0x18   : > { %v3692_v55 = vld [vmem:[%s4713_s1 + $0x148] sm:$0xff]   ;;  %v2844_v57 = vcombine.high %v280_v49, %v284_v51  ;;  %v2846_v59 = vcombine.high %v281_v52, %v285_v53  ;;  %v288_v62 = vld [vmem:[%s3889_s12 + $0xc0] sm:$0xff]  ;;  %v2843_v3 = vcombine.low %v280_v49, %v284_v51  ;;  %v2845_v5 = vcombine.low %v281_v52, %v285_v53  ;;  %v3702_v17 = vld [vmem:[%s4713_s1 + $0x1d8] sm:$0xff]  }
  0x19   : > { %3193 = vmatpush3.bf16.msra.mxu0 %v3674_v18  ;;  %v3693_v58 = vld [vmem:[%s4713_s1 + $0x108] sm:$0xff]   ;;  %v292_v63 = vld [vmem:[%s3889_s12 + $0xe0] sm:$0xff]  ;;  %v3713_v47 = vld [vmem:[%s4713_s1 + $0x130] sm:$0xff]  }
  0x1a   : > { %3305 = vmatpush3.bf16.msra.mxu1 %v3675_v19  ;;  %3194 = vmatprep.subr.bf16.mxu0 %v3676_v20  ;;  %v3694_v60 = vld [vmem:[%s4713_s1 + $0x1c8] sm:$0xff]   ;;  %v2852_v6 = vcombine.high %v288_v62, %v292_v63  ;;  %v296_v10 = vld [vmem:[%s3889_s12 + $0x100] sm:$0xff]  ;;  %v2851_v16 = vcombine.low %v288_v62, %v292_v63  ;;  %v3703_v20 = vld [vmem:[%s4713_s1 + $0x198] sm:$0xff]  }
  0x1b   : > { %3306 = vmatprep.subr.bf16.mxu1 %v3677_v21  ;;  %v3695_v61 = vld [vmem:[%s4713_s1 + $0x188] sm:$0xff]   ;;  %v300_v11 = vld [vmem:[%s3889_s12 + $0x120] sm:$0xff]  ;;  %v3714_v48 = vld [vmem:[%s4713_s1 + $0x1f0] sm:$0xff]  }
  0x1c   : > { %v289_v0 = vld [vmem:[%s3889_s12 + $0xc8] sm:$0xff]  ;;  %v2860_v19 = vcombine.high %v296_v10, %v300_v11  ;;  %v3715_v49 = vld [vmem:[%s4713_s1 + $0x1b0] sm:$0xff]   ;;  %v324_v51 = vld [vmem:[%s3889_s12 + $0x1e0] sm:$0xff] }
  0x1d   : > { %3195 = vmatpush3.bf16.msra.mxu0 %v3678_v22  ;;  %v293_v1 = vld [vmem:[%s3889_s12 + $0xe8] sm:$0xff]  ;;  %v304_v22 = vld [vmem:[%s3889_s12 + $0x140] sm:$0xff] }
  0x1e   : > { %3307 = vmatpush3.bf16.msra.mxu1 %v3679_v23  ;;  %3196 = vmatprep.subr.bf16.mxu0 %v3680_v24  ;;  %v2854_v8 = vcombine.high %v289_v0, %v293_v1  ;;  %v297_v12 = vld [vmem:[%s3889_s12 + $0x108] sm:$0xff]  ;;  %v2853_v18 = vcombine.low %v289_v0, %v293_v1  ;;  %v308_v23 = vld [vmem:[%s3889_s12 + $0x160] sm:$0xff] }
  0x1f   : > { %3308 = vmatprep.subr.bf16.mxu1 %v3681_v25  ;;  %v301_v13 = vld [vmem:[%s3889_s12 + $0x128] sm:$0xff]  ;;  %v3704_v24 = vld [vmem:[%s4713_s1 + $0x160] sm:$0xff]   ;;  %v2868_v32 = vcombine.high %v304_v22, %v308_v23 }
  0x20   : > { %v2862_v21 = vcombine.high %v297_v12, %v301_v13  ;;  %v305_v25 = vld [vmem:[%s3889_s12 + $0x148] sm:$0xff]  ;;  %v328_v62 = vld [vmem:[%s3889_s12 + $0x200] sm:$0xff] }
  0x21   : > { %3197 = vmatpush3.bf16.msra.mxu0 %v3682_v26  ;;  %v309_v26 = vld [vmem:[%s3889_s12 + $0x168] sm:$0xff]  ;;  %v332_v63 = vld [vmem:[%s3889_s12 + $0x220] sm:$0xff] }
  0x22   : > { %3309 = vmatpush3.bf16.msra.mxu1 %v3683_v27  ;;  %3198 = vmatprep.subr.bf16.mxu0 %v3684_v28  ;;  %v3705_v27 = vld [vmem:[%s4713_s1 + $0x120] sm:$0xff]   ;;  %v2870_v33 = vcombine.high %v305_v25, %v309_v26  ;;  %v3708_v34 = vld [vmem:[%s4713_s1 + $0x168] sm:$0xff]  }
  0x23   : > { %3310 = vmatprep.subr.bf16.mxu1 %v3685_v29  ;;  %v3706_v28 = vld [vmem:[%s4713_s1 + $0x1e0] sm:$0xff]   ;;  %v3709_v36 = vld [vmem:[%s4713_s1 + $0x128] sm:$0xff]  }
  0x24   : > { %v3707_v29 = vld [vmem:[%s4713_s1 + $0x1a0] sm:$0xff]   ;;  %v3710_v37 = vld [vmem:[%s4713_s1 + $0x1e8] sm:$0xff]  }
  0x25   : > { %3199 = vmatpush3.bf16.msra.mxu0 %v3686_v30  ;;  %v2859_v30 = vcombine.low %v296_v10, %v300_v11  ;;  %v3711_v39 = vld [vmem:[%s4713_s1 + $0x1a8] sm:$0xff]   ;;  %v2891_v10 = vcombine.low %v328_v62, %v332_v63 }
  0x26   : > { %3311 = vmatpush3.bf16.msra.mxu1 %v3687_v31  ;;  %3408 = vmatprep.subr.bf16.mxu0 %v3688_v40  ;;  %v2861_v31 = vcombine.low %v297_v12, %v301_v13  ;;  %v313_v40 = vld [vmem:[%s3889_s12 + $0x188] sm:$0xff] }
  0x27   : > { %3520 = vmatprep.subr.bf16.mxu1 %v3690_v42  ;;  %v2867_v42 = vcombine.low %v304_v22, %v308_v23  ;;  %v321_v52 = vld [vmem:[%s3889_s12 + $0x1c8] sm:$0xff]  ;;  %v352_v22 = vld [vmem:[%s3889_s12 + $0x2c0] sm:$0xff] }
  0x28   : > { %1577 = vmatmul.mubr.bf16.vlgmr.msra.gmra.mrb[0].mxu0 %v2827_v35  ;;  %v312_v35 = vld [vmem:[%s3889_s12 + $0x180] sm:$0xff]  ;;  %v325_v53 = vld [vmem:[%s3889_s12 + $0x1e8] sm:$0xff] }
  0x29   : > { %1738 = vmatmul.mubr.bf16.vlgmr.msra.gmra.mrb[0].mxu1 %v2829_v38  ;;  %3409 = vmatpush3.bf16.msra.mxu0 %v3689_v41  ;;  %v316_v38 = vld [vmem:[%s3889_s12 + $0x1a0] sm:$0xff]  ;;  %v317_v41 = vld [vmem:[%s3889_s12 + $0x1a8] sm:$0xff] }
  0x2a   : > { %3521 = vmatpush3.bf16.msra.mxu1 %v3691_v43  ;;  %1584 = vmatprep.mubr.bf16.mxu0 %v2836_v46  ;;  %v2869_v43 = vcombine.low %v305_v25, %v309_v26  ;;  %v2876_v44 = vcombine.high %v312_v35, %v316_v38  ;;  %v2878_v45 = vcombine.high %v313_v40, %v317_v41  ;;  %v3712_v46 = vld [vmem:[%s4713_s1 + $0x170] sm:$0xff]   ;;  %v329_v0 = vld [vmem:[%s3889_s12 + $0x208] sm:$0xff]  ;;  %v356_v23 = vld [vmem:[%s3889_s12 + $0x2e0] sm:$0xff] }
  0x2b   : > { %1745 = vmatprep.mubr.bf16.mxu1 %v2838_v50  ;;  %3410 = vmatprep.subr.bf16.mxu0 %v3692_v55  ;;  %v320_v50 = vld [vmem:[%s3889_s12 + $0x1c0] sm:$0xff]  ;;  %v3716_v55 = vld [vmem:[%s4713_s1 + $0x178] sm:$0xff]   ;;  %v333_v1 = vld [vmem:[%s3889_s12 + $0x228] sm:$0xff] }
  0x2c   : > { %3522 = vmatprep.subr.bf16.mxu1 %v3694_v60  ;;  %v3718_v60 = vld [vmem:[%s4713_s1 + $0x1f8] sm:$0xff]   ;;  %v2893_v11 = vcombine.low %v329_v0, %v333_v1  ;;  %v357_v25 = vld [vmem:[%s3889_s12 + $0x2e8] sm:$0xff] }
  0x2d   : > { %3411 = vmatpush3.bf16.msra.mxu0 %v3693_v58  ;;  %v3717_v58 = vld [vmem:[%s4713_s1 + $0x138] sm:$0xff]  }
  0x2e   : > { %3523 = vmatpush3.bf16.msra.mxu1 %v3695_v61  ;;  %3412 = vmatprep.subr.bf16.mxu0 %v3696_v2  ;;  %v3719_v61 = vld [vmem:[%s4713_s1 + $0x1b8] sm:$0xff]   ;;  %v2883_v2 = vcombine.low %v320_v50, %v324_v51 }
  0x2f   : > { %3524 = vmatprep.subr.bf16.mxu1 %v3698_v7  ;;  %v340_v7 = vld [vmem:[%s3889_s12 + $0x260] sm:$0xff] }
  0x30   : > { %1585 = vmatmul.mubr.bf16.gmra.mrb[4].mxu0 %v2835_v54  ;;  %v2875_v54 = vcombine.low %v312_v35, %v316_v38  ;;  %v368_v38 = vld [vmem:[%s3889_s12 + $0x340] sm:$0xff] }
  0x31   : > { %1746 = vmatmul.mubr.bf16.gmra.mrb[4].mxu1 %v2837_v56  ;;  %1592 = vmatprep.mubr.bf16.mxu0 %v2844_v57  ;;  %v2877_v56 = vcombine.low %v313_v40, %v317_v41  ;;  %v2884_v57 = vcombine.high %v320_v50, %v324_v51  ;;  %v369_v40 = vld [vmem:[%s3889_s12 + $0x348] sm:$0xff] }
  0x32   : > { %1753 = vmatprep.mubr.bf16.mxu1 %v2846_v59  ;;  %3413 = vmatpush3.bf16.msra.mxu0 %v3697_v4  ;;  %v2886_v59 = vcombine.high %v321_v52, %v325_v53  ;;  %v2892_v4 = vcombine.high %v328_v62, %v332_v63  ;;  %v373_v41 = vld [vmem:[%s3889_s12 + $0x368] sm:$0xff]  ;;  %v266_v62 = vld [vmem:[%s3889_s12 + $0x10] sm:$0xff] }
  0x33   : > { %3525 = vmatpush3.bf16.msra.mxu1 %v3699_v9  ;;  %3414 = vmatprep.subr.bf16.mxu0 %v3700_v14  ;;  %v341_v9 = vld [vmem:[%s3889_s12 + $0x268] sm:$0xff]  ;;  %v344_v14 = vld [vmem:[%s3889_s12 + $0x280] sm:$0xff]  ;;  %v2933_v51 = vcombine.low %v369_v40, %v373_v41  ;;  %v270_v63 = vld [vmem:[%s3889_s12 + $0x30] sm:$0xff] }
  0x34   : > { %3526 = vmatprep.subr.bf16.mxu1 %v3702_v17  ;;  %v349_v17 = vld [vmem:[%s3889_s12 + $0x2a8] sm:$0xff] }
  0x36   : > { %3415 = vmatpush3.bf16.msra.mxu0 %v3701_v15  ;;  %v348_v15 = vld [vmem:[%s3889_s12 + $0x2a0] sm:$0xff] }
  0x37   : > { %3527 = vmatpush3.bf16.msra.mxu1 %v3703_v20  ;;  %3416 = vmatprep.subr.bf16.mxu0 %v3704_v24  ;;  %v2908_v20 = vcombine.high %v344_v14, %v348_v15  ;;  %v353_v24 = vld [vmem:[%s3889_s12 + $0x2c8] sm:$0xff]  ;;  %v2907_v26 = vcombine.low %v344_v14, %v348_v15  ;;  %v282_v14 = vld [vmem:[%s3889_s12 + $0x90] sm:$0xff] }
  0x38   : > { %1593 = vmatmul.mubr.bf16.gmra.mrb[8].mxu0 %v2843_v3  ;;  %3528 = vmatprep.subr.bf16.mxu1 %v3706_v28  ;;  %v2885_v3 = vcombine.low %v321_v52, %v325_v53  ;;  %v2916_v28 = vcombine.high %v352_v22, %v356_v23  ;;  %v2917_v35 = vcombine.low %v353_v24, %v357_v25  ;;  %v286_v15 = vld [vmem:[%s3889_s12 + $0xb0] sm:$0xff] }
  0x39   : > { %1754 = vmatmul.mubr.bf16.gmra.mrb[8].mxu1 %v2845_v5  ;;  %1600 = vmatprep.mubr.bf16.mxu0 %v2852_v6  ;;  %v2894_v5 = vcombine.high %v329_v0, %v333_v1  ;;  %v336_v6 = vld [vmem:[%s3889_s12 + $0x240] sm:$0xff]  ;;  %v267_v0 = vld [vmem:[%s3889_s12 + $0x18] sm:$0xff] }
  0x3a   : > { %1761 = vmatprep.mubr.bf16.mxu1 %v2854_v8  ;;  %3417 = vmatpush3.bf16.msra.mxu0 %v3705_v27  ;;  %v337_v8 = vld [vmem:[%s3889_s12 + $0x248] sm:$0xff]  ;;  %v2900_v12 = vcombine.high %v336_v6, %v340_v7  ;;  %v271_v1 = vld [vmem:[%s3889_s12 + $0x38] sm:$0xff] }
  0x3b   : > { %3529 = vmatpush3.bf16.msra.mxu1 %v3707_v29  ;;  %3418 = vmatprep.subr.bf16.mxu0 %v3708_v34  ;;  %v2902_v13 = vcombine.high %v337_v8, %v341_v9  ;;  %v2918_v29 = vcombine.high %v353_v24, %v357_v25  ;;  %v2915_v34 = vcombine.low %v352_v22, %v356_v23  ;;  %v290_v22 = vld [vmem:[%s3889_s12 + $0xd0] sm:$0xff]  ;;  %v291_v24 = vld [vmem:[%s3889_s12 + $0xd8] sm:$0xff] }
  0x3c   : > { %3530 = vmatprep.subr.bf16.mxu1 %v3710_v37  ;;  %v294_v23 = vld [vmem:[%s3889_s12 + $0xf0] sm:$0xff]  ;;  %v295_v25 = vld [vmem:[%s3889_s12 + $0xf8] sm:$0xff] }
  0x3e   : > { %3419 = vmatpush3.bf16.msra.mxu0 %v3709_v36 }
  0x3f   : > { %3531 = vmatpush3.bf16.msra.mxu1 %v3711_v39  ;;  %3420 = vmatprep.subr.bf16.mxu0 %v3712_v46  ;;  %v372_v39 = vld [vmem:[%s3889_s12 + $0x360] sm:$0xff] }
  0x40   : > { %1601 = vmatmul.mubr.bf16.gmra.mrb[12].mxu0 %v2851_v16  ;;  %3532 = vmatprep.subr.bf16.mxu1 %v3714_v48  ;;  %v345_v16 = vld [vmem:[%s3889_s12 + $0x288] sm:$0xff]  ;;  %v376_v46 = vld [vmem:[%s3889_s12 + $0x380] sm:$0xff]  ;;  %v2931_v50 = vcombine.low %v368_v38, %v372_v39 }
  0x41   : > { %1762 = vmatmul.mubr.bf16.gmra.mrb[12].mxu1 %v2853_v18  ;;  %1608 = vmatprep.mubr.bf16.mxu0 %v2860_v19  ;;  %v2899_v18 = vcombine.low %v336_v6, %v340_v7  ;;  %v2901_v19 = vcombine.low %v337_v8, %v341_v9  ;;  %v2909_v27 = vcombine.low %v345_v16, %v349_v17  ;;  %v377_v48 = vld [vmem:[%s3889_s12 + $0x388] sm:$0xff]  ;;  %v274_v6 = vld [vmem:[%s3889_s12 + $0x50] sm:$0xff]  ;;  %v275_v8 = vld [vmem:[%s3889_s12 + $0x58] sm:$0xff] }
  0x42   : > { %1769 = vmatprep.mubr.bf16.mxu1 %v2862_v21  ;;  %3421 = vmatpush3.bf16.msra.mxu0 %v3713_v47  ;;  %v2910_v21 = vcombine.high %v345_v16, %v349_v17  ;;  %v380_v47 = vld [vmem:[%s3889_s12 + $0x3a0] sm:$0xff]  ;;  %v278_v7 = vld [vmem:[%s3889_s12 + $0x70] sm:$0xff]  ;;  %v279_v9 = vld [vmem:[%s3889_s12 + $0x78] sm:$0xff] }
  0x43   : > { %3533 = vmatpush3.bf16.msra.mxu1 %v3715_v49  ;;  %3422 = vmatprep.subr.bf16.mxu0 %v3716_v55  ;;  %v381_v49 = vld [vmem:[%s3889_s12 + $0x3a8] sm:$0xff]  ;;  %v2940_v52 = vcombine.high %v376_v46, %v380_v47  ;;  %v388_v55 = vld [vmem:[%s3889_s12 + $0x3e0] sm:$0xff]  ;;  %v283_v16 = vld [vmem:[%s3889_s12 + $0x98] sm:$0xff] }
  0x44   : > { %3534 = vmatprep.subr.bf16.mxu1 %v3718_v60  ;;  %v2942_v53 = vcombine.high %v377_v48, %v381_v49  ;;  %v287_v17 = vld [vmem:[%s3889_s12 + $0xb8] sm:$0xff] }
  0x46   : > { %3423 = vmatpush3.bf16.msra.mxu0 %v3717_v58  ;;  %v2939_v58 = vcombine.low %v376_v46, %v380_v47  ;;  %v314_v46 = vld [vmem:[%s3889_s12 + $0x190] sm:$0xff] }
  0x47   : > { %3535 = vmatpush3.bf16.msra.mxu1 %v3719_v61  ;;  %v318_v47 = vld [vmem:[%s3889_s12 + $0x1b0] sm:$0xff] }
  0x48   : > { %1609 = vmatmul.mubr.bf16.gmra.mrb[16].mxu0 %v2859_v30  ;;  %v360_v30 = vld [vmem:[%s3889_s12 + $0x300] sm:$0xff] }
  0x49   : > { %1770 = vmatmul.mubr.bf16.gmra.mrb[16].mxu1 %v2861_v31  ;;  %1616 = vmatprep.mubr.bf16.mxu0 %v2868_v32  ;;  %v364_v31 = vld [vmem:[%s3889_s12 + $0x320] sm:$0xff]  ;;  %v361_v32 = vld [vmem:[%s3889_s12 + $0x308] sm:$0xff] }
  0x4a   : > { %1777 = vmatprep.mubr.bf16.mxu1 %v2870_v33  ;;  %v365_v33 = vld [vmem:[%s3889_s12 + $0x328] sm:$0xff]  ;;  %v2924_v36 = vcombine.high %v360_v30, %v364_v31 }
  0x4b   : > { %v2926_v37 = vcombine.high %v361_v32, %v365_v33 }
  0x50   : > { %1617 = vmatmul.mubr.bf16.gmra.mrb[20].mxu0 %v2867_v42  ;;  %v2923_v42 = vcombine.low %v360_v30, %v364_v31  ;;  %v298_v30 = vld [vmem:[%s3889_s12 + $0x110] sm:$0xff] }
  0x51   : > { %1778 = vmatmul.mubr.bf16.gmra.mrb[20].mxu1 %v2869_v43  ;;  %1624 = vmatprep.mubr.bf16.mxu0 %v2876_v44  ;;  %v2925_v43 = vcombine.low %v361_v32, %v365_v33  ;;  %v2932_v44 = vcombine.high %v368_v38, %v372_v39  ;;  %v302_v31 = vld [vmem:[%s3889_s12 + $0x130] sm:$0xff]  ;;  %v299_v32 = vld [vmem:[%s3889_s12 + $0x118] sm:$0xff] }
  0x52   : > { %1785 = vmatprep.mubr.bf16.mxu1 %v2878_v45  ;;  %v2934_v45 = vcombine.high %v369_v40, %v373_v41  ;;  %v303_v33 = vld [vmem:[%s3889_s12 + $0x138] sm:$0xff]  ;;  %v306_v38 = vld [vmem:[%s3889_s12 + $0x150] sm:$0xff] }
  0x53   : > { %v310_v39 = vld [vmem:[%s3889_s12 + $0x170] sm:$0xff]  ;;  %v307_v40 = vld [vmem:[%s3889_s12 + $0x158] sm:$0xff] }
  0x54   : > { %v311_v41 = vld [vmem:[%s3889_s12 + $0x178] sm:$0xff] }
  0x58   : > { %1625 = vmatmul.mubr.bf16.gmra.mrb[24].mxu0 %v2875_v54  ;;  %v384_v54 = vld [vmem:[%s3889_s12 + $0x3c0] sm:$0xff] }
  0x59   : > { %1786 = vmatmul.mubr.bf16.gmra.mrb[24].mxu1 %v2877_v56  ;;  %1632 = vmatprep.mubr.bf16.mxu0 %v2884_v57  ;;  %v385_v56 = vld [vmem:[%s3889_s12 + $0x3c8] sm:$0xff]  ;;  %v2948_v60 = vcombine.high %v384_v54, %v388_v55 }
  0x5a   : > { %1793 = vmatprep.mubr.bf16.mxu1 %v2886_v59  ;;  %v389_v57 = vld [vmem:[%s3889_s12 + $0x3e8] sm:$0xff]  ;;  %v2941_v59 = vcombine.low %v377_v48, %v381_v49  ;;  %v315_v48 = vld [vmem:[%s3889_s12 + $0x198] sm:$0xff] }
  0x5b   : > { %v2950_v61 = vcombine.high %v385_v56, %v389_v57  ;;  %v319_v49 = vld [vmem:[%s3889_s12 + $0x1b8] sm:$0xff] }
  0x60   : > { %1633 = vmatmul.mubr.bf16.gmra.mrb[28].mxu0 %v2883_v2  ;;  %v2947_v2 = vcombine.low %v384_v54, %v388_v55  ;;  %v322_v54 = vld [vmem:[%s3889_s12 + $0x1d0] sm:$0xff] }
  0x61   : > { %1794 = vmatmul.mubr.bf16.gmra.mrb[28].mxu1 %v2885_v3  ;;  %1640 = vmatprep.mubr.bf16.mxu0 %v2892_v4  ;;  %v2949_v3 = vcombine.low %v385_v56, %v389_v57  ;;  %v2832_v4 = vcombine.high %v266_v62, %v270_v63  ;;  %v326_v55 = vld [vmem:[%s3889_s12 + $0x1f0] sm:$0xff]  ;;  %v323_v56 = vld [vmem:[%s3889_s12 + $0x1d8] sm:$0xff] }
  0x62   : > { %1801 = vmatprep.mubr.bf16.mxu1 %v2894_v5  ;;  %v2834_v5 = vcombine.high %v267_v0, %v271_v1  ;;  %v327_v57 = vld [vmem:[%s3889_s12 + $0x1f8] sm:$0xff] }
  0x68   : > { %1641 = vmatmul.mubr.bf16.gmra.mrb[32].mxu0 %v2891_v10  ;;  %v2831_v10 = vcombine.low %v266_v62, %v270_v63  ;;  %v330_v62 = vld [vmem:[%s3889_s12 + $0x210] sm:$0xff] }
  0x69   : > { %1802 = vmatmul.mubr.bf16.gmra.mrb[32].mxu1 %v2893_v11  ;;  %1648 = vmatprep.mubr.bf16.mxu0 %v2900_v12  ;;  %v2833_v11 = vcombine.low %v267_v0, %v271_v1  ;;  %v2840_v12 = vcombine.high %v274_v6, %v278_v7  ;;  %v334_v63 = vld [vmem:[%s3889_s12 + $0x230] sm:$0xff]  ;;  %v331_v0 = vld [vmem:[%s3889_s12 + $0x218] sm:$0xff] }
  0x6a   : > { %1809 = vmatprep.mubr.bf16.mxu1 %v2902_v13  ;;  %v2842_v13 = vcombine.high %v275_v8, %v279_v9  ;;  %v335_v1 = vld [vmem:[%s3889_s12 + $0x238] sm:$0xff] }
  0x70   : > { %1649 = vmatmul.mubr.bf16.gmra.mrb[36].mxu0 %v2899_v18  ;;  %v2839_v18 = vcombine.low %v274_v6, %v278_v7  ;;  %v338_v6 = vld [vmem:[%s3889_s12 + $0x250] sm:$0xff] }
  0x71   : > { %1810 = vmatmul.mubr.bf16.gmra.mrb[36].mxu1 %v2901_v19  ;;  %1656 = vmatprep.mubr.bf16.mxu0 %v2908_v20  ;;  %v2841_v19 = vcombine.low %v275_v8, %v279_v9  ;;  %v2848_v20 = vcombine.high %v282_v14, %v286_v15  ;;  %v342_v7 = vld [vmem:[%s3889_s12 + $0x270] sm:$0xff]  ;;  %v339_v8 = vld [vmem:[%s3889_s12 + $0x258] sm:$0xff] }
  0x72   : > { %1817 = vmatprep.mubr.bf16.mxu1 %v2910_v21  ;;  %v2850_v21 = vcombine.high %v283_v16, %v287_v17  ;;  %v343_v9 = vld [vmem:[%s3889_s12 + $0x278] sm:$0xff] }
  0x78   : > { %1657 = vmatmul.mubr.bf16.gmra.mrb[40].mxu0 %v2907_v26  ;;  %v2847_v26 = vcombine.low %v282_v14, %v286_v15  ;;  %v346_v14 = vld [vmem:[%s3889_s12 + $0x290] sm:$0xff] }
  0x79   : > { %1818 = vmatmul.mubr.bf16.gmra.mrb[40].mxu1 %v2909_v27  ;;  %1664 = vmatprep.mubr.bf16.mxu0 %v2916_v28  ;;  %v2849_v27 = vcombine.low %v283_v16, %v287_v17  ;;  %v2856_v28 = vcombine.high %v290_v22, %v294_v23  ;;  %v350_v15 = vld [vmem:[%s3889_s12 + $0x2b0] sm:$0xff]  ;;  %v347_v16 = vld [vmem:[%s3889_s12 + $0x298] sm:$0xff] }
  0x7a   : > { %1825 = vmatprep.mubr.bf16.mxu1 %v2918_v29  ;;  %v2858_v29 = vcombine.high %v291_v24, %v295_v25  ;;  %v351_v17 = vld [vmem:[%s3889_s12 + $0x2b8] sm:$0xff] }
  0x80   : > { %1665 = vmatmul.mubr.bf16.gmra.mrb[44].mxu0 %v2915_v34  ;;  %v2855_v34 = vcombine.low %v290_v22, %v294_v23  ;;  %v354_v22 = vld [vmem:[%s3889_s12 + $0x2d0] sm:$0xff] }
  0x81   : > { %1826 = vmatmul.mubr.bf16.gmra.mrb[44].mxu1 %v2917_v35  ;;  %1672 = vmatprep.mubr.bf16.mxu0 %v2924_v36  ;;  %v2857_v35 = vcombine.low %v291_v24, %v295_v25  ;;  %v2864_v36 = vcombine.high %v298_v30, %v302_v31  ;;  %v358_v23 = vld [vmem:[%s3889_s12 + $0x2f0] sm:$0xff]  ;;  %v355_v24 = vld [vmem:[%s3889_s12 + $0x2d8] sm:$0xff] }
  0x82   : > { %1833 = vmatprep.mubr.bf16.mxu1 %v2926_v37  ;;  %v2866_v37 = vcombine.high %v299_v32, %v303_v33  ;;  %v359_v25 = vld [vmem:[%s3889_s12 + $0x2f8] sm:$0xff] }
  0x88   : > { %1673 = vmatmul.mubr.bf16.gmra.mrb[48].mxu0 %v2923_v42  ;;  %v2863_v42 = vcombine.low %v298_v30, %v302_v31  ;;  %v362_v30 = vld [vmem:[%s3889_s12 + $0x310] sm:$0xff] }
  0x89   : > { %1834 = vmatmul.mubr.bf16.gmra.mrb[48].mxu1 %v2925_v43  ;;  %1680 = vmatprep.mubr.bf16.mxu0 %v2932_v44  ;;  %v2865_v43 = vcombine.low %v299_v32, %v303_v33  ;;  %v2872_v44 = vcombine.high %v306_v38, %v310_v39  ;;  %v366_v31 = vld [vmem:[%s3889_s12 + $0x330] sm:$0xff]  ;;  %v363_v33 = vld [vmem:[%s3889_s12 + $0x318] sm:$0xff] }
  0x8a   : > { %1841 = vmatprep.mubr.bf16.mxu1 %v2934_v45  ;;  %v2874_v45 = vcombine.high %v307_v40, %v311_v41 }
  0x90   : > { %1681 = vmatmul.mubr.bf16.gmra.mrb[52].mxu0 %v2931_v50  ;;  %v2871_v50 = vcombine.low %v306_v38, %v310_v39 }
  0x91   : > { %1842 = vmatmul.mubr.bf16.gmra.mrb[52].mxu1 %v2933_v51  ;;  %1688 = vmatprep.mubr.bf16.mxu0 %v2940_v52  ;;  %v2873_v51 = vcombine.low %v307_v40, %v311_v41  ;;  %v2880_v52 = vcombine.high %v314_v46, %v318_v47  ;;  %v2921_v41 = vcombine.low %v355_v24, %v359_v25 }
  0x92   : > { %1849 = vmatprep.mubr.bf16.mxu1 %v2942_v53  ;;  %v2882_v53 = vcombine.high %v315_v48, %v319_v49 }
  0x98   : > { %1689 = vmatmul.mubr.bf16.gmra.mrb[56].mxu0 %v2939_v58  ;;  %v2879_v58 = vcombine.low %v314_v46, %v318_v47 }
  0x99   : > { %1850 = vmatmul.mubr.bf16.gmra.mrb[56].mxu1 %v2941_v59  ;;  %1696 = vmatprep.mubr.bf16.mxu0 %v2948_v60  ;;  %v2881_v59 = vcombine.low %v315_v48, %v319_v49  ;;  %v2888_v60 = vcombine.high %v322_v54, %v326_v55 }
  0x9a   : > { %1857 = vmatprep.mubr.bf16.mxu1 %v2950_v61  ;;  %v2890_v61 = vcombine.high %v323_v56, %v327_v57 }
  0xa0   : > { %1697 = vmatmul.mubr.bf16.gmra.mrb[60].mxu0 %v2947_v2  ;;  %v2887_v2 = vcombine.low %v322_v54, %v326_v55  ;;  %v371_v55 = vld [vmem:[%s3889_s12 + $0x358] sm:$0xff] }
  0xa1   : > { %1858 = vmatmul.mubr.bf16.gmra.mrb[60].mxu1 %v2949_v3  ;;  %1898 = vmatprep.mubr.bf16.mxu0 %v2832_v4  ;;  %v2889_v3 = vcombine.low %v323_v56, %v327_v57  ;;  %v2896_v4 = vcombine.high %v330_v62, %v334_v63  ;;  %v375_v56 = vld [vmem:[%s3889_s12 + $0x378] sm:$0xff] }
  0xa2   : > { %2059 = vmatprep.mubr.bf16.mxu1 %v2834_v5  ;;  %v2898_v5 = vcombine.high %v331_v0, %v335_v1 }
  0xa8   : > { %1899 = vmatmul.mubr.bf16.vlgmr.msra.gmra.mrb[64].mxu0 %v2831_v10  ;;  %v2895_v10 = vcombine.low %v330_v62, %v334_v63 }
  0xa9   : > { %2060 = vmatmul.mubr.bf16.vlgmr.msra.gmra.mrb[64].mxu1 %v2833_v11  ;;  %1906 = vmatprep.mubr.bf16.mxu0 %v2840_v12  ;;  %v2897_v11 = vcombine.low %v331_v0, %v335_v1  ;;  %v2904_v12 = vcombine.high %v338_v6, %v342_v7 }
  0xaa   : > { %2067 = vmatprep.mubr.bf16.mxu1 %v2842_v13  ;;  %v2906_v13 = vcombine.high %v339_v8, %v343_v9 }
  0xb0   : > { %1907 = vmatmul.mubr.bf16.gmra.mrb[68].mxu0 %v2839_v18  ;;  %v2903_v18 = vcombine.low %v338_v6, %v342_v7 }
  0xb1   : > { %2068 = vmatmul.mubr.bf16.gmra.mrb[68].mxu1 %v2841_v19  ;;  %1914 = vmatprep.mubr.bf16.mxu0 %v2848_v20  ;;  %v2905_v19 = vcombine.low %v339_v8, %v343_v9  ;;  %v2912_v20 = vcombine.high %v346_v14, %v350_v15 }
  0xb2   : > { %2075 = vmatprep.mubr.bf16.mxu1 %v2850_v21  ;;  %v2914_v21 = vcombine.high %v347_v16, %v351_v17 }
  0xb8   : > { %1915 = vmatmul.mubr.bf16.gmra.mrb[72].mxu0 %v2847_v26  ;;  %v2911_v26 = vcombine.low %v346_v14, %v350_v15  ;;  %v383_v14 = vld [vmem:[%s3889_s12 + $0x3b8] sm:$0xff] }
  0xb9   : > { %2076 = vmatmul.mubr.bf16.gmra.mrb[72].mxu1 %v2849_v27  ;;  %1922 = vmatprep.mubr.bf16.mxu0 %v2856_v28  ;;  %v2913_v27 = vcombine.low %v347_v16, %v351_v17  ;;  %v2920_v28 = vcombine.high %v354_v22, %v358_v23 }
  0xba   : > { %2083 = vmatprep.mubr.bf16.mxu1 %v2858_v29  ;;  %v2922_v29 = vcombine.high %v355_v24, %v359_v25 }
  0xc0   : > { %1923 = vmatmul.mubr.bf16.gmra.mrb[76].mxu0 %v2855_v34  ;;  %v367_v34 = vld [vmem:[%s3889_s12 + $0x338] sm:$0xff] }
  0xc1   : > { %2084 = vmatmul.mubr.bf16.gmra.mrb[76].mxu1 %v2857_v35  ;;  %1930 = vmatprep.mubr.bf16.mxu0 %v2864_v36  ;;  %v2930_v46 = vcombine.high %v363_v33, %v367_v34  ;;  %v2929_v63 = vcombine.low %v363_v33, %v367_v34  ;;  %v390_v33 = vld [vmem:[%s3889_s12 + $0x3f0] sm:$0xff] }
  0xc2   : > { %2091 = vmatprep.mubr.bf16.mxu1 %v2866_v37  ;;  %v2919_v37 = vcombine.low %v354_v22, %v358_v23 }
  0xc8   : > { %1931 = vmatmul.mubr.bf16.gmra.mrb[80].mxu0 %v2863_v42  ;;  %v2928_v42 = vcombine.high %v362_v30, %v366_v31 }
  0xc9   : > { %2092 = vmatmul.mubr.bf16.gmra.mrb[80].mxu1 %v2865_v43  ;;  %1938 = vmatprep.mubr.bf16.mxu0 %v2872_v44 }
  0xca   : > { %2099 = vmatprep.mubr.bf16.mxu1 %v2874_v45 }
  0xd0   : > { %1939 = vmatmul.mubr.bf16.gmra.mrb[84].mxu0 %v2871_v50 }
  0xd1   : > { %2100 = vmatmul.mubr.bf16.gmra.mrb[84].mxu1 %v2873_v51  ;;  %1946 = vmatprep.mubr.bf16.mxu0 %v2880_v52  ;;  %v370_v52 = vld [vmem:[%s3889_s12 + $0x350] sm:$0xff] }
  0xd2   : > { %2107 = vmatprep.mubr.bf16.mxu1 %v2882_v53  ;;  %v374_v53 = vld [vmem:[%s3889_s12 + $0x370] sm:$0xff] }
  0xd3   : > { %v2936_v0 = vcombine.high %v370_v52, %v374_v53  ;;  %v2935_v17 = vcombine.low %v370_v52, %v374_v53 }
  0xd8   : > { %1947 = vmatmul.mubr.bf16.gmra.mrb[88].mxu0 %v2879_v58 }
  0xd9   : > { %2108 = vmatmul.mubr.bf16.gmra.mrb[88].mxu1 %v2881_v59  ;;  %1954 = vmatprep.mubr.bf16.mxu0 %v2888_v60  ;;  %v2927_v59 = vcombine.low %v362_v30, %v366_v31 }
  0xda   : > { %2115 = vmatprep.mubr.bf16.mxu1 %v2890_v61 }
  0xe0   : > { %1955 = vmatmul.mubr.bf16.gmra.mrb[92].mxu0 %v2887_v2 }
  0xe1   : > { %2116 = vmatmul.mubr.bf16.gmra.mrb[92].mxu1 %v2889_v3  ;;  %1962 = vmatprep.mubr.bf16.mxu0 %v2896_v4  ;;  %v2938_v4 = vcombine.high %v371_v55, %v375_v56 }
  0xe2   : > { %2123 = vmatprep.mubr.bf16.mxu1 %v2898_v5 }
  0xe8   : > { %1963 = vmatmul.mubr.bf16.gmra.mrb[96].mxu0 %v2895_v10  ;;  %v378_v10 = vld [vmem:[%s3889_s12 + $0x390] sm:$0xff] }
  0xe9   : > { %2124 = vmatmul.mubr.bf16.gmra.mrb[96].mxu1 %v2897_v11  ;;  %1970 = vmatprep.mubr.bf16.mxu0 %v2904_v12  ;;  %v382_v11 = vld [vmem:[%s3889_s12 + $0x3b0] sm:$0xff] }
  0xea   : > { %2131 = vmatprep.mubr.bf16.mxu1 %v2906_v13  ;;  %v379_v13 = vld [vmem:[%s3889_s12 + $0x398] sm:$0xff]  ;;  %v2944_v22 = vcombine.high %v378_v10, %v382_v11 }
  0xf0   : > { %1971 = vmatmul.mubr.bf16.gmra.mrb[100].mxu0 %v2903_v18 }
  0xf1   : > { %2132 = vmatmul.mubr.bf16.gmra.mrb[100].mxu1 %v2905_v19  ;;  %1978 = vmatprep.mubr.bf16.mxu0 %v2912_v20 }
  0xf2   : > { %2139 = vmatprep.mubr.bf16.mxu1 %v2914_v21  ;;  %v2937_v21 = vcombine.low %v371_v55, %v375_v56 }
  0xf8   : > { %1979 = vmatmul.mubr.bf16.gmra.mrb[104].mxu0 %v2911_v26  ;;  %v2946_v26 = vcombine.high %v379_v13, %v383_v14 }
  0xf9   : > { %2140 = vmatmul.mubr.bf16.gmra.mrb[104].mxu1 %v2913_v27  ;;  %1986 = vmatprep.mubr.bf16.mxu0 %v2920_v28 }
  0xfa   : > { %2147 = vmatprep.mubr.bf16.mxu1 %v2922_v29 }
  0xfb   : > { %v3200_v32 = vpop.f32.mrb[0].mxu0 }
  0xfc   : > { %v3312_v35 = vpop.f32.mrb[0].mxu1  ;;  %v3201_v36 = vpop.f32.mrb[1].mxu0 }
  0xfd   : > { %v3202_v38 = vadd.f32 %v3201_v36, %v3200_v32  ;;  %v3313_v39 = vpop.f32.mrb[1].mxu1  ;;  %v3203_v40 = vpop.f32.mrb[2].mxu0  ;;  %v386_v32 = vld [vmem:[%s3889_s12 + $0x3d0] sm:$0xff]  ;;  %v391_v36 = vld [vmem:[%s3889_s12 + $0x3f8] sm:$0xff] }
  0xfe   : > { %v3314_v43 = vadd.f32 %v3313_v39, %v3312_v35  ;;  %v3315_v44 = vpop.f32.mrb[2].mxu1  ;;  %v3204_v45 = vpop.f32.mrb[3].mxu0  ;;  %v387_v35 = vld [vmem:[%s3889_s12 + $0x3d8] sm:$0xff]  ;;  %v2943_v39 = vcombine.low %v378_v10, %v382_v11 }
  0xff   : > { %v3205_v47 = vadd.f32 %v3204_v45, %v3203_v40  ;;  %v3316_v48 = vpop.f32.mrb[3].mxu1 }
 0x100   : > { %v4109_v49 = vadd.f32 %v3314_v43, %v3202_v38  ;;  %v3317_v50 = vadd.f32 %v3316_v48, %v3315_v44  ;;  %1987 = vmatmul.mubr.bf16.gmra.mrb[108].mxu0 %v2919_v37  ;;  %v2945_v43 = vcombine.low %v379_v13, %v383_v14  ;;  %v2952_v44 = vcombine.high %v386_v32, %v390_v33 }
 0x101   : > { %2148 = vmatmul.mubr.bf16.gmra.mrb[108].mxu1 %v2921_v41  ;;  %1994 = vmatprep.mubr.bf16.mxu0 %v2928_v42  ;;  %v2954_v48 = vcombine.high %v387_v35, %v391_v36 }
 0x102   : > { %v4111_v51 = vadd.f32 %v3317_v50, %v3205_v47  ;;  %2155 = vmatprep.mubr.bf16.mxu1 %v2930_v46 }
 0x103   : > { %v3206_v54 = vpop.f32.mrb[4].mxu0 }
 0x104   : > { %v3318_v57 = vpop.f32.mrb[4].mxu1  ;;  %v3207_v58 = vpop.f32.mrb[5].mxu0 }
 0x105   : > { %v3208_v60 = vadd.f32 %v3207_v58, %v3206_v54  ;;  %v3319_v61 = vpop.f32.mrb[5].mxu1  ;;  %v3209_v62 = vpop.f32.mrb[6].mxu0 }
 0x106   : > { %v3320_v1 = vadd.f32 %v3319_v61, %v3318_v57  ;;  %v3321_v2 = vpop.f32.mrb[6].mxu1  ;;  %v3210_v3 = vpop.f32.mrb[7].mxu0 }
 0x107   : > { %v3211_v5 = vadd.f32 %v3210_v3, %v3209_v62  ;;  %v3322_v6 = vpop.f32.mrb[7].mxu1 }
 0x108   : > { %v4117_v7 = vadd.f32 %v3320_v1, %v3208_v60  ;;  %v3323_v8 = vadd.f32 %v3322_v6, %v3321_v2  ;;  %1995 = vmatmul.mubr.bf16.gmra.mrb[112].mxu0 %v2927_v59  ;;  %v2951_v59 = vcombine.low %v386_v32, %v390_v33 }
 0x109   : > { %2156 = vmatmul.mubr.bf16.gmra.mrb[112].mxu1 %v2929_v63  ;;  %2002 = vmatprep.mubr.bf16.mxu0 %v2936_v0  ;;  %v2953_v63 = vcombine.low %v387_v35, %v391_v36 }
 0x10a   : > { %v4119_v9 = vadd.f32 %v3323_v8, %v3211_v5  ;;  %2163 = vmatprep.mubr.bf16.mxu1 %v2938_v4 }
 0x10b   : > { %v3212_v12 = vpop.f32.mrb[8].mxu0 }
 0x10c   : > { %v3324_v15 = vpop.f32.mrb[8].mxu1  ;;  %v3213_v16 = vpop.f32.mrb[9].mxu0 }
 0x10d   : > { %v3214_v18 = vadd.f32 %v3213_v16, %v3212_v12  ;;  %v3325_v19 = vpop.f32.mrb[9].mxu1  ;;  %v3215_v20 = vpop.f32.mrb[10].mxu0 }
 0x10e   : > { %v3326_v23 = vadd.f32 %v3325_v19, %v3324_v15  ;;  %v3327_v24 = vpop.f32.mrb[10].mxu1  ;;  %v3216_v25 = vpop.f32.mrb[11].mxu0 }
 0x10f   : > { %v3217_v27 = vadd.f32 %v3216_v25, %v3215_v20  ;;  %v3328_v28 = vpop.f32.mrb[11].mxu1 }
 0x110   : > { %v4125_v29 = vadd.f32 %v3326_v23, %v3214_v18  ;;  %v3329_v30 = vadd.f32 %v3328_v28, %v3327_v24  ;;  %2003 = vmatmul.mubr.bf16.gmra.mrb[116].mxu0 %v2935_v17 }
 0x111   : > { %2164 = vmatmul.mubr.bf16.gmra.mrb[116].mxu1 %v2937_v21  ;;  %2010 = vmatprep.mubr.bf16.mxu0 %v2944_v22 }
 0x112   : > { %v4127_v31 = vadd.f32 %v3329_v30, %v3217_v27  ;;  %2171 = vmatprep.mubr.bf16.mxu1 %v2946_v26 }
 0x113   : > { %v3218_v34 = vpop.f32.mrb[12].mxu0 }
 0x114   : > { %v3330_v37 = vpop.f32.mrb[12].mxu1  ;;  %v3219_v38 = vpop.f32.mrb[13].mxu0 }
 0x115   : > { %v3220_v40 = vadd.f32 %v3219_v38, %v3218_v34  ;;  %v3331_v41 = vpop.f32.mrb[13].mxu1  ;;  %v3221_v42 = vpop.f32.mrb[14].mxu0 }
 0x116   : > { %v3332_v45 = vadd.f32 %v3331_v41, %v3330_v37  ;;  %v3333_v46 = vpop.f32.mrb[14].mxu1  ;;  %v3222_v47 = vpop.f32.mrb[15].mxu0 }
 0x117   : > { %v3223_v50 = vadd.f32 %v3222_v47, %v3221_v42  ;;  %v3334_v52 = vpop.f32.mrb[15].mxu1 }
 0x118   : > { %v4133_v53 = vadd.f32 %v3332_v45, %v3220_v40  ;;  %v3335_v54 = vadd.f32 %v3334_v52, %v3333_v46  ;;  %2011 = vmatmul.mubr.bf16.gmra.mrb[120].mxu0 %v2943_v39 }
 0x119   : > { %2172 = vmatmul.mubr.bf16.gmra.mrb[120].mxu1 %v2945_v43  ;;  %2018 = vmatprep.mubr.bf16.mxu0 %v2952_v44 }
 0x11a   : > { %v4135_v55 = vadd.f32 %v3335_v54, %v3223_v50  ;;  %2179 = vmatprep.mubr.bf16.mxu1 %v2954_v48 }
 0x11b   : > { %v3224_v56 = vpop.f32.mrb[16].mxu0 }
 0x11c   : > { %v3336_v57 = vpop.f32.mrb[16].mxu1  ;;  %v3225_v58 = vpop.f32.mrb[17].mxu0 }
 0x11d   : > { %v3226_v60 = vadd.f32 %v3225_v58, %v3224_v56  ;;  %v3337_v61 = vpop.f32.mrb[17].mxu1  ;;  %v3227_v62 = vpop.f32.mrb[18].mxu0 }
 0x11e   : > { %v3338_v0 = vadd.f32 %v3337_v61, %v3336_v57  ;;  %v3339_v1 = vpop.f32.mrb[18].mxu1  ;;  %v3228_v2 = vpop.f32.mrb[19].mxu0 }
 0x11f   : > { %v3229_v3 = vadd.f32 %v3228_v2, %v3227_v62  ;;  %v3340_v4 = vpop.f32.mrb[19].mxu1 }
 0x120   : > { %v4137_v5 = vadd.f32 %v3338_v0, %v3226_v60  ;;  %v3341_v6 = vadd.f32 %v3340_v4, %v3339_v1  ;;  %2019 = vmatmul.mubr.bf16.gmra.mrb[124].mxu0 %v2951_v59 }
 0x121   : > { %2180 = vmatmul.mubr.bf16.gmra.mrb[124].mxu1 %v2953_v63 }
 0x122   : > { %v4139_v8 = vadd.f32 %v3341_v6, %v3229_v3 }
 0x123   : > { %v3230_v10 = vpop.f32.mrb[20].mxu0 }
 0x124   : > { %v3342_v11 = vpop.f32.mrb[20].mxu1  ;;  %v3231_v12 = vpop.f32.mrb[21].mxu0 }
 0x125   : > { %v3232_v13 = vadd.f32 %v3231_v12, %v3230_v10  ;;  %v3343_v14 = vpop.f32.mrb[21].mxu1  ;;  %v3233_v15 = vpop.f32.mrb[22].mxu0 }
 0x126   : > { %v3344_v16 = vadd.f32 %v3343_v14, %v3342_v11  ;;  %v3345_v17 = vpop.f32.mrb[22].mxu1  ;;  %v3234_v18 = vpop.f32.mrb[23].mxu0 }
 0x127   : > { %v3235_v19 = vadd.f32 %v3234_v18, %v3233_v15  ;;  %v3346_v20 = vpop.f32.mrb[23].mxu1 }
 0x128   : > { %v4141_v21 = vadd.f32 %v3344_v16, %v3232_v13  ;;  %v3347_v22 = vadd.f32 %v3346_v20, %v3345_v17 }
 0x12a   : > { %v4143_v23 = vadd.f32 %v3347_v22, %v3235_v19 }
 0x12b   : > { %v3236_v24 = vpop.f32.mrb[24].mxu0 }
 0x12c   : > { %v3348_v25 = vpop.f32.mrb[24].mxu1  ;;  %v3237_v26 = vpop.f32.mrb[25].mxu0 }
 0x12d   : > { %v3238_v27 = vadd.f32 %v3237_v26, %v3236_v24  ;;  %v3349_v28 = vpop.f32.mrb[25].mxu1  ;;  %v3239_v30 = vpop.f32.mrb[26].mxu0 }
 0x12e   : > { %v3350_v32 = vadd.f32 %v3349_v28, %v3348_v25  ;;  %v3351_v33 = vpop.f32.mrb[26].mxu1  ;;  %v3240_v34 = vpop.f32.mrb[27].mxu0 }
 0x12f   : > { %v3241_v35 = vadd.f32 %v3240_v34, %v3239_v30  ;;  %v3352_v36 = vpop.f32.mrb[27].mxu1 }
 0x130   : > { %v4145_v37 = vadd.f32 %v3350_v32, %v3238_v27  ;;  %v3353_v38 = vadd.f32 %v3352_v36, %v3351_v33 }
 0x132   : > { %v4147_v39 = vadd.f32 %v3353_v38, %v3241_v35 }
 0x133   : > { %v3242_v40 = vpop.f32.mrb[28].mxu0 }
 0x134   : > { %v3354_v41 = vpop.f32.mrb[28].mxu1  ;;  %v3243_v42 = vpop.f32.mrb[29].mxu0 }
 0x135   : > { %v3244_v43 = vadd.f32 %v3243_v42, %v3242_v40  ;;  %v3355_v44 = vpop.f32.mrb[29].mxu1  ;;  %v3245_v45 = vpop.f32.mrb[30].mxu0 }
 0x136   : > { %v3356_v46 = vadd.f32 %v3355_v44, %v3354_v41  ;;  %v3357_v47 = vpop.f32.mrb[30].mxu1  ;;  %v3246_v48 = vpop.f32.mrb[31].mxu0 }
 0x137   : > { %v3247_v50 = vadd.f32 %v3246_v48, %v3245_v45  ;;  %v3358_v52 = vpop.f32.mrb[31].mxu1 }
 0x138   : > { %v4149_v54 = vadd.f32 %v3356_v46, %v3244_v43  ;;  %v3359_v56 = vadd.f32 %v3358_v52, %v3357_v47 }
 0x13a   : > { %v4151_v57 = vadd.f32 %v3359_v56, %v3247_v50 }
 0x13b   : > { %v3248_v58 = vpop.f32.mrb[32].mxu0 }
 0x13c   : > { %v3360_v59 = vpop.f32.mrb[32].mxu1  ;;  %v3249_v60 = vpop.f32.mrb[33].mxu0 }
 0x13d   : > { %v3250_v61 = vadd.f32 %v3249_v60, %v3248_v58  ;;  %v3361_v62 = vpop.f32.mrb[33].mxu1  ;;  %v3251_v63 = vpop.f32.mrb[34].mxu0 }
 0x13e   : > { %v3362_v0 = vadd.f32 %v3361_v62, %v3360_v59  ;;  %v3363_v1 = vpop.f32.mrb[34].mxu1  ;;  %v3252_v2 = vpop.f32.mrb[35].mxu0 }
 0x13f   : > { %v3253_v3 = vadd.f32 %v3252_v2, %v3251_v63  ;;  %v3364_v4 = vpop.f32.mrb[35].mxu1 }
 0x140   : > { %v4153_v6 = vadd.f32 %v3362_v0, %v3250_v61  ;;  %v3365_v10 = vadd.f32 %v3364_v4, %v3363_v1 }
 0x142   : > { %v4155_v11 = vadd.f32 %v3365_v10, %v3253_v3 }
 0x143   : > { %v3254_v12 = vpop.f32.mrb[36].mxu0 }
 0x144   : > { %v3366_v13 = vpop.f32.mrb[36].mxu1  ;;  %v3255_v14 = vpop.f32.mrb[37].mxu0 }
 0x145   : > { %v3256_v15 = vadd.f32 %v3255_v14, %v3254_v12  ;;  %v3367_v16 = vpop.f32.mrb[37].mxu1  ;;  %v3257_v17 = vpop.f32.mrb[38].mxu0 }
 0x146   : > { %v3368_v18 = vadd.f32 %v3367_v16, %v3366_v13  ;;  %v3369_v19 = vpop.f32.mrb[38].mxu1  ;;  %v3258_v20 = vpop.f32.mrb[39].mxu0 }
 0x147   : > { %v3259_v22 = vadd.f32 %v3258_v20, %v3257_v17  ;;  %v3370_v24 = vpop.f32.mrb[39].mxu1 }
 0x148   : > { %v4157_v25 = vadd.f32 %v3368_v18, %v3256_v15  ;;  %v3371_v26 = vadd.f32 %v3370_v24, %v3369_v19 }
 0x14a   : > { %v4159_v27 = vadd.f32 %v3371_v26, %v3259_v22 }
 0x14b   : > { %v3260_v28 = vpop.f32.mrb[40].mxu0 }
 0x14c   : > { %v3372_v30 = vpop.f32.mrb[40].mxu1  ;;  %v3261_v32 = vpop.f32.mrb[41].mxu0 }
 0x14d   : > { %v3262_v33 = vadd.f32 %v3261_v32, %v3260_v28  ;;  %v3373_v34 = vpop.f32.mrb[41].mxu1  ;;  %v3263_v35 = vpop.f32.mrb[42].mxu0 }
 0x14e   : > { %v3374_v36 = vadd.f32 %v3373_v34, %v3372_v30  ;;  %v3375_v38 = vpop.f32.mrb[42].mxu1  ;;  %v3264_v40 = vpop.f32.mrb[43].mxu0 }
 0x14f   : > { %v3265_v41 = vadd.f32 %v3264_v40, %v3263_v35  ;;  %v3376_v42 = vpop.f32.mrb[43].mxu1 }
 0x150   : > { %v4161_v43 = vadd.f32 %v3374_v36, %v3262_v33  ;;  %v3377_v44 = vadd.f32 %v3376_v42, %v3375_v38 }
 0x152   : > { %v4163_v45 = vadd.f32 %v3377_v44, %v3265_v41 }
 0x153   : > { %v3266_v46 = vpop.f32.mrb[44].mxu0 }
 0x154   : > { %v3378_v47 = vpop.f32.mrb[44].mxu1  ;;  %v3267_v48 = vpop.f32.mrb[45].mxu0 }
 0x155   : > { %v3268_v50 = vadd.f32 %v3267_v48, %v3266_v46  ;;  %v3379_v52 = vpop.f32.mrb[45].mxu1  ;;  %v3269_v56 = vpop.f32.mrb[46].mxu0 }
 0x156   : > { %v3380_v58 = vadd.f32 %v3379_v52, %v3378_v47  ;;  %v3381_v59 = vpop.f32.mrb[46].mxu1  ;;  %v3270_v60 = vpop.f32.mrb[47].mxu0 }
 0x157   : > { %v3271_v61 = vadd.f32 %v3270_v60, %v3269_v56  ;;  %v3382_v62 = vpop.f32.mrb[47].mxu1 }
 0x158   : > { %v4165_v63 = vadd.f32 %v3380_v58, %v3268_v50  ;;  %v3383_v0 = vadd.f32 %v3382_v62, %v3381_v59 }
 0x15a   : > { %v4167_v1 = vadd.f32 %v3383_v0, %v3271_v61 }
 0x15b   : > { %v3272_v2 = vpop.f32.mrb[48].mxu0 }
 0x15c   : > { %v3384_v3 = vpop.f32.mrb[48].mxu1  ;;  %v3273_v4 = vpop.f32.mrb[49].mxu0 }
 0x15d   : > { %v3274_v10 = vadd.f32 %v3273_v4, %v3272_v2  ;;  %v3385_v12 = vpop.f32.mrb[49].mxu1  ;;  %v3275_v13 = vpop.f32.mrb[50].mxu0 }
 0x15e   : > { %v3386_v14 = vadd.f32 %v3385_v12, %v3384_v3  ;;  %v3387_v15 = vpop.f32.mrb[50].mxu1  ;;  %v3276_v16 = vpop.f32.mrb[51].mxu0 }
 0x15f   : > { %v3277_v17 = vadd.f32 %v3276_v16, %v3275_v13  ;;  %v3388_v18 = vpop.f32.mrb[51].mxu1 }
 0x160   : > { %v4169_v19 = vadd.f32 %v3386_v14, %v3274_v10  ;;  %v3389_v20 = vadd.f32 %v3388_v18, %v3387_v15 }
 0x162   : > { %v4171_v22 = vadd.f32 %v3389_v20, %v3277_v17 }
 0x163   : > { %v3278_v24 = vpop.f32.mrb[52].mxu0 }
 0x164   : > { %v3390_v26 = vpop.f32.mrb[52].mxu1  ;;  %v3279_v28 = vpop.f32.mrb[53].mxu0 }
 0x165   : > { %v3280_v30 = vadd.f32 %v3279_v28, %v3278_v24  ;;  %v3391_v32 = vpop.f32.mrb[53].mxu1  ;;  %v3281_v33 = vpop.f32.mrb[54].mxu0 }
 0x166   : > { %v3392_v34 = vadd.f32 %v3391_v32, %v3390_v26  ;;  %v3393_v35 = vpop.f32.mrb[54].mxu1  ;;  %v3282_v36 = vpop.f32.mrb[55].mxu0 }
 0x167   : > { %v3283_v38 = vadd.f32 %v3282_v36, %v3281_v33  ;;  %v3394_v40 = vpop.f32.mrb[55].mxu1 }
 0x168   : > { %v4173_v41 = vadd.f32 %v3392_v34, %v3280_v30  ;;  %v3395_v42 = vadd.f32 %v3394_v40, %v3393_v35 }
 0x16a   : > { %v4175_v44 = vadd.f32 %v3395_v42, %v3283_v38 }
 0x16b   : > { %v3284_v46 = vpop.f32.mrb[56].mxu0 }
 0x16c   : > { %v3396_v47 = vpop.f32.mrb[56].mxu1  ;;  %v3285_v48 = vpop.f32.mrb[57].mxu0 }
 0x16d   : > { %v3286_v50 = vadd.f32 %v3285_v48, %v3284_v46  ;;  %v3397_v52 = vpop.f32.mrb[57].mxu1  ;;  %v3287_v56 = vpop.f32.mrb[58].mxu0 }
 0x16e   : > { %v3398_v58 = vadd.f32 %v3397_v52, %v3396_v47  ;;  %v3399_v59 = vpop.f32.mrb[58].mxu1  ;;  %v3288_v60 = vpop.f32.mrb[59].mxu0 }
 0x16f   : > { %v3289_v61 = vadd.f32 %v3288_v60, %v3287_v56  ;;  %v3400_v62 = vpop.f32.mrb[59].mxu1 }
 0x170   : > { %v4177_v0 = vadd.f32 %v3398_v58, %v3286_v50  ;;  %v3401_v2 = vadd.f32 %v3400_v62, %v3399_v59 }
 0x172   : > { %v4179_v3 = vadd.f32 %v3401_v2, %v3289_v61 }
 0x173   : > { %v3290_v4 = vpop.f32.mrb[60].mxu0 }
 0x174   : > { %v3402_v10 = vpop.f32.mrb[60].mxu1  ;;  %v3291_v12 = vpop.f32.mrb[61].mxu0 }
 0x175   : > { %v3292_v13 = vadd.f32 %v3291_v12, %v3290_v4  ;;  %v3403_v14 = vpop.f32.mrb[61].mxu1  ;;  %v3293_v15 = vpop.f32.mrb[62].mxu0 }
 0x176   : > { %v3404_v16 = vadd.f32 %v3403_v14, %v3402_v10  ;;  %v3405_v17 = vpop.f32.mrb[62].mxu1  ;;  %v3294_v18 = vpop.f32.mrb[63].mxu0 }
 0x177   : > { %v3295_v20 = vadd.f32 %v3294_v18, %v3293_v15  ;;  %v3406_v24 = vpop.f32.mrb[63].mxu1 }
 0x178   : > { %v4181_v26 = vadd.f32 %v3404_v16, %v3292_v13  ;;  %v3407_v28 = vadd.f32 %v3406_v24, %v3405_v17 }
 0x17a   : > { %v4183_v30 = vadd.f32 %v3407_v28, %v3295_v20 }
 0x17b   : > { %v3424_v32 = vpop.f32.mrb[64].mxu0 }
 0x17c   : > { %v3536_v33 = vpop.f32.mrb[64].mxu1  ;;  %v3425_v34 = vpop.f32.mrb[65].mxu0 }
 0x17d   : > { %v3426_v35 = vadd.f32 %v3425_v34, %v3424_v32  ;;  %v3537_v36 = vpop.f32.mrb[65].mxu1  ;;  %v3427_v38 = vpop.f32.mrb[66].mxu0 }
 0x17e   : > { %v3538_v40 = vadd.f32 %v3537_v36, %v3536_v33  ;;  %v3539_v42 = vpop.f32.mrb[66].mxu1  ;;  %v3428_v46 = vpop.f32.mrb[67].mxu0 }
 0x17f   : > { %v1901_v47 = vadd.f32 %v3426_v35, %v4109_v49  ;;  %v3429_v48 = vadd.f32 %v3428_v46, %v3427_v38  ;;  %v3540_v50 = vpop.f32.mrb[67].mxu1 }
 0x180   : > { %v3541_v52 = vadd.f32 %v3540_v50, %v3539_v42 }
 0x181   : > { %v4186_v56 = vadd.f32 %v3538_v40, %v1901_v47  ;;  %v1904_v58 = vadd.f32 %v3429_v48, %v4111_v51 }
 0x183   : > { %v4189_v59 = vadd.f32 %v3541_v52, %v1904_v58  ;;  %v3430_v60 = vpop.f32.mrb[68].mxu0 }
 0x184   : > { %v3542_v61 = vpop.f32.mrb[68].mxu1  ;;  %v3431_v62 = vpop.f32.mrb[69].mxu0 }
 0x185   : > { %v3432_v2 = vadd.f32 %v3431_v62, %v3430_v60  ;;  %v3543_v4 = vpop.f32.mrb[69].mxu1  ;;  %v3433_v10 = vpop.f32.mrb[70].mxu0 }
 0x186   : > { %v3544_v12 = vadd.f32 %v3543_v4, %v3542_v61  ;;  %v3545_v13 = vpop.f32.mrb[70].mxu1  ;;  %v3434_v14 = vpop.f32.mrb[71].mxu0  ;;  %v2227_v61 = vmul.f32 %v4189_v59, %v4189_v59 }
 0x187   : > { %v1909_v49 = vadd.f32 %v3432_v2, %v4117_v7  ;;  %v3435_v15 = vadd.f32 %v3434_v14, %v3433_v10  ;;  %v3546_v16 = vpop.f32.mrb[71].mxu1 }
 0x188   : > { %v3547_v17 = vadd.f32 %v3546_v16, %v3545_v13 }
 0x189   : > { %v4192_v18 = vadd.f32 %v3544_v12, %v1909_v49  ;;  %v1912_v51 = vadd.f32 %v3435_v15, %v4119_v9 }
 0x18b   : > { %v4195_v20 = vadd.f32 %v3547_v17, %v1912_v51  ;;  %v3436_v24 = vpop.f32.mrb[72].mxu0  ;;  %v2228_v14 = vmul.f32 %v4192_v18, %v4192_v18 }
 0x18c   : > { %v3548_v28 = vpop.f32.mrb[72].mxu1  ;;  %v3437_v32 = vpop.f32.mrb[73].mxu0 }
 0x18d   : > { %v3438_v33 = vadd.f32 %v3437_v32, %v3436_v24  ;;  %v3549_v34 = vpop.f32.mrb[73].mxu1  ;;  %v3439_v35 = vpop.f32.mrb[74].mxu0 }
 0x18e   : > { %v3550_v36 = vadd.f32 %v3549_v34, %v3548_v28  ;;  %v3551_v38 = vpop.f32.mrb[74].mxu1  ;;  %v3440_v40 = vpop.f32.mrb[75].mxu0  ;;  %v2229_v34 = vmul.f32 %v4195_v20, %v4195_v20 }
 0x18f   : > { %v1917_v7 = vadd.f32 %v3438_v33, %v4125_v29  ;;  %v3441_v42 = vadd.f32 %v3440_v40, %v3439_v35  ;;  %v3552_v46 = vpop.f32.mrb[75].mxu1  ;;  %v2226_v29 = vmul.f32 %v4186_v56, %v4186_v56 }
 0x190   : > { %v3553_v47 = vadd.f32 %v3552_v46, %v3551_v38 }
 0x191   : > { %v4198_v48 = vadd.f32 %v3550_v36, %v1917_v7  ;;  %v1920_v9 = vadd.f32 %v3441_v42, %v4127_v31  ;;  %v2188_v31 = vadd.f32 %v4189_v59, %v4186_v56  ;;  %v2258_v51 = vadd.f32 %v2227_v61, %v2226_v29 }
 0x193   : > { %v4201_v50 = vadd.f32 %v3553_v47, %v1920_v9  ;;  %v3442_v52 = vpop.f32.mrb[76].mxu0  ;;  %v2189_v24 = vadd.f32 %v2188_v31, %v4192_v18  ;;  %v2259_v33 = vadd.f32 %v2258_v51, %v2228_v14  ;;  %v2230_v7 = vmul.f32 %v4198_v48, %v4198_v48 }
 0x194   : > { %v3554_v58 = vpop.f32.mrb[76].mxu1  ;;  %v3443_v60 = vpop.f32.mrb[77].mxu0 }
 0x195   : > { %v3444_v62 = vadd.f32 %v3443_v60, %v3442_v52  ;;  %v3555_v2 = vpop.f32.mrb[77].mxu1  ;;  %v3445_v4 = vpop.f32.mrb[78].mxu0 }
 0x196   : > { %v3556_v10 = vadd.f32 %v3555_v2, %v3554_v58  ;;  %v3557_v12 = vpop.f32.mrb[78].mxu1  ;;  %v3446_v13 = vpop.f32.mrb[79].mxu0  ;;  %v2260_v58 = vadd.f32 %v2259_v33, %v2229_v34 }
 0x197   : > { %v1925_v49 = vadd.f32 %v3444_v62, %v4133_v53  ;;  %v3447_v15 = vadd.f32 %v3446_v13, %v3445_v4  ;;  %v3558_v16 = vpop.f32.mrb[79].mxu1  ;;  %v2190_v53 = vadd.f32 %v2189_v24, %v4195_v20 }
 0x198   : > { %v3559_v17 = vadd.f32 %v3558_v16, %v3557_v12  ;;  %v2261_v29 = vadd.f32 %v2260_v58, %v2230_v7 }
 0x199   : > { %v4213_v28 = vadd.f32 %v3556_v10, %v1925_v49  ;;  %v1928_v32 = vadd.f32 %v3447_v15, %v4135_v55  ;;  %v2191_v60 = vadd.f32 %v2190_v53, %v4198_v48  ;;  %v2231_v10 = vmul.f32 %v4201_v50, %v4201_v50 }
 0x19b   : > { %v4218_v35 = vadd.f32 %v3559_v17, %v1928_v32  ;;  %v3448_v36 = vpop.f32.mrb[80].mxu0  ;;  %v2192_v31 = vadd.f32 %v2191_v60, %v4201_v50  ;;  %v2232_v14 = vmul.f32 %v4213_v28, %v4213_v28  ;;  %v2262_v17 = vadd.f32 %v2261_v29, %v2231_v10 }
 0x19c   : > { %v3560_v38 = vpop.f32.mrb[80].mxu1  ;;  %v3449_v40 = vpop.f32.mrb[81].mxu0 }
 0x19d   : > { %v3450_v42 = vadd.f32 %v3449_v40, %v3448_v36  ;;  %v3561_v46 = vpop.f32.mrb[81].mxu1  ;;  %v3451_v47 = vpop.f32.mrb[82].mxu0  ;;  %v2193_v51 = vadd.f32 %v2192_v31, %v4213_v28  ;;  %v2233_v40 = vmul.f32 %v4218_v35, %v4218_v35 }
 0x19e   : > { %v3562_v9 = vadd.f32 %v3561_v46, %v3560_v38  ;;  %v3563_v52 = vpop.f32.mrb[82].mxu1  ;;  %v3452_v55 = vpop.f32.mrb[83].mxu0 }
 0x19f   : > { %v1933_v61 = vadd.f32 %v3450_v42, %v4137_v5  ;;  %v3453_v62 = vadd.f32 %v3452_v55, %v3451_v47  ;;  %v3564_v2 = vpop.f32.mrb[83].mxu1  ;;  %v2194_v47 = vadd.f32 %v2193_v51, %v4218_v35 }
 0x1a0   : > { %v3565_v4 = vadd.f32 %v3564_v2, %v3563_v52 }
 0x1a1   : > { %v4227_v12 = vadd.f32 %v3562_v9, %v1933_v61  ;;  %v1936_v13 = vadd.f32 %v3453_v62, %v4139_v8  ;;  %v2263_v8 = vadd.f32 %v2262_v17, %v2232_v14 }
 0x1a3   : > { %v4233_v49 = vadd.f32 %v3565_v4, %v1936_v13  ;;  %v3454_v15 = vpop.f32.mrb[84].mxu0  ;;  %v2234_v9 = vmul.f32 %v4227_v12, %v4227_v12  ;;  %v2264_v58 = vadd.f32 %v2263_v8, %v2233_v40  ;;  %v2195_v60 = vadd.f32 %v2194_v47, %v4227_v12 }
 0x1a4   : > { %v3566_v5 = vpop.f32.mrb[84].mxu1  ;;  %v3455_v16 = vpop.f32.mrb[85].mxu0 }
 0x1a5   : > { %v3456_v24 = vadd.f32 %v3455_v16, %v3454_v15  ;;  %v3567_v32 = vpop.f32.mrb[85].mxu1  ;;  %v3457_v33 = vpop.f32.mrb[86].mxu0  ;;  %v2265_v4 = vadd.f32 %v2264_v58, %v2234_v9  ;;  %v2235_v29 = vmul.f32 %v4233_v49, %v4233_v49 }
 0x1a6   : > { %v3568_v34 = vadd.f32 %v3567_v32, %v3566_v5  ;;  %v3569_v36 = vpop.f32.mrb[86].mxu1  ;;  %v3458_v38 = vpop.f32.mrb[87].mxu0 }
 0x1a7   : > { %v1941_v53 = vadd.f32 %v3456_v24, %v4141_v21  ;;  %v3459_v7 = vadd.f32 %v3458_v38, %v3457_v33  ;;  %v3570_v42 = vpop.f32.mrb[87].mxu1  ;;  %v2266_v33 = vadd.f32 %v2265_v4, %v2235_v29 }
 0x1a8   : > { %v3571_v46 = vadd.f32 %v3570_v42, %v3569_v36 }
 0x1a9   : > { %v4242_v52 = vadd.f32 %v3568_v34, %v1941_v53  ;;  %v1944_v55 = vadd.f32 %v3459_v7, %v4143_v23  ;;  %v2196_v23 = vadd.f32 %v2195_v60, %v4233_v49 }
 0x1ab   : > { %v4246_v61 = vadd.f32 %v3571_v46, %v1944_v55  ;;  %v3460_v62 = vpop.f32.mrb[88].mxu0  ;;  %v2236_v16 = vmul.f32 %v4242_v52, %v4242_v52  ;;  %v2197_v34 = vadd.f32 %v2196_v23, %v4242_v52 }
 0x1ac   : > { %v3572_v2 = vpop.f32.mrb[88].mxu1  ;;  %v3461_v21 = vpop.f32.mrb[89].mxu0 }
 0x1ad   : > { %v3462_v10 = vadd.f32 %v3461_v21, %v3460_v62  ;;  %v3573_v13 = vpop.f32.mrb[89].mxu1  ;;  %v3463_v31 = vpop.f32.mrb[90].mxu0  ;;  %v2267_v8 = vadd.f32 %v2266_v33, %v2236_v16  ;;  %v2237_v40 = vmul.f32 %v4246_v61, %v4246_v61 }
 0x1ae   : > { %v3574_v14 = vadd.f32 %v3573_v13, %v3572_v2  ;;  %v3575_v15 = vpop.f32.mrb[90].mxu1  ;;  %v3464_v5 = vpop.f32.mrb[91].mxu0 }
 0x1af   : > { %v1949_v17 = vadd.f32 %v3462_v10, %v4145_v37  ;;  %v3465_v51 = vadd.f32 %v3464_v5, %v3463_v31  ;;  %v3576_v24 = vpop.f32.mrb[91].mxu1  ;;  %v2198_v37 = vadd.f32 %v2197_v34, %v4246_v61  ;;  %v2268_v2 = vadd.f32 %v2267_v8, %v2237_v40 }
 0x1b0   : > { %v3577_v32 = vadd.f32 %v3576_v24, %v3575_v15 }
 0x1b1   : > { %v4255_v36 = vadd.f32 %v3574_v14, %v1949_v17  ;;  %v1952_v38 = vadd.f32 %v3465_v51, %v4147_v39 }
 0x1b3   : > { %v4260_v53 = vadd.f32 %v3577_v32, %v1952_v38  ;;  %v3466_v7 = vpop.f32.mrb[92].mxu0  ;;  %v2238_v47 = vmul.f32 %v4255_v36, %v4255_v36  ;;  %v2199_v21 = vadd.f32 %v2198_v37, %v4255_v36 }
 0x1b4   : > { %v3578_v42 = vpop.f32.mrb[92].mxu1  ;;  %v3467_v46 = vpop.f32.mrb[93].mxu0 }
 0x1b5   : > { %v3468_v9 = vadd.f32 %v3467_v46, %v3466_v7  ;;  %v3579_v55 = vpop.f32.mrb[93].mxu1  ;;  %v3469_v58 = vpop.f32.mrb[94].mxu0  ;;  %v2269_v31 = vadd.f32 %v2268_v2, %v2238_v47  ;;  %v2239_v14 = vmul.f32 %v4260_v53, %v4260_v53  ;;  %v2200_v23 = vadd.f32 %v2199_v21, %v4260_v53 }
 0x1b6   : > { %v3580_v60 = vadd.f32 %v3579_v55, %v3578_v42  ;;  %v3581_v62 = vpop.f32.mrb[94].mxu1  ;;  %v3470_v39 = vpop.f32.mrb[95].mxu0 }
 0x1b7   : > { %v1957_v4 = vadd.f32 %v3468_v9, %v4149_v54  ;;  %v3471_v29 = vadd.f32 %v3470_v39, %v3469_v58  ;;  %v3582_v10 = vpop.f32.mrb[95].mxu1  ;;  %v2270_v32 = vadd.f32 %v2269_v31, %v2239_v14 }
 0x1b8   : > { %v3583_v13 = vadd.f32 %v3582_v10, %v3581_v62 }
 0x1b9   : > { %v4269_v15 = vadd.f32 %v3580_v60, %v1957_v4  ;;  %v1960_v5 = vadd.f32 %v3471_v29, %v4151_v57 }
 0x1bb   : > { %v2240_v16 = vmul.f32 %v4269_v15, %v4269_v15  ;;  %v4275_v17 = vadd.f32 %v3583_v13, %v1960_v5  ;;  %v3472_v51 = vpop.f32.mrb[96].mxu0  ;;  %v2201_v33 = vadd.f32 %v2200_v23, %v4269_v15 }
 0x1bc   : > { %v3584_v54 = vpop.f32.mrb[96].mxu1  ;;  %v3473_v24 = vpop.f32.mrb[97].mxu0 }
 0x1bd   : > { %v3474_v34 = vadd.f32 %v3473_v24, %v3472_v51  ;;  %v3585_v38 = vpop.f32.mrb[97].mxu1  ;;  %v3475_v8 = vpop.f32.mrb[98].mxu0  ;;  %v2271_v57 = vadd.f32 %v2270_v32, %v2240_v16  ;;  %v2241_v46 = vmul.f32 %v4275_v17, %v4275_v17  ;;  %v2202_v58 = vadd.f32 %v2201_v33, %v4275_v17 }
 0x1be   : > { %v3586_v40 = vadd.f32 %v3585_v38, %v3584_v54  ;;  %v3587_v7 = vpop.f32.mrb[98].mxu1  ;;  %v3476_v42 = vpop.f32.mrb[99].mxu0 }
 0x1bf   : > { %v1965_v37 = vadd.f32 %v3474_v34, %v4153_v6  ;;  %v3477_v47 = vadd.f32 %v3476_v42, %v3475_v8  ;;  %v3588_v9 = vpop.f32.mrb[99].mxu1  ;;  %v2272_v39 = vadd.f32 %v2271_v57, %v2241_v46 }
 0x1c0   : > { %v3589_v55 = vadd.f32 %v3588_v9, %v3587_v7 }
 0x1c1   : > { %v4282_v60 = vadd.f32 %v3586_v40, %v1965_v37  ;;  %v1968_v62 = vadd.f32 %v3477_v47, %v4155_v11 }
 0x1c3   : > { %v2203_v2 = vadd.f32 %v2202_v58, %v4282_v60  ;;  %v2242_v21 = vmul.f32 %v4282_v60, %v4282_v60  ;;  %v4288_v4 = vadd.f32 %v3589_v55, %v1968_v62  ;;  %v3478_v29 = vpop.f32.mrb[100].mxu0 }
 0x1c4   : > { %v3590_v10 = vpop.f32.mrb[100].mxu1  ;;  %v3479_v6 = vpop.f32.mrb[101].mxu0 }
 0x1c5   : > { %v2273_v13 = vadd.f32 %v2272_v39, %v2242_v21  ;;  %v2204_v31 = vadd.f32 %v2203_v2, %v4288_v4  ;;  %v2243_v14 = vmul.f32 %v4288_v4, %v4288_v4  ;;  %v3480_v5 = vadd.f32 %v3479_v6, %v3478_v29  ;;  %v3591_v23 = vpop.f32.mrb[101].mxu1  ;;  %v3481_v11 = vpop.f32.mrb[102].mxu0 }
 0x1c6   : > { %v3592_v16 = vadd.f32 %v3591_v23, %v3590_v10  ;;  %v3593_v51 = vpop.f32.mrb[102].mxu1  ;;  %v3482_v54 = vpop.f32.mrb[103].mxu0 }
 0x1c7   : > { %v2274_v24 = vadd.f32 %v2273_v13, %v2243_v14  ;;  %v1973_v32 = vadd.f32 %v3480_v5, %v4157_v25  ;;  %v3483_v33 = vadd.f32 %v3482_v54, %v3481_v11  ;;  %v3594_v34 = vpop.f32.mrb[103].mxu1 }
 0x1c8   : > { %v3595_v38 = vadd.f32 %v3594_v34, %v3593_v51 }
 0x1c9   : > { %v4294_v8 = vadd.f32 %v3592_v16, %v1973_v32  ;;  %v1976_v40 = vadd.f32 %v3483_v33, %v4159_v27 }
 0x1cb   : > { %v2205_v7 = vadd.f32 %v2204_v31, %v4294_v8  ;;  %v2244_v42 = vmul.f32 %v4294_v8, %v4294_v8  ;;  %v4300_v57 = vadd.f32 %v3595_v38, %v1976_v40  ;;  %v3484_v46 = vpop.f32.mrb[104].mxu0 }
 0x1cc   : > { %v3596_v37 = vpop.f32.mrb[104].mxu1  ;;  %v3485_v47 = vpop.f32.mrb[105].mxu0 }
 0x1cd   : > { %v2275_v9 = vadd.f32 %v2274_v24, %v2244_v42  ;;  %v2206_v25 = vadd.f32 %v2205_v7, %v4300_v57  ;;  %v2245_v55 = vmul.f32 %v4300_v57, %v4300_v57  ;;  %v3486_v58 = vadd.f32 %v3485_v47, %v3484_v46  ;;  %v3597_v62 = vpop.f32.mrb[105].mxu1  ;;  %v3487_v39 = vpop.f32.mrb[106].mxu0 }
 0x1ce   : > { %v3598_v27 = vadd.f32 %v3597_v62, %v3596_v37  ;;  %v3599_v2 = vpop.f32.mrb[106].mxu1  ;;  %v3488_v21 = vpop.f32.mrb[107].mxu0 }
 0x1cf   : > { %v2276_v29 = vadd.f32 %v2275_v9, %v2245_v55  ;;  %v1981_v10 = vadd.f32 %v3486_v58, %v4161_v43  ;;  %v3489_v6 = vadd.f32 %v3488_v21, %v3487_v39  ;;  %v3600_v13 = vpop.f32.mrb[107].mxu1 }
 0x1d0   : > { %v3601_v31 = vadd.f32 %v3600_v13, %v3599_v2 }
 0x1d1   : > { %v4306_v14 = vadd.f32 %v3598_v27, %v1981_v10  ;;  %v1984_v5 = vadd.f32 %v3489_v6, %v4163_v45 }
 0x1d3   : > { %v2207_v23 = vadd.f32 %v2206_v25, %v4306_v14  ;;  %v2246_v11 = vmul.f32 %v4306_v14, %v4306_v14  ;;  %v4312_v16 = vadd.f32 %v3601_v31, %v1984_v5  ;;  %v3490_v51 = vpop.f32.mrb[108].mxu0 }
 0x1d4   : > { %v3602_v54 = vpop.f32.mrb[108].mxu1  ;;  %v3491_v24 = vpop.f32.mrb[109].mxu0 }
 0x1d5   : > { %v2277_v32 = vadd.f32 %v2276_v29, %v2246_v11  ;;  %v2208_v43 = vadd.f32 %v2207_v23, %v4312_v16  ;;  %v2247_v33 = vmul.f32 %v4312_v16, %v4312_v16  ;;  %v3492_v34 = vadd.f32 %v3491_v24, %v3490_v51  ;;  %v3603_v38 = vpop.f32.mrb[109].mxu1  ;;  %v3493_v40 = vpop.f32.mrb[110].mxu0 }
 0x1d6   : > { %v3604_v45 = vadd.f32 %v3603_v38, %v3602_v54  ;;  %v3605_v7 = vpop.f32.mrb[110].mxu1  ;;  %v3494_v42 = vpop.f32.mrb[111].mxu0 }
 0x1d7   : > { %v2278_v46 = vadd.f32 %v2277_v32, %v2247_v33  ;;  %v1989_v37 = vadd.f32 %v3492_v34, %v4165_v63  ;;  %v3495_v47 = vadd.f32 %v3494_v42, %v3493_v40  ;;  %v3606_v9 = vpop.f32.mrb[111].mxu1 }
 0x1d8   : > { %v3607_v25 = vadd.f32 %v3606_v9, %v3605_v7 }
 0x1d9   : > { %v4318_v55 = vadd.f32 %v3604_v45, %v1989_v37  ;;  %v1992_v58 = vadd.f32 %v3495_v47, %v4167_v1 }
 0x1db   : > { %v2209_v62 = vadd.f32 %v2208_v43, %v4318_v55  ;;  %v2248_v39 = vmul.f32 %v4318_v55, %v4318_v55  ;;  %v4324_v27 = vadd.f32 %v3607_v25, %v1992_v58  ;;  %v3496_v2 = vpop.f32.mrb[112].mxu0 }
 0x1dc   : > { %v3608_v21 = vpop.f32.mrb[112].mxu1  ;;  %v3497_v29 = vpop.f32.mrb[113].mxu0 }
 0x1dd   : > { %v2279_v10 = vadd.f32 %v2278_v46, %v2248_v39  ;;  %v2210_v63 = vadd.f32 %v2209_v62, %v4324_v27  ;;  %v2249_v6 = vmul.f32 %v4324_v27, %v4324_v27  ;;  %v3498_v13 = vadd.f32 %v3497_v29, %v3496_v2  ;;  %v3609_v31 = vpop.f32.mrb[113].mxu1  ;;  %v3499_v5 = vpop.f32.mrb[114].mxu0 }
 0x1de   : > { %v3610_v1 = vadd.f32 %v3609_v31, %v3608_v21  ;;  %v3611_v23 = vpop.f32.mrb[114].mxu1  ;;  %v3500_v11 = vpop.f32.mrb[115].mxu0 }
 0x1df   : > { %v2280_v51 = vadd.f32 %v2279_v10, %v2249_v6  ;;  %v1997_v54 = vadd.f32 %v3498_v13, %v4169_v19  ;;  %v3501_v24 = vadd.f32 %v3500_v11, %v3499_v5  ;;  %v3612_v32 = vpop.f32.mrb[115].mxu1 }
 0x1e0   : > { %v3613_v43 = vadd.f32 %v3612_v32, %v3611_v23 }
 0x1e1   : > { %v4330_v33 = vadd.f32 %v3610_v1, %v1997_v54  ;;  %v2000_v34 = vadd.f32 %v3501_v24, %v4171_v22 }
 0x1e3   : > { %v2211_v38 = vadd.f32 %v2210_v63, %v4330_v33  ;;  %v2250_v40 = vmul.f32 %v4330_v33, %v4330_v33  ;;  %v4336_v45 = vadd.f32 %v3613_v43, %v2000_v34  ;;  %v3502_v7 = vpop.f32.mrb[116].mxu0 }
 0x1e4   : > { %v3614_v42 = vpop.f32.mrb[116].mxu1  ;;  %v3503_v46 = vpop.f32.mrb[117].mxu0 }
 0x1e5   : > { %v2281_v37 = vadd.f32 %v2280_v51, %v2250_v40  ;;  %v2212_v19 = vadd.f32 %v2211_v38, %v4336_v45  ;;  %v2251_v47 = vmul.f32 %v4336_v45, %v4336_v45  ;;  %v3504_v9 = vadd.f32 %v3503_v46, %v3502_v7  ;;  %v3615_v25 = vpop.f32.mrb[117].mxu1  ;;  %v3505_v58 = vpop.f32.mrb[118].mxu0 }
 0x1e6   : > { %v3616_v22 = vadd.f32 %v3615_v25, %v3614_v42  ;;  %v3617_v62 = vpop.f32.mrb[118].mxu1  ;;  %v3506_v39 = vpop.f32.mrb[119].mxu0 }
 0x1e7   : > { %v2282_v2 = vadd.f32 %v2281_v37, %v2251_v47  ;;  %v2005_v21 = vadd.f32 %v3504_v9, %v4173_v41  ;;  %v3507_v29 = vadd.f32 %v3506_v39, %v3505_v58  ;;  %v3618_v10 = vpop.f32.mrb[119].mxu1 }
 0x1e8   : > { %v3619_v63 = vadd.f32 %v3618_v10, %v3617_v62 }
 0x1e9   : > { %v4342_v6 = vadd.f32 %v3616_v22, %v2005_v21  ;;  %v2008_v13 = vadd.f32 %v3507_v29, %v4175_v44 }
 0x1eb   : > { %v2213_v31 = vadd.f32 %v2212_v19, %v4342_v6  ;;  %v2252_v5 = vmul.f32 %v4342_v6, %v4342_v6  ;;  %v4348_v1 = vadd.f32 %v3619_v63, %v2008_v13  ;;  %v3508_v23 = vpop.f32.mrb[120].mxu0 }
 0x1ec   : > { %v3620_v11 = vpop.f32.mrb[120].mxu1  ;;  %v3509_v51 = vpop.f32.mrb[121].mxu0 }
 0x1ed   : > { %v2283_v54 = vadd.f32 %v2282_v2, %v2252_v5  ;;  %v2214_v41 = vadd.f32 %v2213_v31, %v4348_v1  ;;  %v2253_v24 = vmul.f32 %v4348_v1, %v4348_v1  ;;  %v3510_v32 = vadd.f32 %v3509_v51, %v3508_v23  ;;  %v3621_v43 = vpop.f32.mrb[121].mxu1  ;;  %v3511_v34 = vpop.f32.mrb[122].mxu0 }
 0x1ee   : > { %v3622_v44 = vadd.f32 %v3621_v43, %v3620_v11  ;;  %v3623_v38 = vpop.f32.mrb[122].mxu1  ;;  %v3512_v40 = vpop.f32.mrb[123].mxu0 }
 0x1ef   : > { %v2284_v7 = vadd.f32 %v2283_v54, %v2253_v24  ;;  %v2013_v42 = vadd.f32 %v3510_v32, %v4177_v0  ;;  %v3513_v46 = vadd.f32 %v3512_v40, %v3511_v34  ;;  %v3624_v37 = vpop.f32.mrb[123].mxu1 }
 0x1f0   : > { %v3625_v19 = vadd.f32 %v3624_v37, %v3623_v38 }
 0x1f1   : > { %v4354_v47 = vadd.f32 %v3622_v44, %v2013_v42  ;;  %v2016_v9 = vadd.f32 %v3513_v46, %v4179_v3 }
 0x1f3   : > { %v2215_v25 = vadd.f32 %v2214_v41, %v4354_v47  ;;  %v2254_v58 = vmul.f32 %v4354_v47, %v4354_v47  ;;  %v4360_v22 = vadd.f32 %v3625_v19, %v2016_v9  ;;  %v3514_v62 = vpop.f32.mrb[124].mxu0 }
 0x1f4   : > { %v3626_v39 = vpop.f32.mrb[124].mxu1  ;;  %v3515_v2 = vpop.f32.mrb[125].mxu0 }
 0x1f5   : > { %v2285_v21 = vadd.f32 %v2284_v7, %v2254_v58  ;;  %v2216_v0 = vadd.f32 %v2215_v25, %v4360_v22  ;;  %v2255_v29 = vmul.f32 %v4360_v22, %v4360_v22  ;;  %v3516_v10 = vadd.f32 %v3515_v2, %v3514_v62  ;;  %v3627_v63 = vpop.f32.mrb[125].mxu1  ;;  %v3517_v13 = vpop.f32.mrb[126].mxu0 }
 0x1f6   : > { %v3628_v3 = vadd.f32 %v3627_v63, %v3626_v39  ;;  %v3629_v31 = vpop.f32.mrb[126].mxu1  ;;  %v3518_v5 = vpop.f32.mrb[127].mxu0 }
 0x1f7   : > { %v2286_v23 = vadd.f32 %v2285_v21, %v2255_v29  ;;  %v2021_v11 = vadd.f32 %v3516_v10, %v4181_v26  ;;  %v3519_v51 = vadd.f32 %v3518_v5, %v3517_v13  ;;  %v3630_v54 = vpop.f32.mrb[127].mxu1 }
 0x1f8   : > { %v3631_v41 = vadd.f32 %v3630_v54, %v3629_v31 }
 0x1f9   : > { %v4366_v24 = vadd.f32 %v3628_v3, %v2021_v11  ;;  %v2024_v32 = vadd.f32 %v3519_v51, %v4183_v30 }
 0x1fb   : > { %v2217_v43 = vadd.f32 %v2216_v0, %v4366_v24  ;;  %v2256_v34 = vmul.f32 %v4366_v24, %v4366_v24  ;;  %v4372_v44 = vadd.f32 %v3631_v41, %v2024_v32 }
 0x1fd   : > { %v2287_v38 = vadd.f32 %v2286_v23, %v2256_v34  ;;  %v2218_v40 = vadd.f32 %v2217_v43, %v4372_v44  ;;  %v2257_v26 = vmul.f32 %v4372_v44, %v4372_v44 }
 0x1ff   : > { %v2219_v7 = vrot.slane %v2218_v40, 4  ;;  %v2288_v42 = vadd.f32 %v2287_v38, %v2257_v26 }
 0x201   : > { %v2220_v46 = vadd.f32 %v2219_v7, %v2218_v40  ;;  %v2289_v37 = vrot.slane %v2288_v42, 4 }
 0x203   : > { %v2221_v19 = vrot.slane %v2220_v46, 2  ;;  %v2290_v9 = vadd.f32 %v2289_v37, %v2288_v42 }
 0x205   : > { %v2222_v30 = vadd.f32 %v2221_v19, %v2220_v46  ;;  %v2291_v25 = vrot.slane %v2290_v9, 2 }
 0x207   : > { %v2223_v58 = vrot.slane %v2222_v30, 1  ;;  %v2292_v62 = vadd.f32 %v2291_v25, %v2290_v9 }
 0x209   : > { %v2224_v39 = vadd.f32 %v2223_v58, %v2222_v30  ;;  %v2293_v2 = vrot.slane %v2292_v62, 1 }
 0x20b   : > { %v4377_v21 = vmul.f32 0.00390625, %v2224_v39  ;;  %v2294_v0 = vadd.f32 %v2293_v2, %v2292_v62 }
 0x20d   : > { %v2295_v29 = vmul.f32 0.00390625, %v2294_v0  ;;  %v2296_v10 = vmul.f32 %v4377_v21, %v4377_v21  ;;  %v2314_v13 = vsub.f32 %v4282_v60, %v4377_v21  ;;  %v2315_v3 = vsub.f32 %v4288_v4, %v4377_v21 }
 0x20e   : > { %v2316_v31 = vsub.f32 %v4294_v8, %v4377_v21  ;;  %v2317_v5 = vsub.f32 %v4300_v57, %v4377_v21  ;;  %v2318_v23 = vsub.f32 %v4306_v14, %v4377_v21  ;;  %v2319_v11 = vsub.f32 %v4312_v16, %v4377_v21 }
 0x20f   : > { %v2297_v63 = vsub.f32 %v2295_v29, %v2296_v10  ;;  %v2320_v51 = vsub.f32 %v4318_v55, %v4377_v21  ;;  %v2321_v60 = vsub.f32 %v4324_v27, %v4377_v21  ;;  %v2322_v4 = vsub.f32 %v4330_v33, %v4377_v21 }
 0x210   : > { %v2323_v8 = vsub.f32 %v4336_v45, %v4377_v21  ;;  %v2324_v57 = vsub.f32 %v4342_v6, %v4377_v21  ;;  %v2325_v14 = vsub.f32 %v4348_v1, %v4377_v21  ;;  %v2326_v16 = vsub.f32 %v4354_v47, %v4377_v21 }
 0x211   : > { %v2327_v55 = vsub.f32 %v4360_v22, %v4377_v21  ;;  %v2328_v27 = vsub.f32 %v4366_v24, %v4377_v21  ;;  %v2329_v33 = vsub.f32 %v4372_v44, %v4377_v21  ;;  %v2330_v54 = vadd.f32 1e-05, %v2297_v63 }
 0x212   : > { %v2298_v45 = vsub.f32 %v4186_v56, %v4377_v21  ;;  %v2299_v6 = vsub.f32 %v4189_v59, %v4377_v21  ;;  %v2300_v1 = vsub.f32 %v4192_v18, %v4377_v21  ;;  %v2301_v47 = vsub.f32 %v4195_v20, %v4377_v21 }
 0x213   : > { %3720 = vrsqrt.f32 %v2330_v54  ;;  %v2302_v22 = vsub.f32 %v4198_v48, %v4377_v21  ;;  %v2303_v41 = vsub.f32 %v4201_v50, %v4377_v21  ;;  %v2304_v24 = vsub.f32 %v4213_v28, %v4377_v21 }
 0x214   : > { %v2305_v56 = vsub.f32 %v4218_v35, %v4377_v21  ;;  %v2306_v59 = vsub.f32 %v4227_v12, %v4377_v21  ;;  %v2307_v18 = vsub.f32 %v4233_v49, %v4377_v21  ;;  %v2308_v20 = vsub.f32 %v4242_v52, %v4377_v21 }
 0x215   : > { %v2309_v48 = vsub.f32 %v4246_v61, %v4377_v21  ;;  %v2310_v50 = vsub.f32 %v4255_v36, %v4377_v21  ;;  %v2311_v28 = vsub.f32 %v4260_v53, %v4377_v21  ;;  %v2312_v35 = vsub.f32 %v4269_v15, %v4377_v21 }
 0x216   : > { %v2313_v12 = vsub.f32 %v4275_v17, %v4377_v21 }
 0x21d   : > { %v3721_v32 = vpop.eup %3720 }
 0x21e   : > { %v2332_v49 = vmul.f32 %v3721_v32, %v2298_v45  ;;  %v2333_v43 = vmul.f32 %v3721_v32, %v2299_v6  ;;  %v2334_v34 = vmul.f32 %v3721_v32, %v2300_v1  ;;  %v2335_v52 = vmul.f32 %v3721_v32, %v2301_v47  ;;  %v3019_v6 = vld [vmem:[%s4714_s2] ss:$0 sm:$0xff] }
 0x21f   : > { %v2336_v44 = vmul.f32 %v3721_v32, %v2302_v22  ;;  %v2337_v38 = vmul.f32 %v3721_v32, %v2303_v41  ;;  %v2338_v61 = vmul.f32 %v3721_v32, %v2304_v24  ;;  %v2339_v40 = vmul.f32 %v3721_v32, %v2305_v56 }
 0x220   : > { %v2340_v26 = vmul.f32 %v3721_v32, %v2306_v59  ;;  %v2341_v7 = vmul.f32 %v3721_v32, %v2307_v18  ;;  %v2342_v36 = vmul.f32 %v3721_v32, %v2308_v20  ;;  %v2343_v42 = vmul.f32 %v3721_v32, %v2309_v48  ;;  %v3020_v20 = vld [vmem:[%s4715_s3] ss:$0 sm:$0xff] }
 0x221   : > { %v2344_v46 = vmul.f32 %v3721_v32, %v2310_v50  ;;  %v2345_v53 = vmul.f32 %v3721_v32, %v2311_v28  ;;  %v2346_v37 = vmul.f32 %v3721_v32, %v2312_v35  ;;  %v2347_v19 = vmul.f32 %v3721_v32, %v2313_v12 }
 0x222   : > { %v2348_v15 = vmul.f32 %v3721_v32, %v2314_v13  ;;  %v2349_v9 = vmul.f32 %v3721_v32, %v2315_v3  ;;  %v2350_v30 = vmul.f32 %v3721_v32, %v2316_v31  ;;  %v2351_v17 = vmul.f32 %v3721_v32, %v2317_v5 }
 0x223   : > { %v2352_v25 = vmul.f32 %v3721_v32, %v2318_v23  ;;  %v2353_v58 = vmul.f32 %v3721_v32, %v2319_v11  ;;  %v2354_v62 = vmul.f32 %v3721_v32, %v2320_v51  ;;  %v2355_v39 = vmul.f32 %v3721_v32, %v2321_v60 }
 0x224   : > { %v2356_v2 = vmul.f32 %v3721_v32, %v2322_v4  ;;  %v2357_v21 = vmul.f32 %v3721_v32, %v2323_v8  ;;  %v2358_v0 = vmul.f32 %v3721_v32, %v2324_v57  ;;  %v2359_v29 = vmul.f32 %v3721_v32, %v2325_v14 }
 0x225   : > { %v2360_v10 = vmul.f32 %v3721_v32, %v2326_v16  ;;  %v2361_v63 = vmul.f32 %v3721_v32, %v2327_v55  ;;  %v2362_v54 = vmul.f32 %v3721_v32, %v2328_v27  ;;  %v2363_v45 = vmul.f32 %v3721_v32, %v2329_v33 }
 0x226   : > { %v2371_v13 = vmul.f32 %v3019_v6, %v2332_v49  ;;  %v2372_v3 = vmul.f32 %v3019_v6, %v2333_v43  ;;  %v2373_v31 = vmul.f32 %v3019_v6, %v2334_v34  ;;  %v2374_v5 = vmul.f32 %v3019_v6, %v2335_v52 }
 0x227   : > { %v2375_v23 = vmul.f32 %v3019_v6, %v2336_v44  ;;  %v2376_v11 = vmul.f32 %v3019_v6, %v2337_v38  ;;  %v2377_v51 = vmul.f32 %v3019_v6, %v2338_v61  ;;  %v2378_v60 = vmul.f32 %v3019_v6, %v2339_v40 }
 0x228   : > { %v2379_v4 = vmul.f32 %v3019_v6, %v2340_v26  ;;  %v2380_v8 = vmul.f32 %v3019_v6, %v2341_v7  ;;  %v2381_v57 = vmul.f32 %v3019_v6, %v2342_v36  ;;  %v2382_v14 = vmul.f32 %v3019_v6, %v2343_v42 }
 0x229   : > { %v2383_v16 = vmul.f32 %v3019_v6, %v2344_v46  ;;  %v2384_v55 = vmul.f32 %v3019_v6, %v2345_v53  ;;  %v2385_v27 = vmul.f32 %v3019_v6, %v2346_v37  ;;  %v2386_v33 = vmul.f32 %v3019_v6, %v2347_v19 }
 0x22a   : > { %v2387_v1 = vmul.f32 %v3019_v6, %v2348_v15  ;;  %v2388_v47 = vmul.f32 %v3019_v6, %v2349_v9  ;;  %v2389_v22 = vmul.f32 %v3019_v6, %v2350_v30  ;;  %v2390_v41 = vmul.f32 %v3019_v6, %v2351_v17 }
 0x22b   : > { %v2391_v24 = vmul.f32 %v3019_v6, %v2352_v25  ;;  %v2392_v56 = vmul.f32 %v3019_v6, %v2353_v58  ;;  %v2393_v59 = vmul.f32 %v3019_v6, %v2354_v62  ;;  %v2394_v18 = vmul.f32 %v3019_v6, %v2355_v39 }
 0x22c   : > { %v2395_v48 = vmul.f32 %v3019_v6, %v2356_v2  ;;  %v2396_v32 = vmul.f32 %v3019_v6, %v2357_v21  ;;  %v2397_v50 = vmul.f32 %v3019_v6, %v2358_v0  ;;  %v2398_v28 = vmul.f32 %v3019_v6, %v2359_v29 }
 0x22d   : > { %v2399_v35 = vmul.f32 %v3019_v6, %v2360_v10  ;;  %v2400_v12 = vmul.f32 %v3019_v6, %v2361_v63  ;;  %v2401_v49 = vmul.f32 %v3019_v6, %v2362_v54  ;;  %v2402_v43 = vmul.f32 %v3019_v6, %v2363_v45 }
 0x22e   : > { %v4451_v34 = vadd.f32 %v3020_v20, %v2371_v13  ;;  %v4453_v52 = vadd.f32 %v3020_v20, %v2372_v3  ;;  %v4455_v44 = vadd.f32 %v3020_v20, %v2373_v31  ;;  %v4457_v38 = vadd.f32 %v3020_v20, %v2374_v5 }
 0x22f   : > { %v4459_v61 = vadd.f32 %v3020_v20, %v2375_v23  ;;  %v4461_v40 = vadd.f32 %v3020_v20, %v2376_v11  ;;  %v4463_v26 = vadd.f32 %v3020_v20, %v2377_v51  ;;  %v4465_v7 = vadd.f32 %v3020_v20, %v2378_v60 }
 0x230   : > { %v4467_v36 = vadd.f32 %v3020_v20, %v2379_v4  ;;  %v4469_v42 = vadd.f32 %v3020_v20, %v2380_v8  ;;  %v4471_v46 = vadd.f32 %v3020_v20, %v2381_v57  ;;  %v4473_v53 = vadd.f32 %v3020_v20, %v2382_v14 }
 0x231   : > { %v4475_v37 = vadd.f32 %v3020_v20, %v2383_v16  ;;  %v4477_v19 = vadd.f32 %v3020_v20, %v2384_v55  ;;  %v4479_v15 = vadd.f32 %v3020_v20, %v2385_v27  ;;  %v4481_v9 = vadd.f32 %v3020_v20, %v2386_v33 }
 0x232   : > { %v4483_v30 = vadd.f32 %v3020_v20, %v2387_v1  ;;  %v4485_v17 = vadd.f32 %v3020_v20, %v2388_v47  ;;  %v4487_v25 = vadd.f32 %v3020_v20, %v2389_v22  ;;  %v4489_v58 = vadd.f32 %v3020_v20, %v2390_v41 }
 0x233   : > { %v4491_v62 = vadd.f32 %v3020_v20, %v2391_v24  ;;  %v4493_v39 = vadd.f32 %v3020_v20, %v2392_v56  ;;  %v4495_v2 = vadd.f32 %v3020_v20, %v2393_v59  ;;  %v4497_v21 = vadd.f32 %v3020_v20, %v2394_v18 }
 0x234   : > { %v4499_v0 = vadd.f32 %v3020_v20, %v2395_v48  ;;  %v4501_v29 = vadd.f32 %v3020_v20, %v2396_v32  ;;  %v4503_v10 = vadd.f32 %v3020_v20, %v2397_v50  ;;  %v4505_v63 = vadd.f32 %v3020_v20, %v2398_v28 }
 0x235   : > { %v4507_v54 = vadd.f32 %v3020_v20, %v2399_v35  ;;  %v4509_v45 = vadd.f32 %v3020_v20, %v2400_v12  ;;  %vm2442_vm0 = vcmp.ge.f32.partialorder %v4451_v34, 0.0  ;;  %vm2443_vm1 = vcmp.ge.f32.partialorder %v4453_v52, 0.0 }
 0x236   : > { %vm2444_vm2 = vcmp.ge.f32.partialorder %v4455_v44, 0.0  ;;  %vm2445_vm3 = vcmp.ge.f32.partialorder %v4457_v38, 0.0  ;;  %vm2446_vm4 = vcmp.ge.f32.partialorder %v4459_v61, 0.0  ;;  %vm2447_vm5 = vcmp.ge.f32.partialorder %v4461_v40, 0.0 }
 0x237   : > { %vm2448_vm6 = vcmp.ge.f32.partialorder %v4463_v26, 0.0  ;;  %vm2449_vm7 = vcmp.ge.f32.partialorder %v4465_v7, 0.0  ;;  %vm2450_vm8 = vcmp.ge.f32.partialorder %v4467_v36, 0.0  ;;  %v4521_v6 = vadd.f32 %v3020_v20, %v2401_v49 }
 0x238   : > { %v2474_v13 = vmul.f32 0.2, %v4451_v34  ;;  %v2475_v3 = vmul.f32 0.2, %v4453_v52  ;;  %v2476_v31 = vmul.f32 0.2, %v4455_v44  ;;  %v4530_v5 = vadd.f32 %v3020_v20, %v2402_v43 }
 0x239   : > { %vm2457_vm15 = vcmp.ge.f32.partialorder %v4481_v9, 0.0  ;;  %vm2458_vm10 = vcmp.ge.f32.partialorder %v4483_v30, 0.0  ;;  %v2477_v23 = vmul.f32 0.2, %v4457_v38  ;;  %v2478_v11 = vmul.f32 0.2, %v4459_v61 }
 0x23a   : > { %v2479_v51 = vmul.f32 0.2, %v4461_v40  ;;  %vm2463_vm14 = vcmp.ge.f32.partialorder %v4493_v39, 0.0  ;;  %v2480_v60 = vmul.f32 0.2, %v4463_v26  ;;  %v4549_v57 = vsel %vm2442_vm0, %v4451_v34, %v2474_v13 }
 0x23b   : > { %v2481_v4 = vmul.f32 0.2, %v4465_v7  ;;  %v2482_v8 = vmul.f32 0.2, %v4467_v36  ;;  %vm2467_vm9 = vcmp.ge.f32.partialorder %v4501_v29, 0.0  ;;  %v4561_v27 = vsel %vm2443_vm1, %v4453_v52, %v2475_v3 }
 0x23c   : > { %v2483_v14 = vmul.f32 0.2, %v4469_v42  ;;  %v2484_v16 = vmul.f32 0.2, %v4471_v46  ;;  %v2485_v55 = vmul.f32 0.2, %v4473_v53  ;;  %v2508_v22 = vsel %vm2444_vm2, %v4455_v44, %v2476_v31 }
 0x23d   : > { %vm2469_vm11 = vcmp.ge.f32.partialorder %v4505_v63, 0.0  ;;  %vm2470_vm13 = vcmp.ge.f32.partialorder %v4507_v54, 0.0  ;;  %vm2471_vm12 = vcmp.ge.f32.partialorder %v4509_v45, 0.0  ;;  %v2486_v33 = vmul.f32 0.2, %v4475_v37 }
 0x23e   : > { %v2487_v1 = vmul.f32 0.2, %v4477_v19  ;;  %v2488_v47 = vmul.f32 0.2, %v4479_v15  ;;  %vm2472_vm1 = vcmp.ge.f32.partialorder %v4521_v6, 0.0  ;;  %vm2473_vm0 = vcmp.ge.f32.partialorder %v4530_v5, 0.0 }
 0x23f   : > { %v2489_v41 = vmul.f32 0.2, %v4481_v9  ;;  %v2490_v24 = vmul.f32 0.2, %v4483_v30  ;;  %v2491_v56 = vmul.f32 0.2, %v4485_v17  ;;  %v2509_v59 = vsel %vm2445_vm3, %v4457_v38, %v2477_v23 }
 0x240   : > { %v2492_v18 = vmul.f32 0.2, %v4487_v25  ;;  %v2493_v20 = vmul.f32 0.2, %v4489_v58  ;;  %v2494_v48 = vmul.f32 0.2, %v4491_v62  ;;  %v2510_v32 = vsel %vm2446_vm4, %v4459_v61, %v2478_v11 }
 0x241   : > { %v2495_v50 = vmul.f32 0.2, %v4493_v39  ;;  %v2496_v28 = vmul.f32 0.2, %v4495_v2  ;;  %v2497_v35 = vmul.f32 0.2, %v4497_v21  ;;  %v2511_v12 = vsel %vm2447_vm5, %v4461_v40, %v2479_v51 }
 0x242   : > { %v2498_v49 = vmul.f32 0.2, %v4499_v0  ;;  %v2499_v43 = vmul.f32 0.2, %v4501_v29  ;;  %v2500_v34 = vmul.f32 0.2, %v4503_v10  ;;  %v2512_v52 = vsel %vm2448_vm6, %v4463_v26, %v2480_v60 }
 0x243   : > { %v2501_v44 = vmul.f32 0.2, %v4505_v63  ;;  %v2502_v38 = vmul.f32 0.2, %v4507_v54  ;;  %v2503_v61 = vmul.f32 0.2, %v4509_v45  ;;  %v2513_v40 = vsel %vm2449_vm7, %v4465_v7, %v2481_v4 }
 0x244   : > { %v2504_v13 = vmul.f32 0.2, %v4521_v6  ;;  %v2505_v3 = vmul.f32 0.2, %v4530_v5  ;;  %v2514_v31 = vsel %vm2450_vm8, %v4467_v36, %v2482_v8  ;;  %vm4717_vm2 = vcmp.ge.f32.partialorder %v4469_v42, 0.0 }
 0x245   : > { %v2515_v26 = vsel %vm4717_vm2, %v4469_v42, %v2483_v14  ;;  %vm4718_vm3 = vcmp.ge.f32.partialorder %v4471_v46, 0.0  ;;  %vm4719_vm4 = vcmp.ge.f32.partialorder %v4473_v53, 0.0  ;;  %vm4720_vm5 = vcmp.ge.f32.partialorder %v4475_v37, 0.0 }
 0x246   : > { %v2516_v23 = vsel %vm4718_vm3, %v4471_v46, %v2484_v16  ;;  %v2517_v7 = vsel %vm4719_vm4, %v4473_v53, %v2485_v55  ;;  %v2518_v11 = vsel %vm4720_vm5, %v4475_v37, %v2486_v33  ;;  %vm4721_vm6 = vcmp.ge.f32.partialorder %v4477_v19, 0.0 }
 0x247   : > { %v2519_v36 = vsel %vm4721_vm6, %v4477_v19, %v2487_v1  ;;  %vm4722_vm7 = vcmp.ge.f32.partialorder %v4479_v15, 0.0  ;;  %v2521_v46 = vsel %vm2457_vm15, %v4481_v9, %v2489_v41  ;;  %v2522_v53 = vsel %vm2458_vm10, %v4483_v30, %v2490_v24 }
 0x248   : > { %v2520_v42 = vsel %vm4722_vm7, %v4479_v15, %v2488_v47  ;;  %vm4723_vm8 = vcmp.ge.f32.partialorder %v4485_v17, 0.0  ;;  %vm4724_vm2 = vcmp.ge.f32.partialorder %v4487_v25, 0.0  ;;  %vm4725_vm3 = vcmp.ge.f32.partialorder %v4489_v58, 0.0 }
 0x249   : > { %v2523_v37 = vsel %vm4723_vm8, %v4485_v17, %v2491_v56  ;;  %v2524_v19 = vsel %vm4724_vm2, %v4487_v25, %v2492_v18  ;;  %v2525_v15 = vsel %vm4725_vm3, %v4489_v58, %v2493_v20  ;;  %vm4726_vm4 = vcmp.ge.f32.partialorder %v4491_v62, 0.0 }
 0x24a   : > { %v2526_v9 = vsel %vm4726_vm4, %v4491_v62, %v2494_v48  ;;  %v2527_v30 = vsel %vm2463_vm14, %v4493_v39, %v2495_v50  ;;  %vm4727_vm10 = vcmp.ge.f32.partialorder %v4495_v2, 0.0  ;;  %vm4728_vm15 = vcmp.ge.f32.partialorder %v4497_v21, 0.0 }
 0x24b   : > { %v2528_v17 = vsel %vm4727_vm10, %v4495_v2, %v2496_v28  ;;  %v2529_v25 = vsel %vm4728_vm15, %v4497_v21, %v2497_v35  ;;  %vm4729_vm5 = vcmp.ge.f32.partialorder %v4499_v0, 0.0  ;;  %v2531_v62 = vsel %vm2467_vm9, %v4501_v29, %v2499_v43 }
 0x24c   : > { %v2530_v58 = vsel %vm4729_vm5, %v4499_v0, %v2498_v49  ;;  %vm4730_vm14 = vcmp.ge.f32.partialorder %v4503_v10, 0.0  ;;  %v2533_v2 = vsel %vm2469_vm11, %v4505_v63, %v2501_v44  ;;  %v2534_v21 = vsel %vm2470_vm13, %v4507_v54, %v2502_v38 }
 0x24d   : > { %v2532_v39 = vsel %vm4730_vm14, %v4503_v10, %v2500_v34  ;;  %v2535_v0 = vsel %vm2471_vm12, %v4509_v45, %v2503_v61  ;;  %v2536_v29 = vsel %vm2472_vm1, %v4521_v6, %v2504_v13  ;;  %v2537_v10 = vsel %vm2473_vm0, %v4530_v5, %v2505_v3 }
 0x24e   : > { %v3092_v63 = vpack.c.bf16 %v4561_v27, %v4549_v57  ;;  %v3097_v54 = vpack.c.bf16 %v2509_v59, %v2508_v22  ;;  %v3102_v51 = vpack.c.bf16 %v2511_v12, %v2510_v32  ;;  %v3107_v60 = vpack.c.bf16 %v2513_v40, %v2512_v52 }
 0x24f   : > { %v3112_v4 = vpack.c.bf16 %v2515_v26, %v2514_v31  ;;  %v3117_v45 = vpack.c.bf16 %v2517_v7, %v2516_v23  ;;  %v3122_v6 = vpack.c.bf16 %v2519_v36, %v2518_v11  ;;  %v3127_v8 = vpack.c.bf16 %v2521_v46, %v2520_v42 }
 0x250   : > { %3093 = vst [vmem:[%s4665_s27] sm:$0xff] %v3092_v63   ;;  %3169 = vst [vmem:[%s4665_s27 + $0x8] sm:$0xff] %v3097_v54   ;;  %v3132_v14 = vpack.c.bf16 %v2523_v37, %v2522_v53  ;;  %v3137_v5 = vpack.c.bf16 %v2525_v15, %v2524_v19  ;;  %v3142_v57 = vpack.c.bf16 %v2527_v30, %v2526_v9 }
 0x251   : > { %3170 = vst [vmem:[%s4665_s27 + $0x10] sm:$0xff] %v3102_v51   ;;  %3171 = vst [vmem:[%s4665_s27 + $0x18] sm:$0xff] %v3107_v60   ;;  %v3147_v16 = vpack.c.bf16 %v2529_v25, %v2528_v17  ;;  %v3152_v55 = vpack.c.bf16 %v2531_v62, %v2530_v58  ;;  %v3157_v27 = vpack.c.bf16 %v2533_v2, %v2532_v39 }
 0x252   : > { %3172 = vst [vmem:[%s4665_s27 + $0x20] sm:$0xff] %v3112_v4   ;;  %3173 = vst [vmem:[%s4665_s27 + $0x28] sm:$0xff] %v3117_v45   ;;  %v3162_v33 = vpack.c.bf16 %v2535_v0, %v2534_v21  ;;  %v3167_v1 = vpack.c.bf16 %v2537_v10, %v2536_v29 }
 0x253   : > { %3174 = vst [vmem:[%s4665_s27 + $0x30] sm:$0xff] %v3122_v6   ;;  %3175 = vst [vmem:[%s4665_s27 + $0x38] sm:$0xff] %v3127_v8  }
 0x254   : > { %3176 = vst [vmem:[%s4665_s27 + $0x40] sm:$0xff] %v3132_v14   ;;  %3177 = vst [vmem:[%s4665_s27 + $0x48] sm:$0xff] %v3137_v5  }
 0x255   : > { %3178 = vst [vmem:[%s4665_s27 + $0x50] sm:$0xff] %v3142_v57   ;;  %3179 = vst [vmem:[%s4665_s27 + $0x58] sm:$0xff] %v3147_v16  }
 0x256   : > { %3180 = vst [vmem:[%s4665_s27 + $0x60] sm:$0xff] %v3152_v55   ;;  %3181 = vst [vmem:[%s4665_s27 + $0x68] sm:$0xff] %v3157_v27  }
 0x257   : > { %3182 = vst [vmem:[%s4665_s27 + $0x70] sm:$0xff] %v3162_v33   ;;  %3183 = vst [vmem:[%s4665_s27 + $0x78] sm:$0xff] %v3167_v1  }
 0x258 PF: > { %s14_s17 = sadd.s32 1, %s3744_s17   ;;  %s4731_s15 = smov %s3740_s16 }
 0x259   : > { %p11_p5 = scmp.ge.s32.totalorder %s14_s17, 4   ;;  %s4732_s16 = smov %s4734_s18 }
 0x25b   :  { %13 = sbr.rel (!%p11_p5) target bundleno = 2 (0x2), region = 75 }

// kernel: discriminator_forward.7
= control target key start
LH: loop header
LB: loop body
LE: loop exit
PB: predicated region body
PF: predicated region fallthrough
CT: control target
= control target key end

     0   :  { %s4389_s15 = smov 0   ;;  %s4391_s16 = smov 0   ;;  %s5260_s0 = inlined_call_operand.vmem [shape: bf16[2,56,2048], index: 0, kind: input, shape index: {}]   ;;  %s5261_s1 = inlined_call_operand.vmem [shape: bf16[2048,256], index: 1, kind: input, shape index: {}]   ;;  %s5262_s2 = inlined_call_operand.vmem [shape: f32[1,256], index: 2, kind: input, shape index: {}]   ;;  %s5263_s3 = inlined_call_operand.vmem [shape: f32[1,256], index: 3, kind: input, shape index: {}]   ;;  %s5264_s4 = inlined_call_operand.vmem [shape: bf16[2,56,256], index: 4, kind: output, shape index: {}]  }
   0x1   :  { %s4393_s17 = smov 0   ;;  %s4395_s18 = smov 0  }
   0x2   :  { %s4397_s19 = smov 0   ;;  %s4399_s20 = smov 0  }
   0x3   :  { %s4401_s21 = smov 0   ;;  %s4403_s22 = smov 0  }
   0x4   :  { %s4405_s23 = smov 0  }
   0x5 LB: > { %s3514_s24 = sadd.s32 4294967295, %s4362_s23   ;;  %s23_s25 = sadd.s32 1, %s4354_s21  ;;  %s4362_s23 = sphi %s4405_s23, %s14_s23   ;;  %s4358_s22 = sphi %s4403_s22, %s5273_s22   ;;  %s4354_s21 = sphi %s4401_s21, %s5272_s21   ;;  %s4350_s20 = sphi %s4399_s20, %s5271_s20   ;;  %s4346_s19 = sphi %s4397_s19, %s5270_s19   ;;  %s4342_s18 = sphi %s4395_s18, %s5269_s18   ;;  %s4338_s17 = sphi %s4393_s17, %s5268_s17   ;;  %s4334_s16 = sphi %s4391_s16, %s5267_s16   ;;  %s4330_s15 = sphi %s4389_s15, %s5266_s15  }
   0x6   : > { %p24_p0 = scmp.ge.s32.totalorder %s23_s25, 2  ;;  %s26_s26 = sadd.s32 1, %s4358_s22 }
   0x7   : > { %s59_s27 = sadd.s32 1, %s4342_s18  ;;  %p66_p1 = scmp.ne.s32.totalorder %s4342_s18, %s4338_s17 }
   0x8   : > { %s5275_s25 = smov (%p24_p0, %s23_s25), 0  ;;  %s5277_s26 = smov (!%p24_p0, %s26_s26), %s4358_s22 }
   0x9   : > { %s56_s28 = ssub.s32 %s4354_s21, %s5275_s25  ;;  %p67_p2 = scmp.eq.s32.totalorder %s4362_s23, 0 }
   0xa   : > { %p28_p3 = scmp.ge.s32.totalorder %s5277_s26, 2  ;;  %p57_p4 = scmp.eq.s32.totalorder %s56_s28, 0 }
   0xb   : > { %p68_p5 = por %p67_p2, %p66_p1  ;;  %s139_s29 = sadd.s32 1, %s4334_s16 }
   0xc   : > { %s5279_s26 = smov (%p28_p3, %s5277_s26), 0  ;;  %p149_p6 = scmp.ne.s32.totalorder %s4334_s16, %s4330_s15 }
   0xd   : > { %s4450_s30 = scalar_select %p57_p4, %s4342_s18, %s59_s27  }
   0xe   : > { %s134_s5 = ssub.s32 %s4358_s22, %s5279_s26  ;;  %p150_p7 = scmp.eq.s32.totalorder %s3514_s24, 3 }
   0xf   : > { %s136_s6 = sor.u32 %s134_s5, %s56_s28  ;;  %p3517_p10 = scmp.ge.s32.totalorder %s4362_s23, 4 }
  0x10   : > { %p137_p8 = scmp.eq.s32.totalorder %s136_s6, 0  ;;  %p4456_p9 = por %p150_p7, %p149_p6 }
  0x11   : > { %172 = sbr.rel (%p3517_p10) target bundleno = 198 (0xc6), region = 16 }
  0x12   : > { %s4461_s8 = scalar_select %p137_p8, %s4334_s16, %s139_s29  }
  0x18   : > { %183 = sbr.rel (!%p68_p5) target bundleno = 198 (0xc6), region = 24  ;;  %s185_s9 = sand.u32 (%p68_p5), 1, %s4342_s18  }
  0x19   : > { %s3519_s10 = sshll.u32 (%p68_p5), %s4354_s21, 2  ;;  %s3518_s11 = sshll.u32 (%p68_p5), %s185_s9, 10 }
  0x1a   : > { %s4469_s14 = scalar_lea.vmem (%p68_p5), %s5261_s1, %s3519_s10  ;;  %s4473_s24 = scalar_lea.vmem (%p68_p5), [#allocation2], %s3518_s11 }
  0x1b   : > { %v205_v0 = vld [vmem:[%s4469_s14] sm:$0xf] (%p68_p5)  ;;  %v207_v1 = vld [vmem:[%s4469_s14 + $0x8] sm:$0xf] (%p68_p5)  ;;  %v209_v2 = vld [vmem:[%s4469_s14 + $0x10] sm:$0xf] (%p68_p5) }
  0x1c   : > { %206 = vst [vmem:[%s4473_s24] sm:$0xf] (%p68_p5), %v205_v0  ;;  %208 = vst [vmem:[%s4473_s24 + $0x4] sm:$0xf] (%p68_p5), %v207_v1  ;;  %v211_v3 = vld [vmem:[%s4469_s14 + $0x18] sm:$0xf] (%p68_p5) }
  0x1d   : > { %v213_v4 = vld [vmem:[%s4469_s14 + $0x20] sm:$0xf] (%p68_p5)  ;;  %210 = vst [vmem:[%s4473_s24 + $0x8] sm:$0xf] (%p68_p5), %v209_v2  ;;  %212 = vst [vmem:[%s4473_s24 + $0xc] sm:$0xf] (%p68_p5), %v211_v3 }
  0x1e   : > { %214 = vst [vmem:[%s4473_s24 + $0x10] sm:$0xf] (%p68_p5), %v213_v4  ;;  %v215_v5 = vld [vmem:[%s4469_s14 + $0x28] sm:$0xf] (%p68_p5)  ;;  %v217_v6 = vld [vmem:[%s4469_s14 + $0x30] sm:$0xf] (%p68_p5) }
  0x1f   : > { %v219_v7 = vld [vmem:[%s4469_s14 + $0x38] sm:$0xf]  ;;  %216 = vst [vmem:[%s4473_s24 + $0x14] sm:$0xf] %v215_v5  ;;  %218 = vst [vmem:[%s4473_s24 + $0x18] sm:$0xf] %v217_v6 }
  0x20   : > { %220 = vst [vmem:[%s4473_s24 + $0x1c] sm:$0xf] %v219_v7  ;;  %v221_v8 = vld [vmem:[%s4469_s14 + $0x40] sm:$0xf]  ;;  %v223_v9 = vld [vmem:[%s4469_s14 + $0x48] sm:$0xf] }
  0x21   : > { %v225_v10 = vld [vmem:[%s4469_s14 + $0x50] sm:$0xf]  ;;  %222 = vst [vmem:[%s4473_s24 + $0x20] sm:$0xf] %v221_v8  ;;  %224 = vst [vmem:[%s4473_s24 + $0x24] sm:$0xf] %v223_v9 }
  0x22   : > { %226 = vst [vmem:[%s4473_s24 + $0x28] sm:$0xf] %v225_v10  ;;  %v227_v11 = vld [vmem:[%s4469_s14 + $0x58] sm:$0xf]  ;;  %v229_v12 = vld [vmem:[%s4469_s14 + $0x60] sm:$0xf] }
  0x23   : > { %v231_v13 = vld [vmem:[%s4469_s14 + $0x68] sm:$0xf]  ;;  %228 = vst [vmem:[%s4473_s24 + $0x2c] sm:$0xf] %v227_v11  ;;  %230 = vst [vmem:[%s4473_s24 + $0x30] sm:$0xf] %v229_v12 }
  0x24   : > { %232 = vst [vmem:[%s4473_s24 + $0x34] sm:$0xf] %v231_v13  ;;  %v233_v14 = vld [vmem:[%s4469_s14 + $0x70] sm:$0xf]  ;;  %v235_v15 = vld [vmem:[%s4469_s14 + $0x78] sm:$0xf] }
  0x25   : > { %v237_v16 = vld [vmem:[%s4469_s14 + $0x80] sm:$0xf]  ;;  %234 = vst [vmem:[%s4473_s24 + $0x38] sm:$0xf] %v233_v14  ;;  %236 = vst [vmem:[%s4473_s24 + $0x3c] sm:$0xf] %v235_v15 }
  0x26   : > { %238 = vst [vmem:[%s4473_s24 + $0x40] sm:$0xf] %v237_v16  ;;  %v239_v17 = vld [vmem:[%s4469_s14 + $0x88] sm:$0xf]  ;;  %v241_v18 = vld [vmem:[%s4469_s14 + $0x90] sm:$0xf] }
  0x27   : > { %v243_v19 = vld [vmem:[%s4469_s14 + $0x98] sm:$0xf]  ;;  %240 = vst [vmem:[%s4473_s24 + $0x44] sm:$0xf] %v239_v17  ;;  %242 = vst [vmem:[%s4473_s24 + $0x48] sm:$0xf] %v241_v18 }
  0x28   : > { %244 = vst [vmem:[%s4473_s24 + $0x4c] sm:$0xf] %v243_v19  ;;  %v245_v20 = vld [vmem:[%s4469_s14 + $0xa0] sm:$0xf]  ;;  %v247_v21 = vld [vmem:[%s4469_s14 + $0xa8] sm:$0xf] }
  0x29   : > { %v249_v22 = vld [vmem:[%s4469_s14 + $0xb0] sm:$0xf]  ;;  %246 = vst [vmem:[%s4473_s24 + $0x50] sm:$0xf] %v245_v20  ;;  %248 = vst [vmem:[%s4473_s24 + $0x54] sm:$0xf] %v247_v21 }
  0x2a   : > { %250 = vst [vmem:[%s4473_s24 + $0x58] sm:$0xf] %v249_v22  ;;  %v251_v23 = vld [vmem:[%s4469_s14 + $0xb8] sm:$0xf]  ;;  %v253_v24 = vld [vmem:[%s4469_s14 + $0xc0] sm:$0xf] }
  0x2b   : > { %v255_v25 = vld [vmem:[%s4469_s14 + $0xc8] sm:$0xf]  ;;  %252 = vst [vmem:[%s4473_s24 + $0x5c] sm:$0xf] %v251_v23  ;;  %254 = vst [vmem:[%s4473_s24 + $0x60] sm:$0xf] %v253_v24 }
  0x2c   : > { %256 = vst [vmem:[%s4473_s24 + $0x64] sm:$0xf] %v255_v25  ;;  %v257_v26 = vld [vmem:[%s4469_s14 + $0xd0] sm:$0xf]  ;;  %v259_v27 = vld [vmem:[%s4469_s14 + $0xd8] sm:$0xf] }
  0x2d   : > { %v261_v28 = vld [vmem:[%s4469_s14 + $0xe0] sm:$0xf]  ;;  %258 = vst [vmem:[%s4473_s24 + $0x68] sm:$0xf] %v257_v26  ;;  %260 = vst [vmem:[%s4473_s24 + $0x6c] sm:$0xf] %v259_v27 }
  0x2e   : > { %262 = vst [vmem:[%s4473_s24 + $0x70] sm:$0xf] %v261_v28  ;;  %v263_v29 = vld [vmem:[%s4469_s14 + $0xe8] sm:$0xf]  ;;  %v265_v30 = vld [vmem:[%s4469_s14 + $0xf0] sm:$0xf] }
  0x2f   : > { %v267_v31 = vld [vmem:[%s4469_s14 + $0xf8] sm:$0xf]  ;;  %264 = vst [vmem:[%s4473_s24 + $0x74] sm:$0xf] %v263_v29  ;;  %266 = vst [vmem:[%s4473_s24 + $0x78] sm:$0xf] %v265_v30 }
  0x30   : > { %268 = vst [vmem:[%s4473_s24 + $0x7c] sm:$0xf] %v267_v31  ;;  %v269_v32 = vld [vmem:[%s4469_s14 + $0x100] sm:$0xf]  ;;  %v271_v33 = vld [vmem:[%s4469_s14 + $0x108] sm:$0xf] }
  0x31   : > { %v273_v34 = vld [vmem:[%s4469_s14 + $0x110] sm:$0xf]  ;;  %270 = vst [vmem:[%s4473_s24 + $0x80] sm:$0xf] %v269_v32  ;;  %272 = vst [vmem:[%s4473_s24 + $0x84] sm:$0xf] %v271_v33 }
  0x32   : > { %274 = vst [vmem:[%s4473_s24 + $0x88] sm:$0xf] %v273_v34  ;;  %v275_v35 = vld [vmem:[%s4469_s14 + $0x118] sm:$0xf]  ;;  %v277_v36 = vld [vmem:[%s4469_s14 + $0x120] sm:$0xf] }
  0x33   : > { %v279_v37 = vld [vmem:[%s4469_s14 + $0x128] sm:$0xf]  ;;  %276 = vst [vmem:[%s4473_s24 + $0x8c] sm:$0xf] %v275_v35  ;;  %278 = vst [vmem:[%s4473_s24 + $0x90] sm:$0xf] %v277_v36 }
  0x34   : > { %280 = vst [vmem:[%s4473_s24 + $0x94] sm:$0xf] %v279_v37  ;;  %v281_v38 = vld [vmem:[%s4469_s14 + $0x130] sm:$0xf]  ;;  %v283_v39 = vld [vmem:[%s4469_s14 + $0x138] sm:$0xf] }
  0x35   : > { %v285_v40 = vld [vmem:[%s4469_s14 + $0x140] sm:$0xf]  ;;  %282 = vst [vmem:[%s4473_s24 + $0x98] sm:$0xf] %v281_v38  ;;  %284 = vst [vmem:[%s4473_s24 + $0x9c] sm:$0xf] %v283_v39 }
  0x36   : > { %286 = vst [vmem:[%s4473_s24 + $0xa0] sm:$0xf] %v285_v40  ;;  %v287_v41 = vld [vmem:[%s4469_s14 + $0x148] sm:$0xf]  ;;  %v289_v42 = vld [vmem:[%s4469_s14 + $0x150] sm:$0xf] }
  0x37   : > { %v291_v43 = vld [vmem:[%s4469_s14 + $0x158] sm:$0xf]  ;;  %288 = vst [vmem:[%s4473_s24 + $0xa4] sm:$0xf] %v287_v41  ;;  %290 = vst [vmem:[%s4473_s24 + $0xa8] sm:$0xf] %v289_v42 }
  0x38   : > { %292 = vst [vmem:[%s4473_s24 + $0xac] sm:$0xf] %v291_v43  ;;  %v293_v44 = vld [vmem:[%s4469_s14 + $0x160] sm:$0xf]  ;;  %v295_v45 = vld [vmem:[%s4469_s14 + $0x168] sm:$0xf] }
  0x39   : > { %v297_v46 = vld [vmem:[%s4469_s14 + $0x170] sm:$0xf]  ;;  %294 = vst [vmem:[%s4473_s24 + $0xb0] sm:$0xf] %v293_v44  ;;  %296 = vst [vmem:[%s4473_s24 + $0xb4] sm:$0xf] %v295_v45 }
  0x3a   : > { %298 = vst [vmem:[%s4473_s24 + $0xb8] sm:$0xf] %v297_v46  ;;  %v299_v47 = vld [vmem:[%s4469_s14 + $0x178] sm:$0xf]  ;;  %v301_v48 = vld [vmem:[%s4469_s14 + $0x180] sm:$0xf] }
  0x3b   : > { %v303_v49 = vld [vmem:[%s4469_s14 + $0x188] sm:$0xf]  ;;  %300 = vst [vmem:[%s4473_s24 + $0xbc] sm:$0xf] %v299_v47  ;;  %302 = vst [vmem:[%s4473_s24 + $0xc0] sm:$0xf] %v301_v48 }
  0x3c   : > { %304 = vst [vmem:[%s4473_s24 + $0xc4] sm:$0xf] %v303_v49  ;;  %v305_v50 = vld [vmem:[%s4469_s14 + $0x190] sm:$0xf]  ;;  %v307_v51 = vld [vmem:[%s4469_s14 + $0x198] sm:$0xf] }
  0x3d   : > { %v309_v52 = vld [vmem:[%s4469_s14 + $0x1a0] sm:$0xf]  ;;  %306 = vst [vmem:[%s4473_s24 + $0xc8] sm:$0xf] %v305_v50  ;;  %308 = vst [vmem:[%s4473_s24 + $0xcc] sm:$0xf] %v307_v51 }
  0x3e   : > { %310 = vst [vmem:[%s4473_s24 + $0xd0] sm:$0xf] %v309_v52  ;;  %v311_v53 = vld [vmem:[%s4469_s14 + $0x1a8] sm:$0xf]  ;;  %v313_v54 = vld [vmem:[%s4469_s14 + $0x1b0] sm:$0xf] }
  0x3f   : > { %v315_v55 = vld [vmem:[%s4469_s14 + $0x1b8] sm:$0xf]  ;;  %312 = vst [vmem:[%s4473_s24 + $0xd4] sm:$0xf] %v311_v53  ;;  %314 = vst [vmem:[%s4473_s24 + $0xd8] sm:$0xf] %v313_v54 }
  0x40   : > { %316 = vst [vmem:[%s4473_s24 + $0xdc] sm:$0xf] %v315_v55  ;;  %v317_v56 = vld [vmem:[%s4469_s14 + $0x1c0] sm:$0xf]  ;;  %v319_v57 = vld [vmem:[%s4469_s14 + $0x1c8] sm:$0xf] }
  0x41   : > { %v321_v58 = vld [vmem:[%s4469_s14 + $0x1d0] sm:$0xf]  ;;  %318 = vst [vmem:[%s4473_s24 + $0xe0] sm:$0xf] %v317_v56  ;;  %320 = vst [vmem:[%s4473_s24 + $0xe4] sm:$0xf] %v319_v57 }
  0x42   : > { %322 = vst [vmem:[%s4473_s24 + $0xe8] sm:$0xf] %v321_v58  ;;  %v323_v59 = vld [vmem:[%s4469_s14 + $0x1d8] sm:$0xf]  ;;  %v325_v60 = vld [vmem:[%s4469_s14 + $0x1e0] sm:$0xf] }
  0x43   : > { %v327_v61 = vld [vmem:[%s4469_s14 + $0x1e8] sm:$0xf]  ;;  %324 = vst [vmem:[%s4473_s24 + $0xec] sm:$0xf] %v323_v59  ;;  %326 = vst [vmem:[%s4473_s24 + $0xf0] sm:$0xf] %v325_v60 }
  0x44   : > { %328 = vst [vmem:[%s4473_s24 + $0xf4] sm:$0xf] %v327_v61  ;;  %v329_v62 = vld [vmem:[%s4469_s14 + $0x1f0] sm:$0xf]  ;;  %v331_v63 = vld [vmem:[%s4469_s14 + $0x1f8] sm:$0xf] }
  0x45   : > { %v333_v0 = vld [vmem:[%s4469_s14 + $0x200] sm:$0xf]  ;;  %330 = vst [vmem:[%s4473_s24 + $0xf8] sm:$0xf] %v329_v62  ;;  %332 = vst [vmem:[%s4473_s24 + $0xfc] sm:$0xf] %v331_v63 }
  0x46   : > { %334 = vst [vmem:[%s4473_s24 + $0x100] sm:$0xf] %v333_v0  ;;  %v335_v1 = vld [vmem:[%s4469_s14 + $0x208] sm:$0xf]  ;;  %v337_v2 = vld [vmem:[%s4469_s14 + $0x210] sm:$0xf] }
  0x47   : > { %v339_v3 = vld [vmem:[%s4469_s14 + $0x218] sm:$0xf]  ;;  %336 = vst [vmem:[%s4473_s24 + $0x104] sm:$0xf] %v335_v1  ;;  %338 = vst [vmem:[%s4473_s24 + $0x108] sm:$0xf] %v337_v2 }
  0x48   : > { %340 = vst [vmem:[%s4473_s24 + $0x10c] sm:$0xf] %v339_v3  ;;  %v341_v4 = vld [vmem:[%s4469_s14 + $0x220] sm:$0xf]  ;;  %v343_v5 = vld [vmem:[%s4469_s14 + $0x228] sm:$0xf] }
  0x49   : > { %v345_v6 = vld [vmem:[%s4469_s14 + $0x230] sm:$0xf]  ;;  %342 = vst [vmem:[%s4473_s24 + $0x110] sm:$0xf] %v341_v4  ;;  %344 = vst [vmem:[%s4473_s24 + $0x114] sm:$0xf] %v343_v5 }
  0x4a   : > { %346 = vst [vmem:[%s4473_s24 + $0x118] sm:$0xf] %v345_v6  ;;  %v347_v7 = vld [vmem:[%s4469_s14 + $0x238] sm:$0xf]  ;;  %v349_v8 = vld [vmem:[%s4469_s14 + $0x240] sm:$0xf] }
  0x4b   : > { %v351_v9 = vld [vmem:[%s4469_s14 + $0x248] sm:$0xf]  ;;  %348 = vst [vmem:[%s4473_s24 + $0x11c] sm:$0xf] %v347_v7  ;;  %350 = vst [vmem:[%s4473_s24 + $0x120] sm:$0xf] %v349_v8 }
  0x4c   : > { %352 = vst [vmem:[%s4473_s24 + $0x124] sm:$0xf] %v351_v9  ;;  %v353_v10 = vld [vmem:[%s4469_s14 + $0x250] sm:$0xf]  ;;  %v355_v11 = vld [vmem:[%s4469_s14 + $0x258] sm:$0xf] }
  0x4d   : > { %v357_v12 = vld [vmem:[%s4469_s14 + $0x260] sm:$0xf]  ;;  %354 = vst [vmem:[%s4473_s24 + $0x128] sm:$0xf] %v353_v10  ;;  %356 = vst [vmem:[%s4473_s24 + $0x12c] sm:$0xf] %v355_v11 }
  0x4e   : > { %358 = vst [vmem:[%s4473_s24 + $0x130] sm:$0xf] %v357_v12  ;;  %v359_v13 = vld [vmem:[%s4469_s14 + $0x268] sm:$0xf]  ;;  %v361_v14 = vld [vmem:[%s4469_s14 + $0x270] sm:$0xf] }
  0x4f   : > { %v363_v15 = vld [vmem:[%s4469_s14 + $0x278] sm:$0xf]  ;;  %360 = vst [vmem:[%s4473_s24 + $0x134] sm:$0xf] %v359_v13  ;;  %362 = vst [vmem:[%s4473_s24 + $0x138] sm:$0xf] %v361_v14 }
  0x50   : > { %364 = vst [vmem:[%s4473_s24 + $0x13c] sm:$0xf] %v363_v15  ;;  %v365_v16 = vld [vmem:[%s4469_s14 + $0x280] sm:$0xf]  ;;  %v367_v17 = vld [vmem:[%s4469_s14 + $0x288] sm:$0xf] }
  0x51   : > { %v369_v18 = vld [vmem:[%s4469_s14 + $0x290] sm:$0xf]  ;;  %366 = vst [vmem:[%s4473_s24 + $0x140] sm:$0xf] %v365_v16  ;;  %368 = vst [vmem:[%s4473_s24 + $0x144] sm:$0xf] %v367_v17 }
  0x52   : > { %370 = vst [vmem:[%s4473_s24 + $0x148] sm:$0xf] %v369_v18  ;;  %v371_v19 = vld [vmem:[%s4469_s14 + $0x298] sm:$0xf]  ;;  %v373_v20 = vld [vmem:[%s4469_s14 + $0x2a0] sm:$0xf] }
  0x53   : > { %v375_v21 = vld [vmem:[%s4469_s14 + $0x2a8] sm:$0xf]  ;;  %372 = vst [vmem:[%s4473_s24 + $0x14c] sm:$0xf] %v371_v19  ;;  %374 = vst [vmem:[%s4473_s24 + $0x150] sm:$0xf] %v373_v20 }
  0x54   : > { %376 = vst [vmem:[%s4473_s24 + $0x154] sm:$0xf] %v375_v21  ;;  %v377_v22 = vld [vmem:[%s4469_s14 + $0x2b0] sm:$0xf]  ;;  %v379_v23 = vld [vmem:[%s4469_s14 + $0x2b8] sm:$0xf] }
  0x55   : > { %v381_v24 = vld [vmem:[%s4469_s14 + $0x2c0] sm:$0xf]  ;;  %378 = vst [vmem:[%s4473_s24 + $0x158] sm:$0xf] %v377_v22  ;;  %380 = vst [vmem:[%s4473_s24 + $0x15c] sm:$0xf] %v379_v23 }
  0x56   : > { %382 = vst [vmem:[%s4473_s24 + $0x160] sm:$0xf] %v381_v24  ;;  %v383_v25 = vld [vmem:[%s4469_s14 + $0x2c8] sm:$0xf]  ;;  %v385_v26 = vld [vmem:[%s4469_s14 + $0x2d0] sm:$0xf] }
  0x57   : > { %v387_v27 = vld [vmem:[%s4469_s14 + $0x2d8] sm:$0xf]  ;;  %384 = vst [vmem:[%s4473_s24 + $0x164] sm:$0xf] %v383_v25  ;;  %386 = vst [vmem:[%s4473_s24 + $0x168] sm:$0xf] %v385_v26 }
  0x58   : > { %388 = vst [vmem:[%s4473_s24 + $0x16c] sm:$0xf] %v387_v27  ;;  %v389_v28 = vld [vmem:[%s4469_s14 + $0x2e0] sm:$0xf]  ;;  %v391_v29 = vld [vmem:[%s4469_s14 + $0x2e8] sm:$0xf] }
  0x59   : > { %v393_v30 = vld [vmem:[%s4469_s14 + $0x2f0] sm:$0xf]  ;;  %390 = vst [vmem:[%s4473_s24 + $0x170] sm:$0xf] %v389_v28  ;;  %392 = vst [vmem:[%s4473_s24 + $0x174] sm:$0xf] %v391_v29 }
  0x5a   : > { %394 = vst [vmem:[%s4473_s24 + $0x178] sm:$0xf] %v393_v30  ;;  %v395_v31 = vld [vmem:[%s4469_s14 + $0x2f8] sm:$0xf]  ;;  %v397_v32 = vld [vmem:[%s4469_s14 + $0x300] sm:$0xf] }
  0x5b   : > { %v399_v33 = vld [vmem:[%s4469_s14 + $0x308] sm:$0xf]  ;;  %396 = vst [vmem:[%s4473_s24 + $0x17c] sm:$0xf] %v395_v31  ;;  %398 = vst [vmem:[%s4473_s24 + $0x180] sm:$0xf] %v397_v32 }
  0x5c   : > { %400 = vst [vmem:[%s4473_s24 + $0x184] sm:$0xf] %v399_v33  ;;  %v401_v34 = vld [vmem:[%s4469_s14 + $0x310] sm:$0xf]  ;;  %v403_v35 = vld [vmem:[%s4469_s14 + $0x318] sm:$0xf] }
  0x5d   : > { %v405_v36 = vld [vmem:[%s4469_s14 + $0x320] sm:$0xf]  ;;  %402 = vst [vmem:[%s4473_s24 + $0x188] sm:$0xf] %v401_v34  ;;  %404 = vst [vmem:[%s4473_s24 + $0x18c] sm:$0xf] %v403_v35 }
  0x5e   : > { %406 = vst [vmem:[%s4473_s24 + $0x190] sm:$0xf] %v405_v36  ;;  %v407_v37 = vld [vmem:[%s4469_s14 + $0x328] sm:$0xf]  ;;  %v409_v38 = vld [vmem:[%s4469_s14 + $0x330] sm:$0xf] }
  0x5f   : > { %v411_v39 = vld [vmem:[%s4469_s14 + $0x338] sm:$0xf]  ;;  %408 = vst [vmem:[%s4473_s24 + $0x194] sm:$0xf] %v407_v37  ;;  %410 = vst [vmem:[%s4473_s24 + $0x198] sm:$0xf] %v409_v38 }
  0x60   : > { %412 = vst [vmem:[%s4473_s24 + $0x19c] sm:$0xf] %v411_v39  ;;  %v413_v40 = vld [vmem:[%s4469_s14 + $0x340] sm:$0xf]  ;;  %v415_v41 = vld [vmem:[%s4469_s14 + $0x348] sm:$0xf] }
  0x61   : > { %v417_v42 = vld [vmem:[%s4469_s14 + $0x350] sm:$0xf]  ;;  %414 = vst [vmem:[%s4473_s24 + $0x1a0] sm:$0xf] %v413_v40  ;;  %416 = vst [vmem:[%s4473_s24 + $0x1a4] sm:$0xf] %v415_v41 }
  0x62   : > { %418 = vst [vmem:[%s4473_s24 + $0x1a8] sm:$0xf] %v417_v42  ;;  %v419_v43 = vld [vmem:[%s4469_s14 + $0x358] sm:$0xf]  ;;  %v421_v44 = vld [vmem:[%s4469_s14 + $0x360] sm:$0xf] }
  0x63   : > { %v423_v45 = vld [vmem:[%s4469_s14 + $0x368] sm:$0xf]  ;;  %420 = vst [vmem:[%s4473_s24 + $0x1ac] sm:$0xf] %v419_v43  ;;  %422 = vst [vmem:[%s4473_s24 + $0x1b0] sm:$0xf] %v421_v44 }
  0x64   : > { %424 = vst [vmem:[%s4473_s24 + $0x1b4] sm:$0xf] %v423_v45  ;;  %v425_v46 = vld [vmem:[%s4469_s14 + $0x370] sm:$0xf]  ;;  %v427_v47 = vld [vmem:[%s4469_s14 + $0x378] sm:$0xf] }
  0x65   : > { %v429_v48 = vld [vmem:[%s4469_s14 + $0x380] sm:$0xf]  ;;  %426 = vst [vmem:[%s4473_s24 + $0x1b8] sm:$0xf] %v425_v46  ;;  %428 = vst [vmem:[%s4473_s24 + $0x1bc] sm:$0xf] %v427_v47 }
  0x66   : > { %430 = vst [vmem:[%s4473_s24 + $0x1c0] sm:$0xf] %v429_v48  ;;  %v431_v49 = vld [vmem:[%s4469_s14 + $0x388] sm:$0xf]  ;;  %v433_v50 = vld [vmem:[%s4469_s14 + $0x390] sm:$0xf] }
  0x67   : > { %v435_v51 = vld [vmem:[%s4469_s14 + $0x398] sm:$0xf]  ;;  %432 = vst [vmem:[%s4473_s24 + $0x1c4] sm:$0xf] %v431_v49  ;;  %434 = vst [vmem:[%s4473_s24 + $0x1c8] sm:$0xf] %v433_v50 }
  0x68   : > { %436 = vst [vmem:[%s4473_s24 + $0x1cc] sm:$0xf] %v435_v51  ;;  %v437_v52 = vld [vmem:[%s4469_s14 + $0x3a0] sm:$0xf]  ;;  %v439_v53 = vld [vmem:[%s4469_s14 + $0x3a8] sm:$0xf] }
  0x69   : > { %v441_v54 = vld [vmem:[%s4469_s14 + $0x3b0] sm:$0xf]  ;;  %438 = vst [vmem:[%s4473_s24 + $0x1d0] sm:$0xf] %v437_v52  ;;  %440 = vst [vmem:[%s4473_s24 + $0x1d4] sm:$0xf] %v439_v53 }
  0x6a   : > { %442 = vst [vmem:[%s4473_s24 + $0x1d8] sm:$0xf] %v441_v54  ;;  %v443_v55 = vld [vmem:[%s4469_s14 + $0x3b8] sm:$0xf]  ;;  %v445_v56 = vld [vmem:[%s4469_s14 + $0x3c0] sm:$0xf] }
  0x6b   : > { %v447_v57 = vld [vmem:[%s4469_s14 + $0x3c8] sm:$0xf]  ;;  %444 = vst [vmem:[%s4473_s24 + $0x1dc] sm:$0xf] %v443_v55  ;;  %446 = vst [vmem:[%s4473_s24 + $0x1e0] sm:$0xf] %v445_v56 }
  0x6c   : > { %448 = vst [vmem:[%s4473_s24 + $0x1e4] sm:$0xf] %v447_v57  ;;  %v449_v58 = vld [vmem:[%s4469_s14 + $0x3d0] sm:$0xf]  ;;  %v451_v59 = vld [vmem:[%s4469_s14 + $0x3d8] sm:$0xf] }
  0x6d   : > { %v453_v60 = vld [vmem:[%s4469_s14 + $0x3e0] sm:$0xf]  ;;  %450 = vst [vmem:[%s4473_s24 + $0x1e8] sm:$0xf] %v449_v58  ;;  %452 = vst [vmem:[%s4473_s24 + $0x1ec] sm:$0xf] %v451_v59 }
  0x6e   : > { %454 = vst [vmem:[%s4473_s24 + $0x1f0] sm:$0xf] %v453_v60  ;;  %v455_v61 = vld [vmem:[%s4469_s14 + $0x3e8] sm:$0xf]  ;;  %v457_v62 = vld [vmem:[%s4469_s14 + $0x3f0] sm:$0xf] }
  0x6f   : > { %v459_v63 = vld [vmem:[%s4469_s14 + $0x3f8] sm:$0xf]  ;;  %456 = vst [vmem:[%s4473_s24 + $0x1f4] sm:$0xf] %v455_v61  ;;  %458 = vst [vmem:[%s4473_s24 + $0x1f8] sm:$0xf] %v457_v62 }
  0x70   : > { %460 = vst [vmem:[%s4473_s24 + $0x1fc] sm:$0xf] %v459_v63  ;;  %v461_v0 = vld [vmem:[%s4469_s14 + $0x400] sm:$0xf]  ;;  %v463_v1 = vld [vmem:[%s4469_s14 + $0x408] sm:$0xf] }
  0x71   : > { %v465_v2 = vld [vmem:[%s4469_s14 + $0x410] sm:$0xf]  ;;  %462 = vst [vmem:[%s4473_s24 + $0x200] sm:$0xf] %v461_v0  ;;  %464 = vst [vmem:[%s4473_s24 + $0x204] sm:$0xf] %v463_v1 }
  0x72   : > { %466 = vst [vmem:[%s4473_s24 + $0x208] sm:$0xf] %v465_v2  ;;  %v467_v3 = vld [vmem:[%s4469_s14 + $0x418] sm:$0xf]  ;;  %v469_v4 = vld [vmem:[%s4469_s14 + $0x420] sm:$0xf] }
  0x73   : > { %v471_v5 = vld [vmem:[%s4469_s14 + $0x428] sm:$0xf]  ;;  %468 = vst [vmem:[%s4473_s24 + $0x20c] sm:$0xf] %v467_v3  ;;  %470 = vst [vmem:[%s4473_s24 + $0x210] sm:$0xf] %v469_v4 }
  0x74   : > { %472 = vst [vmem:[%s4473_s24 + $0x214] sm:$0xf] %v471_v5  ;;  %v473_v6 = vld [vmem:[%s4469_s14 + $0x430] sm:$0xf]  ;;  %v475_v7 = vld [vmem:[%s4469_s14 + $0x438] sm:$0xf] }
  0x75   : > { %v477_v8 = vld [vmem:[%s4469_s14 + $0x440] sm:$0xf]  ;;  %474 = vst [vmem:[%s4473_s24 + $0x218] sm:$0xf] %v473_v6  ;;  %476 = vst [vmem:[%s4473_s24 + $0x21c] sm:$0xf] %v475_v7 }
  0x76   : > { %478 = vst [vmem:[%s4473_s24 + $0x220] sm:$0xf] %v477_v8  ;;  %v479_v9 = vld [vmem:[%s4469_s14 + $0x448] sm:$0xf]  ;;  %v481_v10 = vld [vmem:[%s4469_s14 + $0x450] sm:$0xf] }
  0x77   : > { %v483_v11 = vld [vmem:[%s4469_s14 + $0x458] sm:$0xf]  ;;  %480 = vst [vmem:[%s4473_s24 + $0x224] sm:$0xf] %v479_v9  ;;  %482 = vst [vmem:[%s4473_s24 + $0x228] sm:$0xf] %v481_v10 }
  0x78   : > { %484 = vst [vmem:[%s4473_s24 + $0x22c] sm:$0xf] %v483_v11  ;;  %v485_v12 = vld [vmem:[%s4469_s14 + $0x460] sm:$0xf]  ;;  %v487_v13 = vld [vmem:[%s4469_s14 + $0x468] sm:$0xf] }
  0x79   : > { %v489_v14 = vld [vmem:[%s4469_s14 + $0x470] sm:$0xf]  ;;  %486 = vst [vmem:[%s4473_s24 + $0x230] sm:$0xf] %v485_v12  ;;  %488 = vst [vmem:[%s4473_s24 + $0x234] sm:$0xf] %v487_v13 }
  0x7a   : > { %490 = vst [vmem:[%s4473_s24 + $0x238] sm:$0xf] %v489_v14  ;;  %v491_v15 = vld [vmem:[%s4469_s14 + $0x478] sm:$0xf]  ;;  %v493_v16 = vld [vmem:[%s4469_s14 + $0x480] sm:$0xf] }
  0x7b   : > { %v495_v17 = vld [vmem:[%s4469_s14 + $0x488] sm:$0xf]  ;;  %492 = vst [vmem:[%s4473_s24 + $0x23c] sm:$0xf] %v491_v15  ;;  %494 = vst [vmem:[%s4473_s24 + $0x240] sm:$0xf] %v493_v16 }
  0x7c   : > { %496 = vst [vmem:[%s4473_s24 + $0x244] sm:$0xf] %v495_v17  ;;  %v497_v18 = vld [vmem:[%s4469_s14 + $0x490] sm:$0xf]  ;;  %v499_v19 = vld [vmem:[%s4469_s14 + $0x498] sm:$0xf] }
  0x7d   : > { %v501_v20 = vld [vmem:[%s4469_s14 + $0x4a0] sm:$0xf]  ;;  %498 = vst [vmem:[%s4473_s24 + $0x248] sm:$0xf] %v497_v18  ;;  %500 = vst [vmem:[%s4473_s24 + $0x24c] sm:$0xf] %v499_v19 }
  0x7e   : > { %502 = vst [vmem:[%s4473_s24 + $0x250] sm:$0xf] %v501_v20  ;;  %v503_v21 = vld [vmem:[%s4469_s14 + $0x4a8] sm:$0xf]  ;;  %v505_v22 = vld [vmem:[%s4469_s14 + $0x4b0] sm:$0xf] }
  0x7f   : > { %v507_v23 = vld [vmem:[%s4469_s14 + $0x4b8] sm:$0xf]  ;;  %504 = vst [vmem:[%s4473_s24 + $0x254] sm:$0xf] %v503_v21  ;;  %506 = vst [vmem:[%s4473_s24 + $0x258] sm:$0xf] %v505_v22 }
  0x80   : > { %508 = vst [vmem:[%s4473_s24 + $0x25c] sm:$0xf] %v507_v23  ;;  %v509_v24 = vld [vmem:[%s4469_s14 + $0x4c0] sm:$0xf]  ;;  %v511_v25 = vld [vmem:[%s4469_s14 + $0x4c8] sm:$0xf] }
  0x81   : > { %v513_v26 = vld [vmem:[%s4469_s14 + $0x4d0] sm:$0xf]  ;;  %510 = vst [vmem:[%s4473_s24 + $0x260] sm:$0xf] %v509_v24  ;;  %512 = vst [vmem:[%s4473_s24 + $0x264] sm:$0xf] %v511_v25 }
  0x82   : > { %514 = vst [vmem:[%s4473_s24 + $0x268] sm:$0xf] %v513_v26  ;;  %v515_v27 = vld [vmem:[%s4469_s14 + $0x4d8] sm:$0xf]  ;;  %v517_v28 = vld [vmem:[%s4469_s14 + $0x4e0] sm:$0xf] }
  0x83   : > { %v519_v29 = vld [vmem:[%s4469_s14 + $0x4e8] sm:$0xf]  ;;  %516 = vst [vmem:[%s4473_s24 + $0x26c] sm:$0xf] %v515_v27  ;;  %518 = vst [vmem:[%s4473_s24 + $0x270] sm:$0xf] %v517_v28 }
  0x84   : > { %520 = vst [vmem:[%s4473_s24 + $0x274] sm:$0xf] %v519_v29  ;;  %v521_v30 = vld [vmem:[%s4469_s14 + $0x4f0] sm:$0xf]  ;;  %v523_v31 = vld [vmem:[%s4469_s14 + $0x4f8] sm:$0xf] }
  0x85   : > { %v525_v32 = vld [vmem:[%s4469_s14 + $0x500] sm:$0xf]  ;;  %522 = vst [vmem:[%s4473_s24 + $0x278] sm:$0xf] %v521_v30  ;;  %524 = vst [vmem:[%s4473_s24 + $0x27c] sm:$0xf] %v523_v31 }
  0x86   : > { %526 = vst [vmem:[%s4473_s24 + $0x280] sm:$0xf] %v525_v32  ;;  %v527_v33 = vld [vmem:[%s4469_s14 + $0x508] sm:$0xf]  ;;  %v529_v34 = vld [vmem:[%s4469_s14 + $0x510] sm:$0xf] }
  0x87   : > { %v531_v35 = vld [vmem:[%s4469_s14 + $0x518] sm:$0xf]  ;;  %528 = vst [vmem:[%s4473_s24 + $0x284] sm:$0xf] %v527_v33  ;;  %530 = vst [vmem:[%s4473_s24 + $0x288] sm:$0xf] %v529_v34 }
  0x88   : > { %532 = vst [vmem:[%s4473_s24 + $0x28c] sm:$0xf] %v531_v35  ;;  %v533_v36 = vld [vmem:[%s4469_s14 + $0x520] sm:$0xf]  ;;  %v535_v37 = vld [vmem:[%s4469_s14 + $0x528] sm:$0xf] }
  0x89   : > { %v537_v38 = vld [vmem:[%s4469_s14 + $0x530] sm:$0xf]  ;;  %534 = vst [vmem:[%s4473_s24 + $0x290] sm:$0xf] %v533_v36  ;;  %536 = vst [vmem:[%s4473_s24 + $0x294] sm:$0xf] %v535_v37 }
  0x8a   : > { %538 = vst [vmem:[%s4473_s24 + $0x298] sm:$0xf] %v537_v38  ;;  %v539_v39 = vld [vmem:[%s4469_s14 + $0x538] sm:$0xf]  ;;  %v541_v40 = vld [vmem:[%s4469_s14 + $0x540] sm:$0xf] }
  0x8b   : > { %v543_v41 = vld [vmem:[%s4469_s14 + $0x548] sm:$0xf]  ;;  %540 = vst [vmem:[%s4473_s24 + $0x29c] sm:$0xf] %v539_v39  ;;  %542 = vst [vmem:[%s4473_s24 + $0x2a0] sm:$0xf] %v541_v40 }
  0x8c   : > { %544 = vst [vmem:[%s4473_s24 + $0x2a4] sm:$0xf] %v543_v41  ;;  %v545_v42 = vld [vmem:[%s4469_s14 + $0x550] sm:$0xf]  ;;  %v547_v43 = vld [vmem:[%s4469_s14 + $0x558] sm:$0xf] }
  0x8d   : > { %v549_v44 = vld [vmem:[%s4469_s14 + $0x560] sm:$0xf]  ;;  %546 = vst [vmem:[%s4473_s24 + $0x2a8] sm:$0xf] %v545_v42  ;;  %548 = vst [vmem:[%s4473_s24 + $0x2ac] sm:$0xf] %v547_v43 }
  0x8e   : > { %550 = vst [vmem:[%s4473_s24 + $0x2b0] sm:$0xf] %v549_v44  ;;  %v551_v45 = vld [vmem:[%s4469_s14 + $0x568] sm:$0xf]  ;;  %v553_v46 = vld [vmem:[%s4469_s14 + $0x570] sm:$0xf] }
  0x8f   : > { %v555_v47 = vld [vmem:[%s4469_s14 + $0x578] sm:$0xf]  ;;  %552 = vst [vmem:[%s4473_s24 + $0x2b4] sm:$0xf] %v551_v45  ;;  %554 = vst [vmem:[%s4473_s24 + $0x2b8] sm:$0xf] %v553_v46 }
  0x90   : > { %556 = vst [vmem:[%s4473_s24 + $0x2bc] sm:$0xf] %v555_v47  ;;  %v557_v48 = vld [vmem:[%s4469_s14 + $0x580] sm:$0xf]  ;;  %v559_v49 = vld [vmem:[%s4469_s14 + $0x588] sm:$0xf] }
  0x91   : > { %v561_v50 = vld [vmem:[%s4469_s14 + $0x590] sm:$0xf]  ;;  %558 = vst [vmem:[%s4473_s24 + $0x2c0] sm:$0xf] %v557_v48  ;;  %560 = vst [vmem:[%s4473_s24 + $0x2c4] sm:$0xf] %v559_v49 }
  0x92   : > { %562 = vst [vmem:[%s4473_s24 + $0x2c8] sm:$0xf] %v561_v50  ;;  %v563_v51 = vld [vmem:[%s4469_s14 + $0x598] sm:$0xf]  ;;  %v565_v52 = vld [vmem:[%s4469_s14 + $0x5a0] sm:$0xf] }
  0x93   : > { %v567_v53 = vld [vmem:[%s4469_s14 + $0x5a8] sm:$0xf]  ;;  %564 = vst [vmem:[%s4473_s24 + $0x2cc] sm:$0xf] %v563_v51  ;;  %566 = vst [vmem:[%s4473_s24 + $0x2d0] sm:$0xf] %v565_v52 }
  0x94   : > { %568 = vst [vmem:[%s4473_s24 + $0x2d4] sm:$0xf] %v567_v53  ;;  %v569_v54 = vld [vmem:[%s4469_s14 + $0x5b0] sm:$0xf]  ;;  %v571_v55 = vld [vmem:[%s4469_s14 + $0x5b8] sm:$0xf] }
  0x95   : > { %v573_v56 = vld [vmem:[%s4469_s14 + $0x5c0] sm:$0xf]  ;;  %570 = vst [vmem:[%s4473_s24 + $0x2d8] sm:$0xf] %v569_v54  ;;  %572 = vst [vmem:[%s4473_s24 + $0x2dc] sm:$0xf] %v571_v55 }
  0x96   : > { %574 = vst [vmem:[%s4473_s24 + $0x2e0] sm:$0xf] %v573_v56  ;;  %v575_v57 = vld [vmem:[%s4469_s14 + $0x5c8] sm:$0xf]  ;;  %v577_v58 = vld [vmem:[%s4469_s14 + $0x5d0] sm:$0xf] }
  0x97   : > { %v579_v59 = vld [vmem:[%s4469_s14 + $0x5d8] sm:$0xf]  ;;  %576 = vst [vmem:[%s4473_s24 + $0x2e4] sm:$0xf] %v575_v57  ;;  %578 = vst [vmem:[%s4473_s24 + $0x2e8] sm:$0xf] %v577_v58 }
  0x98   : > { %580 = vst [vmem:[%s4473_s24 + $0x2ec] sm:$0xf] %v579_v59  ;;  %v581_v60 = vld [vmem:[%s4469_s14 + $0x5e0] sm:$0xf]  ;;  %v583_v61 = vld [vmem:[%s4469_s14 + $0x5e8] sm:$0xf] }
  0x99   : > { %v585_v62 = vld [vmem:[%s4469_s14 + $0x5f0] sm:$0xf]  ;;  %582 = vst [vmem:[%s4473_s24 + $0x2f0] sm:$0xf] %v581_v60  ;;  %584 = vst [vmem:[%s4473_s24 + $0x2f4] sm:$0xf] %v583_v61 }
  0x9a   : > { %586 = vst [vmem:[%s4473_s24 + $0x2f8] sm:$0xf] %v585_v62  ;;  %v587_v63 = vld [vmem:[%s4469_s14 + $0x5f8] sm:$0xf]  ;;  %v589_v0 = vld [vmem:[%s4469_s14 + $0x600] sm:$0xf] }
  0x9b   : > { %v591_v1 = vld [vmem:[%s4469_s14 + $0x608] sm:$0xf]  ;;  %588 = vst [vmem:[%s4473_s24 + $0x2fc] sm:$0xf] %v587_v63  ;;  %590 = vst [vmem:[%s4473_s24 + $0x300] sm:$0xf] %v589_v0 }
  0x9c   : > { %592 = vst [vmem:[%s4473_s24 + $0x304] sm:$0xf] %v591_v1  ;;  %v593_v2 = vld [vmem:[%s4469_s14 + $0x610] sm:$0xf]  ;;  %v595_v3 = vld [vmem:[%s4469_s14 + $0x618] sm:$0xf] }
  0x9d   : > { %v597_v4 = vld [vmem:[%s4469_s14 + $0x620] sm:$0xf]  ;;  %594 = vst [vmem:[%s4473_s24 + $0x308] sm:$0xf] %v593_v2  ;;  %596 = vst [vmem:[%s4473_s24 + $0x30c] sm:$0xf] %v595_v3 }
  0x9e   : > { %598 = vst [vmem:[%s4473_s24 + $0x310] sm:$0xf] %v597_v4  ;;  %v599_v5 = vld [vmem:[%s4469_s14 + $0x628] sm:$0xf]  ;;  %v601_v6 = vld [vmem:[%s4469_s14 + $0x630] sm:$0xf] }
  0x9f   : > { %v603_v7 = vld [vmem:[%s4469_s14 + $0x638] sm:$0xf]  ;;  %600 = vst [vmem:[%s4473_s24 + $0x314] sm:$0xf] %v599_v5  ;;  %602 = vst [vmem:[%s4473_s24 + $0x318] sm:$0xf] %v601_v6 }
  0xa0   : > { %604 = vst [vmem:[%s4473_s24 + $0x31c] sm:$0xf] %v603_v7  ;;  %v605_v8 = vld [vmem:[%s4469_s14 + $0x640] sm:$0xf]  ;;  %v607_v9 = vld [vmem:[%s4469_s14 + $0x648] sm:$0xf] }
  0xa1   : > { %v609_v10 = vld [vmem:[%s4469_s14 + $0x650] sm:$0xf]  ;;  %606 = vst [vmem:[%s4473_s24 + $0x320] sm:$0xf] %v605_v8  ;;  %608 = vst [vmem:[%s4473_s24 + $0x324] sm:$0xf] %v607_v9 }
  0xa2   : > { %610 = vst [vmem:[%s4473_s24 + $0x328] sm:$0xf] %v609_v10  ;;  %v611_v11 = vld [vmem:[%s4469_s14 + $0x658] sm:$0xf]  ;;  %v613_v12 = vld [vmem:[%s4469_s14 + $0x660] sm:$0xf] }
  0xa3   : > { %v615_v13 = vld [vmem:[%s4469_s14 + $0x668] sm:$0xf]  ;;  %612 = vst [vmem:[%s4473_s24 + $0x32c] sm:$0xf] %v611_v11  ;;  %614 = vst [vmem:[%s4473_s24 + $0x330] sm:$0xf] %v613_v12 }
  0xa4   : > { %616 = vst [vmem:[%s4473_s24 + $0x334] sm:$0xf] %v615_v13  ;;  %v617_v14 = vld [vmem:[%s4469_s14 + $0x670] sm:$0xf]  ;;  %v619_v15 = vld [vmem:[%s4469_s14 + $0x678] sm:$0xf] }
  0xa5   : > { %v621_v16 = vld [vmem:[%s4469_s14 + $0x680] sm:$0xf]  ;;  %618 = vst [vmem:[%s4473_s24 + $0x338] sm:$0xf] %v617_v14  ;;  %620 = vst [vmem:[%s4473_s24 + $0x33c] sm:$0xf] %v619_v15 }
  0xa6   : > { %622 = vst [vmem:[%s4473_s24 + $0x340] sm:$0xf] %v621_v16  ;;  %v623_v17 = vld [vmem:[%s4469_s14 + $0x688] sm:$0xf]  ;;  %v625_v18 = vld [vmem:[%s4469_s14 + $0x690] sm:$0xf] }
  0xa7   : > { %v627_v19 = vld [vmem:[%s4469_s14 + $0x698] sm:$0xf]  ;;  %624 = vst [vmem:[%s4473_s24 + $0x344] sm:$0xf] %v623_v17  ;;  %626 = vst [vmem:[%s4473_s24 + $0x348] sm:$0xf] %v625_v18 }
  0xa8   : > { %628 = vst [vmem:[%s4473_s24 + $0x34c] sm:$0xf] %v627_v19  ;;  %v629_v20 = vld [vmem:[%s4469_s14 + $0x6a0] sm:$0xf]  ;;  %v631_v21 = vld [vmem:[%s4469_s14 + $0x6a8] sm:$0xf] }
  0xa9   : > { %v633_v22 = vld [vmem:[%s4469_s14 + $0x6b0] sm:$0xf]  ;;  %630 = vst [vmem:[%s4473_s24 + $0x350] sm:$0xf] %v629_v20  ;;  %632 = vst [vmem:[%s4473_s24 + $0x354] sm:$0xf] %v631_v21 }
  0xaa   : > { %634 = vst [vmem:[%s4473_s24 + $0x358] sm:$0xf] %v633_v22  ;;  %v635_v23 = vld [vmem:[%s4469_s14 + $0x6b8] sm:$0xf]  ;;  %v637_v24 = vld [vmem:[%s4469_s14 + $0x6c0] sm:$0xf] }
  0xab   : > { %v639_v25 = vld [vmem:[%s4469_s14 + $0x6c8] sm:$0xf]  ;;  %636 = vst [vmem:[%s4473_s24 + $0x35c] sm:$0xf] %v635_v23  ;;  %638 = vst [vmem:[%s4473_s24 + $0x360] sm:$0xf] %v637_v24 }
  0xac   : > { %640 = vst [vmem:[%s4473_s24 + $0x364] sm:$0xf] %v639_v25  ;;  %v641_v26 = vld [vmem:[%s4469_s14 + $0x6d0] sm:$0xf]  ;;  %v643_v27 = vld [vmem:[%s4469_s14 + $0x6d8] sm:$0xf] }
  0xad   : > { %v645_v28 = vld [vmem:[%s4469_s14 + $0x6e0] sm:$0xf]  ;;  %642 = vst [vmem:[%s4473_s24 + $0x368] sm:$0xf] %v641_v26  ;;  %644 = vst [vmem:[%s4473_s24 + $0x36c] sm:$0xf] %v643_v27 }
  0xae   : > { %646 = vst [vmem:[%s4473_s24 + $0x370] sm:$0xf] %v645_v28  ;;  %v647_v29 = vld [vmem:[%s4469_s14 + $0x6e8] sm:$0xf]  ;;  %v649_v30 = vld [vmem:[%s4469_s14 + $0x6f0] sm:$0xf] }
  0xaf   : > { %v651_v31 = vld [vmem:[%s4469_s14 + $0x6f8] sm:$0xf]  ;;  %648 = vst [vmem:[%s4473_s24 + $0x374] sm:$0xf] %v647_v29  ;;  %650 = vst [vmem:[%s4473_s24 + $0x378] sm:$0xf] %v649_v30 }
  0xb0   : > { %652 = vst [vmem:[%s4473_s24 + $0x37c] sm:$0xf] %v651_v31  ;;  %v653_v32 = vld [vmem:[%s4469_s14 + $0x700] sm:$0xf]  ;;  %v655_v33 = vld [vmem:[%s4469_s14 + $0x708] sm:$0xf] }
  0xb1   : > { %v657_v34 = vld [vmem:[%s4469_s14 + $0x710] sm:$0xf]  ;;  %654 = vst [vmem:[%s4473_s24 + $0x380] sm:$0xf] %v653_v32  ;;  %656 = vst [vmem:[%s4473_s24 + $0x384] sm:$0xf] %v655_v33 }
  0xb2   : > { %658 = vst [vmem:[%s4473_s24 + $0x388] sm:$0xf] %v657_v34  ;;  %v659_v35 = vld [vmem:[%s4469_s14 + $0x718] sm:$0xf]  ;;  %v661_v36 = vld [vmem:[%s4469_s14 + $0x720] sm:$0xf] }
  0xb3   : > { %v663_v37 = vld [vmem:[%s4469_s14 + $0x728] sm:$0xf]  ;;  %660 = vst [vmem:[%s4473_s24 + $0x38c] sm:$0xf] %v659_v35  ;;  %662 = vst [vmem:[%s4473_s24 + $0x390] sm:$0xf] %v661_v36 }
  0xb4   : > { %664 = vst [vmem:[%s4473_s24 + $0x394] sm:$0xf] %v663_v37  ;;  %v665_v38 = vld [vmem:[%s4469_s14 + $0x730] sm:$0xf]  ;;  %v667_v39 = vld [vmem:[%s4469_s14 + $0x738] sm:$0xf] }
  0xb5   : > { %v669_v40 = vld [vmem:[%s4469_s14 + $0x740] sm:$0xf]  ;;  %666 = vst [vmem:[%s4473_s24 + $0x398] sm:$0xf] %v665_v38  ;;  %668 = vst [vmem:[%s4473_s24 + $0x39c] sm:$0xf] %v667_v39 }
  0xb6   : > { %670 = vst [vmem:[%s4473_s24 + $0x3a0] sm:$0xf] %v669_v40  ;;  %v671_v41 = vld [vmem:[%s4469_s14 + $0x748] sm:$0xf]  ;;  %v673_v42 = vld [vmem:[%s4469_s14 + $0x750] sm:$0xf] }
  0xb7   : > { %v675_v43 = vld [vmem:[%s4469_s14 + $0x758] sm:$0xf]  ;;  %672 = vst [vmem:[%s4473_s24 + $0x3a4] sm:$0xf] %v671_v41  ;;  %674 = vst [vmem:[%s4473_s24 + $0x3a8] sm:$0xf] %v673_v42 }
  0xb8   : > { %676 = vst [vmem:[%s4473_s24 + $0x3ac] sm:$0xf] %v675_v43  ;;  %v677_v44 = vld [vmem:[%s4469_s14 + $0x760] sm:$0xf]  ;;  %v679_v45 = vld [vmem:[%s4469_s14 + $0x768] sm:$0xf] }
  0xb9   : > { %v681_v46 = vld [vmem:[%s4469_s14 + $0x770] sm:$0xf]  ;;  %678 = vst [vmem:[%s4473_s24 + $0x3b0] sm:$0xf] %v677_v44  ;;  %680 = vst [vmem:[%s4473_s24 + $0x3b4] sm:$0xf] %v679_v45 }
  0xba   : > { %682 = vst [vmem:[%s4473_s24 + $0x3b8] sm:$0xf] %v681_v46  ;;  %v683_v47 = vld [vmem:[%s4469_s14 + $0x778] sm:$0xf]  ;;  %v685_v48 = vld [vmem:[%s4469_s14 + $0x780] sm:$0xf] }
  0xbb   : > { %v687_v49 = vld [vmem:[%s4469_s14 + $0x788] sm:$0xf]  ;;  %684 = vst [vmem:[%s4473_s24 + $0x3bc] sm:$0xf] %v683_v47  ;;  %686 = vst [vmem:[%s4473_s24 + $0x3c0] sm:$0xf] %v685_v48 }
  0xbc   : > { %688 = vst [vmem:[%s4473_s24 + $0x3c4] sm:$0xf] %v687_v49  ;;  %v689_v50 = vld [vmem:[%s4469_s14 + $0x790] sm:$0xf]  ;;  %v691_v51 = vld [vmem:[%s4469_s14 + $0x798] sm:$0xf] }
  0xbd   : > { %v693_v52 = vld [vmem:[%s4469_s14 + $0x7a0] sm:$0xf]  ;;  %690 = vst [vmem:[%s4473_s24 + $0x3c8] sm:$0xf] %v689_v50  ;;  %692 = vst [vmem:[%s4473_s24 + $0x3cc] sm:$0xf] %v691_v51 }
  0xbe   : > { %694 = vst [vmem:[%s4473_s24 + $0x3d0] sm:$0xf] %v693_v52  ;;  %v695_v53 = vld [vmem:[%s4469_s14 + $0x7a8] sm:$0xf]  ;;  %v697_v54 = vld [vmem:[%s4469_s14 + $0x7b0] sm:$0xf] }
  0xbf   : > { %v699_v55 = vld [vmem:[%s4469_s14 + $0x7b8] sm:$0xf]  ;;  %696 = vst [vmem:[%s4473_s24 + $0x3d4] sm:$0xf] %v695_v53  ;;  %698 = vst [vmem:[%s4473_s24 + $0x3d8] sm:$0xf] %v697_v54 }
  0xc0   : > { %700 = vst [vmem:[%s4473_s24 + $0x3dc] sm:$0xf] %v699_v55  ;;  %v701_v56 = vld [vmem:[%s4469_s14 + $0x7c0] sm:$0xf]  ;;  %v703_v57 = vld [vmem:[%s4469_s14 + $0x7c8] sm:$0xf] }
  0xc1   : > { %v705_v58 = vld [vmem:[%s4469_s14 + $0x7d0] sm:$0xf]  ;;  %702 = vst [vmem:[%s4473_s24 + $0x3e0] sm:$0xf] %v701_v56  ;;  %704 = vst [vmem:[%s4473_s24 + $0x3e4] sm:$0xf] %v703_v57 }
  0xc2   : > { %706 = vst [vmem:[%s4473_s24 + $0x3e8] sm:$0xf] %v705_v58  ;;  %v707_v59 = vld [vmem:[%s4469_s14 + $0x7d8] sm:$0xf]  ;;  %v709_v60 = vld [vmem:[%s4469_s14 + $0x7e0] sm:$0xf] }
  0xc3   : > { %v711_v61 = vld [vmem:[%s4469_s14 + $0x7e8] sm:$0xf]  ;;  %708 = vst [vmem:[%s4473_s24 + $0x3ec] sm:$0xf] %v707_v59  ;;  %710 = vst [vmem:[%s4473_s24 + $0x3f0] sm:$0xf] %v709_v60 }
  0xc4   : > { %712 = vst [vmem:[%s4473_s24 + $0x3f4] sm:$0xf] %v711_v61  ;;  %v713_v62 = vld [vmem:[%s4469_s14 + $0x7f0] sm:$0xf]  ;;  %v715_v63 = vld [vmem:[%s4469_s14 + $0x7f8] sm:$0xf] }
  0xc5   : > { %714 = vst [vmem:[%s4473_s24 + $0x3f8] sm:$0xf] %v713_v62  ;;  %716 = vst [vmem:[%s4473_s24 + $0x3fc] sm:$0xf] %v715_v63 }
  0xc6 PF: > { %p3520_p11 = scmp.ge.s32.totalorder %s4362_s23, 1  ;;  %p1262_p12 = scmp.lt.s32.totalorder %s4362_s23, 5 }
  0xc8   : > { %p1263_p13 = pnand %p3520_p11, %p1262_p12 }
  0xc9   : > { %s1269_s27 = sand.u32 (!%p1263_p13), 1, %s4338_s17   ;;  %p1304_p0 = scmp.lt.s32.totalorder (!%p1263_p13), %s4350_s20, 1 }
  0xca   : > { %1266 = sbr.rel (%p1263_p13) target bundleno = 636 (0x27c), region = 73  ;;  %s3521_s28 = sshll.u32 (!%p1263_p13), %s1269_s27, 10 }
  0xcb   : > { %s4988_s29 = scalar_lea.vmem (!%p1263_p13), [#allocation2], %s3521_s28  ;;  %p1309_p1 = scmp.lt.s32.totalorder (!%p1263_p13), %s4346_s19, 1 }
  0xcc   : > { %v4146_v0 = vld [vmem:[%s4988_s29 + $0x40] sm:$0xff] (!%p1263_p13)   ;;  %v4150_v4 = vld [vmem:[%s4988_s29 + $0x48] sm:$0xff] (!%p1263_p13)   ;;  %v4154_v8 = vld [vmem:[%s4988_s29 + $0x50] sm:$0xff] (!%p1263_p13)  }
  0xcd   : > { %v4147_v1 = vld [vmem:[%s4988_s29 + $0xc0] sm:$0xff] (!%p1263_p13)   ;;  %3751 = vmatprep.subr.bf16.mxu0 (!%p1263_p13), %v4146_v0  ;;  %v4151_v5 = vld [vmem:[%s4988_s29 + $0xc8] sm:$0xff] (!%p1263_p13)   ;;  %v4155_v9 = vld [vmem:[%s4988_s29 + $0xd0] sm:$0xff] (!%p1263_p13)  }
  0xce   : > { %v4148_v2 = vld [vmem:[%s4988_s29] sm:$0xff] (!%p1263_p13)   ;;  %3791 = vmatprep.subr.bf16.mxu1 (!%p1263_p13), %v4147_v1  ;;  %v4152_v6 = vld [vmem:[%s4988_s29 + $0x8] sm:$0xff] (!%p1263_p13)   ;;  %v4156_v10 = vld [vmem:[%s4988_s29 + $0x10] sm:$0xff] (!%p1263_p13)  }
  0xcf   : > { %v4149_v3 = vld [vmem:[%s4988_s29 + $0x80] sm:$0xff] (!%p1263_p13)   ;;  %3752 = vmatpush3.bf16.msra.mxu0 (!%p1263_p13), %v4148_v2  ;;  %v4153_v7 = vld [vmem:[%s4988_s29 + $0x88] sm:$0xff] (!%p1263_p13)   ;;  %v4157_v11 = vld [vmem:[%s4988_s29 + $0x90] sm:$0xff] (!%p1263_p13)  }
  0xd0   : > { %3792 = vmatpush3.bf16.msra.mxu1 (!%p1263_p13), %v4149_v3  ;;  %3753 = vmatprep.subr.bf16.mxu0 (!%p1263_p13), %v4150_v4  ;;  %v4158_v12 = vld [vmem:[%s4988_s29 + $0x58] sm:$0xff] (!%p1263_p13)   ;;  %v4162_v16 = vld [vmem:[%s4988_s29 + $0x60] sm:$0xff] (!%p1263_p13)   ;;  %v4166_v20 = vld [vmem:[%s4988_s29 + $0x68] sm:$0xff] (!%p1263_p13)  }
  0xd1   : > { %3793 = vmatprep.subr.bf16.mxu1 %v4151_v5  ;;  %v4159_v13 = vld [vmem:[%s4988_s29 + $0xd8] sm:$0xff]   ;;  %v4163_v17 = vld [vmem:[%s4988_s29 + $0xe0] sm:$0xff]   ;;  %v4167_v21 = vld [vmem:[%s4988_s29 + $0xe8] sm:$0xff]   ;;  %s1305_s17 = scalar_select %p1304_p0, %s4350_s20, 1 }
  0xd2   : > { %v4160_v14 = vld [vmem:[%s4988_s29 + $0x18] sm:$0xff]   ;;  %v4164_v18 = vld [vmem:[%s4988_s29 + $0x20] sm:$0xff]   ;;  %v4168_v22 = vld [vmem:[%s4988_s29 + $0x28] sm:$0xff]   ;;  %s1310_s11 = scalar_select %p1309_p1, %s4346_s19, 1 }
  0xd3   : > { %3754 = vmatpush3.bf16.msra.mxu0 %v4152_v6  ;;  %v4161_v15 = vld [vmem:[%s4988_s29 + $0x98] sm:$0xff]   ;;  %v4165_v19 = vld [vmem:[%s4988_s29 + $0xa0] sm:$0xff]   ;;  %v4169_v23 = vld [vmem:[%s4988_s29 + $0xa8] sm:$0xff]   ;;  %s4072_s5 = smul.u32 448, %s1305_s17 }
  0xd4   : > { %3794 = vmatpush3.bf16.msra.mxu1 %v4153_v7  ;;  %3755 = vmatprep.subr.bf16.mxu0 %v4154_v8  ;;  %v4170_v24 = vld [vmem:[%s4988_s29 + $0x70] sm:$0xff]   ;;  %v4174_v28 = vld [vmem:[%s4988_s29 + $0x78] sm:$0xff]   ;;  %v4178_v40 = vld [vmem:[%s4988_s29 + $0x140] sm:$0xff]   ;;  %s1311_s14 = scalar_lea.vmem %s5262_s2, %s1310_s11  ;;  %s1314_s28 = scalar_lea.vmem %s5263_s3, %s1310_s11 }
  0xd5   : > { %3795 = vmatprep.subr.bf16.mxu1 %v4155_v9  ;;  %v4171_v25 = vld [vmem:[%s4988_s29 + $0xf0] sm:$0xff]   ;;  %v4175_v29 = vld [vmem:[%s4988_s29 + $0xf8] sm:$0xff]   ;;  %s5025_s10 = scalar_lea.vmem %s5260_s0, %s4072_s5  ;;  %v4179_v41 = vld [vmem:[%s4988_s29 + $0x1c0] sm:$0xff]   ;;  %s4073_s5 = smul.u32 (%p4456_p9), 14, %s4350_s20 }
  0xd6   : > { %v4172_v26 = vld [vmem:[%s4988_s29 + $0x30] sm:$0xff]   ;;  %v4176_v30 = vld [vmem:[%s4988_s29 + $0x38] sm:$0xff]   ;;  %v1316_v32 = vld [vmem:[%s5025_s10] sm:$0xff] }
  0xd7   : > { %3756 = vmatpush3.bf16.msra.mxu0 %v4156_v10  ;;  %v4173_v27 = vld [vmem:[%s4988_s29 + $0xb0] sm:$0xff]   ;;  %v4177_v31 = vld [vmem:[%s4988_s29 + $0xb8] sm:$0xff]   ;;  %v1324_v33 = vld [vmem:[%s5025_s10 + $0x40] sm:$0xff]  ;;  %s3348_s6 = sadd.s32 (%p4456_p9), %s4346_s19, %s4073_s5 }
  0xd8   : > { %3796 = vmatpush3.bf16.msra.mxu1 %v4157_v11  ;;  %3757 = vmatprep.subr.bf16.mxu0 %v4158_v12  ;;  %v1317_v34 = vld [vmem:[%s5025_s10 + $0x8] sm:$0xff]  ;;  %v3523_v35 = vcombine.low %v1316_v32, %v1324_v33  ;;  %v3524_v36 = vcombine.high %v1316_v32, %v1324_v33  ;;  %v4180_v42 = vld [vmem:[%s4988_s29 + $0x100] sm:$0xff]   ;;  %v4186_v56 = vld [vmem:[%s4988_s29 + $0x150] sm:$0xff]   ;;  %s3724_s9 = sshll.u32 (%p4456_p9), %s3348_s6, 2 }
  0xd9   : > { %3797 = vmatprep.subr.bf16.mxu1 %v4159_v13  ;;  %v1325_v37 = vld [vmem:[%s5025_s10 + $0x48] sm:$0xff]  ;;  %v4181_v43 = vld [vmem:[%s4988_s29 + $0x180] sm:$0xff]   ;;  %v4187_v57 = vld [vmem:[%s4988_s29 + $0x1d0] sm:$0xff]   ;;  %s3350_s12 = scalar_lea.vmem (%p4456_p9), %s5264_s4, %s3724_s9 }
  0xda   : > { %v3525_v38 = vcombine.low %v1317_v34, %v1325_v37  ;;  %v3526_v39 = vcombine.high %v1317_v34, %v1325_v37  ;;  %2724 = vmatprep.mubr.bf16.mxu0 %v3524_v36  ;;  %v4182_v44 = vld [vmem:[%s4988_s29 + $0x148] sm:$0xff]   ;;  %v1332_v48 = vld [vmem:[%s5025_s10 + $0x80] sm:$0xff]  ;;  %v4188_v58 = vld [vmem:[%s4988_s29 + $0x110] sm:$0xff]  }
  0xdb   : > { %3758 = vmatpush3.bf16.msra.mxu0 %v4160_v14  ;;  %v4183_v45 = vld [vmem:[%s4988_s29 + $0x1c8] sm:$0xff]   ;;  %v1340_v49 = vld [vmem:[%s5025_s10 + $0xc0] sm:$0xff]  ;;  %v4189_v59 = vld [vmem:[%s4988_s29 + $0x190] sm:$0xff]  }
  0xdc   : > { %3798 = vmatpush3.bf16.msra.mxu1 %v4161_v15  ;;  %3759 = vmatprep.subr.bf16.mxu0 %v4162_v16  ;;  %v4184_v46 = vld [vmem:[%s4988_s29 + $0x108] sm:$0xff]   ;;  %v3540_v50 = vcombine.high %v1332_v48, %v1340_v49  ;;  %v3539_v53 = vcombine.low %v1332_v48, %v1340_v49  ;;  %v4190_v60 = vld [vmem:[%s4988_s29 + $0x158] sm:$0xff]   ;;  %v1348_v0 = vld [vmem:[%s5025_s10 + $0x100] sm:$0xff] }
  0xdd   : > { %3799 = vmatprep.subr.bf16.mxu1 %v4163_v17  ;;  %2788 = vmatprep.mubr.bf16.mxu1 %v3526_v39  ;;  %v4185_v47 = vld [vmem:[%s4988_s29 + $0x188] sm:$0xff]   ;;  %v4191_v61 = vld [vmem:[%s4988_s29 + $0x1d8] sm:$0xff]   ;;  %v1356_v1 = vld [vmem:[%s5025_s10 + $0x140] sm:$0xff] }
  0xde   : > { %v1333_v51 = vld [vmem:[%s5025_s10 + $0x88] sm:$0xff]  ;;  %v4192_v62 = vld [vmem:[%s4988_s29 + $0x118] sm:$0xff]   ;;  %v3556_v4 = vcombine.high %v1348_v0, %v1356_v1  ;;  %v3555_v6 = vcombine.low %v1348_v0, %v1356_v1  ;;  %v4194_v8 = vld [vmem:[%s4988_s29 + $0x160] sm:$0xff]  }
  0xdf   : > { %3760 = vmatpush3.bf16.msra.mxu0 %v4164_v18  ;;  %v1341_v52 = vld [vmem:[%s5025_s10 + $0xc8] sm:$0xff]  ;;  %v4193_v63 = vld [vmem:[%s4988_s29 + $0x198] sm:$0xff]   ;;  %v4195_v9 = vld [vmem:[%s4988_s29 + $0x1e0] sm:$0xff]  }
  0xe0   : > { %3800 = vmatpush3.bf16.msra.mxu1 %v4165_v19  ;;  %3761 = vmatprep.subr.bf16.mxu0 %v4166_v20  ;;  %v3542_v54 = vcombine.high %v1333_v51, %v1341_v52  ;;  %v3541_v55 = vcombine.low %v1333_v51, %v1341_v52  ;;  %v1349_v2 = vld [vmem:[%s5025_s10 + $0x108] sm:$0xff]  ;;  %v4196_v10 = vld [vmem:[%s4988_s29 + $0x120] sm:$0xff]   ;;  %v1319_v32 = vld [vmem:[%s5025_s10 + $0x18] sm:$0xff] }
  0xe1   : > { %3801 = vmatprep.subr.bf16.mxu1 %v4167_v21  ;;  %v1357_v3 = vld [vmem:[%s5025_s10 + $0x148] sm:$0xff]  ;;  %v4197_v11 = vld [vmem:[%s4988_s29 + $0x1a0] sm:$0xff]   ;;  %v4206_v21 = vld [vmem:[%s4988_s29 + $0x170] sm:$0xff]  }
  0xe2   : > { %v3558_v5 = vcombine.high %v1349_v2, %v1357_v3  ;;  %v3557_v7 = vcombine.low %v1349_v2, %v1357_v3  ;;  %v4198_v12 = vld [vmem:[%s4988_s29 + $0x168] sm:$0xff]   ;;  %v1364_v16 = vld [vmem:[%s5025_s10 + $0x180] sm:$0xff]  ;;  %v1327_v33 = vld [vmem:[%s5025_s10 + $0x58] sm:$0xff] }
  0xe3   : > { %3762 = vmatpush3.bf16.msra.mxu0 %v4168_v22  ;;  %v4199_v13 = vld [vmem:[%s4988_s29 + $0x1e8] sm:$0xff]   ;;  %v3572_v18 = vcombine.high %v1364_v16, %v1364_v16  ;;  %v3571_v20 = vcombine.low %v1364_v16, %v1364_v16  ;;  %v3529_v36 = vcombine.low %v1319_v32, %v1327_v33  ;;  %v4214_v37 = vld [vmem:[%s4988_s29 + $0x240] sm:$0xff]   ;;  %v1335_v48 = vld [vmem:[%s5025_s10 + $0x98] sm:$0xff] }
  0xe4   : > { %3802 = vmatpush3.bf16.msra.mxu1 %v4169_v23  ;;  %3763 = vmatprep.subr.bf16.mxu0 %v4170_v24  ;;  %v4200_v14 = vld [vmem:[%s4988_s29 + $0x128] sm:$0xff]   ;;  %v4207_v23 = vld [vmem:[%s4988_s29 + $0x1f0] sm:$0xff]   ;;  %v4215_v39 = vld [vmem:[%s4988_s29 + $0x2c0] sm:$0xff]  }
  0xe5   : > { %3803 = vmatprep.subr.bf16.mxu1 %v4171_v25  ;;  %v4201_v15 = vld [vmem:[%s4988_s29 + $0x1a8] sm:$0xff]   ;;  %v4208_v24 = vld [vmem:[%s4988_s29 + $0x130] sm:$0xff]   ;;  %v1351_v1 = vld [vmem:[%s5025_s10 + $0x118] sm:$0xff] }
  0xe6   : > { %v1365_v17 = vld [vmem:[%s5025_s10 + $0x188] sm:$0xff]  ;;  %v4209_v25 = vld [vmem:[%s4988_s29 + $0x1b0] sm:$0xff]   ;;  %v1359_v2 = vld [vmem:[%s5025_s10 + $0x158] sm:$0xff] }
  0xe7   : > { %3764 = vmatpush3.bf16.msra.mxu0 %v4172_v26  ;;  %v3574_v19 = vcombine.high %v1365_v17, %v1365_v17  ;;  %v3573_v22 = vcombine.low %v1365_v17, %v1365_v17  ;;  %v4210_v26 = vld [vmem:[%s4988_s29 + $0x178] sm:$0xff]  }
  0xe8   : > { %3804 = vmatpush3.bf16.msra.mxu1 %v4173_v27  ;;  %3765 = vmatprep.subr.bf16.mxu0 %v4174_v28  ;;  %v4211_v27 = vld [vmem:[%s4988_s29 + $0x1f8] sm:$0xff]  }
  0xe9   : > { %3805 = vmatprep.subr.bf16.mxu1 %v4175_v29  ;;  %v4212_v28 = vld [vmem:[%s4988_s29 + $0x138] sm:$0xff]  }
  0xea   : > { %v4213_v29 = vld [vmem:[%s4988_s29 + $0x1b8] sm:$0xff]  }
  0xeb   : > { %3766 = vmatpush3.bf16.msra.mxu0 %v4176_v30  ;;  %v1318_v30 = vld [vmem:[%s5025_s10 + $0x10] sm:$0xff]  ;;  %v1367_v16 = vld [vmem:[%s5025_s10 + $0x198] sm:$0xff] }
  0xec   : > { %3806 = vmatpush3.bf16.msra.mxu1 %v4177_v31  ;;  %3831 = vmatprep.subr.bf16.mxu0 %v4178_v40  ;;  %v1326_v31 = vld [vmem:[%s5025_s10 + $0x50] sm:$0xff]  ;;  %v4216_v40 = vld [vmem:[%s4988_s29 + $0x200] sm:$0xff]  }
  0xed   : > { %3871 = vmatprep.subr.bf16.mxu1 %v4179_v41  ;;  %v3527_v34 = vcombine.low %v1318_v30, %v1326_v31  ;;  %v4217_v41 = vld [vmem:[%s4988_s29 + $0x280] sm:$0xff]  }
  0xee   : > { %2725 = vmatmul.mubr.bf16.vlgmr.msra.gmra.mrb[0].mxu0 %v3523_v35  ;;  %v3528_v35 = vcombine.high %v1318_v30, %v1326_v31 }
  0xef   : > { %2789 = vmatmul.mubr.bf16.vlgmr.msra.gmra.mrb[0].mxu1 %v3525_v38  ;;  %3832 = vmatpush3.bf16.msra.mxu0 %v4180_v42  ;;  %v3530_v38 = vcombine.high %v1319_v32, %v1327_v33  ;;  %v4218_v42 = vld [vmem:[%s4988_s29 + $0x248] sm:$0xff]  }
  0xf0   : > { %3872 = vmatpush3.bf16.msra.mxu1 %v4181_v43  ;;  %3833 = vmatprep.subr.bf16.mxu0 %v4182_v44  ;;  %v4219_v43 = vld [vmem:[%s4988_s29 + $0x2c8] sm:$0xff]  }
  0xf1   : > { %3873 = vmatprep.subr.bf16.mxu1 %v4183_v45  ;;  %2732 = vmatprep.mubr.bf16.mxu0 %v3540_v50  ;;  %v4220_v44 = vld [vmem:[%s4988_s29 + $0x208] sm:$0xff]   ;;  %v1343_v50 = vld [vmem:[%s5025_s10 + $0xd8] sm:$0xff] }
  0xf2   : > { %2796 = vmatprep.mubr.bf16.mxu1 %v3542_v54  ;;  %v4221_v45 = vld [vmem:[%s4988_s29 + $0x288] sm:$0xff]   ;;  %v3546_v52 = vcombine.high %v1335_v48, %v1343_v50  ;;  %v4222_v54 = vld [vmem:[%s4988_s29 + $0x250] sm:$0xff]  }
  0xf3   : > { %3834 = vmatpush3.bf16.msra.mxu0 %v4184_v46  ;;  %v1334_v46 = vld [vmem:[%s5025_s10 + $0x90] sm:$0xff]  ;;  %v1321_v32 = vld [vmem:[%s5025_s10 + $0x28] sm:$0xff] }
  0xf4   : > { %3874 = vmatpush3.bf16.msra.mxu1 %v4185_v47  ;;  %3835 = vmatprep.subr.bf16.mxu0 %v4186_v56  ;;  %v1342_v47 = vld [vmem:[%s5025_s10 + $0xd0] sm:$0xff]  ;;  %v1329_v33 = vld [vmem:[%s5025_s10 + $0x68] sm:$0xff] }
  0xf5   : > { %3875 = vmatprep.subr.bf16.mxu1 %v4187_v57  ;;  %v3544_v49 = vcombine.high %v1334_v46, %v1342_v47  ;;  %v3543_v51 = vcombine.low %v1334_v46, %v1342_v47  ;;  %v4224_v56 = vld [vmem:[%s4988_s29 + $0x210] sm:$0xff]   ;;  %v1337_v46 = vld [vmem:[%s5025_s10 + $0xa8] sm:$0xff] }
  0xf6   : > { %2733 = vmatmul.mubr.bf16.gmra.mrb[4].mxu0 %v3539_v53  ;;  %v3545_v53 = vcombine.low %v1335_v48, %v1343_v50  ;;  %v4225_v57 = vld [vmem:[%s4988_s29 + $0x290] sm:$0xff]   ;;  %v1345_v47 = vld [vmem:[%s5025_s10 + $0xe8] sm:$0xff] }
  0xf7   : > { %2797 = vmatmul.mubr.bf16.gmra.mrb[4].mxu1 %v3541_v55  ;;  %3836 = vmatpush3.bf16.msra.mxu0 %v4188_v58  ;;  %v4223_v55 = vld [vmem:[%s4988_s29 + $0x2d0] sm:$0xff]   ;;  %v4226_v58 = vld [vmem:[%s4988_s29 + $0x258] sm:$0xff]  }
  0xf8   : > { %3876 = vmatpush3.bf16.msra.mxu1 %v4189_v59  ;;  %3837 = vmatprep.subr.bf16.mxu0 %v4190_v60  ;;  %v4227_v59 = vld [vmem:[%s4988_s29 + $0x2d8] sm:$0xff]  }
  0xf9   : > { %3877 = vmatprep.subr.bf16.mxu1 %v4191_v61  ;;  %2740 = vmatprep.mubr.bf16.mxu0 %v3556_v4  ;;  %v4228_v60 = vld [vmem:[%s4988_s29 + $0x218] sm:$0xff]   ;;  %v3562_v4 = vcombine.high %v1351_v1, %v1359_v2 }
  0xfa   : > { %2804 = vmatprep.mubr.bf16.mxu1 %v3558_v5  ;;  %v4229_v61 = vld [vmem:[%s4988_s29 + $0x298] sm:$0xff]   ;;  %v3561_v5 = vcombine.low %v1351_v1, %v1359_v2 }
  0xfb   : > { %3838 = vmatpush3.bf16.msra.mxu0 %v4192_v62  ;;  %v1350_v62 = vld [vmem:[%s5025_s10 + $0x110] sm:$0xff] }
  0xfc   : > { %3878 = vmatpush3.bf16.msra.mxu1 %v4193_v63  ;;  %3839 = vmatprep.subr.bf16.mxu0 %v4194_v8  ;;  %v1358_v63 = vld [vmem:[%s5025_s10 + $0x150] sm:$0xff]  ;;  %v4232_v8 = vld [vmem:[%s4988_s29 + $0x220] sm:$0xff]  }
  0xfd   : > { %3879 = vmatprep.subr.bf16.mxu1 %v4195_v9  ;;  %v3560_v0 = vcombine.high %v1350_v62, %v1358_v63  ;;  %v3559_v3 = vcombine.low %v1350_v62, %v1358_v63  ;;  %v4233_v9 = vld [vmem:[%s4988_s29 + $0x2a0] sm:$0xff]   ;;  %v1353_v62 = vld [vmem:[%s5025_s10 + $0x128] sm:$0xff] }
  0xfe   : > { %2741 = vmatmul.mubr.bf16.gmra.mrb[8].mxu0 %v3555_v6  ;;  %v4230_v6 = vld [vmem:[%s4988_s29 + $0x260] sm:$0xff]  }
  0xff   : > { %2805 = vmatmul.mubr.bf16.gmra.mrb[8].mxu1 %v3557_v7  ;;  %3840 = vmatpush3.bf16.msra.mxu0 %v4196_v10  ;;  %v4231_v7 = vld [vmem:[%s4988_s29 + $0x2e0] sm:$0xff]   ;;  %v4234_v10 = vld [vmem:[%s4988_s29 + $0x268] sm:$0xff]  }
 0x100   : > { %3880 = vmatpush3.bf16.msra.mxu1 %v4197_v11  ;;  %3841 = vmatprep.subr.bf16.mxu0 %v4198_v12  ;;  %v4235_v11 = vld [vmem:[%s4988_s29 + $0x2e8] sm:$0xff]  }
 0x101   : > { %3881 = vmatprep.subr.bf16.mxu1 %v4199_v13  ;;  %2748 = vmatprep.mubr.bf16.mxu0 %v3572_v18  ;;  %v4236_v12 = vld [vmem:[%s4988_s29 + $0x228] sm:$0xff]   ;;  %v3578_v18 = vcombine.high %v1367_v16, %v1367_v16 }
 0x102   : > { %2812 = vmatprep.mubr.bf16.mxu1 %v3574_v19  ;;  %v4237_v13 = vld [vmem:[%s4988_s29 + $0x2a8] sm:$0xff]   ;;  %v3577_v19 = vcombine.low %v1367_v16, %v1367_v16 }
 0x103   : > { %3842 = vmatpush3.bf16.msra.mxu0 %v4200_v14  ;;  %v1366_v14 = vld [vmem:[%s5025_s10 + $0x190] sm:$0xff] }
 0x104   : > { %3882 = vmatpush3.bf16.msra.mxu1 %v4201_v15  ;;  %3843 = vmatprep.subr.bf16.mxu0 %v4206_v21  ;;  %v3576_v15 = vcombine.high %v1366_v14, %v1366_v14  ;;  %v3575_v17 = vcombine.low %v1366_v14, %v1366_v14  ;;  %v4243_v21 = vld [vmem:[%s4988_s29 + $0x2f0] sm:$0xff]  }
 0x105   : > { %3883 = vmatprep.subr.bf16.mxu1 %v4207_v23  ;;  %v4245_v23 = vld [vmem:[%s4988_s29 + $0x2b0] sm:$0xff]  }
 0x106   : > { %2749 = vmatmul.mubr.bf16.gmra.mrb[12].mxu0 %v3571_v20  ;;  %v4242_v20 = vld [vmem:[%s4988_s29 + $0x270] sm:$0xff]  }
 0x107   : > { %2813 = vmatmul.mubr.bf16.gmra.mrb[12].mxu1 %v3573_v22  ;;  %3844 = vmatpush3.bf16.msra.mxu0 %v4208_v24  ;;  %v4244_v22 = vld [vmem:[%s4988_s29 + $0x230] sm:$0xff]   ;;  %v4246_v24 = vld [vmem:[%s4988_s29 + $0x278] sm:$0xff]  }
 0x108   : > { %3884 = vmatpush3.bf16.msra.mxu1 %v4209_v25  ;;  %3845 = vmatprep.subr.bf16.mxu0 %v4210_v26  ;;  %v4247_v25 = vld [vmem:[%s4988_s29 + $0x2f8] sm:$0xff]  }
 0x109   : > { %3885 = vmatprep.subr.bf16.mxu1 %v4211_v27  ;;  %2852 = vmatprep.mubr.bf16.mxu0 %v3528_v35  ;;  %v4248_v26 = vld [vmem:[%s4988_s29 + $0x238] sm:$0xff]   ;;  %v3534_v35 = vcombine.high %v1321_v32, %v1329_v33 }
 0x10a   : > { %2916 = vmatprep.mubr.bf16.mxu1 %v3530_v38  ;;  %v4249_v27 = vld [vmem:[%s4988_s29 + $0x2b8] sm:$0xff]   ;;  %v4252_v38 = vld [vmem:[%s4988_s29 + $0x300] sm:$0xff]  }
 0x10b   : > { %3846 = vmatpush3.bf16.msra.mxu0 %v4212_v28  ;;  %v1320_v28 = vld [vmem:[%s5025_s10 + $0x20] sm:$0xff] }
 0x10c   : > { %3886 = vmatpush3.bf16.msra.mxu1 %v4213_v29  ;;  %3911 = vmatprep.subr.bf16.mxu0 %v4214_v37  ;;  %v1328_v29 = vld [vmem:[%s5025_s10 + $0x60] sm:$0xff] }
 0x10d   : > { %3951 = vmatprep.subr.bf16.mxu1 %v4215_v39  ;;  %v3531_v30 = vcombine.low %v1320_v28, %v1328_v29  ;;  %v3532_v31 = vcombine.high %v1320_v28, %v1328_v29  ;;  %v4251_v37 = vld [vmem:[%s4988_s29 + $0x3c0] sm:$0xff]   ;;  %v1323_v28 = vld [vmem:[%s5025_s10 + $0x38] sm:$0xff] }
 0x10e   : > { %2853 = vmatmul.mubr.bf16.vlgmr.msra.gmra.mrb[16].mxu0 %v3527_v34  ;;  %v3533_v34 = vcombine.low %v1321_v32, %v1329_v33  ;;  %v4253_v39 = vld [vmem:[%s4988_s29 + $0x380] sm:$0xff]   ;;  %v1338_v32 = vld [vmem:[%s5025_s10 + $0xb0] sm:$0xff] }
 0x10f   : > { %2917 = vmatmul.mubr.bf16.vlgmr.msra.gmra.mrb[16].mxu1 %v3529_v36  ;;  %3912 = vmatpush3.bf16.msra.mxu0 %v4216_v40  ;;  %v4250_v36 = vld [vmem:[%s4988_s29 + $0x340] sm:$0xff]   ;;  %v4254_v40 = vld [vmem:[%s4988_s29 + $0x348] sm:$0xff]   ;;  %v1346_v33 = vld [vmem:[%s5025_s10 + $0xf0] sm:$0xff] }
 0x110   : > { %3952 = vmatpush3.bf16.msra.mxu1 %v4217_v41  ;;  %3913 = vmatprep.subr.bf16.mxu0 %v4218_v42  ;;  %v4255_v41 = vld [vmem:[%s4988_s29 + $0x3c8] sm:$0xff]  }
 0x111   : > { %3953 = vmatprep.subr.bf16.mxu1 %v4219_v43  ;;  %2860 = vmatprep.mubr.bf16.mxu0 %v3544_v49  ;;  %v4256_v42 = vld [vmem:[%s4988_s29 + $0x308] sm:$0xff]   ;;  %v3550_v49 = vcombine.high %v1337_v46, %v1345_v47 }
 0x112   : > { %2924 = vmatprep.mubr.bf16.mxu1 %v3546_v52  ;;  %v4257_v43 = vld [vmem:[%s4988_s29 + $0x388] sm:$0xff]   ;;  %v4258_v52 = vld [vmem:[%s4988_s29 + $0x350] sm:$0xff]  }
 0x113   : > { %3914 = vmatpush3.bf16.msra.mxu0 %v4220_v44  ;;  %v1336_v44 = vld [vmem:[%s5025_s10 + $0xa0] sm:$0xff] }
 0x114   : > { %3954 = vmatpush3.bf16.msra.mxu1 %v4221_v45  ;;  %3915 = vmatprep.subr.bf16.mxu0 %v4222_v54  ;;  %v1344_v45 = vld [vmem:[%s5025_s10 + $0xe0] sm:$0xff]  ;;  %v4260_v54 = vld [vmem:[%s4988_s29 + $0x310] sm:$0xff]  }
 0x115   : > { %3955 = vmatprep.subr.bf16.mxu1 %v4223_v55  ;;  %v3548_v48 = vcombine.high %v1336_v44, %v1344_v45  ;;  %v3547_v50 = vcombine.low %v1336_v44, %v1344_v45  ;;  %v4261_v55 = vld [vmem:[%s4988_s29 + $0x390] sm:$0xff]   ;;  %v3551_v44 = vcombine.low %v1338_v32, %v1346_v33 }
 0x116   : > { %2861 = vmatmul.mubr.bf16.gmra.mrb[20].mxu0 %v3543_v51  ;;  %v3549_v51 = vcombine.low %v1337_v46, %v1345_v47 }
 0x117   : > { %2925 = vmatmul.mubr.bf16.gmra.mrb[20].mxu1 %v3545_v53  ;;  %3916 = vmatpush3.bf16.msra.mxu0 %v4224_v56  ;;  %v4259_v53 = vld [vmem:[%s4988_s29 + $0x3d0] sm:$0xff]   ;;  %v4262_v56 = vld [vmem:[%s4988_s29 + $0x358] sm:$0xff]  }
 0x118   : > { %3956 = vmatpush3.bf16.msra.mxu1 %v4225_v57  ;;  %3917 = vmatprep.subr.bf16.mxu0 %v4226_v58  ;;  %v4263_v57 = vld [vmem:[%s4988_s29 + $0x3d8] sm:$0xff]  }
 0x119   : > { %3957 = vmatprep.subr.bf16.mxu1 %v4227_v59  ;;  %2868 = vmatprep.mubr.bf16.mxu0 %v3560_v0  ;;  %v4264_v58 = vld [vmem:[%s4988_s29 + $0x318] sm:$0xff]   ;;  %v1361_v0 = vld [vmem:[%s5025_s10 + $0x168] sm:$0xff] }
 0x11a   : > { %2932 = vmatprep.mubr.bf16.mxu1 %v3562_v4  ;;  %v4265_v59 = vld [vmem:[%s4988_s29 + $0x398] sm:$0xff]   ;;  %v3566_v2 = vcombine.high %v1353_v62, %v1361_v0  ;;  %v4266_v4 = vld [vmem:[%s4988_s29 + $0x360] sm:$0xff]  }
 0x11b   : > { %3918 = vmatpush3.bf16.msra.mxu0 %v4228_v60  ;;  %v1352_v60 = vld [vmem:[%s5025_s10 + $0x120] sm:$0xff] }
 0x11c   : > { %3958 = vmatpush3.bf16.msra.mxu1 %v4229_v61  ;;  %3919 = vmatprep.subr.bf16.mxu0 %v4230_v6  ;;  %v1360_v61 = vld [vmem:[%s5025_s10 + $0x160] sm:$0xff] }
 0x11d   : > { %3959 = vmatprep.subr.bf16.mxu1 %v4231_v7  ;;  %v3564_v63 = vcombine.high %v1352_v60, %v1360_v61  ;;  %v3563_v1 = vcombine.low %v1352_v60, %v1360_v61  ;;  %v4268_v6 = vld [vmem:[%s4988_s29 + $0x320] sm:$0xff]  }
 0x11e   : > { %2869 = vmatmul.mubr.bf16.gmra.mrb[24].mxu0 %v3559_v3  ;;  %v3565_v3 = vcombine.low %v1353_v62, %v1361_v0  ;;  %v4269_v7 = vld [vmem:[%s4988_s29 + $0x3a0] sm:$0xff]  }
 0x11f   : > { %2933 = vmatmul.mubr.bf16.gmra.mrb[24].mxu1 %v3561_v5  ;;  %3920 = vmatpush3.bf16.msra.mxu0 %v4232_v8  ;;  %v4267_v5 = vld [vmem:[%s4988_s29 + $0x3e0] sm:$0xff]   ;;  %v4270_v8 = vld [vmem:[%s4988_s29 + $0x368] sm:$0xff]  }
 0x120   : > { %3960 = vmatpush3.bf16.msra.mxu1 %v4233_v9  ;;  %3921 = vmatprep.subr.bf16.mxu0 %v4234_v10  ;;  %v4271_v9 = vld [vmem:[%s4988_s29 + $0x3e8] sm:$0xff]  }
 0x121   : > { %3961 = vmatprep.subr.bf16.mxu1 %v4235_v11  ;;  %2876 = vmatprep.mubr.bf16.mxu0 %v3576_v15  ;;  %v4272_v10 = vld [vmem:[%s4988_s29 + $0x328] sm:$0xff]  }
 0x122   : > { %2940 = vmatprep.mubr.bf16.mxu1 %v3578_v18  ;;  %v4273_v11 = vld [vmem:[%s4988_s29 + $0x3a8] sm:$0xff]   ;;  %v4278_v18 = vld [vmem:[%s4988_s29 + $0x370] sm:$0xff]  }
 0x123   : > { %3922 = vmatpush3.bf16.msra.mxu0 %v4236_v12  ;;  %v1368_v12 = vld [vmem:[%s5025_s10 + $0x1a0] sm:$0xff] }
 0x124   : > { %3962 = vmatpush3.bf16.msra.mxu1 %v4237_v13  ;;  %3923 = vmatprep.subr.bf16.mxu0 %v4242_v20  ;;  %v1369_v13 = vld [vmem:[%s5025_s10 + $0x1a8] sm:$0xff]  ;;  %v3580_v14 = vcombine.high %v1368_v12, %v1368_v12  ;;  %v3579_v16 = vcombine.low %v1368_v12, %v1368_v12  ;;  %v4280_v20 = vld [vmem:[%s4988_s29 + $0x330] sm:$0xff]  }
 0x125   : > { %3963 = vmatprep.subr.bf16.mxu1 %v4243_v21  ;;  %v3582_v15 = vcombine.high %v1369_v13, %v1369_v13  ;;  %v4281_v21 = vld [vmem:[%s4988_s29 + $0x3b0] sm:$0xff]  }
 0x126   : > { %2877 = vmatmul.mubr.bf16.gmra.mrb[28].mxu0 %v3575_v17  ;;  %v3581_v17 = vcombine.low %v1369_v13, %v1369_v13 }
 0x127   : > { %2941 = vmatmul.mubr.bf16.gmra.mrb[28].mxu1 %v3577_v19  ;;  %3924 = vmatpush3.bf16.msra.mxu0 %v4244_v22  ;;  %v4279_v19 = vld [vmem:[%s4988_s29 + $0x3f0] sm:$0xff]   ;;  %v4282_v22 = vld [vmem:[%s4988_s29 + $0x378] sm:$0xff]  }
 0x128   : > { %3964 = vmatpush3.bf16.msra.mxu1 %v4245_v23  ;;  %3925 = vmatprep.subr.bf16.mxu0 %v4246_v24  ;;  %v4283_v23 = vld [vmem:[%s4988_s29 + $0x3f8] sm:$0xff]  }
 0x129   : > { %3965 = vmatprep.subr.bf16.mxu1 %v4247_v25  ;;  %2980 = vmatprep.mubr.bf16.mxu0 %v3532_v31  ;;  %v4284_v24 = vld [vmem:[%s4988_s29 + $0x338] sm:$0xff]  }
 0x12a   : > { %3044 = vmatprep.mubr.bf16.mxu1 %v3534_v35  ;;  %v4285_v25 = vld [vmem:[%s4988_s29 + $0x3b8] sm:$0xff]   ;;  %s1301_s29 = sand.u32 1, %s4330_s15  }
 0x12b   : > { %3926 = vmatpush3.bf16.msra.mxu0 %v4248_v26  ;;  %v1322_v26 = vld [vmem:[%s5025_s10 + $0x30] sm:$0xff]  ;;  %v1331_v31 = vld [vmem:[%s5025_s10 + $0x78] sm:$0xff]  ;;  %s4071_s17 = smul.u32 28, %s1301_s29 }
 0x12c   : > { %3966 = vmatpush3.bf16.msra.mxu1 %v4249_v27  ;;  %3991 = vmatprep.subr.bf16.mxu0 %v4250_v36  ;;  %v1330_v27 = vld [vmem:[%s5025_s10 + $0x70] sm:$0xff]  ;;  %v3538_v35 = vcombine.high %v1323_v28, %v1331_v31  ;;  %v3552_v36 = vcombine.high %v1338_v32, %v1346_v33 }
 0x12d   : > { %4031 = vmatprep.subr.bf16.mxu1 %v4251_v37  ;;  %v3535_v29 = vcombine.low %v1322_v26, %v1330_v27  ;;  %v1339_v37 = vld [vmem:[%s5025_s10 + $0xb8] sm:$0xff]  ;;  %s1303_s15 = scalar_lea.vmem [#allocation3], %s4071_s17 }
 0x12e   : > { %2981 = vmatmul.mubr.bf16.vlgmr.msra.gmra.mrb[32].mxu0 %v3531_v30  ;;  %v3536_v30 = vcombine.high %v1322_v26, %v1330_v27 }
 0x12f   : > { %3045 = vmatmul.mubr.bf16.vlgmr.msra.gmra.mrb[32].mxu1 %v3533_v34  ;;  %3992 = vmatpush3.bf16.msra.mxu0 %v4252_v38  ;;  %v3537_v34 = vcombine.low %v1323_v28, %v1331_v31  ;;  %v1347_v38 = vld [vmem:[%s5025_s10 + $0xf8] sm:$0xff] }
 0x130   : > { %4032 = vmatpush3.bf16.msra.mxu1 %v4253_v39  ;;  %3993 = vmatprep.subr.bf16.mxu0 %v4254_v40  ;;  %v3554_v39 = vcombine.high %v1339_v37, %v1347_v38  ;;  %v1354_v40 = vld [vmem:[%s5025_s10 + $0x130] sm:$0xff]  ;;  %v3553_v45 = vcombine.low %v1339_v37, %v1347_v38 }
 0x131   : > { %4033 = vmatprep.subr.bf16.mxu1 %v4255_v41  ;;  %2988 = vmatprep.mubr.bf16.mxu0 %v3548_v48  ;;  %v1362_v41 = vld [vmem:[%s5025_s10 + $0x170] sm:$0xff] }
 0x132   : > { %3052 = vmatprep.mubr.bf16.mxu1 %v3550_v49  ;;  %v3568_v46 = vcombine.high %v1354_v40, %v1362_v41  ;;  %v1370_v48 = vld [vmem:[%s5025_s10 + $0x1b0] sm:$0xff]  ;;  %v1371_v49 = vld [vmem:[%s5025_s10 + $0x1b8] sm:$0xff] }
 0x133   : > { %3994 = vmatpush3.bf16.msra.mxu0 %v4256_v42  ;;  %v1355_v42 = vld [vmem:[%s5025_s10 + $0x138] sm:$0xff] }
 0x134   : > { %4034 = vmatpush3.bf16.msra.mxu1 %v4257_v43  ;;  %3995 = vmatprep.subr.bf16.mxu0 %v4258_v52  ;;  %v1363_v43 = vld [vmem:[%s5025_s10 + $0x178] sm:$0xff]  ;;  %v3584_v52 = vcombine.high %v1370_v48, %v1370_v48 }
 0x135   : > { %4035 = vmatprep.subr.bf16.mxu1 %v4259_v53  ;;  %v3570_v47 = vcombine.high %v1355_v42, %v1363_v43  ;;  %v3586_v53 = vcombine.high %v1371_v49, %v1371_v49 }
 0x136   : > { %2989 = vmatmul.mubr.bf16.gmra.mrb[36].mxu0 %v3547_v50  ;;  %v3567_v50 = vcombine.low %v1354_v40, %v1362_v41 }
 0x137   : > { %3053 = vmatmul.mubr.bf16.gmra.mrb[36].mxu1 %v3549_v51  ;;  %3996 = vmatpush3.bf16.msra.mxu0 %v4260_v54  ;;  %v3569_v51 = vcombine.low %v1355_v42, %v1363_v43  ;;  %v3583_v54 = vcombine.low %v1370_v48, %v1370_v48 }
 0x138   : > { %4036 = vmatpush3.bf16.msra.mxu1 %v4261_v55  ;;  %3997 = vmatprep.subr.bf16.mxu0 %v4262_v56  ;;  %v3585_v55 = vcombine.low %v1371_v49, %v1371_v49 }
 0x139   : > { %4037 = vmatprep.subr.bf16.mxu1 %v4263_v57  ;;  %2996 = vmatprep.mubr.bf16.mxu0 %v3564_v63 }
 0x13a   : > { %3060 = vmatprep.mubr.bf16.mxu1 %v3566_v2 }
 0x13b   : > { %3998 = vmatpush3.bf16.msra.mxu0 %v4264_v58 }
 0x13c   : > { %4038 = vmatpush3.bf16.msra.mxu1 %v4265_v59  ;;  %3999 = vmatprep.subr.bf16.mxu0 %v4266_v4 }
 0x13d   : > { %4039 = vmatprep.subr.bf16.mxu1 %v4267_v5 }
 0x13e   : > { %2997 = vmatmul.mubr.bf16.gmra.mrb[40].mxu0 %v3563_v1 }
 0x13f   : > { %3061 = vmatmul.mubr.bf16.gmra.mrb[40].mxu1 %v3565_v3  ;;  %4000 = vmatpush3.bf16.msra.mxu0 %v4268_v6 }
 0x140   : > { %4040 = vmatpush3.bf16.msra.mxu1 %v4269_v7  ;;  %4001 = vmatprep.subr.bf16.mxu0 %v4270_v8 }
 0x141   : > { %4041 = vmatprep.subr.bf16.mxu1 %v4271_v9  ;;  %3004 = vmatprep.mubr.bf16.mxu0 %v3580_v14 }
 0x142   : > { %3068 = vmatprep.mubr.bf16.mxu1 %v3582_v15 }
 0x143   : > { %4002 = vmatpush3.bf16.msra.mxu0 %v4272_v10 }
 0x144   : > { %4042 = vmatpush3.bf16.msra.mxu1 %v4273_v11  ;;  %4003 = vmatprep.subr.bf16.mxu0 %v4278_v18 }
 0x145   : > { %4043 = vmatprep.subr.bf16.mxu1 %v4279_v19 }
 0x146   : > { %3005 = vmatmul.mubr.bf16.gmra.mrb[44].mxu0 %v3579_v16 }
 0x147   : > { %3069 = vmatmul.mubr.bf16.gmra.mrb[44].mxu1 %v3581_v17  ;;  %4004 = vmatpush3.bf16.msra.mxu0 %v4280_v20 }
 0x148   : > { %4044 = vmatpush3.bf16.msra.mxu1 %v4281_v21  ;;  %4005 = vmatprep.subr.bf16.mxu0 %v4282_v22 }
 0x149   : > { %4045 = vmatprep.subr.bf16.mxu1 %v4283_v23  ;;  %3108 = vmatprep.mubr.bf16.mxu0 %v3536_v30 }
 0x14a   : > { %3172 = vmatprep.mubr.bf16.mxu1 %v3538_v35 }
 0x14b   : > { %4006 = vmatpush3.bf16.msra.mxu0 %v4284_v24 }
 0x14c   : > { %4046 = vmatpush3.bf16.msra.mxu1 %v4285_v25 }
 0x14e   : > { %3109 = vmatmul.mubr.bf16.vlgmr.msra.gmra.mrb[48].mxu0 %v3535_v29 }
 0x14f   : > { %3173 = vmatmul.mubr.bf16.vlgmr.msra.gmra.mrb[48].mxu1 %v3537_v34  ;;  %3116 = vmatprep.mubr.bf16.mxu0 %v3552_v36 }
 0x150   : > { %3180 = vmatprep.mubr.bf16.mxu1 %v3554_v39 }
 0x156   : > { %3117 = vmatmul.mubr.bf16.gmra.mrb[52].mxu0 %v3551_v44 }
 0x157   : > { %3181 = vmatmul.mubr.bf16.gmra.mrb[52].mxu1 %v3553_v45  ;;  %3124 = vmatprep.mubr.bf16.mxu0 %v3568_v46 }
 0x158   : > { %3188 = vmatprep.mubr.bf16.mxu1 %v3570_v47 }
 0x15e   : > { %3125 = vmatmul.mubr.bf16.gmra.mrb[56].mxu0 %v3567_v50 }
 0x15f   : > { %3189 = vmatmul.mubr.bf16.gmra.mrb[56].mxu1 %v3569_v51  ;;  %3132 = vmatprep.mubr.bf16.mxu0 %v3584_v52 }
 0x160   : > { %3196 = vmatprep.mubr.bf16.mxu1 %v3586_v53 }
 0x166   : > { %3133 = vmatmul.mubr.bf16.gmra.mrb[60].mxu0 %v3583_v54 }
 0x167   : > { %3197 = vmatmul.mubr.bf16.gmra.mrb[60].mxu1 %v3585_v55 }
 0x1c1   : > { %v3767_v56 = vpop.f32.mrb[0].mxu0 }
 0x1c2   : > { %v3807_v57 = vpop.f32.mrb[0].mxu1  ;;  %v3768_v58 = vpop.f32.mrb[1].mxu0 }
 0x1c3   : > { %v3769_v59 = vadd.f32 %v3768_v58, %v3767_v56  ;;  %v3808_v60 = vpop.f32.mrb[1].mxu1  ;;  %v3770_v61 = vpop.f32.mrb[2].mxu0 }
 0x1c4   : > { %v3809_v62 = vadd.f32 %v3808_v60, %v3807_v57  ;;  %v3810_v63 = vpop.f32.mrb[2].mxu1  ;;  %v3771_v0 = vpop.f32.mrb[3].mxu0 }
 0x1c5   : > { %v3772_v1 = vadd.f32 %v3771_v0, %v3770_v61  ;;  %v3811_v2 = vpop.f32.mrb[3].mxu1 }
 0x1c6   : > { %v2791_v3 = vadd.f32 %v3809_v62, %v3769_v59  ;;  %v3812_v4 = vadd.f32 %v3811_v2, %v3810_v63 }
 0x1c8   : > { %v2794_v5 = vadd.f32 %v3812_v4, %v3772_v1 }
 0x1c9   : > { %v3773_v6 = vpop.f32.mrb[4].mxu0 }
 0x1ca   : > { %v3813_v7 = vpop.f32.mrb[4].mxu1  ;;  %v3774_v8 = vpop.f32.mrb[5].mxu0 }
 0x1cb   : > { %v3775_v9 = vadd.f32 %v3774_v8, %v3773_v6  ;;  %v3814_v10 = vpop.f32.mrb[5].mxu1  ;;  %v3776_v11 = vpop.f32.mrb[6].mxu0 }
 0x1cc   : > { %v3815_v12 = vadd.f32 %v3814_v10, %v3813_v7  ;;  %v3816_v13 = vpop.f32.mrb[6].mxu1  ;;  %v3777_v14 = vpop.f32.mrb[7].mxu0 }
 0x1cd   : > { %v3778_v15 = vadd.f32 %v3777_v14, %v3776_v11  ;;  %v3817_v16 = vpop.f32.mrb[7].mxu1 }
 0x1ce   : > { %v2799_v17 = vadd.f32 %v3815_v12, %v3775_v9  ;;  %v3818_v18 = vadd.f32 %v3817_v16, %v3816_v13 }
 0x1d0   : > { %v2802_v19 = vadd.f32 %v3818_v18, %v3778_v15 }
 0x1d1   : > { %v3779_v20 = vpop.f32.mrb[8].mxu0 }
 0x1d2   : > { %v3819_v21 = vpop.f32.mrb[8].mxu1  ;;  %v3780_v22 = vpop.f32.mrb[9].mxu0 }
 0x1d3   : > { %v3820_v23 = vpop.f32.mrb[9].mxu1  ;;  %v3781_v24 = vadd.f32 %v3780_v22, %v3779_v20  ;;  %v3782_v26 = vpop.f32.mrb[10].mxu0 }
 0x1d4   : > { %v3821_v25 = vadd.f32 %v3820_v23, %v3819_v21  ;;  %v3822_v27 = vpop.f32.mrb[10].mxu1  ;;  %v3783_v28 = vpop.f32.mrb[11].mxu0 }
 0x1d5   : > { %v3823_v29 = vpop.f32.mrb[11].mxu1  ;;  %v3784_v31 = vadd.f32 %v3783_v28, %v3782_v26 }
 0x1d6   : > { %v2807_v30 = vadd.f32 %v3821_v25, %v3781_v24  ;;  %v3824_v32 = vadd.f32 %v3823_v29, %v3822_v27 }
 0x1d8   : > { %v2810_v33 = vadd.f32 %v3824_v32, %v3784_v31 }
 0x1d9   : > { %v3785_v34 = vpop.f32.mrb[12].mxu0 }
 0x1da   : > { %v3825_v35 = vpop.f32.mrb[12].mxu1  ;;  %v3786_v36 = vpop.f32.mrb[13].mxu0 }
 0x1db   : > { %v3826_v37 = vpop.f32.mrb[13].mxu1  ;;  %v3787_v38 = vadd.f32 %v3786_v36, %v3785_v34  ;;  %v3788_v40 = vpop.f32.mrb[14].mxu0 }
 0x1dc   : > { %v3827_v39 = vadd.f32 %v3826_v37, %v3825_v35  ;;  %v3828_v41 = vpop.f32.mrb[14].mxu1  ;;  %v3789_v42 = vpop.f32.mrb[15].mxu0 }
 0x1dd   : > { %v3829_v43 = vpop.f32.mrb[15].mxu1 }
 0x1de   : > { %v2815_v44 = vadd.f32 %v3827_v39, %v3787_v38 }
 0x1e1   : > { %v3847_v45 = vpop.f32.mrb[16].mxu0 }
 0x1e2   : > { %v3887_v46 = vpop.f32.mrb[16].mxu1  ;;  %v3848_v47 = vpop.f32.mrb[17].mxu0 }
 0x1e3   : > { %v3849_v48 = vadd.f32 %v3848_v47, %v3847_v45  ;;  %v3888_v49 = vpop.f32.mrb[17].mxu1  ;;  %v3850_v50 = vpop.f32.mrb[18].mxu0 }
 0x1e4   : > { %v3889_v51 = vadd.f32 %v3888_v49, %v3887_v46  ;;  %v3890_v52 = vpop.f32.mrb[18].mxu1  ;;  %v3851_v53 = vpop.f32.mrb[19].mxu0 }
 0x1e5   : > { %v2855_v54 = vadd.f32 %v3849_v48, %v2791_v3  ;;  %v3852_v55 = vadd.f32 %v3851_v53, %v3850_v50  ;;  %v3891_v56 = vpop.f32.mrb[19].mxu1 }
 0x1e6   : > { %v3892_v57 = vadd.f32 %v3891_v56, %v3890_v52 }
 0x1e7   : > { %v2919_v58 = vadd.f32 %v3889_v51, %v2855_v54  ;;  %v2858_v59 = vadd.f32 %v3852_v55, %v2794_v5 }
 0x1e9   : > { %v2922_v60 = vadd.f32 %v3892_v57, %v2858_v59  ;;  %v3853_v61 = vpop.f32.mrb[20].mxu0 }
 0x1ea   : > { %v3893_v62 = vpop.f32.mrb[20].mxu1  ;;  %v3854_v63 = vpop.f32.mrb[21].mxu0 }
 0x1eb   : > { %v3855_v0 = vadd.f32 %v3854_v63, %v3853_v61  ;;  %v3894_v1 = vpop.f32.mrb[21].mxu1  ;;  %v3856_v2 = vpop.f32.mrb[22].mxu0 }
 0x1ec   : > { %v3895_v4 = vadd.f32 %v3894_v1, %v3893_v62  ;;  %v3896_v6 = vpop.f32.mrb[22].mxu1  ;;  %v3857_v7 = vpop.f32.mrb[23].mxu0 }
 0x1ed   : > { %v2863_v8 = vadd.f32 %v3855_v0, %v2799_v17  ;;  %v3858_v9 = vadd.f32 %v3857_v7, %v3856_v2  ;;  %v3897_v10 = vpop.f32.mrb[23].mxu1 }
 0x1ee   : > { %v3898_v11 = vadd.f32 %v3897_v10, %v3896_v6 }
 0x1ef   : > { %v2927_v3 = vadd.f32 %v3895_v4, %v2863_v8  ;;  %v2866_v12 = vadd.f32 %v3858_v9, %v2802_v19 }
 0x1f1   : > { %v2930_v13 = vadd.f32 %v3898_v11, %v2866_v12  ;;  %v3859_v14 = vpop.f32.mrb[24].mxu0 }
 0x1f2   : > { %v3899_v15 = vpop.f32.mrb[24].mxu1  ;;  %v3860_v5 = vpop.f32.mrb[25].mxu0 }
 0x1f3   : > { %v3861_v16 = vadd.f32 %v3860_v5, %v3859_v14  ;;  %v3900_v18 = vpop.f32.mrb[25].mxu1  ;;  %v3862_v20 = vpop.f32.mrb[26].mxu0 }
 0x1f4   : > { %v3901_v21 = vadd.f32 %v3900_v18, %v3899_v15  ;;  %v3902_v22 = vpop.f32.mrb[26].mxu1  ;;  %v3863_v23 = vpop.f32.mrb[27].mxu0 }
 0x1f5   : > { %v2871_v24 = vadd.f32 %v3861_v16, %v2807_v30  ;;  %v3864_v25 = vadd.f32 %v3863_v23, %v3862_v20  ;;  %v3903_v26 = vpop.f32.mrb[27].mxu1 }
 0x1f6   : > { %v3904_v27 = vadd.f32 %v3903_v26, %v3902_v22 }
 0x1f7   : > { %v2935_v17 = vadd.f32 %v3901_v21, %v2871_v24  ;;  %v2874_v28 = vadd.f32 %v3864_v25, %v2810_v33 }
 0x1f9   : > { %v2938_v29 = vadd.f32 %v3904_v27, %v2874_v28  ;;  %v3865_v31 = vpop.f32.mrb[28].mxu0 }
 0x1fa   : > { %v3905_v32 = vpop.f32.mrb[28].mxu1  ;;  %v3866_v19 = vpop.f32.mrb[29].mxu0 }
 0x1fb   : > { %v3867_v34 = vadd.f32 %v3866_v19, %v3865_v31  ;;  %v3906_v35 = vpop.f32.mrb[29].mxu1  ;;  %v3868_v36 = vpop.f32.mrb[30].mxu0 }
 0x1fc   : > { %v3907_v37 = vadd.f32 %v3906_v35, %v3905_v32  ;;  %v3908_v38 = vpop.f32.mrb[30].mxu1  ;;  %v3869_v39 = vpop.f32.mrb[31].mxu0 }
 0x1fd   : > { %v2879_v40 = vadd.f32 %v3867_v34, %v2815_v44  ;;  %v3909_v41 = vpop.f32.mrb[31].mxu1 }
 0x1ff   : > { %v2943_v42 = vadd.f32 %v3907_v37, %v2879_v40 }
 0x201   : > { %v3927_v43 = vpop.f32.mrb[32].mxu0 }
 0x202   : > { %v3967_v30 = vpop.f32.mrb[32].mxu1  ;;  %v3928_v45 = vpop.f32.mrb[33].mxu0 }
 0x203   : > { %v3929_v46 = vadd.f32 %v3928_v45, %v3927_v43  ;;  %v3968_v47 = vpop.f32.mrb[33].mxu1  ;;  %v3930_v48 = vpop.f32.mrb[34].mxu0 }
 0x204   : > { %v3969_v33 = vadd.f32 %v3968_v47, %v3967_v30  ;;  %v3970_v49 = vpop.f32.mrb[34].mxu1  ;;  %v3931_v50 = vpop.f32.mrb[35].mxu0 }
 0x205   : > { %v2983_v51 = vadd.f32 %v3929_v46, %v2919_v58  ;;  %v3932_v52 = vadd.f32 %v3931_v50, %v3930_v48  ;;  %v3971_v53 = vpop.f32.mrb[35].mxu1 }
 0x206   : > { %v3972_v54 = vadd.f32 %v3971_v53, %v3970_v49 }
 0x207   : > { %v3047_v55 = vadd.f32 %v3969_v33, %v2983_v51  ;;  %v2986_v56 = vadd.f32 %v3932_v52, %v2922_v60 }
 0x209   : > { %v3050_v57 = vadd.f32 %v3972_v54, %v2986_v56  ;;  %v3933_v59 = vpop.f32.mrb[36].mxu0 }
 0x20a   : > { %v3973_v44 = vpop.f32.mrb[36].mxu1  ;;  %v3934_v61 = vpop.f32.mrb[37].mxu0 }
 0x20b   : > { %v3974_v62 = vpop.f32.mrb[37].mxu1  ;;  %v3935_v63 = vadd.f32 %v3934_v61, %v3933_v59  ;;  %v3936_v1 = vpop.f32.mrb[38].mxu0 }
 0x20c   : > { %v3975_v0 = vadd.f32 %v3974_v62, %v3973_v44  ;;  %v3976_v2 = vpop.f32.mrb[38].mxu1  ;;  %v3937_v4 = vpop.f32.mrb[39].mxu0 }
 0x20d   : > { %v3977_v6 = vpop.f32.mrb[39].mxu1  ;;  %v2991_v7 = vadd.f32 %v3935_v63, %v2927_v3  ;;  %v3938_v8 = vadd.f32 %v3937_v4, %v3936_v1 }
 0x20e   : > { %v3978_v9 = vadd.f32 %v3977_v6, %v3976_v2 }
 0x20f   : > { %v3055_v58 = vadd.f32 %v3975_v0, %v2991_v7  ;;  %v2994_v10 = vadd.f32 %v3938_v8, %v2930_v13 }
 0x211   : > { %v5181_v11 = vadd.f32 %v3978_v9, %v2994_v10  ;;  %v3939_v12 = vpop.f32.mrb[40].mxu0 }
 0x212   : > { %v3979_v60 = vpop.f32.mrb[40].mxu1  ;;  %v3940_v14 = vpop.f32.mrb[41].mxu0 }
 0x213   : > { %v3941_v15 = vadd.f32 %v3940_v14, %v3939_v12  ;;  %v3980_v5 = vpop.f32.mrb[41].mxu1  ;;  %v3942_v16 = vpop.f32.mrb[42].mxu0 }
 0x214   : > { %v3981_v18 = vadd.f32 %v3980_v5, %v3979_v60  ;;  %v3982_v20 = vpop.f32.mrb[42].mxu1  ;;  %v3943_v21 = vpop.f32.mrb[43].mxu0 }
 0x215   : > { %v2999_v22 = vadd.f32 %v3941_v15, %v2935_v17  ;;  %v3944_v23 = vadd.f32 %v3943_v21, %v3942_v16  ;;  %v3983_v24 = vpop.f32.mrb[43].mxu1 }
 0x216   : > { %v3984_v25 = vadd.f32 %v3983_v24, %v3982_v20 }
 0x217   : > { %v5183_v3 = vadd.f32 %v3981_v18, %v2999_v22  ;;  %v3002_v26 = vadd.f32 %v3944_v23, %v2938_v29 }
 0x219   : > { %v5185_v27 = vadd.f32 %v3984_v25, %v3002_v26  ;;  %v3945_v13 = vpop.f32.mrb[44].mxu0 }
 0x21a   : > { %v3985_v28 = vpop.f32.mrb[44].mxu1  ;;  %v3946_v31 = vpop.f32.mrb[45].mxu0 }
 0x21b   : > { %v3986_v32 = vpop.f32.mrb[45].mxu1  ;;  %v3947_v19 = vadd.f32 %v3946_v31, %v3945_v13  ;;  %v3948_v35 = vpop.f32.mrb[46].mxu0 }
 0x21c   : > { %v3987_v34 = vadd.f32 %v3986_v32, %v3985_v28  ;;  %v3988_v36 = vpop.f32.mrb[46].mxu1  ;;  %v3949_v37 = vpop.f32.mrb[47].mxu0 }
 0x21d   : > { %v3989_v38 = vpop.f32.mrb[47].mxu1  ;;  %v3007_v39 = vadd.f32 %v3947_v19, %v2943_v42 }
 0x21f   : > { %v5187_v17 = vadd.f32 %v3987_v34, %v3007_v39 }
 0x221   : > { %v4007_v40 = vpop.f32.mrb[48].mxu0 }
 0x222   : > { %v4047_v41 = vpop.f32.mrb[48].mxu1  ;;  %v4008_v43 = vpop.f32.mrb[49].mxu0 }
 0x223   : > { %v4009_v30 = vadd.f32 %v4008_v43, %v4007_v40  ;;  %v4048_v29 = vpop.f32.mrb[49].mxu1  ;;  %v4010_v45 = vpop.f32.mrb[50].mxu0 }
 0x224   : > { %v4049_v46 = vadd.f32 %v4048_v29, %v4047_v41  ;;  %v4050_v47 = vpop.f32.mrb[50].mxu1  ;;  %v4011_v48 = vpop.f32.mrb[51].mxu0 }
 0x225   : > { %v3111_v33 = vadd.f32 %v4009_v30, %v3047_v55  ;;  %v4012_v49 = vadd.f32 %v4011_v48, %v4010_v45  ;;  %v4051_v50 = vpop.f32.mrb[51].mxu1 }
 0x226   : > { %v4052_v51 = vadd.f32 %v4051_v50, %v4050_v47 }
 0x227   : > { %v5189_v52 = vadd.f32 %v4049_v46, %v3111_v33  ;;  %v3114_v53 = vadd.f32 %v4012_v49, %v3050_v57 }
 0x229   : > { %v5191_v54 = vadd.f32 %v4052_v51, %v3114_v53  ;;  %v4013_v42 = vpop.f32.mrb[52].mxu0  ;;  %v3217_v44 = vmul.f32 %v5189_v52, %v5189_v52 }
 0x22a   : > { %v4053_v56 = vpop.f32.mrb[52].mxu1  ;;  %v4014_v59 = vpop.f32.mrb[53].mxu0 }
 0x22b   : > { %v3204_v61 = vadd.f32 %v5191_v54, %v5189_v52  ;;  %v3218_v55 = vmul.f32 %v5191_v54, %v5191_v54  ;;  %v4015_v62 = vadd.f32 %v4014_v59, %v4013_v42  ;;  %v4054_v63 = vpop.f32.mrb[53].mxu1  ;;  %v4016_v0 = vpop.f32.mrb[54].mxu0 }
 0x22c   : > { %v4055_v1 = vadd.f32 %v4054_v63, %v4053_v56  ;;  %v4056_v2 = vpop.f32.mrb[54].mxu1  ;;  %v4017_v57 = vpop.f32.mrb[55].mxu0 }
 0x22d   : > { %v3224_v4 = vadd.f32 %v3218_v55, %v3217_v44  ;;  %v3119_v6 = vadd.f32 %v4015_v62, %v3055_v58  ;;  %v4018_v7 = vadd.f32 %v4017_v57, %v4016_v0  ;;  %v4057_v8 = vpop.f32.mrb[55].mxu1 }
 0x22e   : > { %v4058_v9 = vadd.f32 %v4057_v8, %v4056_v2 }
 0x22f   : > { %v5199_v10 = vadd.f32 %v4055_v1, %v3119_v6  ;;  %v3122_v12 = vadd.f32 %v4018_v7, %v5181_v11 }
 0x231   : > { %v3205_v60 = vadd.f32 %v3204_v61, %v5199_v10  ;;  %v3219_v14 = vmul.f32 %v5199_v10, %v5199_v10  ;;  %v5205_v15 = vadd.f32 %v4058_v9, %v3122_v12  ;;  %v4019_v5 = vpop.f32.mrb[56].mxu0 }
 0x232   : > { %v4059_v16 = vpop.f32.mrb[56].mxu1  ;;  %v4020_v18 = vpop.f32.mrb[57].mxu0 }
 0x233   : > { %v3225_v20 = vadd.f32 %v3224_v4, %v3219_v14  ;;  %v3206_v58 = vadd.f32 %v3205_v60, %v5205_v15  ;;  %v3220_v21 = vmul.f32 %v5205_v15, %v5205_v15  ;;  %v4021_v22 = vadd.f32 %v4020_v18, %v4019_v5  ;;  %v4060_v23 = vpop.f32.mrb[57].mxu1  ;;  %v4022_v24 = vpop.f32.mrb[58].mxu0 }
 0x234   : > { %v4061_v11 = vadd.f32 %v4060_v23, %v4059_v16  ;;  %v4062_v25 = vpop.f32.mrb[58].mxu1  ;;  %v4023_v26 = vpop.f32.mrb[59].mxu0 }
 0x235   : > { %v3226_v13 = vadd.f32 %v3225_v20, %v3220_v21  ;;  %v3127_v28 = vadd.f32 %v4021_v22, %v5183_v3  ;;  %v4024_v31 = vadd.f32 %v4023_v26, %v4022_v24  ;;  %v4063_v32 = vpop.f32.mrb[59].mxu1 }
 0x236   : > { %v4064_v19 = vadd.f32 %v4063_v32, %v4062_v25  ;;  %v3716_v25 = vld [vmem:[%s1314_s28] ss:$0 sm:$0xff] }
 0x237   : > { %v3191_v34 = vadd.f32 %v4061_v11, %v3127_v28  ;;  %v3130_v35 = vadd.f32 %v4024_v31, %v5185_v27 }
 0x239   : > { %v3207_v36 = vadd.f32 %v3206_v58, %v3191_v34  ;;  %v3221_v37 = vmul.f32 %v3191_v34, %v3191_v34  ;;  %v3194_v38 = vadd.f32 %v4064_v19, %v3130_v35  ;;  %v4025_v39 = vpop.f32.mrb[60].mxu0 }
 0x23a   : > { %v4065_v40 = vpop.f32.mrb[60].mxu1  ;;  %v4026_v41 = vpop.f32.mrb[61].mxu0 }
 0x23b   : > { %v3227_v43 = vadd.f32 %v3226_v13, %v3221_v37  ;;  %v3208_v30 = vadd.f32 %v3207_v36, %v3194_v38  ;;  %v3222_v29 = vmul.f32 %v3194_v38, %v3194_v38  ;;  %v4027_v45 = vadd.f32 %v4026_v41, %v4025_v39  ;;  %v4066_v46 = vpop.f32.mrb[61].mxu1  ;;  %v4028_v47 = vpop.f32.mrb[62].mxu0 }
 0x23c   : > { %v4067_v48 = vadd.f32 %v4066_v46, %v4065_v40  ;;  %v4068_v3 = vpop.f32.mrb[62].mxu1  ;;  %v4029_v33 = vpop.f32.mrb[63].mxu0 }
 0x23d   : > { %v3228_v49 = vadd.f32 %v3227_v43, %v3222_v29  ;;  %v3135_v50 = vadd.f32 %v4027_v45, %v5187_v17  ;;  %v4069_v51 = vpop.f32.mrb[63].mxu1 }
 0x23f   : > { %v3199_v27 = vadd.f32 %v4067_v48, %v3135_v50 }
 0x241   : > { %v3209_v53 = vadd.f32 %v3208_v30, %v3199_v27  ;;  %v3223_v42 = vmul.f32 %v3199_v27, %v3199_v27 }
 0x243   : > { %v3210_v56 = vrot.slane %v3209_v53, 4  ;;  %v3229_v59 = vadd.f32 %v3228_v49, %v3223_v42 }
 0x245   : > { %v3211_v44 = vadd.f32 %v3210_v56, %v3209_v53  ;;  %v3230_v61 = vrot.slane %v3229_v59, 4 }
 0x247   : > { %v3212_v55 = vrot.slane %v3211_v44, 2  ;;  %v3231_v62 = vadd.f32 %v3230_v61, %v3229_v59 }
 0x249   : > { %v3213_v63 = vadd.f32 %v3212_v55, %v3211_v44  ;;  %v3232_v0 = vrot.slane %v3231_v62, 2 }
 0x24b   : > { %v3214_v1 = vrot.slane %v3213_v63, 1  ;;  %v3233_v2 = vadd.f32 %v3232_v0, %v3231_v62 }
 0x24d   : > { %v3215_v57 = vadd.f32 %v3214_v1, %v3213_v63  ;;  %v3234_v4 = vrot.slane %v3233_v2, 1 }
 0x24f   : > { %v3216_v6 = vmul.f32 0.020408163, %v3215_v57  ;;  %v3235_v17 = vadd.f32 %v3234_v4, %v3233_v2 }
 0x251   : > { %v3236_v7 = vmul.f32 0.020408163, %v3235_v17  ;;  %v3237_v8 = vmul.f32 %v3216_v6, %v3216_v6  ;;  %v3239_v9 = vsub.f32 %v5189_v52, %v3216_v6  ;;  %v3240_v12 = vsub.f32 %v5191_v54, %v3216_v6  ;;  %v3715_v54 = vld [vmem:[%s1311_s14] ss:$0 sm:$0xff] }
 0x252   : > { %v3241_v60 = vsub.f32 %v5199_v10, %v3216_v6  ;;  %v3242_v14 = vsub.f32 %v5205_v15, %v3216_v6  ;;  %v3243_v5 = vsub.f32 %v3191_v34, %v3216_v6  ;;  %v3244_v16 = vsub.f32 %v3194_v38, %v3216_v6 }
 0x253   : > { %v3238_v18 = vsub.f32 %v3236_v7, %v3237_v8  ;;  %v3245_v20 = vsub.f32 %v3199_v27, %v3216_v6 }
 0x255   : > { %v3246_v58 = vadd.f32 1e-05, %v3238_v18 }
 0x257   : > { %4290 = vrsqrt.f32 %v3246_v58 }
 0x261   : > { %v4291_v52 = vpop.eup %4290 }
 0x262   : > { %v3248_v10 = vmul.f32 %v4291_v52, %v3239_v9  ;;  %v3249_v15 = vmul.f32 %v4291_v52, %v3240_v12  ;;  %v3250_v21 = vmul.f32 %v4291_v52, %v3241_v60  ;;  %v3251_v22 = vmul.f32 %v4291_v52, %v3242_v14 }
 0x263   : > { %v3252_v23 = vmul.f32 %v4291_v52, %v3243_v5  ;;  %v3253_v24 = vmul.f32 %v4291_v52, %v3244_v16  ;;  %v3254_v11 = vmul.f32 %v4291_v52, %v3245_v20 }
 0x264   : > { %v3262_v26 = vmul.f32 %v3715_v54, %v3248_v10  ;;  %v3263_v13 = vmul.f32 %v3715_v54, %v3249_v15  ;;  %v3264_v28 = vmul.f32 %v3715_v54, %v3250_v21  ;;  %v3265_v31 = vmul.f32 %v3715_v54, %v3251_v22 }
 0x265   : > { %v3266_v32 = vmul.f32 %v3715_v54, %v3252_v23  ;;  %v3267_v19 = vmul.f32 %v3715_v54, %v3253_v24  ;;  %v3268_v34 = vmul.f32 %v3715_v54, %v3254_v11 }
 0x266   : > { %v3276_v35 = vadd.f32 %v3716_v25, %v3262_v26  ;;  %v3277_v36 = vadd.f32 %v3716_v25, %v3263_v13  ;;  %v3278_v37 = vadd.f32 %v3716_v25, %v3264_v28  ;;  %v3279_v38 = vadd.f32 %v3716_v25, %v3265_v31 }
 0x267   : > { %v3280_v39 = vadd.f32 %v3716_v25, %v3266_v32  ;;  %v3281_v40 = vadd.f32 %v3716_v25, %v3267_v19  ;;  %v3282_v41 = vadd.f32 %v3716_v25, %v3268_v34 }
 0x268   : > { %vm3283_vm0 = vcmp.ge.f32.partialorder %v3276_v35, 0.0  ;;  %vm3284_vm1 = vcmp.ge.f32.partialorder %v3277_v36, 0.0  ;;  %vm3285_vm2 = vcmp.ge.f32.partialorder %v3278_v37, 0.0  ;;  %vm3286_vm3 = vcmp.ge.f32.partialorder %v3279_v38, 0.0 }
 0x269   : > { %vm3287_vm4 = vcmp.ge.f32.partialorder %v3280_v39, 0.0  ;;  %vm3288_vm5 = vcmp.ge.f32.partialorder %v3281_v40, 0.0  ;;  %vm3289_vm6 = vcmp.ge.f32.partialorder %v3282_v41, 0.0  ;;  %v3290_v43 = vmul.f32 0.2, %v3276_v35 }
 0x26a   : > { %v3291_v30 = vmul.f32 0.2, %v3277_v36  ;;  %v3292_v29 = vmul.f32 0.2, %v3278_v37  ;;  %v3293_v45 = vmul.f32 0.2, %v3279_v38 }
 0x26b   : > { %v3294_v46 = vmul.f32 0.2, %v3280_v39  ;;  %v3295_v47 = vmul.f32 0.2, %v3281_v40  ;;  %v3296_v48 = vmul.f32 0.2, %v3282_v41  ;;  %v3297_v3 = vsel %vm3283_vm0, %v3276_v35, %v3290_v43 }
 0x26c   : > { %v3298_v33 = vsel %vm3284_vm1, %v3277_v36, %v3291_v30  ;;  %v3299_v49 = vsel %vm3285_vm2, %v3278_v37, %v3292_v29  ;;  %v3300_v50 = vsel %vm3286_vm3, %v3279_v38, %v3293_v45  ;;  %3346 = sbr.rel (!%p4456_p9) target bundleno = 636 (0x27c), region = 81 }
 0x26d   : > { %v3301_v51 = vsel %vm3287_vm4, %v3280_v39, %v3294_v46  ;;  %v3302_v27 = vsel %vm3288_vm5, %v3281_v40, %v3295_v47  ;;  %v3303_v53 = vsel %vm3289_vm6, %v3282_v41, %v3296_v48  ;;  %v3737_v42 = vpack.c.bf16 %v3298_v33, %v3297_v3 }
 0x26e   : > { %v3733_v56 = vpack.c.bf16 %v3303_v53, %v3303_v53  ;;  %v3742_v59 = vpack.c.bf16 %v3300_v50, %v3299_v49  ;;  %v3747_v44 = vpack.c.bf16 %v3302_v27, %v3301_v51 }
 0x26f   : > { %3738 = vst [vmem:[%s1303_s15] sm:$0xff] %v3737_v42  }
 0x270   : > { %3749 = vst [vmem:[%s1303_s15 + $0x8] sm:$0xff] %v3742_v59   ;;  %3750 = vst [vmem:[%s1303_s15 + $0x10] sm:$0xff] %v3747_v44  }
 0x271   : > { %3339 = vst [vmem:[%s1303_s15 + $0x18] sm:$0xf] %v3733_v56 }
 0x276   : > { %v3366_v61 = vld [vmem:[%s1303_s15] sm:$0xf]  ;;  %v3368_v55 = vld [vmem:[%s1303_s15 + $0x4] sm:$0xf] }
 0x277   : > { %v3370_v62 = vld [vmem:[%s1303_s15 + $0x8] sm:$0xf]  ;;  %v3372_v63 = vld [vmem:[%s1303_s15 + $0xc] sm:$0xf]  ;;  %v3374_v0 = vld [vmem:[%s1303_s15 + $0x10] sm:$0xf] }
 0x278   : > { %v3376_v1 = vld [vmem:[%s1303_s15 + $0x14] sm:$0xf]  ;;  %v3378_v2 = vld [vmem:[%s1303_s15 + $0x18] sm:$0xf]  ;;  %3367 = vst [vmem:[%s3350_s12] sm:$0xf] %v3366_v61 }
 0x279   : > { %3369 = vst [vmem:[%s3350_s12 + $0x8] sm:$0xf] %v3368_v55  ;;  %3371 = vst [vmem:[%s3350_s12 + $0x10] sm:$0xf] %v3370_v62 }
 0x27a   : > { %3373 = vst [vmem:[%s3350_s12 + $0x18] sm:$0xf] %v3372_v63  ;;  %3375 = vst [vmem:[%s3350_s12 + $0x20] sm:$0xf] %v3374_v0 }
 0x27b   : > { %3377 = vst [vmem:[%s3350_s12 + $0x28] sm:$0xf] %v3376_v1  ;;  %3379 = vst [vmem:[%s3350_s12 + $0x30] sm:$0xf] %v3378_v2 }
 0x27c PF: > { %s14_s23 = sadd.s32 1, %s4362_s23   ;;  %s5266_s15 = smov %s4334_s16 }
 0x27d   : > { %p11_p2 = scmp.ge.s32.totalorder %s14_s23, 6   ;;  %s5267_s16 = smov %s4461_s8 }
 0x27e   : > { %s5268_s17 = smov %s4342_s18  ;;  %s5269_s18 = smov %s4450_s30 }
 0x27f   : > { %s5270_s19 = smov %s4354_s21  ;;  %s5271_s20 = smov %s4358_s22 }
 0x280   : > { %s5272_s21 = smov %s5275_s25  ;;  %s5273_s22 = smov %s5279_s26 }
 0x281   :  { %13 = sbr.rel (!%p11_p2) target bundleno = 5 (0x5), region = 162 }

// kernel: discriminator_forward.8
= control target key start
LH: loop header
LB: loop body
LE: loop exit
PB: predicated region body
PF: predicated region fallthrough
CT: control target
= control target key end

     0   :  { %s8631_s15 = smov 0   ;;  %s8633_s16 = smov 0   ;;  %s10082_s0 = inlined_call_operand.vmem [shape: bf16[2,16,4096], index: 0, kind: input, shape index: {}]   ;;  %s10083_s1 = inlined_call_operand.vmem [shape: bf16[4096,512], index: 1, kind: input, shape index: {}]   ;;  %s10084_s2 = inlined_call_operand.vmem [shape: f32[1,512], index: 2, kind: input, shape index: {}]   ;;  %s10085_s3 = inlined_call_operand.vmem [shape: f32[1,512], index: 3, kind: input, shape index: {}]   ;;  %s10086_s4 = inlined_call_operand.vmem [shape: bf16[2,16,512], index: 4, kind: output, shape index: {}]  }
   0x1   :  { %s8635_s17 = smov 0   ;;  %s8637_s18 = smov 0  }
   0x2   :  { %s8639_s19 = smov 0   ;;  %s8641_s20 = smov 0  }
   0x3   :  { %s8643_s21 = smov 0   ;;  %s8645_s22 = smov 0  }
   0x4   :  { %s8647_s23 = smov 0  }
   0x5 LB: > { %s7536_s24 = sadd.s32 4294967295, %s8604_s23   ;;  %s23_s25 = sadd.s32 1, %s8596_s21  ;;  %s8604_s23 = sphi %s8647_s23, %s14_s23   ;;  %s8600_s22 = sphi %s8645_s22, %s10095_s22   ;;  %s8596_s21 = sphi %s8643_s21, %s10094_s21   ;;  %s8592_s20 = sphi %s8641_s20, %s10093_s20   ;;  %s8588_s19 = sphi %s8639_s19, %s10092_s19   ;;  %s8584_s18 = sphi %s8637_s18, %s10091_s18   ;;  %s8580_s17 = sphi %s8635_s17, %s10090_s17   ;;  %s8576_s16 = sphi %s8633_s16, %s10089_s16   ;;  %s8572_s15 = sphi %s8631_s15, %s10088_s15  }
   0x6   : > { %p24_p0 = scmp.ge.s32.totalorder %s23_s25, 4  ;;  %s26_s26 = sadd.s32 1, %s8600_s22 }
   0x7   : > { %s59_s27 = sadd.s32 1, %s8584_s18  ;;  %p66_p1 = scmp.ne.s32.totalorder %s8584_s18, %s8580_s17 }
   0x8   : > { %s10097_s25 = smov (%p24_p0, %s23_s25), 0  ;;  %s10099_s26 = smov (!%p24_p0, %s26_s26), %s8600_s22 }
   0x9   : > { %s56_s28 = ssub.s32 %s8596_s21, %s10097_s25  ;;  %p67_p2 = scmp.eq.s32.totalorder %s8604_s23, 0 }
   0xa   : > { %p28_p3 = scmp.ge.s32.totalorder %s10099_s26, 2  ;;  %p57_p4 = scmp.eq.s32.totalorder %s56_s28, 0 }
   0xb   : > { %p68_p5 = por %p67_p2, %p66_p1  ;;  %s139_s29 = sadd.s32 1, %s8576_s16 }
   0xc   : > { %s10101_s26 = smov (%p28_p3, %s10099_s26), 0  ;;  %p149_p6 = scmp.ne.s32.totalorder %s8576_s16, %s8572_s15 }
   0xd   : > { %s8692_s30 = scalar_select %p57_p4, %s8584_s18, %s59_s27  }
   0xe   : > { %s134_s5 = ssub.s32 %s8600_s22, %s10101_s26  ;;  %p150_p7 = scmp.eq.s32.totalorder %s7536_s24, 7 }
   0xf   : > { %s136_s6 = sor.u32 %s134_s5, %s56_s28  ;;  %p7539_p10 = scmp.ge.s32.totalorder %s8604_s23, 8 }
  0x10   : > { %p137_p8 = scmp.eq.s32.totalorder %s136_s6, 0  ;;  %p8698_p9 = por %p150_p7, %p149_p6 }
  0x11   : > { %172 = sbr.rel (%p7539_p10) target bundleno = 369 (0x171), region = 16 }
  0x12   : > { %s8703_s8 = scalar_select %p137_p8, %s8576_s16, %s139_s29  }
  0x18   : > { %183 = sbr.rel (!%p68_p5) target bundleno = 369 (0x171), region = 24  ;;  %s185_s9 = sand.u32 (%p68_p5), 1, %s8584_s18  }
  0x19   : > { %s7541_s10 = sshll.u32 (%p68_p5), %s8596_s21, 2  ;;  %s7540_s11 = sshll.u32 (%p68_p5), %s185_s9, 11 }
  0x1a   : > { %s8711_s14 = scalar_lea.vmem (%p68_p5), %s10083_s1, %s7541_s10  ;;  %s8715_s24 = scalar_lea.vmem (%p68_p5), [#allocation2], %s7540_s11 }
  0x1b   : > { %v205_v0 = vld [vmem:[%s8711_s14] sm:$0xf] (%p68_p5)  ;;  %v207_v1 = vld [vmem:[%s8711_s14 + $0x10] sm:$0xf] (%p68_p5) }
  0x1c   : > { %206 = vst [vmem:[%s8715_s24] sm:$0xf] (%p68_p5), %v205_v0  ;;  %208 = vst [vmem:[%s8715_s24 + $0x4] sm:$0xf] (%p68_p5), %v207_v1  ;;  %v209_v2 = vld [vmem:[%s8711_s14 + $0x20] sm:$0xf] (%p68_p5) }
  0x1d   : > { %v211_v3 = vld [vmem:[%s8711_s14 + $0x30] sm:$0xf] (%p68_p5)  ;;  %v213_v4 = vld [vmem:[%s8711_s14 + $0x40] sm:$0xf] (%p68_p5)  ;;  %210 = vst [vmem:[%s8715_s24 + $0x8] sm:$0xf] (%p68_p5), %v209_v2 }
  0x1e   : > { %212 = vst [vmem:[%s8715_s24 + $0xc] sm:$0xf] (%p68_p5), %v211_v3  ;;  %214 = vst [vmem:[%s8715_s24 + $0x10] sm:$0xf] (%p68_p5), %v213_v4  ;;  %v215_v5 = vld [vmem:[%s8711_s14 + $0x50] sm:$0xf] (%p68_p5) }
  0x1f   : > { %v217_v6 = vld [vmem:[%s8711_s14 + $0x60] sm:$0xf]  ;;  %v219_v7 = vld [vmem:[%s8711_s14 + $0x70] sm:$0xf]  ;;  %216 = vst [vmem:[%s8715_s24 + $0x14] sm:$0xf] %v215_v5 }
  0x20   : > { %218 = vst [vmem:[%s8715_s24 + $0x18] sm:$0xf] %v217_v6  ;;  %220 = vst [vmem:[%s8715_s24 + $0x1c] sm:$0xf] %v219_v7  ;;  %v221_v8 = vld [vmem:[%s8711_s14 + $0x80] sm:$0xf] }
  0x21   : > { %v223_v9 = vld [vmem:[%s8711_s14 + $0x90] sm:$0xf]  ;;  %v225_v10 = vld [vmem:[%s8711_s14 + $0xa0] sm:$0xf]  ;;  %222 = vst [vmem:[%s8715_s24 + $0x20] sm:$0xf] %v221_v8 }
  0x22   : > { %224 = vst [vmem:[%s8715_s24 + $0x24] sm:$0xf] %v223_v9  ;;  %226 = vst [vmem:[%s8715_s24 + $0x28] sm:$0xf] %v225_v10  ;;  %v227_v11 = vld [vmem:[%s8711_s14 + $0xb0] sm:$0xf] }
  0x23   : > { %v229_v12 = vld [vmem:[%s8711_s14 + $0xc0] sm:$0xf]  ;;  %v231_v13 = vld [vmem:[%s8711_s14 + $0xd0] sm:$0xf]  ;;  %228 = vst [vmem:[%s8715_s24 + $0x2c] sm:$0xf] %v227_v11 }
  0x24   : > { %230 = vst [vmem:[%s8715_s24 + $0x30] sm:$0xf] %v229_v12  ;;  %232 = vst [vmem:[%s8715_s24 + $0x34] sm:$0xf] %v231_v13  ;;  %v233_v14 = vld [vmem:[%s8711_s14 + $0xe0] sm:$0xf] }
  0x25   : > { %v235_v15 = vld [vmem:[%s8711_s14 + $0xf0] sm:$0xf]  ;;  %v237_v16 = vld [vmem:[%s8711_s14 + $0x100] sm:$0xf]  ;;  %234 = vst [vmem:[%s8715_s24 + $0x38] sm:$0xf] %v233_v14 }
  0x26   : > { %236 = vst [vmem:[%s8715_s24 + $0x3c] sm:$0xf] %v235_v15  ;;  %238 = vst [vmem:[%s8715_s24 + $0x40] sm:$0xf] %v237_v16  ;;  %v239_v17 = vld [vmem:[%s8711_s14 + $0x110] sm:$0xf] }
  0x27   : > { %v241_v18 = vld [vmem:[%s8711_s14 + $0x120] sm:$0xf]  ;;  %v243_v19 = vld [vmem:[%s8711_s14 + $0x130] sm:$0xf]  ;;  %240 = vst [vmem:[%s8715_s24 + $0x44] sm:$0xf] %v239_v17 }
  0x28   : > { %242 = vst [vmem:[%s8715_s24 + $0x48] sm:$0xf] %v241_v18  ;;  %244 = vst [vmem:[%s8715_s24 + $0x4c] sm:$0xf] %v243_v19  ;;  %v245_v20 = vld [vmem:[%s8711_s14 + $0x140] sm:$0xf] }
  0x29   : > { %v247_v21 = vld [vmem:[%s8711_s14 + $0x150] sm:$0xf]  ;;  %v249_v22 = vld [vmem:[%s8711_s14 + $0x160] sm:$0xf]  ;;  %246 = vst [vmem:[%s8715_s24 + $0x50] sm:$0xf] %v245_v20 }
  0x2a   : > { %248 = vst [vmem:[%s8715_s24 + $0x54] sm:$0xf] %v247_v21  ;;  %250 = vst [vmem:[%s8715_s24 + $0x58] sm:$0xf] %v249_v22  ;;  %v251_v23 = vld [vmem:[%s8711_s14 + $0x170] sm:$0xf] }
  0x2b   : > { %v253_v24 = vld [vmem:[%s8711_s14 + $0x180] sm:$0xf]  ;;  %v255_v25 = vld [vmem:[%s8711_s14 + $0x190] sm:$0xf]  ;;  %252 = vst [vmem:[%s8715_s24 + $0x5c] sm:$0xf] %v251_v23 }
  0x2c   : > { %254 = vst [vmem:[%s8715_s24 + $0x60] sm:$0xf] %v253_v24  ;;  %256 = vst [vmem:[%s8715_s24 + $0x64] sm:$0xf] %v255_v25  ;;  %v257_v26 = vld [vmem:[%s8711_s14 + $0x1a0] sm:$0xf] }
  0x2d   : > { %v259_v27 = vld [vmem:[%s8711_s14 + $0x1b0] sm:$0xf]  ;;  %v261_v28 = vld [vmem:[%s8711_s14 + $0x1c0] sm:$0xf]  ;;  %258 = vst [vmem:[%s8715_s24 + $0x68] sm:$0xf] %v257_v26 }
  0x2e   : > { %260 = vst [vmem:[%s8715_s24 + $0x6c] sm:$0xf] %v259_v27  ;;  %262 = vst [vmem:[%s8715_s24 + $0x70] sm:$0xf] %v261_v28  ;;  %v263_v29 = vld [vmem:[%s8711_s14 + $0x1d0] sm:$0xf] }
  0x2f   : > { %v265_v30 = vld [vmem:[%s8711_s14 + $0x1e0] sm:$0xf]  ;;  %v267_v31 = vld [vmem:[%s8711_s14 + $0x1f0] sm:$0xf]  ;;  %264 = vst [vmem:[%s8715_s24 + $0x74] sm:$0xf] %v263_v29 }
  0x30   : > { %266 = vst [vmem:[%s8715_s24 + $0x78] sm:$0xf] %v265_v30  ;;  %268 = vst [vmem:[%s8715_s24 + $0x7c] sm:$0xf] %v267_v31  ;;  %v269_v32 = vld [vmem:[%s8711_s14 + $0x200] sm:$0xf] }
  0x31   : > { %v271_v33 = vld [vmem:[%s8711_s14 + $0x210] sm:$0xf]  ;;  %v273_v34 = vld [vmem:[%s8711_s14 + $0x220] sm:$0xf]  ;;  %270 = vst [vmem:[%s8715_s24 + $0x80] sm:$0xf] %v269_v32 }
  0x32   : > { %272 = vst [vmem:[%s8715_s24 + $0x84] sm:$0xf] %v271_v33  ;;  %274 = vst [vmem:[%s8715_s24 + $0x88] sm:$0xf] %v273_v34  ;;  %v275_v35 = vld [vmem:[%s8711_s14 + $0x230] sm:$0xf] }
  0x33   : > { %v277_v36 = vld [vmem:[%s8711_s14 + $0x240] sm:$0xf]  ;;  %v279_v37 = vld [vmem:[%s8711_s14 + $0x250] sm:$0xf]  ;;  %276 = vst [vmem:[%s8715_s24 + $0x8c] sm:$0xf] %v275_v35 }
  0x34   : > { %278 = vst [vmem:[%s8715_s24 + $0x90] sm:$0xf] %v277_v36  ;;  %280 = vst [vmem:[%s8715_s24 + $0x94] sm:$0xf] %v279_v37  ;;  %v281_v38 = vld [vmem:[%s8711_s14 + $0x260] sm:$0xf] }
  0x35   : > { %v283_v39 = vld [vmem:[%s8711_s14 + $0x270] sm:$0xf]  ;;  %v285_v40 = vld [vmem:[%s8711_s14 + $0x280] sm:$0xf]  ;;  %282 = vst [vmem:[%s8715_s24 + $0x98] sm:$0xf] %v281_v38 }
  0x36   : > { %284 = vst [vmem:[%s8715_s24 + $0x9c] sm:$0xf] %v283_v39  ;;  %286 = vst [vmem:[%s8715_s24 + $0xa0] sm:$0xf] %v285_v40  ;;  %v287_v41 = vld [vmem:[%s8711_s14 + $0x290] sm:$0xf] }
  0x37   : > { %v289_v42 = vld [vmem:[%s8711_s14 + $0x2a0] sm:$0xf]  ;;  %v291_v43 = vld [vmem:[%s8711_s14 + $0x2b0] sm:$0xf]  ;;  %288 = vst [vmem:[%s8715_s24 + $0xa4] sm:$0xf] %v287_v41 }
  0x38   : > { %290 = vst [vmem:[%s8715_s24 + $0xa8] sm:$0xf] %v289_v42  ;;  %292 = vst [vmem:[%s8715_s24 + $0xac] sm:$0xf] %v291_v43  ;;  %v293_v44 = vld [vmem:[%s8711_s14 + $0x2c0] sm:$0xf] }
  0x39   : > { %v295_v45 = vld [vmem:[%s8711_s14 + $0x2d0] sm:$0xf]  ;;  %v297_v46 = vld [vmem:[%s8711_s14 + $0x2e0] sm:$0xf]  ;;  %294 = vst [vmem:[%s8715_s24 + $0xb0] sm:$0xf] %v293_v44 }
  0x3a   : > { %296 = vst [vmem:[%s8715_s24 + $0xb4] sm:$0xf] %v295_v45  ;;  %298 = vst [vmem:[%s8715_s24 + $0xb8] sm:$0xf] %v297_v46  ;;  %v299_v47 = vld [vmem:[%s8711_s14 + $0x2f0] sm:$0xf] }
  0x3b   : > { %v301_v48 = vld [vmem:[%s8711_s14 + $0x300] sm:$0xf]  ;;  %v303_v49 = vld [vmem:[%s8711_s14 + $0x310] sm:$0xf]  ;;  %300 = vst [vmem:[%s8715_s24 + $0xbc] sm:$0xf] %v299_v47 }
  0x3c   : > { %302 = vst [vmem:[%s8715_s24 + $0xc0] sm:$0xf] %v301_v48  ;;  %304 = vst [vmem:[%s8715_s24 + $0xc4] sm:$0xf] %v303_v49  ;;  %v305_v50 = vld [vmem:[%s8711_s14 + $0x320] sm:$0xf] }
  0x3d   : > { %v307_v51 = vld [vmem:[%s8711_s14 + $0x330] sm:$0xf]  ;;  %v309_v52 = vld [vmem:[%s8711_s14 + $0x340] sm:$0xf]  ;;  %306 = vst [vmem:[%s8715_s24 + $0xc8] sm:$0xf] %v305_v50 }
  0x3e   : > { %308 = vst [vmem:[%s8715_s24 + $0xcc] sm:$0xf] %v307_v51  ;;  %310 = vst [vmem:[%s8715_s24 + $0xd0] sm:$0xf] %v309_v52  ;;  %v311_v53 = vld [vmem:[%s8711_s14 + $0x350] sm:$0xf] }
  0x3f   : > { %v313_v54 = vld [vmem:[%s8711_s14 + $0x360] sm:$0xf]  ;;  %v315_v55 = vld [vmem:[%s8711_s14 + $0x370] sm:$0xf]  ;;  %312 = vst [vmem:[%s8715_s24 + $0xd4] sm:$0xf] %v311_v53 }
  0x40   : > { %314 = vst [vmem:[%s8715_s24 + $0xd8] sm:$0xf] %v313_v54  ;;  %316 = vst [vmem:[%s8715_s24 + $0xdc] sm:$0xf] %v315_v55  ;;  %v317_v56 = vld [vmem:[%s8711_s14 + $0x380] sm:$0xf] }
  0x41   : > { %v319_v57 = vld [vmem:[%s8711_s14 + $0x390] sm:$0xf]  ;;  %v321_v58 = vld [vmem:[%s8711_s14 + $0x3a0] sm:$0xf]  ;;  %318 = vst [vmem:[%s8715_s24 + $0xe0] sm:$0xf] %v317_v56 }
  0x42   : > { %320 = vst [vmem:[%s8715_s24 + $0xe4] sm:$0xf] %v319_v57  ;;  %322 = vst [vmem:[%s8715_s24 + $0xe8] sm:$0xf] %v321_v58  ;;  %v323_v59 = vld [vmem:[%s8711_s14 + $0x3b0] sm:$0xf] }
  0x43   : > { %v325_v60 = vld [vmem:[%s8711_s14 + $0x3c0] sm:$0xf]  ;;  %v327_v61 = vld [vmem:[%s8711_s14 + $0x3d0] sm:$0xf]  ;;  %324 = vst [vmem:[%s8715_s24 + $0xec] sm:$0xf] %v323_v59 }
  0x44   : > { %326 = vst [vmem:[%s8715_s24 + $0xf0] sm:$0xf] %v325_v60  ;;  %328 = vst [vmem:[%s8715_s24 + $0xf4] sm:$0xf] %v327_v61  ;;  %v329_v62 = vld [vmem:[%s8711_s14 + $0x3e0] sm:$0xf] }
  0x45   : > { %v331_v63 = vld [vmem:[%s8711_s14 + $0x3f0] sm:$0xf]  ;;  %v333_v0 = vld [vmem:[%s8711_s14 + $0x400] sm:$0xf]  ;;  %330 = vst [vmem:[%s8715_s24 + $0xf8] sm:$0xf] %v329_v62 }
  0x46   : > { %332 = vst [vmem:[%s8715_s24 + $0xfc] sm:$0xf] %v331_v63  ;;  %334 = vst [vmem:[%s8715_s24 + $0x100] sm:$0xf] %v333_v0  ;;  %v335_v1 = vld [vmem:[%s8711_s14 + $0x410] sm:$0xf] }
  0x47   : > { %v337_v2 = vld [vmem:[%s8711_s14 + $0x420] sm:$0xf]  ;;  %v339_v3 = vld [vmem:[%s8711_s14 + $0x430] sm:$0xf]  ;;  %336 = vst [vmem:[%s8715_s24 + $0x104] sm:$0xf] %v335_v1 }
  0x48   : > { %338 = vst [vmem:[%s8715_s24 + $0x108] sm:$0xf] %v337_v2  ;;  %340 = vst [vmem:[%s8715_s24 + $0x10c] sm:$0xf] %v339_v3  ;;  %v341_v4 = vld [vmem:[%s8711_s14 + $0x440] sm:$0xf] }
  0x49   : > { %v343_v5 = vld [vmem:[%s8711_s14 + $0x450] sm:$0xf]  ;;  %v345_v6 = vld [vmem:[%s8711_s14 + $0x460] sm:$0xf]  ;;  %342 = vst [vmem:[%s8715_s24 + $0x110] sm:$0xf] %v341_v4 }
  0x4a   : > { %344 = vst [vmem:[%s8715_s24 + $0x114] sm:$0xf] %v343_v5  ;;  %346 = vst [vmem:[%s8715_s24 + $0x118] sm:$0xf] %v345_v6  ;;  %v347_v7 = vld [vmem:[%s8711_s14 + $0x470] sm:$0xf] }
  0x4b   : > { %v349_v8 = vld [vmem:[%s8711_s14 + $0x480] sm:$0xf]  ;;  %v351_v9 = vld [vmem:[%s8711_s14 + $0x490] sm:$0xf]  ;;  %348 = vst [vmem:[%s8715_s24 + $0x11c] sm:$0xf] %v347_v7 }
  0x4c   : > { %350 = vst [vmem:[%s8715_s24 + $0x120] sm:$0xf] %v349_v8  ;;  %352 = vst [vmem:[%s8715_s24 + $0x124] sm:$0xf] %v351_v9  ;;  %v353_v10 = vld [vmem:[%s8711_s14 + $0x4a0] sm:$0xf] }
  0x4d   : > { %v355_v11 = vld [vmem:[%s8711_s14 + $0x4b0] sm:$0xf]  ;;  %v357_v12 = vld [vmem:[%s8711_s14 + $0x4c0] sm:$0xf]  ;;  %354 = vst [vmem:[%s8715_s24 + $0x128] sm:$0xf] %v353_v10 }
  0x4e   : > { %356 = vst [vmem:[%s8715_s24 + $0x12c] sm:$0xf] %v355_v11  ;;  %358 = vst [vmem:[%s8715_s24 + $0x130] sm:$0xf] %v357_v12  ;;  %v359_v13 = vld [vmem:[%s8711_s14 + $0x4d0] sm:$0xf] }
  0x4f   : > { %v361_v14 = vld [vmem:[%s8711_s14 + $0x4e0] sm:$0xf]  ;;  %v363_v15 = vld [vmem:[%s8711_s14 + $0x4f0] sm:$0xf]  ;;  %360 = vst [vmem:[%s8715_s24 + $0x134] sm:$0xf] %v359_v13 }
  0x50   : > { %362 = vst [vmem:[%s8715_s24 + $0x138] sm:$0xf] %v361_v14  ;;  %364 = vst [vmem:[%s8715_s24 + $0x13c] sm:$0xf] %v363_v15  ;;  %v365_v16 = vld [vmem:[%s8711_s14 + $0x500] sm:$0xf] }
  0x51   : > { %v367_v17 = vld [vmem:[%s8711_s14 + $0x510] sm:$0xf]  ;;  %v369_v18 = vld [vmem:[%s8711_s14 + $0x520] sm:$0xf]  ;;  %366 = vst [vmem:[%s8715_s24 + $0x140] sm:$0xf] %v365_v16 }
  0x52   : > { %368 = vst [vmem:[%s8715_s24 + $0x144] sm:$0xf] %v367_v17  ;;  %370 = vst [vmem:[%s8715_s24 + $0x148] sm:$0xf] %v369_v18  ;;  %v371_v19 = vld [vmem:[%s8711_s14 + $0x530] sm:$0xf] }
  0x53   : > { %v373_v20 = vld [vmem:[%s8711_s14 + $0x540] sm:$0xf]  ;;  %v375_v21 = vld [vmem:[%s8711_s14 + $0x550] sm:$0xf]  ;;  %372 = vst [vmem:[%s8715_s24 + $0x14c] sm:$0xf] %v371_v19 }
  0x54   : > { %374 = vst [vmem:[%s8715_s24 + $0x150] sm:$0xf] %v373_v20  ;;  %376 = vst [vmem:[%s8715_s24 + $0x154] sm:$0xf] %v375_v21  ;;  %v377_v22 = vld [vmem:[%s8711_s14 + $0x560] sm:$0xf] }
  0x55   : > { %v379_v23 = vld [vmem:[%s8711_s14 + $0x570] sm:$0xf]  ;;  %v381_v24 = vld [vmem:[%s8711_s14 + $0x580] sm:$0xf]  ;;  %378 = vst [vmem:[%s8715_s24 + $0x158] sm:$0xf] %v377_v22 }
  0x56   : > { %380 = vst [vmem:[%s8715_s24 + $0x15c] sm:$0xf] %v379_v23  ;;  %382 = vst [vmem:[%s8715_s24 + $0x160] sm:$0xf] %v381_v24  ;;  %v383_v25 = vld [vmem:[%s8711_s14 + $0x590] sm:$0xf] }
  0x57   : > { %v385_v26 = vld [vmem:[%s8711_s14 + $0x5a0] sm:$0xf]  ;;  %v387_v27 = vld [vmem:[%s8711_s14 + $0x5b0] sm:$0xf]  ;;  %384 = vst [vmem:[%s8715_s24 + $0x164] sm:$0xf] %v383_v25 }
  0x58   : > { %386 = vst [vmem:[%s8715_s24 + $0x168] sm:$0xf] %v385_v26  ;;  %388 = vst [vmem:[%s8715_s24 + $0x16c] sm:$0xf] %v387_v27  ;;  %v389_v28 = vld [vmem:[%s8711_s14 + $0x5c0] sm:$0xf] }
  0x59   : > { %v391_v29 = vld [vmem:[%s8711_s14 + $0x5d0] sm:$0xf]  ;;  %v393_v30 = vld [vmem:[%s8711_s14 + $0x5e0] sm:$0xf]  ;;  %390 = vst [vmem:[%s8715_s24 + $0x170] sm:$0xf] %v389_v28 }
  0x5a   : > { %392 = vst [vmem:[%s8715_s24 + $0x174] sm:$0xf] %v391_v29  ;;  %394 = vst [vmem:[%s8715_s24 + $0x178] sm:$0xf] %v393_v30  ;;  %v395_v31 = vld [vmem:[%s8711_s14 + $0x5f0] sm:$0xf] }
  0x5b   : > { %v397_v32 = vld [vmem:[%s8711_s14 + $0x600] sm:$0xf]  ;;  %v399_v33 = vld [vmem:[%s8711_s14 + $0x610] sm:$0xf]  ;;  %396 = vst [vmem:[%s8715_s24 + $0x17c] sm:$0xf] %v395_v31 }
  0x5c   : > { %398 = vst [vmem:[%s8715_s24 + $0x180] sm:$0xf] %v397_v32  ;;  %400 = vst [vmem:[%s8715_s24 + $0x184] sm:$0xf] %v399_v33  ;;  %v401_v34 = vld [vmem:[%s8711_s14 + $0x620] sm:$0xf] }
  0x5d   : > { %v403_v35 = vld [vmem:[%s8711_s14 + $0x630] sm:$0xf]  ;;  %v405_v36 = vld [vmem:[%s8711_s14 + $0x640] sm:$0xf]  ;;  %402 = vst [vmem:[%s8715_s24 + $0x188] sm:$0xf] %v401_v34 }
  0x5e   : > { %404 = vst [vmem:[%s8715_s24 + $0x18c] sm:$0xf] %v403_v35  ;;  %406 = vst [vmem:[%s8715_s24 + $0x190] sm:$0xf] %v405_v36  ;;  %v407_v37 = vld [vmem:[%s8711_s14 + $0x650] sm:$0xf] }
  0x5f   : > { %v409_v38 = vld [vmem:[%s8711_s14 + $0x660] sm:$0xf]  ;;  %v411_v39 = vld [vmem:[%s8711_s14 + $0x670] sm:$0xf]  ;;  %408 = vst [vmem:[%s8715_s24 + $0x194] sm:$0xf] %v407_v37 }
  0x60   : > { %410 = vst [vmem:[%s8715_s24 + $0x198] sm:$0xf] %v409_v38  ;;  %412 = vst [vmem:[%s8715_s24 + $0x19c] sm:$0xf] %v411_v39  ;;  %v413_v40 = vld [vmem:[%s8711_s14 + $0x680] sm:$0xf] }
  0x61   : > { %v415_v41 = vld [vmem:[%s8711_s14 + $0x690] sm:$0xf]  ;;  %v417_v42 = vld [vmem:[%s8711_s14 + $0x6a0] sm:$0xf]  ;;  %414 = vst [vmem:[%s8715_s24 + $0x1a0] sm:$0xf] %v413_v40 }
  0x62   : > { %416 = vst [vmem:[%s8715_s24 + $0x1a4] sm:$0xf] %v415_v41  ;;  %418 = vst [vmem:[%s8715_s24 + $0x1a8] sm:$0xf] %v417_v42  ;;  %v419_v43 = vld [vmem:[%s8711_s14 + $0x6b0] sm:$0xf] }
  0x63   : > { %v421_v44 = vld [vmem:[%s8711_s14 + $0x6c0] sm:$0xf]  ;;  %v423_v45 = vld [vmem:[%s8711_s14 + $0x6d0] sm:$0xf]  ;;  %420 = vst [vmem:[%s8715_s24 + $0x1ac] sm:$0xf] %v419_v43 }
  0x64   : > { %422 = vst [vmem:[%s8715_s24 + $0x1b0] sm:$0xf] %v421_v44  ;;  %424 = vst [vmem:[%s8715_s24 + $0x1b4] sm:$0xf] %v423_v45  ;;  %v425_v46 = vld [vmem:[%s8711_s14 + $0x6e0] sm:$0xf] }
  0x65   : > { %v427_v47 = vld [vmem:[%s8711_s14 + $0x6f0] sm:$0xf]  ;;  %v429_v48 = vld [vmem:[%s8711_s14 + $0x700] sm:$0xf]  ;;  %426 = vst [vmem:[%s8715_s24 + $0x1b8] sm:$0xf] %v425_v46 }
  0x66   : > { %428 = vst [vmem:[%s8715_s24 + $0x1bc] sm:$0xf] %v427_v47  ;;  %430 = vst [vmem:[%s8715_s24 + $0x1c0] sm:$0xf] %v429_v48  ;;  %v431_v49 = vld [vmem:[%s8711_s14 + $0x710] sm:$0xf] }
  0x67   : > { %v433_v50 = vld [vmem:[%s8711_s14 + $0x720] sm:$0xf]  ;;  %v435_v51 = vld [vmem:[%s8711_s14 + $0x730] sm:$0xf]  ;;  %432 = vst [vmem:[%s8715_s24 + $0x1c4] sm:$0xf] %v431_v49 }
  0x68   : > { %434 = vst [vmem:[%s8715_s24 + $0x1c8] sm:$0xf] %v433_v50  ;;  %436 = vst [vmem:[%s8715_s24 + $0x1cc] sm:$0xf] %v435_v51  ;;  %v437_v52 = vld [vmem:[%s8711_s14 + $0x740] sm:$0xf] }
  0x69   : > { %v439_v53 = vld [vmem:[%s8711_s14 + $0x750] sm:$0xf]  ;;  %v441_v54 = vld [vmem:[%s8711_s14 + $0x760] sm:$0xf]  ;;  %438 = vst [vmem:[%s8715_s24 + $0x1d0] sm:$0xf] %v437_v52 }
  0x6a   : > { %440 = vst [vmem:[%s8715_s24 + $0x1d4] sm:$0xf] %v439_v53  ;;  %442 = vst [vmem:[%s8715_s24 + $0x1d8] sm:$0xf] %v441_v54  ;;  %v443_v55 = vld [vmem:[%s8711_s14 + $0x770] sm:$0xf] }
  0x6b   : > { %v445_v56 = vld [vmem:[%s8711_s14 + $0x780] sm:$0xf]  ;;  %v447_v57 = vld [vmem:[%s8711_s14 + $0x790] sm:$0xf]  ;;  %444 = vst [vmem:[%s8715_s24 + $0x1dc] sm:$0xf] %v443_v55 }
  0x6c   : > { %446 = vst [vmem:[%s8715_s24 + $0x1e0] sm:$0xf] %v445_v56  ;;  %448 = vst [vmem:[%s8715_s24 + $0x1e4] sm:$0xf] %v447_v57  ;;  %v449_v58 = vld [vmem:[%s8711_s14 + $0x7a0] sm:$0xf] }
  0x6d   : > { %v451_v59 = vld [vmem:[%s8711_s14 + $0x7b0] sm:$0xf]  ;;  %v453_v60 = vld [vmem:[%s8711_s14 + $0x7c0] sm:$0xf]  ;;  %450 = vst [vmem:[%s8715_s24 + $0x1e8] sm:$0xf] %v449_v58 }
  0x6e   : > { %452 = vst [vmem:[%s8715_s24 + $0x1ec] sm:$0xf] %v451_v59  ;;  %454 = vst [vmem:[%s8715_s24 + $0x1f0] sm:$0xf] %v453_v60  ;;  %v455_v61 = vld [vmem:[%s8711_s14 + $0x7d0] sm:$0xf] }
  0x6f   : > { %v457_v62 = vld [vmem:[%s8711_s14 + $0x7e0] sm:$0xf]  ;;  %v459_v63 = vld [vmem:[%s8711_s14 + $0x7f0] sm:$0xf]  ;;  %456 = vst [vmem:[%s8715_s24 + $0x1f4] sm:$0xf] %v455_v61 }
  0x70   : > { %458 = vst [vmem:[%s8715_s24 + $0x1f8] sm:$0xf] %v457_v62  ;;  %460 = vst [vmem:[%s8715_s24 + $0x1fc] sm:$0xf] %v459_v63  ;;  %v461_v0 = vld [vmem:[%s8711_s14 + $0x800] sm:$0xf] }
  0x71   : > { %v463_v1 = vld [vmem:[%s8711_s14 + $0x810] sm:$0xf]  ;;  %v465_v2 = vld [vmem:[%s8711_s14 + $0x820] sm:$0xf]  ;;  %462 = vst [vmem:[%s8715_s24 + $0x200] sm:$0xf] %v461_v0 }
  0x72   : > { %464 = vst [vmem:[%s8715_s24 + $0x204] sm:$0xf] %v463_v1  ;;  %466 = vst [vmem:[%s8715_s24 + $0x208] sm:$0xf] %v465_v2  ;;  %v467_v3 = vld [vmem:[%s8711_s14 + $0x830] sm:$0xf] }
  0x73   : > { %v469_v4 = vld [vmem:[%s8711_s14 + $0x840] sm:$0xf]  ;;  %v471_v5 = vld [vmem:[%s8711_s14 + $0x850] sm:$0xf]  ;;  %468 = vst [vmem:[%s8715_s24 + $0x20c] sm:$0xf] %v467_v3 }
  0x74   : > { %470 = vst [vmem:[%s8715_s24 + $0x210] sm:$0xf] %v469_v4  ;;  %472 = vst [vmem:[%s8715_s24 + $0x214] sm:$0xf] %v471_v5  ;;  %v473_v6 = vld [vmem:[%s8711_s14 + $0x860] sm:$0xf] }
  0x75   : > { %v475_v7 = vld [vmem:[%s8711_s14 + $0x870] sm:$0xf]  ;;  %v477_v8 = vld [vmem:[%s8711_s14 + $0x880] sm:$0xf]  ;;  %474 = vst [vmem:[%s8715_s24 + $0x218] sm:$0xf] %v473_v6 }
  0x76   : > { %476 = vst [vmem:[%s8715_s24 + $0x21c] sm:$0xf] %v475_v7  ;;  %478 = vst [vmem:[%s8715_s24 + $0x220] sm:$0xf] %v477_v8  ;;  %v479_v9 = vld [vmem:[%s8711_s14 + $0x890] sm:$0xf] }
  0x77   : > { %v481_v10 = vld [vmem:[%s8711_s14 + $0x8a0] sm:$0xf]  ;;  %v483_v11 = vld [vmem:[%s8711_s14 + $0x8b0] sm:$0xf]  ;;  %480 = vst [vmem:[%s8715_s24 + $0x224] sm:$0xf] %v479_v9 }
  0x78   : > { %482 = vst [vmem:[%s8715_s24 + $0x228] sm:$0xf] %v481_v10  ;;  %484 = vst [vmem:[%s8715_s24 + $0x22c] sm:$0xf] %v483_v11  ;;  %v485_v12 = vld [vmem:[%s8711_s14 + $0x8c0] sm:$0xf] }
  0x79   : > { %v487_v13 = vld [vmem:[%s8711_s14 + $0x8d0] sm:$0xf]  ;;  %v489_v14 = vld [vmem:[%s8711_s14 + $0x8e0] sm:$0xf]  ;;  %486 = vst [vmem:[%s8715_s24 + $0x230] sm:$0xf] %v485_v12 }
  0x7a   : > { %488 = vst [vmem:[%s8715_s24 + $0x234] sm:$0xf] %v487_v13  ;;  %490 = vst [vmem:[%s8715_s24 + $0x238] sm:$0xf] %v489_v14  ;;  %v491_v15 = vld [vmem:[%s8711_s14 + $0x8f0] sm:$0xf] }
  0x7b   : > { %v493_v16 = vld [vmem:[%s8711_s14 + $0x900] sm:$0xf]  ;;  %v495_v17 = vld [vmem:[%s8711_s14 + $0x910] sm:$0xf]  ;;  %492 = vst [vmem:[%s8715_s24 + $0x23c] sm:$0xf] %v491_v15 }
  0x7c   : > { %494 = vst [vmem:[%s8715_s24 + $0x240] sm:$0xf] %v493_v16  ;;  %496 = vst [vmem:[%s8715_s24 + $0x244] sm:$0xf] %v495_v17  ;;  %v497_v18 = vld [vmem:[%s8711_s14 + $0x920] sm:$0xf] }
  0x7d   : > { %v499_v19 = vld [vmem:[%s8711_s14 + $0x930] sm:$0xf]  ;;  %v501_v20 = vld [vmem:[%s8711_s14 + $0x940] sm:$0xf]  ;;  %498 = vst [vmem:[%s8715_s24 + $0x248] sm:$0xf] %v497_v18 }
  0x7e   : > { %500 = vst [vmem:[%s8715_s24 + $0x24c] sm:$0xf] %v499_v19  ;;  %502 = vst [vmem:[%s8715_s24 + $0x250] sm:$0xf] %v501_v20  ;;  %v503_v21 = vld [vmem:[%s8711_s14 + $0x950] sm:$0xf] }
  0x7f   : > { %v505_v22 = vld [vmem:[%s8711_s14 + $0x960] sm:$0xf]  ;;  %v507_v23 = vld [vmem:[%s8711_s14 + $0x970] sm:$0xf]  ;;  %504 = vst [vmem:[%s8715_s24 + $0x254] sm:$0xf] %v503_v21 }
  0x80   : > { %506 = vst [vmem:[%s8715_s24 + $0x258] sm:$0xf] %v505_v22  ;;  %508 = vst [vmem:[%s8715_s24 + $0x25c] sm:$0xf] %v507_v23  ;;  %v509_v24 = vld [vmem:[%s8711_s14 + $0x980] sm:$0xf] }
  0x81   : > { %v511_v25 = vld [vmem:[%s8711_s14 + $0x990] sm:$0xf]  ;;  %v513_v26 = vld [vmem:[%s8711_s14 + $0x9a0] sm:$0xf]  ;;  %510 = vst [vmem:[%s8715_s24 + $0x260] sm:$0xf] %v509_v24 }
  0x82   : > { %512 = vst [vmem:[%s8715_s24 + $0x264] sm:$0xf] %v511_v25  ;;  %514 = vst [vmem:[%s8715_s24 + $0x268] sm:$0xf] %v513_v26  ;;  %v515_v27 = vld [vmem:[%s8711_s14 + $0x9b0] sm:$0xf] }
  0x83   : > { %v517_v28 = vld [vmem:[%s8711_s14 + $0x9c0] sm:$0xf]  ;;  %v519_v29 = vld [vmem:[%s8711_s14 + $0x9d0] sm:$0xf]  ;;  %516 = vst [vmem:[%s8715_s24 + $0x26c] sm:$0xf] %v515_v27 }
  0x84   : > { %518 = vst [vmem:[%s8715_s24 + $0x270] sm:$0xf] %v517_v28  ;;  %520 = vst [vmem:[%s8715_s24 + $0x274] sm:$0xf] %v519_v29  ;;  %v521_v30 = vld [vmem:[%s8711_s14 + $0x9e0] sm:$0xf] }
  0x85   : > { %v523_v31 = vld [vmem:[%s8711_s14 + $0x9f0] sm:$0xf]  ;;  %v525_v32 = vld [vmem:[%s8711_s14 + $0xa00] sm:$0xf]  ;;  %522 = vst [vmem:[%s8715_s24 + $0x278] sm:$0xf] %v521_v30 }
  0x86   : > { %524 = vst [vmem:[%s8715_s24 + $0x27c] sm:$0xf] %v523_v31  ;;  %526 = vst [vmem:[%s8715_s24 + $0x280] sm:$0xf] %v525_v32  ;;  %v527_v33 = vld [vmem:[%s8711_s14 + $0xa10] sm:$0xf] }
  0x87   : > { %v529_v34 = vld [vmem:[%s8711_s14 + $0xa20] sm:$0xf]  ;;  %v531_v35 = vld [vmem:[%s8711_s14 + $0xa30] sm:$0xf]  ;;  %528 = vst [vmem:[%s8715_s24 + $0x284] sm:$0xf] %v527_v33 }
  0x88   : > { %530 = vst [vmem:[%s8715_s24 + $0x288] sm:$0xf] %v529_v34  ;;  %532 = vst [vmem:[%s8715_s24 + $0x28c] sm:$0xf] %v531_v35  ;;  %v533_v36 = vld [vmem:[%s8711_s14 + $0xa40] sm:$0xf] }
  0x89   : > { %v535_v37 = vld [vmem:[%s8711_s14 + $0xa50] sm:$0xf]  ;;  %v537_v38 = vld [vmem:[%s8711_s14 + $0xa60] sm:$0xf]  ;;  %534 = vst [vmem:[%s8715_s24 + $0x290] sm:$0xf] %v533_v36 }
  0x8a   : > { %536 = vst [vmem:[%s8715_s24 + $0x294] sm:$0xf] %v535_v37  ;;  %538 = vst [vmem:[%s8715_s24 + $0x298] sm:$0xf] %v537_v38  ;;  %v539_v39 = vld [vmem:[%s8711_s14 + $0xa70] sm:$0xf] }
  0x8b   : > { %v541_v40 = vld [vmem:[%s8711_s14 + $0xa80] sm:$0xf]  ;;  %v543_v41 = vld [vmem:[%s8711_s14 + $0xa90] sm:$0xf]  ;;  %540 = vst [vmem:[%s8715_s24 + $0x29c] sm:$0xf] %v539_v39 }
  0x8c   : > { %542 = vst [vmem:[%s8715_s24 + $0x2a0] sm:$0xf] %v541_v40  ;;  %544 = vst [vmem:[%s8715_s24 + $0x2a4] sm:$0xf] %v543_v41  ;;  %v545_v42 = vld [vmem:[%s8711_s14 + $0xaa0] sm:$0xf] }
  0x8d   : > { %v547_v43 = vld [vmem:[%s8711_s14 + $0xab0] sm:$0xf]  ;;  %v549_v44 = vld [vmem:[%s8711_s14 + $0xac0] sm:$0xf]  ;;  %546 = vst [vmem:[%s8715_s24 + $0x2a8] sm:$0xf] %v545_v42 }
  0x8e   : > { %548 = vst [vmem:[%s8715_s24 + $0x2ac] sm:$0xf] %v547_v43  ;;  %550 = vst [vmem:[%s8715_s24 + $0x2b0] sm:$0xf] %v549_v44  ;;  %v551_v45 = vld [vmem:[%s8711_s14 + $0xad0] sm:$0xf] }
  0x8f   : > { %v553_v46 = vld [vmem:[%s8711_s14 + $0xae0] sm:$0xf]  ;;  %v555_v47 = vld [vmem:[%s8711_s14 + $0xaf0] sm:$0xf]  ;;  %552 = vst [vmem:[%s8715_s24 + $0x2b4] sm:$0xf] %v551_v45 }
  0x90   : > { %554 = vst [vmem:[%s8715_s24 + $0x2b8] sm:$0xf] %v553_v46  ;;  %556 = vst [vmem:[%s8715_s24 + $0x2bc] sm:$0xf] %v555_v47  ;;  %v557_v48 = vld [vmem:[%s8711_s14 + $0xb00] sm:$0xf] }
  0x91   : > { %v559_v49 = vld [vmem:[%s8711_s14 + $0xb10] sm:$0xf]  ;;  %v561_v50 = vld [vmem:[%s8711_s14 + $0xb20] sm:$0xf]  ;;  %558 = vst [vmem:[%s8715_s24 + $0x2c0] sm:$0xf] %v557_v48 }
  0x92   : > { %560 = vst [vmem:[%s8715_s24 + $0x2c4] sm:$0xf] %v559_v49  ;;  %562 = vst [vmem:[%s8715_s24 + $0x2c8] sm:$0xf] %v561_v50  ;;  %v563_v51 = vld [vmem:[%s8711_s14 + $0xb30] sm:$0xf] }
  0x93   : > { %v565_v52 = vld [vmem:[%s8711_s14 + $0xb40] sm:$0xf]  ;;  %v567_v53 = vld [vmem:[%s8711_s14 + $0xb50] sm:$0xf]  ;;  %564 = vst [vmem:[%s8715_s24 + $0x2cc] sm:$0xf] %v563_v51 }
  0x94   : > { %566 = vst [vmem:[%s8715_s24 + $0x2d0] sm:$0xf] %v565_v52  ;;  %568 = vst [vmem:[%s8715_s24 + $0x2d4] sm:$0xf] %v567_v53  ;;  %v569_v54 = vld [vmem:[%s8711_s14 + $0xb60] sm:$0xf] }
  0x95   : > { %v571_v55 = vld [vmem:[%s8711_s14 + $0xb70] sm:$0xf]  ;;  %v573_v56 = vld [vmem:[%s8711_s14 + $0xb80] sm:$0xf]  ;;  %570 = vst [vmem:[%s8715_s24 + $0x2d8] sm:$0xf] %v569_v54 }
  0x96   : > { %572 = vst [vmem:[%s8715_s24 + $0x2dc] sm:$0xf] %v571_v55  ;;  %574 = vst [vmem:[%s8715_s24 + $0x2e0] sm:$0xf] %v573_v56  ;;  %v575_v57 = vld [vmem:[%s8711_s14 + $0xb90] sm:$0xf] }
  0x97   : > { %v577_v58 = vld [vmem:[%s8711_s14 + $0xba0] sm:$0xf]  ;;  %v579_v59 = vld [vmem:[%s8711_s14 + $0xbb0] sm:$0xf]  ;;  %576 = vst [vmem:[%s8715_s24 + $0x2e4] sm:$0xf] %v575_v57 }
  0x98   : > { %578 = vst [vmem:[%s8715_s24 + $0x2e8] sm:$0xf] %v577_v58  ;;  %580 = vst [vmem:[%s8715_s24 + $0x2ec] sm:$0xf] %v579_v59  ;;  %v581_v60 = vld [vmem:[%s8711_s14 + $0xbc0] sm:$0xf] }
  0x99   : > { %v583_v61 = vld [vmem:[%s8711_s14 + $0xbd0] sm:$0xf]  ;;  %v585_v62 = vld [vmem:[%s8711_s14 + $0xbe0] sm:$0xf]  ;;  %582 = vst [vmem:[%s8715_s24 + $0x2f0] sm:$0xf] %v581_v60 }
  0x9a   : > { %584 = vst [vmem:[%s8715_s24 + $0x2f4] sm:$0xf] %v583_v61  ;;  %586 = vst [vmem:[%s8715_s24 + $0x2f8] sm:$0xf] %v585_v62  ;;  %v587_v63 = vld [vmem:[%s8711_s14 + $0xbf0] sm:$0xf] }
  0x9b   : > { %v589_v0 = vld [vmem:[%s8711_s14 + $0xc00] sm:$0xf]  ;;  %v591_v1 = vld [vmem:[%s8711_s14 + $0xc10] sm:$0xf]  ;;  %588 = vst [vmem:[%s8715_s24 + $0x2fc] sm:$0xf] %v587_v63 }
  0x9c   : > { %590 = vst [vmem:[%s8715_s24 + $0x300] sm:$0xf] %v589_v0  ;;  %592 = vst [vmem:[%s8715_s24 + $0x304] sm:$0xf] %v591_v1  ;;  %v593_v2 = vld [vmem:[%s8711_s14 + $0xc20] sm:$0xf] }
  0x9d   : > { %v595_v3 = vld [vmem:[%s8711_s14 + $0xc30] sm:$0xf]  ;;  %v597_v4 = vld [vmem:[%s8711_s14 + $0xc40] sm:$0xf]  ;;  %594 = vst [vmem:[%s8715_s24 + $0x308] sm:$0xf] %v593_v2 }
  0x9e   : > { %596 = vst [vmem:[%s8715_s24 + $0x30c] sm:$0xf] %v595_v3  ;;  %598 = vst [vmem:[%s8715_s24 + $0x310] sm:$0xf] %v597_v4  ;;  %v599_v5 = vld [vmem:[%s8711_s14 + $0xc50] sm:$0xf] }
  0x9f   : > { %v601_v6 = vld [vmem:[%s8711_s14 + $0xc60] sm:$0xf]  ;;  %v603_v7 = vld [vmem:[%s8711_s14 + $0xc70] sm:$0xf]  ;;  %600 = vst [vmem:[%s8715_s24 + $0x314] sm:$0xf] %v599_v5 }
  0xa0   : > { %602 = vst [vmem:[%s8715_s24 + $0x318] sm:$0xf] %v601_v6  ;;  %604 = vst [vmem:[%s8715_s24 + $0x31c] sm:$0xf] %v603_v7  ;;  %v605_v8 = vld [vmem:[%s8711_s14 + $0xc80] sm:$0xf] }
  0xa1   : > { %v607_v9 = vld [vmem:[%s8711_s14 + $0xc90] sm:$0xf]  ;;  %v609_v10 = vld [vmem:[%s8711_s14 + $0xca0] sm:$0xf]  ;;  %606 = vst [vmem:[%s8715_s24 + $0x320] sm:$0xf] %v605_v8 }
  0xa2   : > { %608 = vst [vmem:[%s8715_s24 + $0x324] sm:$0xf] %v607_v9  ;;  %610 = vst [vmem:[%s8715_s24 + $0x328] sm:$0xf] %v609_v10  ;;  %v611_v11 = vld [vmem:[%s8711_s14 + $0xcb0] sm:$0xf] }
  0xa3   : > { %v613_v12 = vld [vmem:[%s8711_s14 + $0xcc0] sm:$0xf]  ;;  %v615_v13 = vld [vmem:[%s8711_s14 + $0xcd0] sm:$0xf]  ;;  %612 = vst [vmem:[%s8715_s24 + $0x32c] sm:$0xf] %v611_v11 }
  0xa4   : > { %614 = vst [vmem:[%s8715_s24 + $0x330] sm:$0xf] %v613_v12  ;;  %616 = vst [vmem:[%s8715_s24 + $0x334] sm:$0xf] %v615_v13  ;;  %v617_v14 = vld [vmem:[%s8711_s14 + $0xce0] sm:$0xf] }
  0xa5   : > { %v619_v15 = vld [vmem:[%s8711_s14 + $0xcf0] sm:$0xf]  ;;  %v621_v16 = vld [vmem:[%s8711_s14 + $0xd00] sm:$0xf]  ;;  %618 = vst [vmem:[%s8715_s24 + $0x338] sm:$0xf] %v617_v14 }
  0xa6   : > { %620 = vst [vmem:[%s8715_s24 + $0x33c] sm:$0xf] %v619_v15  ;;  %622 = vst [vmem:[%s8715_s24 + $0x340] sm:$0xf] %v621_v16  ;;  %v623_v17 = vld [vmem:[%s8711_s14 + $0xd10] sm:$0xf] }
  0xa7   : > { %v625_v18 = vld [vmem:[%s8711_s14 + $0xd20] sm:$0xf]  ;;  %v627_v19 = vld [vmem:[%s8711_s14 + $0xd30] sm:$0xf]  ;;  %624 = vst [vmem:[%s8715_s24 + $0x344] sm:$0xf] %v623_v17 }
  0xa8   : > { %626 = vst [vmem:[%s8715_s24 + $0x348] sm:$0xf] %v625_v18  ;;  %628 = vst [vmem:[%s8715_s24 + $0x34c] sm:$0xf] %v627_v19  ;;  %v629_v20 = vld [vmem:[%s8711_s14 + $0xd40] sm:$0xf] }
  0xa9   : > { %v631_v21 = vld [vmem:[%s8711_s14 + $0xd50] sm:$0xf]  ;;  %v633_v22 = vld [vmem:[%s8711_s14 + $0xd60] sm:$0xf]  ;;  %630 = vst [vmem:[%s8715_s24 + $0x350] sm:$0xf] %v629_v20 }
  0xaa   : > { %632 = vst [vmem:[%s8715_s24 + $0x354] sm:$0xf] %v631_v21  ;;  %634 = vst [vmem:[%s8715_s24 + $0x358] sm:$0xf] %v633_v22  ;;  %v635_v23 = vld [vmem:[%s8711_s14 + $0xd70] sm:$0xf] }
  0xab   : > { %v637_v24 = vld [vmem:[%s8711_s14 + $0xd80] sm:$0xf]  ;;  %v639_v25 = vld [vmem:[%s8711_s14 + $0xd90] sm:$0xf]  ;;  %636 = vst [vmem:[%s8715_s24 + $0x35c] sm:$0xf] %v635_v23 }
  0xac   : > { %638 = vst [vmem:[%s8715_s24 + $0x360] sm:$0xf] %v637_v24  ;;  %640 = vst [vmem:[%s8715_s24 + $0x364] sm:$0xf] %v639_v25  ;;  %v641_v26 = vld [vmem:[%s8711_s14 + $0xda0] sm:$0xf] }
  0xad   : > { %v643_v27 = vld [vmem:[%s8711_s14 + $0xdb0] sm:$0xf]  ;;  %v645_v28 = vld [vmem:[%s8711_s14 + $0xdc0] sm:$0xf]  ;;  %642 = vst [vmem:[%s8715_s24 + $0x368] sm:$0xf] %v641_v26 }
  0xae   : > { %644 = vst [vmem:[%s8715_s24 + $0x36c] sm:$0xf] %v643_v27  ;;  %646 = vst [vmem:[%s8715_s24 + $0x370] sm:$0xf] %v645_v28  ;;  %v647_v29 = vld [vmem:[%s8711_s14 + $0xdd0] sm:$0xf] }
  0xaf   : > { %v649_v30 = vld [vmem:[%s8711_s14 + $0xde0] sm:$0xf]  ;;  %v651_v31 = vld [vmem:[%s8711_s14 + $0xdf0] sm:$0xf]  ;;  %648 = vst [vmem:[%s8715_s24 + $0x374] sm:$0xf] %v647_v29 }
  0xb0   : > { %650 = vst [vmem:[%s8715_s24 + $0x378] sm:$0xf] %v649_v30  ;;  %652 = vst [vmem:[%s8715_s24 + $0x37c] sm:$0xf] %v651_v31  ;;  %v653_v32 = vld [vmem:[%s8711_s14 + $0xe00] sm:$0xf] }
  0xb1   : > { %v655_v33 = vld [vmem:[%s8711_s14 + $0xe10] sm:$0xf]  ;;  %v657_v34 = vld [vmem:[%s8711_s14 + $0xe20] sm:$0xf]  ;;  %654 = vst [vmem:[%s8715_s24 + $0x380] sm:$0xf] %v653_v32 }
  0xb2   : > { %656 = vst [vmem:[%s8715_s24 + $0x384] sm:$0xf] %v655_v33  ;;  %658 = vst [vmem:[%s8715_s24 + $0x388] sm:$0xf] %v657_v34  ;;  %v659_v35 = vld [vmem:[%s8711_s14 + $0xe30] sm:$0xf] }
  0xb3   : > { %v661_v36 = vld [vmem:[%s8711_s14 + $0xe40] sm:$0xf]  ;;  %v663_v37 = vld [vmem:[%s8711_s14 + $0xe50] sm:$0xf]  ;;  %660 = vst [vmem:[%s8715_s24 + $0x38c] sm:$0xf] %v659_v35 }
  0xb4   : > { %662 = vst [vmem:[%s8715_s24 + $0x390] sm:$0xf] %v661_v36  ;;  %664 = vst [vmem:[%s8715_s24 + $0x394] sm:$0xf] %v663_v37  ;;  %v665_v38 = vld [vmem:[%s8711_s14 + $0xe60] sm:$0xf] }
  0xb5   : > { %v667_v39 = vld [vmem:[%s8711_s14 + $0xe70] sm:$0xf]  ;;  %v669_v40 = vld [vmem:[%s8711_s14 + $0xe80] sm:$0xf]  ;;  %666 = vst [vmem:[%s8715_s24 + $0x398] sm:$0xf] %v665_v38 }
  0xb6   : > { %668 = vst [vmem:[%s8715_s24 + $0x39c] sm:$0xf] %v667_v39  ;;  %670 = vst [vmem:[%s8715_s24 + $0x3a0] sm:$0xf] %v669_v40  ;;  %v671_v41 = vld [vmem:[%s8711_s14 + $0xe90] sm:$0xf] }
  0xb7   : > { %v673_v42 = vld [vmem:[%s8711_s14 + $0xea0] sm:$0xf]  ;;  %v675_v43 = vld [vmem:[%s8711_s14 + $0xeb0] sm:$0xf]  ;;  %672 = vst [vmem:[%s8715_s24 + $0x3a4] sm:$0xf] %v671_v41 }
  0xb8   : > { %674 = vst [vmem:[%s8715_s24 + $0x3a8] sm:$0xf] %v673_v42  ;;  %676 = vst [vmem:[%s8715_s24 + $0x3ac] sm:$0xf] %v675_v43  ;;  %v677_v44 = vld [vmem:[%s8711_s14 + $0xec0] sm:$0xf] }
  0xb9   : > { %v679_v45 = vld [vmem:[%s8711_s14 + $0xed0] sm:$0xf]  ;;  %v681_v46 = vld [vmem:[%s8711_s14 + $0xee0] sm:$0xf]  ;;  %678 = vst [vmem:[%s8715_s24 + $0x3b0] sm:$0xf] %v677_v44 }
  0xba   : > { %680 = vst [vmem:[%s8715_s24 + $0x3b4] sm:$0xf] %v679_v45  ;;  %682 = vst [vmem:[%s8715_s24 + $0x3b8] sm:$0xf] %v681_v46  ;;  %v683_v47 = vld [vmem:[%s8711_s14 + $0xef0] sm:$0xf] }
  0xbb   : > { %v685_v48 = vld [vmem:[%s8711_s14 + $0xf00] sm:$0xf]  ;;  %v687_v49 = vld [vmem:[%s8711_s14 + $0xf10] sm:$0xf]  ;;  %684 = vst [vmem:[%s8715_s24 + $0x3bc] sm:$0xf] %v683_v47 }
  0xbc   : > { %686 = vst [vmem:[%s8715_s24 + $0x3c0] sm:$0xf] %v685_v48  ;;  %688 = vst [vmem:[%s8715_s24 + $0x3c4] sm:$0xf] %v687_v49  ;;  %v689_v50 = vld [vmem:[%s8711_s14 + $0xf20] sm:$0xf] }
  0xbd   : > { %v691_v51 = vld [vmem:[%s8711_s14 + $0xf30] sm:$0xf]  ;;  %v693_v52 = vld [vmem:[%s8711_s14 + $0xf40] sm:$0xf]  ;;  %690 = vst [vmem:[%s8715_s24 + $0x3c8] sm:$0xf] %v689_v50 }
  0xbe   : > { %692 = vst [vmem:[%s8715_s24 + $0x3cc] sm:$0xf] %v691_v51  ;;  %694 = vst [vmem:[%s8715_s24 + $0x3d0] sm:$0xf] %v693_v52  ;;  %v695_v53 = vld [vmem:[%s8711_s14 + $0xf50] sm:$0xf] }
  0xbf   : > { %v697_v54 = vld [vmem:[%s8711_s14 + $0xf60] sm:$0xf]  ;;  %v699_v55 = vld [vmem:[%s8711_s14 + $0xf70] sm:$0xf]  ;;  %696 = vst [vmem:[%s8715_s24 + $0x3d4] sm:$0xf] %v695_v53 }
  0xc0   : > { %698 = vst [vmem:[%s8715_s24 + $0x3d8] sm:$0xf] %v697_v54  ;;  %700 = vst [vmem:[%s8715_s24 + $0x3dc] sm:$0xf] %v699_v55  ;;  %v701_v56 = vld [vmem:[%s8711_s14 + $0xf80] sm:$0xf] }
  0xc1   : > { %v703_v57 = vld [vmem:[%s8711_s14 + $0xf90] sm:$0xf]  ;;  %v705_v58 = vld [vmem:[%s8711_s14 + $0xfa0] sm:$0xf]  ;;  %702 = vst [vmem:[%s8715_s24 + $0x3e0] sm:$0xf] %v701_v56 }
  0xc2   : > { %704 = vst [vmem:[%s8715_s24 + $0x3e4] sm:$0xf] %v703_v57  ;;  %706 = vst [vmem:[%s8715_s24 + $0x3e8] sm:$0xf] %v705_v58  ;;  %v707_v59 = vld [vmem:[%s8711_s14 + $0xfb0] sm:$0xf] }
  0xc3   : > { %v709_v60 = vld [vmem:[%s8711_s14 + $0xfc0] sm:$0xf]  ;;  %v711_v61 = vld [vmem:[%s8711_s14 + $0xfd0] sm:$0xf]  ;;  %708 = vst [vmem:[%s8715_s24 + $0x3ec] sm:$0xf] %v707_v59 }
  0xc4   : > { %710 = vst [vmem:[%s8715_s24 + $0x3f0] sm:$0xf] %v709_v60  ;;  %712 = vst [vmem:[%s8715_s24 + $0x3f4] sm:$0xf] %v711_v61  ;;  %v713_v62 = vld [vmem:[%s8711_s14 + $0xfe0] sm:$0xf] }
  0xc5   : > { %v715_v63 = vld [vmem:[%s8711_s14 + $0xff0] sm:$0xf]  ;;  %v717_v0 = vld [vmem:[%s8711_s14 + $0x1000] sm:$0xf]  ;;  %714 = vst [vmem:[%s8715_s24 + $0x3f8] sm:$0xf] %v713_v62 }
  0xc6   : > { %716 = vst [vmem:[%s8715_s24 + $0x3fc] sm:$0xf] %v715_v63  ;;  %718 = vst [vmem:[%s8715_s24 + $0x400] sm:$0xf] %v717_v0  ;;  %v719_v1 = vld [vmem:[%s8711_s14 + $0x1010] sm:$0xf] }
  0xc7   : > { %v721_v2 = vld [vmem:[%s8711_s14 + $0x1020] sm:$0xf]  ;;  %v723_v3 = vld [vmem:[%s8711_s14 + $0x1030] sm:$0xf]  ;;  %720 = vst [vmem:[%s8715_s24 + $0x404] sm:$0xf] %v719_v1 }
  0xc8   : > { %722 = vst [vmem:[%s8715_s24 + $0x408] sm:$0xf] %v721_v2  ;;  %724 = vst [vmem:[%s8715_s24 + $0x40c] sm:$0xf] %v723_v3  ;;  %v725_v4 = vld [vmem:[%s8711_s14 + $0x1040] sm:$0xf] }
  0xc9   : > { %v727_v5 = vld [vmem:[%s8711_s14 + $0x1050] sm:$0xf]  ;;  %v729_v6 = vld [vmem:[%s8711_s14 + $0x1060] sm:$0xf]  ;;  %726 = vst [vmem:[%s8715_s24 + $0x410] sm:$0xf] %v725_v4 }
  0xca   : > { %728 = vst [vmem:[%s8715_s24 + $0x414] sm:$0xf] %v727_v5  ;;  %730 = vst [vmem:[%s8715_s24 + $0x418] sm:$0xf] %v729_v6  ;;  %v731_v7 = vld [vmem:[%s8711_s14 + $0x1070] sm:$0xf] }
  0xcb   : > { %v733_v8 = vld [vmem:[%s8711_s14 + $0x1080] sm:$0xf]  ;;  %v735_v9 = vld [vmem:[%s8711_s14 + $0x1090] sm:$0xf]  ;;  %732 = vst [vmem:[%s8715_s24 + $0x41c] sm:$0xf] %v731_v7 }
  0xcc   : > { %734 = vst [vmem:[%s8715_s24 + $0x420] sm:$0xf] %v733_v8  ;;  %736 = vst [vmem:[%s8715_s24 + $0x424] sm:$0xf] %v735_v9  ;;  %v737_v10 = vld [vmem:[%s8711_s14 + $0x10a0] sm:$0xf] }
  0xcd   : > { %v739_v11 = vld [vmem:[%s8711_s14 + $0x10b0] sm:$0xf]  ;;  %v741_v12 = vld [vmem:[%s8711_s14 + $0x10c0] sm:$0xf]  ;;  %738 = vst [vmem:[%s8715_s24 + $0x428] sm:$0xf] %v737_v10 }
  0xce   : > { %740 = vst [vmem:[%s8715_s24 + $0x42c] sm:$0xf] %v739_v11  ;;  %742 = vst [vmem:[%s8715_s24 + $0x430] sm:$0xf] %v741_v12  ;;  %v743_v13 = vld [vmem:[%s8711_s14 + $0x10d0] sm:$0xf] }
  0xcf   : > { %v745_v14 = vld [vmem:[%s8711_s14 + $0x10e0] sm:$0xf]  ;;  %v747_v15 = vld [vmem:[%s8711_s14 + $0x10f0] sm:$0xf]  ;;  %744 = vst [vmem:[%s8715_s24 + $0x434] sm:$0xf] %v743_v13 }
  0xd0   : > { %746 = vst [vmem:[%s8715_s24 + $0x438] sm:$0xf] %v745_v14  ;;  %748 = vst [vmem:[%s8715_s24 + $0x43c] sm:$0xf] %v747_v15  ;;  %v749_v16 = vld [vmem:[%s8711_s14 + $0x1100] sm:$0xf] }
  0xd1   : > { %v751_v17 = vld [vmem:[%s8711_s14 + $0x1110] sm:$0xf]  ;;  %v753_v18 = vld [vmem:[%s8711_s14 + $0x1120] sm:$0xf]  ;;  %750 = vst [vmem:[%s8715_s24 + $0x440] sm:$0xf] %v749_v16 }
  0xd2   : > { %752 = vst [vmem:[%s8715_s24 + $0x444] sm:$0xf] %v751_v17  ;;  %754 = vst [vmem:[%s8715_s24 + $0x448] sm:$0xf] %v753_v18  ;;  %v755_v19 = vld [vmem:[%s8711_s14 + $0x1130] sm:$0xf] }
  0xd3   : > { %v757_v20 = vld [vmem:[%s8711_s14 + $0x1140] sm:$0xf]  ;;  %v759_v21 = vld [vmem:[%s8711_s14 + $0x1150] sm:$0xf]  ;;  %756 = vst [vmem:[%s8715_s24 + $0x44c] sm:$0xf] %v755_v19 }
  0xd4   : > { %758 = vst [vmem:[%s8715_s24 + $0x450] sm:$0xf] %v757_v20  ;;  %760 = vst [vmem:[%s8715_s24 + $0x454] sm:$0xf] %v759_v21  ;;  %v761_v22 = vld [vmem:[%s8711_s14 + $0x1160] sm:$0xf] }
  0xd5   : > { %v763_v23 = vld [vmem:[%s8711_s14 + $0x1170] sm:$0xf]  ;;  %v765_v24 = vld [vmem:[%s8711_s14 + $0x1180] sm:$0xf]  ;;  %762 = vst [vmem:[%s8715_s24 + $0x458] sm:$0xf] %v761_v22 }
  0xd6   : > { %764 = vst [vmem:[%s8715_s24 + $0x45c] sm:$0xf] %v763_v23  ;;  %766 = vst [vmem:[%s8715_s24 + $0x460] sm:$0xf] %v765_v24  ;;  %v767_v25 = vld [vmem:[%s8711_s14 + $0x1190] sm:$0xf] }
  0xd7   : > { %v769_v26 = vld [vmem:[%s8711_s14 + $0x11a0] sm:$0xf]  ;;  %v771_v27 = vld [vmem:[%s8711_s14 + $0x11b0] sm:$0xf]  ;;  %768 = vst [vmem:[%s8715_s24 + $0x464] sm:$0xf] %v767_v25 }
  0xd8   : > { %770 = vst [vmem:[%s8715_s24 + $0x468] sm:$0xf] %v769_v26  ;;  %772 = vst [vmem:[%s8715_s24 + $0x46c] sm:$0xf] %v771_v27  ;;  %v773_v28 = vld [vmem:[%s8711_s14 + $0x11c0] sm:$0xf] }
  0xd9   : > { %v775_v29 = vld [vmem:[%s8711_s14 + $0x11d0] sm:$0xf]  ;;  %v777_v30 = vld [vmem:[%s8711_s14 + $0x11e0] sm:$0xf]  ;;  %774 = vst [vmem:[%s8715_s24 + $0x470] sm:$0xf] %v773_v28 }
  0xda   : > { %776 = vst [vmem:[%s8715_s24 + $0x474] sm:$0xf] %v775_v29  ;;  %778 = vst [vmem:[%s8715_s24 + $0x478] sm:$0xf] %v777_v30  ;;  %v779_v31 = vld [vmem:[%s8711_s14 + $0x11f0] sm:$0xf] }
  0xdb   : > { %v781_v32 = vld [vmem:[%s8711_s14 + $0x1200] sm:$0xf]  ;;  %v783_v33 = vld [vmem:[%s8711_s14 + $0x1210] sm:$0xf]  ;;  %780 = vst [vmem:[%s8715_s24 + $0x47c] sm:$0xf] %v779_v31 }
  0xdc   : > { %782 = vst [vmem:[%s8715_s24 + $0x480] sm:$0xf] %v781_v32  ;;  %784 = vst [vmem:[%s8715_s24 + $0x484] sm:$0xf] %v783_v33  ;;  %v785_v34 = vld [vmem:[%s8711_s14 + $0x1220] sm:$0xf] }
  0xdd   : > { %v787_v35 = vld [vmem:[%s8711_s14 + $0x1230] sm:$0xf]  ;;  %v789_v36 = vld [vmem:[%s8711_s14 + $0x1240] sm:$0xf]  ;;  %786 = vst [vmem:[%s8715_s24 + $0x488] sm:$0xf] %v785_v34 }
  0xde   : > { %788 = vst [vmem:[%s8715_s24 + $0x48c] sm:$0xf] %v787_v35  ;;  %790 = vst [vmem:[%s8715_s24 + $0x490] sm:$0xf] %v789_v36  ;;  %v791_v37 = vld [vmem:[%s8711_s14 + $0x1250] sm:$0xf] }
  0xdf   : > { %v793_v38 = vld [vmem:[%s8711_s14 + $0x1260] sm:$0xf]  ;;  %v795_v39 = vld [vmem:[%s8711_s14 + $0x1270] sm:$0xf]  ;;  %792 = vst [vmem:[%s8715_s24 + $0x494] sm:$0xf] %v791_v37 }
  0xe0   : > { %794 = vst [vmem:[%s8715_s24 + $0x498] sm:$0xf] %v793_v38  ;;  %796 = vst [vmem:[%s8715_s24 + $0x49c] sm:$0xf] %v795_v39  ;;  %v797_v40 = vld [vmem:[%s8711_s14 + $0x1280] sm:$0xf] }
  0xe1   : > { %v799_v41 = vld [vmem:[%s8711_s14 + $0x1290] sm:$0xf]  ;;  %v801_v42 = vld [vmem:[%s8711_s14 + $0x12a0] sm:$0xf]  ;;  %798 = vst [vmem:[%s8715_s24 + $0x4a0] sm:$0xf] %v797_v40 }
  0xe2   : > { %800 = vst [vmem:[%s8715_s24 + $0x4a4] sm:$0xf] %v799_v41  ;;  %802 = vst [vmem:[%s8715_s24 + $0x4a8] sm:$0xf] %v801_v42  ;;  %v803_v43 = vld [vmem:[%s8711_s14 + $0x12b0] sm:$0xf] }
  0xe3   : > { %v805_v44 = vld [vmem:[%s8711_s14 + $0x12c0] sm:$0xf]  ;;  %v807_v45 = vld [vmem:[%s8711_s14 + $0x12d0] sm:$0xf]  ;;  %804 = vst [vmem:[%s8715_s24 + $0x4ac] sm:$0xf] %v803_v43 }
  0xe4   : > { %806 = vst [vmem:[%s8715_s24 + $0x4b0] sm:$0xf] %v805_v44  ;;  %808 = vst [vmem:[%s8715_s24 + $0x4b4] sm:$0xf] %v807_v45  ;;  %v809_v46 = vld [vmem:[%s8711_s14 + $0x12e0] sm:$0xf] }
  0xe5   : > { %v811_v47 = vld [vmem:[%s8711_s14 + $0x12f0] sm:$0xf]  ;;  %v813_v48 = vld [vmem:[%s8711_s14 + $0x1300] sm:$0xf]  ;;  %810 = vst [vmem:[%s8715_s24 + $0x4b8] sm:$0xf] %v809_v46 }
  0xe6   : > { %812 = vst [vmem:[%s8715_s24 + $0x4bc] sm:$0xf] %v811_v47  ;;  %814 = vst [vmem:[%s8715_s24 + $0x4c0] sm:$0xf] %v813_v48  ;;  %v815_v49 = vld [vmem:[%s8711_s14 + $0x1310] sm:$0xf] }
  0xe7   : > { %v817_v50 = vld [vmem:[%s8711_s14 + $0x1320] sm:$0xf]  ;;  %v819_v51 = vld [vmem:[%s8711_s14 + $0x1330] sm:$0xf]  ;;  %816 = vst [vmem:[%s8715_s24 + $0x4c4] sm:$0xf] %v815_v49 }
  0xe8   : > { %818 = vst [vmem:[%s8715_s24 + $0x4c8] sm:$0xf] %v817_v50  ;;  %820 = vst [vmem:[%s8715_s24 + $0x4cc] sm:$0xf] %v819_v51  ;;  %v821_v52 = vld [vmem:[%s8711_s14 + $0x1340] sm:$0xf] }
  0xe9   : > { %v823_v53 = vld [vmem:[%s8711_s14 + $0x1350] sm:$0xf]  ;;  %v825_v54 = vld [vmem:[%s8711_s14 + $0x1360] sm:$0xf]  ;;  %822 = vst [vmem:[%s8715_s24 + $0x4d0] sm:$0xf] %v821_v52 }
  0xea   : > { %824 = vst [vmem:[%s8715_s24 + $0x4d4] sm:$0xf] %v823_v53  ;;  %826 = vst [vmem:[%s8715_s24 + $0x4d8] sm:$0xf] %v825_v54  ;;  %v827_v55 = vld [vmem:[%s8711_s14 + $0x1370] sm:$0xf] }
  0xeb   : > { %v829_v56 = vld [vmem:[%s8711_s14 + $0x1380] sm:$0xf]  ;;  %v831_v57 = vld [vmem:[%s8711_s14 + $0x1390] sm:$0xf]  ;;  %828 = vst [vmem:[%s8715_s24 + $0x4dc] sm:$0xf] %v827_v55 }
  0xec   : > { %830 = vst [vmem:[%s8715_s24 + $0x4e0] sm:$0xf] %v829_v56  ;;  %832 = vst [vmem:[%s8715_s24 + $0x4e4] sm:$0xf] %v831_v57  ;;  %v833_v58 = vld [vmem:[%s8711_s14 + $0x13a0] sm:$0xf] }
  0xed   : > { %v835_v59 = vld [vmem:[%s8711_s14 + $0x13b0] sm:$0xf]  ;;  %v837_v60 = vld [vmem:[%s8711_s14 + $0x13c0] sm:$0xf]  ;;  %834 = vst [vmem:[%s8715_s24 + $0x4e8] sm:$0xf] %v833_v58 }
  0xee   : > { %836 = vst [vmem:[%s8715_s24 + $0x4ec] sm:$0xf] %v835_v59  ;;  %838 = vst [vmem:[%s8715_s24 + $0x4f0] sm:$0xf] %v837_v60  ;;  %v839_v61 = vld [vmem:[%s8711_s14 + $0x13d0] sm:$0xf] }
  0xef   : > { %v841_v62 = vld [vmem:[%s8711_s14 + $0x13e0] sm:$0xf]  ;;  %v843_v63 = vld [vmem:[%s8711_s14 + $0x13f0] sm:$0xf]  ;;  %840 = vst [vmem:[%s8715_s24 + $0x4f4] sm:$0xf] %v839_v61 }
  0xf0   : > { %842 = vst [vmem:[%s8715_s24 + $0x4f8] sm:$0xf] %v841_v62  ;;  %844 = vst [vmem:[%s8715_s24 + $0x4fc] sm:$0xf] %v843_v63  ;;  %v845_v0 = vld [vmem:[%s8711_s14 + $0x1400] sm:$0xf] }
  0xf1   : > { %v847_v1 = vld [vmem:[%s8711_s14 + $0x1410] sm:$0xf]  ;;  %v849_v2 = vld [vmem:[%s8711_s14 + $0x1420] sm:$0xf]  ;;  %846 = vst [vmem:[%s8715_s24 + $0x500] sm:$0xf] %v845_v0 }
  0xf2   : > { %848 = vst [vmem:[%s8715_s24 + $0x504] sm:$0xf] %v847_v1  ;;  %850 = vst [vmem:[%s8715_s24 + $0x508] sm:$0xf] %v849_v2  ;;  %v851_v3 = vld [vmem:[%s8711_s14 + $0x1430] sm:$0xf] }
  0xf3   : > { %v853_v4 = vld [vmem:[%s8711_s14 + $0x1440] sm:$0xf]  ;;  %v855_v5 = vld [vmem:[%s8711_s14 + $0x1450] sm:$0xf]  ;;  %852 = vst [vmem:[%s8715_s24 + $0x50c] sm:$0xf] %v851_v3 }
  0xf4   : > { %854 = vst [vmem:[%s8715_s24 + $0x510] sm:$0xf] %v853_v4  ;;  %856 = vst [vmem:[%s8715_s24 + $0x514] sm:$0xf] %v855_v5  ;;  %v857_v6 = vld [vmem:[%s8711_s14 + $0x1460] sm:$0xf] }
  0xf5   : > { %v859_v7 = vld [vmem:[%s8711_s14 + $0x1470] sm:$0xf]  ;;  %v861_v8 = vld [vmem:[%s8711_s14 + $0x1480] sm:$0xf]  ;;  %858 = vst [vmem:[%s8715_s24 + $0x518] sm:$0xf] %v857_v6 }
  0xf6   : > { %860 = vst [vmem:[%s8715_s24 + $0x51c] sm:$0xf] %v859_v7  ;;  %862 = vst [vmem:[%s8715_s24 + $0x520] sm:$0xf] %v861_v8  ;;  %v863_v9 = vld [vmem:[%s8711_s14 + $0x1490] sm:$0xf] }
  0xf7   : > { %v865_v10 = vld [vmem:[%s8711_s14 + $0x14a0] sm:$0xf]  ;;  %v867_v11 = vld [vmem:[%s8711_s14 + $0x14b0] sm:$0xf]  ;;  %864 = vst [vmem:[%s8715_s24 + $0x524] sm:$0xf] %v863_v9 }
  0xf8   : > { %866 = vst [vmem:[%s8715_s24 + $0x528] sm:$0xf] %v865_v10  ;;  %868 = vst [vmem:[%s8715_s24 + $0x52c] sm:$0xf] %v867_v11  ;;  %v869_v12 = vld [vmem:[%s8711_s14 + $0x14c0] sm:$0xf] }
  0xf9   : > { %v871_v13 = vld [vmem:[%s8711_s14 + $0x14d0] sm:$0xf]  ;;  %v873_v14 = vld [vmem:[%s8711_s14 + $0x14e0] sm:$0xf]  ;;  %870 = vst [vmem:[%s8715_s24 + $0x530] sm:$0xf] %v869_v12 }
  0xfa   : > { %872 = vst [vmem:[%s8715_s24 + $0x534] sm:$0xf] %v871_v13  ;;  %874 = vst [vmem:[%s8715_s24 + $0x538] sm:$0xf] %v873_v14  ;;  %v875_v15 = vld [vmem:[%s8711_s14 + $0x14f0] sm:$0xf] }
  0xfb   : > { %v877_v16 = vld [vmem:[%s8711_s14 + $0x1500] sm:$0xf]  ;;  %v879_v17 = vld [vmem:[%s8711_s14 + $0x1510] sm:$0xf]  ;;  %876 = vst [vmem:[%s8715_s24 + $0x53c] sm:$0xf] %v875_v15 }
  0xfc   : > { %878 = vst [vmem:[%s8715_s24 + $0x540] sm:$0xf] %v877_v16  ;;  %880 = vst [vmem:[%s8715_s24 + $0x544] sm:$0xf] %v879_v17  ;;  %v881_v18 = vld [vmem:[%s8711_s14 + $0x1520] sm:$0xf] }
  0xfd   : > { %v883_v19 = vld [vmem:[%s8711_s14 + $0x1530] sm:$0xf]  ;;  %v885_v20 = vld [vmem:[%s8711_s14 + $0x1540] sm:$0xf]  ;;  %882 = vst [vmem:[%s8715_s24 + $0x548] sm:$0xf] %v881_v18 }
  0xfe   : > { %884 = vst [vmem:[%s8715_s24 + $0x54c] sm:$0xf] %v883_v19  ;;  %886 = vst [vmem:[%s8715_s24 + $0x550] sm:$0xf] %v885_v20  ;;  %v887_v21 = vld [vmem:[%s8711_s14 + $0x1550] sm:$0xf] }
  0xff   : > { %v889_v22 = vld [vmem:[%s8711_s14 + $0x1560] sm:$0xf]  ;;  %v891_v23 = vld [vmem:[%s8711_s14 + $0x1570] sm:$0xf]  ;;  %888 = vst [vmem:[%s8715_s24 + $0x554] sm:$0xf] %v887_v21 }
 0x100   : > { %890 = vst [vmem:[%s8715_s24 + $0x558] sm:$0xf] %v889_v22  ;;  %892 = vst [vmem:[%s8715_s24 + $0x55c] sm:$0xf] %v891_v23  ;;  %v893_v24 = vld [vmem:[%s8711_s14 + $0x1580] sm:$0xf] }
 0x101   : > { %v895_v25 = vld [vmem:[%s8711_s14 + $0x1590] sm:$0xf]  ;;  %v897_v26 = vld [vmem:[%s8711_s14 + $0x15a0] sm:$0xf]  ;;  %894 = vst [vmem:[%s8715_s24 + $0x560] sm:$0xf] %v893_v24 }
 0x102   : > { %896 = vst [vmem:[%s8715_s24 + $0x564] sm:$0xf] %v895_v25  ;;  %898 = vst [vmem:[%s8715_s24 + $0x568] sm:$0xf] %v897_v26  ;;  %v899_v27 = vld [vmem:[%s8711_s14 + $0x15b0] sm:$0xf] }
 0x103   : > { %v901_v28 = vld [vmem:[%s8711_s14 + $0x15c0] sm:$0xf]  ;;  %v903_v29 = vld [vmem:[%s8711_s14 + $0x15d0] sm:$0xf]  ;;  %900 = vst [vmem:[%s8715_s24 + $0x56c] sm:$0xf] %v899_v27 }
 0x104   : > { %902 = vst [vmem:[%s8715_s24 + $0x570] sm:$0xf] %v901_v28  ;;  %904 = vst [vmem:[%s8715_s24 + $0x574] sm:$0xf] %v903_v29  ;;  %v905_v30 = vld [vmem:[%s8711_s14 + $0x15e0] sm:$0xf] }
 0x105   : > { %v907_v31 = vld [vmem:[%s8711_s14 + $0x15f0] sm:$0xf]  ;;  %v909_v32 = vld [vmem:[%s8711_s14 + $0x1600] sm:$0xf]  ;;  %906 = vst [vmem:[%s8715_s24 + $0x578] sm:$0xf] %v905_v30 }
 0x106   : > { %908 = vst [vmem:[%s8715_s24 + $0x57c] sm:$0xf] %v907_v31  ;;  %910 = vst [vmem:[%s8715_s24 + $0x580] sm:$0xf] %v909_v32  ;;  %v911_v33 = vld [vmem:[%s8711_s14 + $0x1610] sm:$0xf] }
 0x107   : > { %v913_v34 = vld [vmem:[%s8711_s14 + $0x1620] sm:$0xf]  ;;  %v915_v35 = vld [vmem:[%s8711_s14 + $0x1630] sm:$0xf]  ;;  %912 = vst [vmem:[%s8715_s24 + $0x584] sm:$0xf] %v911_v33 }
 0x108   : > { %914 = vst [vmem:[%s8715_s24 + $0x588] sm:$0xf] %v913_v34  ;;  %916 = vst [vmem:[%s8715_s24 + $0x58c] sm:$0xf] %v915_v35  ;;  %v917_v36 = vld [vmem:[%s8711_s14 + $0x1640] sm:$0xf] }
 0x109   : > { %v919_v37 = vld [vmem:[%s8711_s14 + $0x1650] sm:$0xf]  ;;  %v921_v38 = vld [vmem:[%s8711_s14 + $0x1660] sm:$0xf]  ;;  %918 = vst [vmem:[%s8715_s24 + $0x590] sm:$0xf] %v917_v36 }
 0x10a   : > { %920 = vst [vmem:[%s8715_s24 + $0x594] sm:$0xf] %v919_v37  ;;  %922 = vst [vmem:[%s8715_s24 + $0x598] sm:$0xf] %v921_v38  ;;  %v923_v39 = vld [vmem:[%s8711_s14 + $0x1670] sm:$0xf] }
 0x10b   : > { %v925_v40 = vld [vmem:[%s8711_s14 + $0x1680] sm:$0xf]  ;;  %v927_v41 = vld [vmem:[%s8711_s14 + $0x1690] sm:$0xf]  ;;  %924 = vst [vmem:[%s8715_s24 + $0x59c] sm:$0xf] %v923_v39 }
 0x10c   : > { %926 = vst [vmem:[%s8715_s24 + $0x5a0] sm:$0xf] %v925_v40  ;;  %928 = vst [vmem:[%s8715_s24 + $0x5a4] sm:$0xf] %v927_v41  ;;  %v929_v42 = vld [vmem:[%s8711_s14 + $0x16a0] sm:$0xf] }
 0x10d   : > { %v931_v43 = vld [vmem:[%s8711_s14 + $0x16b0] sm:$0xf]  ;;  %v933_v44 = vld [vmem:[%s8711_s14 + $0x16c0] sm:$0xf]  ;;  %930 = vst [vmem:[%s8715_s24 + $0x5a8] sm:$0xf] %v929_v42 }
 0x10e   : > { %932 = vst [vmem:[%s8715_s24 + $0x5ac] sm:$0xf] %v931_v43  ;;  %934 = vst [vmem:[%s8715_s24 + $0x5b0] sm:$0xf] %v933_v44  ;;  %v935_v45 = vld [vmem:[%s8711_s14 + $0x16d0] sm:$0xf] }
 0x10f   : > { %v937_v46 = vld [vmem:[%s8711_s14 + $0x16e0] sm:$0xf]  ;;  %v939_v47 = vld [vmem:[%s8711_s14 + $0x16f0] sm:$0xf]  ;;  %936 = vst [vmem:[%s8715_s24 + $0x5b4] sm:$0xf] %v935_v45 }
 0x110   : > { %938 = vst [vmem:[%s8715_s24 + $0x5b8] sm:$0xf] %v937_v46  ;;  %940 = vst [vmem:[%s8715_s24 + $0x5bc] sm:$0xf] %v939_v47  ;;  %v941_v48 = vld [vmem:[%s8711_s14 + $0x1700] sm:$0xf] }
 0x111   : > { %v943_v49 = vld [vmem:[%s8711_s14 + $0x1710] sm:$0xf]  ;;  %v945_v50 = vld [vmem:[%s8711_s14 + $0x1720] sm:$0xf]  ;;  %942 = vst [vmem:[%s8715_s24 + $0x5c0] sm:$0xf] %v941_v48 }
 0x112   : > { %944 = vst [vmem:[%s8715_s24 + $0x5c4] sm:$0xf] %v943_v49  ;;  %946 = vst [vmem:[%s8715_s24 + $0x5c8] sm:$0xf] %v945_v50  ;;  %v947_v51 = vld [vmem:[%s8711_s14 + $0x1730] sm:$0xf] }
 0x113   : > { %v949_v52 = vld [vmem:[%s8711_s14 + $0x1740] sm:$0xf]  ;;  %v951_v53 = vld [vmem:[%s8711_s14 + $0x1750] sm:$0xf]  ;;  %948 = vst [vmem:[%s8715_s24 + $0x5cc] sm:$0xf] %v947_v51 }
 0x114   : > { %950 = vst [vmem:[%s8715_s24 + $0x5d0] sm:$0xf] %v949_v52  ;;  %952 = vst [vmem:[%s8715_s24 + $0x5d4] sm:$0xf] %v951_v53  ;;  %v953_v54 = vld [vmem:[%s8711_s14 + $0x1760] sm:$0xf] }
 0x115   : > { %v955_v55 = vld [vmem:[%s8711_s14 + $0x1770] sm:$0xf]  ;;  %v957_v56 = vld [vmem:[%s8711_s14 + $0x1780] sm:$0xf]  ;;  %954 = vst [vmem:[%s8715_s24 + $0x5d8] sm:$0xf] %v953_v54 }
 0x116   : > { %956 = vst [vmem:[%s8715_s24 + $0x5dc] sm:$0xf] %v955_v55  ;;  %958 = vst [vmem:[%s8715_s24 + $0x5e0] sm:$0xf] %v957_v56  ;;  %v959_v57 = vld [vmem:[%s8711_s14 + $0x1790] sm:$0xf] }
 0x117   : > { %v961_v58 = vld [vmem:[%s8711_s14 + $0x17a0] sm:$0xf]  ;;  %v963_v59 = vld [vmem:[%s8711_s14 + $0x17b0] sm:$0xf]  ;;  %960 = vst [vmem:[%s8715_s24 + $0x5e4] sm:$0xf] %v959_v57 }
 0x118   : > { %962 = vst [vmem:[%s8715_s24 + $0x5e8] sm:$0xf] %v961_v58  ;;  %964 = vst [vmem:[%s8715_s24 + $0x5ec] sm:$0xf] %v963_v59  ;;  %v965_v60 = vld [vmem:[%s8711_s14 + $0x17c0] sm:$0xf] }
 0x119   : > { %v967_v61 = vld [vmem:[%s8711_s14 + $0x17d0] sm:$0xf]  ;;  %v969_v62 = vld [vmem:[%s8711_s14 + $0x17e0] sm:$0xf]  ;;  %966 = vst [vmem:[%s8715_s24 + $0x5f0] sm:$0xf] %v965_v60 }
 0x11a   : > { %968 = vst [vmem:[%s8715_s24 + $0x5f4] sm:$0xf] %v967_v61  ;;  %970 = vst [vmem:[%s8715_s24 + $0x5f8] sm:$0xf] %v969_v62  ;;  %v971_v63 = vld [vmem:[%s8711_s14 + $0x17f0] sm:$0xf] }
 0x11b   : > { %v973_v0 = vld [vmem:[%s8711_s14 + $0x1800] sm:$0xf]  ;;  %v975_v1 = vld [vmem:[%s8711_s14 + $0x1810] sm:$0xf]  ;;  %972 = vst [vmem:[%s8715_s24 + $0x5fc] sm:$0xf] %v971_v63 }
 0x11c   : > { %974 = vst [vmem:[%s8715_s24 + $0x600] sm:$0xf] %v973_v0  ;;  %976 = vst [vmem:[%s8715_s24 + $0x604] sm:$0xf] %v975_v1  ;;  %v977_v2 = vld [vmem:[%s8711_s14 + $0x1820] sm:$0xf] }
 0x11d   : > { %v979_v3 = vld [vmem:[%s8711_s14 + $0x1830] sm:$0xf]  ;;  %v981_v4 = vld [vmem:[%s8711_s14 + $0x1840] sm:$0xf]  ;;  %978 = vst [vmem:[%s8715_s24 + $0x608] sm:$0xf] %v977_v2 }
 0x11e   : > { %980 = vst [vmem:[%s8715_s24 + $0x60c] sm:$0xf] %v979_v3  ;;  %982 = vst [vmem:[%s8715_s24 + $0x610] sm:$0xf] %v981_v4  ;;  %v983_v5 = vld [vmem:[%s8711_s14 + $0x1850] sm:$0xf] }
 0x11f   : > { %v985_v6 = vld [vmem:[%s8711_s14 + $0x1860] sm:$0xf]  ;;  %v987_v7 = vld [vmem:[%s8711_s14 + $0x1870] sm:$0xf]  ;;  %984 = vst [vmem:[%s8715_s24 + $0x614] sm:$0xf] %v983_v5 }
 0x120   : > { %986 = vst [vmem:[%s8715_s24 + $0x618] sm:$0xf] %v985_v6  ;;  %988 = vst [vmem:[%s8715_s24 + $0x61c] sm:$0xf] %v987_v7  ;;  %v989_v8 = vld [vmem:[%s8711_s14 + $0x1880] sm:$0xf] }
 0x121   : > { %v991_v9 = vld [vmem:[%s8711_s14 + $0x1890] sm:$0xf]  ;;  %v993_v10 = vld [vmem:[%s8711_s14 + $0x18a0] sm:$0xf]  ;;  %990 = vst [vmem:[%s8715_s24 + $0x620] sm:$0xf] %v989_v8 }
 0x122   : > { %992 = vst [vmem:[%s8715_s24 + $0x624] sm:$0xf] %v991_v9  ;;  %994 = vst [vmem:[%s8715_s24 + $0x628] sm:$0xf] %v993_v10  ;;  %v995_v11 = vld [vmem:[%s8711_s14 + $0x18b0] sm:$0xf] }
 0x123   : > { %v997_v12 = vld [vmem:[%s8711_s14 + $0x18c0] sm:$0xf]  ;;  %v999_v13 = vld [vmem:[%s8711_s14 + $0x18d0] sm:$0xf]  ;;  %996 = vst [vmem:[%s8715_s24 + $0x62c] sm:$0xf] %v995_v11 }
 0x124   : > { %998 = vst [vmem:[%s8715_s24 + $0x630] sm:$0xf] %v997_v12  ;;  %1000 = vst [vmem:[%s8715_s24 + $0x634] sm:$0xf] %v999_v13  ;;  %v1001_v14 = vld [vmem:[%s8711_s14 + $0x18e0] sm:$0xf] }
 0x125   : > { %v1003_v15 = vld [vmem:[%s8711_s14 + $0x18f0] sm:$0xf]  ;;  %v1005_v16 = vld [vmem:[%s8711_s14 + $0x1900] sm:$0xf]  ;;  %1002 = vst [vmem:[%s8715_s24 + $0x638] sm:$0xf] %v1001_v14 }
 0x126   : > { %1004 = vst [vmem:[%s8715_s24 + $0x63c] sm:$0xf] %v1003_v15  ;;  %1006 = vst [vmem:[%s8715_s24 + $0x640] sm:$0xf] %v1005_v16  ;;  %v1007_v17 = vld [vmem:[%s8711_s14 + $0x1910] sm:$0xf] }
 0x127   : > { %v1009_v18 = vld [vmem:[%s8711_s14 + $0x1920] sm:$0xf]  ;;  %v1011_v19 = vld [vmem:[%s8711_s14 + $0x1930] sm:$0xf]  ;;  %1008 = vst [vmem:[%s8715_s24 + $0x644] sm:$0xf] %v1007_v17 }
 0x128   : > { %1010 = vst [vmem:[%s8715_s24 + $0x648] sm:$0xf] %v1009_v18  ;;  %1012 = vst [vmem:[%s8715_s24 + $0x64c] sm:$0xf] %v1011_v19  ;;  %v1013_v20 = vld [vmem:[%s8711_s14 + $0x1940] sm:$0xf] }
 0x129   : > { %v1015_v21 = vld [vmem:[%s8711_s14 + $0x1950] sm:$0xf]  ;;  %v1017_v22 = vld [vmem:[%s8711_s14 + $0x1960] sm:$0xf]  ;;  %1014 = vst [vmem:[%s8715_s24 + $0x650] sm:$0xf] %v1013_v20 }
 0x12a   : > { %1016 = vst [vmem:[%s8715_s24 + $0x654] sm:$0xf] %v1015_v21  ;;  %1018 = vst [vmem:[%s8715_s24 + $0x658] sm:$0xf] %v1017_v22  ;;  %v1019_v23 = vld [vmem:[%s8711_s14 + $0x1970] sm:$0xf] }
 0x12b   : > { %v1021_v24 = vld [vmem:[%s8711_s14 + $0x1980] sm:$0xf]  ;;  %v1023_v25 = vld [vmem:[%s8711_s14 + $0x1990] sm:$0xf]  ;;  %1020 = vst [vmem:[%s8715_s24 + $0x65c] sm:$0xf] %v1019_v23 }
 0x12c   : > { %1022 = vst [vmem:[%s8715_s24 + $0x660] sm:$0xf] %v1021_v24  ;;  %1024 = vst [vmem:[%s8715_s24 + $0x664] sm:$0xf] %v1023_v25  ;;  %v1025_v26 = vld [vmem:[%s8711_s14 + $0x19a0] sm:$0xf] }
 0x12d   : > { %v1027_v27 = vld [vmem:[%s8711_s14 + $0x19b0] sm:$0xf]  ;;  %v1029_v28 = vld [vmem:[%s8711_s14 + $0x19c0] sm:$0xf]  ;;  %1026 = vst [vmem:[%s8715_s24 + $0x668] sm:$0xf] %v1025_v26 }
 0x12e   : > { %1028 = vst [vmem:[%s8715_s24 + $0x66c] sm:$0xf] %v1027_v27  ;;  %1030 = vst [vmem:[%s8715_s24 + $0x670] sm:$0xf] %v1029_v28  ;;  %v1031_v29 = vld [vmem:[%s8711_s14 + $0x19d0] sm:$0xf] }
 0x12f   : > { %v1033_v30 = vld [vmem:[%s8711_s14 + $0x19e0] sm:$0xf]  ;;  %v1035_v31 = vld [vmem:[%s8711_s14 + $0x19f0] sm:$0xf]  ;;  %1032 = vst [vmem:[%s8715_s24 + $0x674] sm:$0xf] %v1031_v29 }
 0x130   : > { %1034 = vst [vmem:[%s8715_s24 + $0x678] sm:$0xf] %v1033_v30  ;;  %1036 = vst [vmem:[%s8715_s24 + $0x67c] sm:$0xf] %v1035_v31  ;;  %v1037_v32 = vld [vmem:[%s8711_s14 + $0x1a00] sm:$0xf] }
 0x131   : > { %v1039_v33 = vld [vmem:[%s8711_s14 + $0x1a10] sm:$0xf]  ;;  %v1041_v34 = vld [vmem:[%s8711_s14 + $0x1a20] sm:$0xf]  ;;  %1038 = vst [vmem:[%s8715_s24 + $0x680] sm:$0xf] %v1037_v32 }
 0x132   : > { %1040 = vst [vmem:[%s8715_s24 + $0x684] sm:$0xf] %v1039_v33  ;;  %1042 = vst [vmem:[%s8715_s24 + $0x688] sm:$0xf] %v1041_v34  ;;  %v1043_v35 = vld [vmem:[%s8711_s14 + $0x1a30] sm:$0xf] }
 0x133   : > { %v1045_v36 = vld [vmem:[%s8711_s14 + $0x1a40] sm:$0xf]  ;;  %v1047_v37 = vld [vmem:[%s8711_s14 + $0x1a50] sm:$0xf]  ;;  %1044 = vst [vmem:[%s8715_s24 + $0x68c] sm:$0xf] %v1043_v35 }
 0x134   : > { %1046 = vst [vmem:[%s8715_s24 + $0x690] sm:$0xf] %v1045_v36  ;;  %1048 = vst [vmem:[%s8715_s24 + $0x694] sm:$0xf] %v1047_v37  ;;  %v1049_v38 = vld [vmem:[%s8711_s14 + $0x1a60] sm:$0xf] }
 0x135   : > { %v1051_v39 = vld [vmem:[%s8711_s14 + $0x1a70] sm:$0xf]  ;;  %v1053_v40 = vld [vmem:[%s8711_s14 + $0x1a80] sm:$0xf]  ;;  %1050 = vst [vmem:[%s8715_s24 + $0x698] sm:$0xf] %v1049_v38 }
 0x136   : > { %1052 = vst [vmem:[%s8715_s24 + $0x69c] sm:$0xf] %v1051_v39  ;;  %1054 = vst [vmem:[%s8715_s24 + $0x6a0] sm:$0xf] %v1053_v40  ;;  %v1055_v41 = vld [vmem:[%s8711_s14 + $0x1a90] sm:$0xf] }
 0x137   : > { %v1057_v42 = vld [vmem:[%s8711_s14 + $0x1aa0] sm:$0xf]  ;;  %v1059_v43 = vld [vmem:[%s8711_s14 + $0x1ab0] sm:$0xf]  ;;  %1056 = vst [vmem:[%s8715_s24 + $0x6a4] sm:$0xf] %v1055_v41 }
 0x138   : > { %1058 = vst [vmem:[%s8715_s24 + $0x6a8] sm:$0xf] %v1057_v42  ;;  %1060 = vst [vmem:[%s8715_s24 + $0x6ac] sm:$0xf] %v1059_v43  ;;  %v1061_v44 = vld [vmem:[%s8711_s14 + $0x1ac0] sm:$0xf] }
 0x139   : > { %v1063_v45 = vld [vmem:[%s8711_s14 + $0x1ad0] sm:$0xf]  ;;  %v1065_v46 = vld [vmem:[%s8711_s14 + $0x1ae0] sm:$0xf]  ;;  %1062 = vst [vmem:[%s8715_s24 + $0x6b0] sm:$0xf] %v1061_v44 }
 0x13a   : > { %1064 = vst [vmem:[%s8715_s24 + $0x6b4] sm:$0xf] %v1063_v45  ;;  %1066 = vst [vmem:[%s8715_s24 + $0x6b8] sm:$0xf] %v1065_v46  ;;  %v1067_v47 = vld [vmem:[%s8711_s14 + $0x1af0] sm:$0xf] }
 0x13b   : > { %v1069_v48 = vld [vmem:[%s8711_s14 + $0x1b00] sm:$0xf]  ;;  %v1071_v49 = vld [vmem:[%s8711_s14 + $0x1b10] sm:$0xf]  ;;  %1068 = vst [vmem:[%s8715_s24 + $0x6bc] sm:$0xf] %v1067_v47 }
 0x13c   : > { %1070 = vst [vmem:[%s8715_s24 + $0x6c0] sm:$0xf] %v1069_v48  ;;  %1072 = vst [vmem:[%s8715_s24 + $0x6c4] sm:$0xf] %v1071_v49  ;;  %v1073_v50 = vld [vmem:[%s8711_s14 + $0x1b20] sm:$0xf] }
 0x13d   : > { %v1075_v51 = vld [vmem:[%s8711_s14 + $0x1b30] sm:$0xf]  ;;  %v1077_v52 = vld [vmem:[%s8711_s14 + $0x1b40] sm:$0xf]  ;;  %1074 = vst [vmem:[%s8715_s24 + $0x6c8] sm:$0xf] %v1073_v50 }
 0x13e   : > { %1076 = vst [vmem:[%s8715_s24 + $0x6cc] sm:$0xf] %v1075_v51  ;;  %1078 = vst [vmem:[%s8715_s24 + $0x6d0] sm:$0xf] %v1077_v52  ;;  %v1079_v53 = vld [vmem:[%s8711_s14 + $0x1b50] sm:$0xf] }
 0x13f   : > { %v1081_v54 = vld [vmem:[%s8711_s14 + $0x1b60] sm:$0xf]  ;;  %v1083_v55 = vld [vmem:[%s8711_s14 + $0x1b70] sm:$0xf]  ;;  %1080 = vst [vmem:[%s8715_s24 + $0x6d4] sm:$0xf] %v1079_v53 }
 0x140   : > { %1082 = vst [vmem:[%s8715_s24 + $0x6d8] sm:$0xf] %v1081_v54  ;;  %1084 = vst [vmem:[%s8715_s24 + $0x6dc] sm:$0xf] %v1083_v55  ;;  %v1085_v56 = vld [vmem:[%s8711_s14 + $0x1b80] sm:$0xf] }
 0x141   : > { %v1087_v57 = vld [vmem:[%s8711_s14 + $0x1b90] sm:$0xf]  ;;  %v1089_v58 = vld [vmem:[%s8711_s14 + $0x1ba0] sm:$0xf]  ;;  %1086 = vst [vmem:[%s8715_s24 + $0x6e0] sm:$0xf] %v1085_v56 }
 0x142   : > { %1088 = vst [vmem:[%s8715_s24 + $0x6e4] sm:$0xf] %v1087_v57  ;;  %1090 = vst [vmem:[%s8715_s24 + $0x6e8] sm:$0xf] %v1089_v58  ;;  %v1091_v59 = vld [vmem:[%s8711_s14 + $0x1bb0] sm:$0xf] }
 0x143   : > { %v1093_v60 = vld [vmem:[%s8711_s14 + $0x1bc0] sm:$0xf]  ;;  %v1095_v61 = vld [vmem:[%s8711_s14 + $0x1bd0] sm:$0xf]  ;;  %1092 = vst [vmem:[%s8715_s24 + $0x6ec] sm:$0xf] %v1091_v59 }
 0x144   : > { %1094 = vst [vmem:[%s8715_s24 + $0x6f0] sm:$0xf] %v1093_v60  ;;  %1096 = vst [vmem:[%s8715_s24 + $0x6f4] sm:$0xf] %v1095_v61  ;;  %v1097_v62 = vld [vmem:[%s8711_s14 + $0x1be0] sm:$0xf] }
 0x145   : > { %v1099_v63 = vld [vmem:[%s8711_s14 + $0x1bf0] sm:$0xf]  ;;  %v1101_v0 = vld [vmem:[%s8711_s14 + $0x1c00] sm:$0xf]  ;;  %1098 = vst [vmem:[%s8715_s24 + $0x6f8] sm:$0xf] %v1097_v62 }
 0x146   : > { %1100 = vst [vmem:[%s8715_s24 + $0x6fc] sm:$0xf] %v1099_v63  ;;  %1102 = vst [vmem:[%s8715_s24 + $0x700] sm:$0xf] %v1101_v0  ;;  %v1103_v1 = vld [vmem:[%s8711_s14 + $0x1c10] sm:$0xf] }
 0x147   : > { %v1105_v2 = vld [vmem:[%s8711_s14 + $0x1c20] sm:$0xf]  ;;  %v1107_v3 = vld [vmem:[%s8711_s14 + $0x1c30] sm:$0xf]  ;;  %1104 = vst [vmem:[%s8715_s24 + $0x704] sm:$0xf] %v1103_v1 }
 0x148   : > { %1106 = vst [vmem:[%s8715_s24 + $0x708] sm:$0xf] %v1105_v2  ;;  %1108 = vst [vmem:[%s8715_s24 + $0x70c] sm:$0xf] %v1107_v3  ;;  %v1109_v4 = vld [vmem:[%s8711_s14 + $0x1c40] sm:$0xf] }
 0x149   : > { %v1111_v5 = vld [vmem:[%s8711_s14 + $0x1c50] sm:$0xf]  ;;  %v1113_v6 = vld [vmem:[%s8711_s14 + $0x1c60] sm:$0xf]  ;;  %1110 = vst [vmem:[%s8715_s24 + $0x710] sm:$0xf] %v1109_v4 }
 0x14a   : > { %1112 = vst [vmem:[%s8715_s24 + $0x714] sm:$0xf] %v1111_v5  ;;  %1114 = vst [vmem:[%s8715_s24 + $0x718] sm:$0xf] %v1113_v6  ;;  %v1115_v7 = vld [vmem:[%s8711_s14 + $0x1c70] sm:$0xf] }
 0x14b   : > { %v1117_v8 = vld [vmem:[%s8711_s14 + $0x1c80] sm:$0xf]  ;;  %v1119_v9 = vld [vmem:[%s8711_s14 + $0x1c90] sm:$0xf]  ;;  %1116 = vst [vmem:[%s8715_s24 + $0x71c] sm:$0xf] %v1115_v7 }
 0x14c   : > { %1118 = vst [vmem:[%s8715_s24 + $0x720] sm:$0xf] %v1117_v8  ;;  %1120 = vst [vmem:[%s8715_s24 + $0x724] sm:$0xf] %v1119_v9  ;;  %v1121_v10 = vld [vmem:[%s8711_s14 + $0x1ca0] sm:$0xf] }
 0x14d   : > { %v1123_v11 = vld [vmem:[%s8711_s14 + $0x1cb0] sm:$0xf]  ;;  %v1125_v12 = vld [vmem:[%s8711_s14 + $0x1cc0] sm:$0xf]  ;;  %1122 = vst [vmem:[%s8715_s24 + $0x728] sm:$0xf] %v1121_v10 }
 0x14e   : > { %1124 = vst [vmem:[%s8715_s24 + $0x72c] sm:$0xf] %v1123_v11  ;;  %1126 = vst [vmem:[%s8715_s24 + $0x730] sm:$0xf] %v1125_v12  ;;  %v1127_v13 = vld [vmem:[%s8711_s14 + $0x1cd0] sm:$0xf] }
 0x14f   : > { %v1129_v14 = vld [vmem:[%s8711_s14 + $0x1ce0] sm:$0xf]  ;;  %v1131_v15 = vld [vmem:[%s8711_s14 + $0x1cf0] sm:$0xf]  ;;  %1128 = vst [vmem:[%s8715_s24 + $0x734] sm:$0xf] %v1127_v13 }
 0x150   : > { %1130 = vst [vmem:[%s8715_s24 + $0x738] sm:$0xf] %v1129_v14  ;;  %1132 = vst [vmem:[%s8715_s24 + $0x73c] sm:$0xf] %v1131_v15  ;;  %v1133_v16 = vld [vmem:[%s8711_s14 + $0x1d00] sm:$0xf] }
 0x151   : > { %v1135_v17 = vld [vmem:[%s8711_s14 + $0x1d10] sm:$0xf]  ;;  %v1137_v18 = vld [vmem:[%s8711_s14 + $0x1d20] sm:$0xf]  ;;  %1134 = vst [vmem:[%s8715_s24 + $0x740] sm:$0xf] %v1133_v16 }
 0x152   : > { %1136 = vst [vmem:[%s8715_s24 + $0x744] sm:$0xf] %v1135_v17  ;;  %1138 = vst [vmem:[%s8715_s24 + $0x748] sm:$0xf] %v1137_v18  ;;  %v1139_v19 = vld [vmem:[%s8711_s14 + $0x1d30] sm:$0xf] }
 0x153   : > { %v1141_v20 = vld [vmem:[%s8711_s14 + $0x1d40] sm:$0xf]  ;;  %v1143_v21 = vld [vmem:[%s8711_s14 + $0x1d50] sm:$0xf]  ;;  %1140 = vst [vmem:[%s8715_s24 + $0x74c] sm:$0xf] %v1139_v19 }
 0x154   : > { %1142 = vst [vmem:[%s8715_s24 + $0x750] sm:$0xf] %v1141_v20  ;;  %1144 = vst [vmem:[%s8715_s24 + $0x754] sm:$0xf] %v1143_v21  ;;  %v1145_v22 = vld [vmem:[%s8711_s14 + $0x1d60] sm:$0xf] }
 0x155   : > { %v1147_v23 = vld [vmem:[%s8711_s14 + $0x1d70] sm:$0xf]  ;;  %v1149_v24 = vld [vmem:[%s8711_s14 + $0x1d80] sm:$0xf]  ;;  %1146 = vst [vmem:[%s8715_s24 + $0x758] sm:$0xf] %v1145_v22 }
 0x156   : > { %1148 = vst [vmem:[%s8715_s24 + $0x75c] sm:$0xf] %v1147_v23  ;;  %1150 = vst [vmem:[%s8715_s24 + $0x760] sm:$0xf] %v1149_v24  ;;  %v1151_v25 = vld [vmem:[%s8711_s14 + $0x1d90] sm:$0xf] }
 0x157   : > { %v1153_v26 = vld [vmem:[%s8711_s14 + $0x1da0] sm:$0xf]  ;;  %v1155_v27 = vld [vmem:[%s8711_s14 + $0x1db0] sm:$0xf]  ;;  %1152 = vst [vmem:[%s8715_s24 + $0x764] sm:$0xf] %v1151_v25 }
 0x158   : > { %1154 = vst [vmem:[%s8715_s24 + $0x768] sm:$0xf] %v1153_v26  ;;  %1156 = vst [vmem:[%s8715_s24 + $0x76c] sm:$0xf] %v1155_v27  ;;  %v1157_v28 = vld [vmem:[%s8711_s14 + $0x1dc0] sm:$0xf] }
 0x159   : > { %v1159_v29 = vld [vmem:[%s8711_s14 + $0x1dd0] sm:$0xf]  ;;  %v1161_v30 = vld [vmem:[%s8711_s14 + $0x1de0] sm:$0xf]  ;;  %1158 = vst [vmem:[%s8715_s24 + $0x770] sm:$0xf] %v1157_v28 }
 0x15a   : > { %1160 = vst [vmem:[%s8715_s24 + $0x774] sm:$0xf] %v1159_v29  ;;  %1162 = vst [vmem:[%s8715_s24 + $0x778] sm:$0xf] %v1161_v30  ;;  %v1163_v31 = vld [vmem:[%s8711_s14 + $0x1df0] sm:$0xf] }
 0x15b   : > { %v1165_v32 = vld [vmem:[%s8711_s14 + $0x1e00] sm:$0xf]  ;;  %v1167_v33 = vld [vmem:[%s8711_s14 + $0x1e10] sm:$0xf]  ;;  %1164 = vst [vmem:[%s8715_s24 + $0x77c] sm:$0xf] %v1163_v31 }
 0x15c   : > { %1166 = vst [vmem:[%s8715_s24 + $0x780] sm:$0xf] %v1165_v32  ;;  %1168 = vst [vmem:[%s8715_s24 + $0x784] sm:$0xf] %v1167_v33  ;;  %v1169_v34 = vld [vmem:[%s8711_s14 + $0x1e20] sm:$0xf] }
 0x15d   : > { %v1171_v35 = vld [vmem:[%s8711_s14 + $0x1e30] sm:$0xf]  ;;  %v1173_v36 = vld [vmem:[%s8711_s14 + $0x1e40] sm:$0xf]  ;;  %1170 = vst [vmem:[%s8715_s24 + $0x788] sm:$0xf] %v1169_v34 }
 0x15e   : > { %1172 = vst [vmem:[%s8715_s24 + $0x78c] sm:$0xf] %v1171_v35  ;;  %1174 = vst [vmem:[%s8715_s24 + $0x790] sm:$0xf] %v1173_v36  ;;  %v1175_v37 = vld [vmem:[%s8711_s14 + $0x1e50] sm:$0xf] }
 0x15f   : > { %v1177_v38 = vld [vmem:[%s8711_s14 + $0x1e60] sm:$0xf]  ;;  %v1179_v39 = vld [vmem:[%s8711_s14 + $0x1e70] sm:$0xf]  ;;  %1176 = vst [vmem:[%s8715_s24 + $0x794] sm:$0xf] %v1175_v37 }
 0x160   : > { %1178 = vst [vmem:[%s8715_s24 + $0x798] sm:$0xf] %v1177_v38  ;;  %1180 = vst [vmem:[%s8715_s24 + $0x79c] sm:$0xf] %v1179_v39  ;;  %v1181_v40 = vld [vmem:[%s8711_s14 + $0x1e80] sm:$0xf] }
 0x161   : > { %v1183_v41 = vld [vmem:[%s8711_s14 + $0x1e90] sm:$0xf]  ;;  %v1185_v42 = vld [vmem:[%s8711_s14 + $0x1ea0] sm:$0xf]  ;;  %1182 = vst [vmem:[%s8715_s24 + $0x7a0] sm:$0xf] %v1181_v40 }
 0x162   : > { %1184 = vst [vmem:[%s8715_s24 + $0x7a4] sm:$0xf] %v1183_v41  ;;  %1186 = vst [vmem:[%s8715_s24 + $0x7a8] sm:$0xf] %v1185_v42  ;;  %v1187_v43 = vld [vmem:[%s8711_s14 + $0x1eb0] sm:$0xf] }
 0x163   : > { %v1189_v44 = vld [vmem:[%s8711_s14 + $0x1ec0] sm:$0xf]  ;;  %v1191_v45 = vld [vmem:[%s8711_s14 + $0x1ed0] sm:$0xf]  ;;  %1188 = vst [vmem:[%s8715_s24 + $0x7ac] sm:$0xf] %v1187_v43 }
 0x164   : > { %1190 = vst [vmem:[%s8715_s24 + $0x7b0] sm:$0xf] %v1189_v44  ;;  %1192 = vst [vmem:[%s8715_s24 + $0x7b4] sm:$0xf] %v1191_v45  ;;  %v1193_v46 = vld [vmem:[%s8711_s14 + $0x1ee0] sm:$0xf] }
 0x165   : > { %v1195_v47 = vld [vmem:[%s8711_s14 + $0x1ef0] sm:$0xf]  ;;  %v1197_v48 = vld [vmem:[%s8711_s14 + $0x1f00] sm:$0xf]  ;;  %1194 = vst [vmem:[%s8715_s24 + $0x7b8] sm:$0xf] %v1193_v46 }
 0x166   : > { %1196 = vst [vmem:[%s8715_s24 + $0x7bc] sm:$0xf] %v1195_v47  ;;  %1198 = vst [vmem:[%s8715_s24 + $0x7c0] sm:$0xf] %v1197_v48  ;;  %v1199_v49 = vld [vmem:[%s8711_s14 + $0x1f10] sm:$0xf] }
 0x167   : > { %v1201_v50 = vld [vmem:[%s8711_s14 + $0x1f20] sm:$0xf]  ;;  %v1203_v51 = vld [vmem:[%s8711_s14 + $0x1f30] sm:$0xf]  ;;  %1200 = vst [vmem:[%s8715_s24 + $0x7c4] sm:$0xf] %v1199_v49 }
 0x168   : > { %1202 = vst [vmem:[%s8715_s24 + $0x7c8] sm:$0xf] %v1201_v50  ;;  %1204 = vst [vmem:[%s8715_s24 + $0x7cc] sm:$0xf] %v1203_v51  ;;  %v1205_v52 = vld [vmem:[%s8711_s14 + $0x1f40] sm:$0xf] }
 0x169   : > { %v1207_v53 = vld [vmem:[%s8711_s14 + $0x1f50] sm:$0xf]  ;;  %v1209_v54 = vld [vmem:[%s8711_s14 + $0x1f60] sm:$0xf]  ;;  %1206 = vst [vmem:[%s8715_s24 + $0x7d0] sm:$0xf] %v1205_v52 }
 0x16a   : > { %1208 = vst [vmem:[%s8715_s24 + $0x7d4] sm:$0xf] %v1207_v53  ;;  %1210 = vst [vmem:[%s8715_s24 + $0x7d8] sm:$0xf] %v1209_v54  ;;  %v1211_v55 = vld [vmem:[%s8711_s14 + $0x1f70] sm:$0xf] }
 0x16b   : > { %v1213_v56 = vld [vmem:[%s8711_s14 + $0x1f80] sm:$0xf]  ;;  %v1215_v57 = vld [vmem:[%s8711_s14 + $0x1f90] sm:$0xf]  ;;  %1212 = vst [vmem:[%s8715_s24 + $0x7dc] sm:$0xf] %v1211_v55 }
 0x16c   : > { %1214 = vst [vmem:[%s8715_s24 + $0x7e0] sm:$0xf] %v1213_v56  ;;  %1216 = vst [vmem:[%s8715_s24 + $0x7e4] sm:$0xf] %v1215_v57  ;;  %v1217_v58 = vld [vmem:[%s8711_s14 + $0x1fa0] sm:$0xf] }
 0x16d   : > { %v1219_v59 = vld [vmem:[%s8711_s14 + $0x1fb0] sm:$0xf]  ;;  %v1221_v60 = vld [vmem:[%s8711_s14 + $0x1fc0] sm:$0xf]  ;;  %1218 = vst [vmem:[%s8715_s24 + $0x7e8] sm:$0xf] %v1217_v58 }
 0x16e   : > { %1220 = vst [vmem:[%s8715_s24 + $0x7ec] sm:$0xf] %v1219_v59  ;;  %1222 = vst [vmem:[%s8715_s24 + $0x7f0] sm:$0xf] %v1221_v60  ;;  %v1223_v61 = vld [vmem:[%s8711_s14 + $0x1fd0] sm:$0xf] }
 0x16f   : > { %v1225_v62 = vld [vmem:[%s8711_s14 + $0x1fe0] sm:$0xf]  ;;  %v1227_v63 = vld [vmem:[%s8711_s14 + $0x1ff0] sm:$0xf]  ;;  %1224 = vst [vmem:[%s8715_s24 + $0x7f4] sm:$0xf] %v1223_v61 }
 0x170   : > { %1226 = vst [vmem:[%s8715_s24 + $0x7f8] sm:$0xf] %v1225_v62  ;;  %1228 = vst [vmem:[%s8715_s24 + $0x7fc] sm:$0xf] %v1227_v63 }
 0x171 PF: > { %p7542_p11 = scmp.ge.s32.totalorder %s8604_s23, 1  ;;  %p4364_p12 = scmp.lt.s32.totalorder %s8604_s23, 9 }
 0x173   : > { %p4365_p13 = pnand %p7542_p11, %p4364_p12 }
 0x174   : > { %s4371_s27 = sand.u32 (!%p4365_p13), 1, %s8580_s17   ;;  %p4406_p0 = scmp.lt.s32.totalorder (!%p4365_p13), %s8592_s20, 1 }
 0x175   : > { %4368 = sbr.rel (%p4365_p13) target bundleno = 907 (0x38b), region = 84  ;;  %s7543_s28 = sshll.u32 (!%p4365_p13), %s4371_s27, 11 }
 0x176   : > { %s9742_s29 = scalar_lea.vmem (!%p4365_p13), [#allocation2], %s7543_s28  ;;  %p4411_p1 = scmp.lt.s32.totalorder (!%p4365_p13), %s8588_s19, 3 }
 0x177   : > { %v8276_v0 = vld [vmem:[%s9742_s29 + $0x40] sm:$0xff] (!%p4365_p13)   ;;  %v8280_v4 = vld [vmem:[%s9742_s29 + $0x48] sm:$0xff] (!%p4365_p13)   ;;  %v8284_v8 = vld [vmem:[%s9742_s29 + $0x50] sm:$0xff] (!%p4365_p13)  }
 0x178   : > { %v8277_v1 = vld [vmem:[%s9742_s29 + $0xc0] sm:$0xff] (!%p4365_p13)   ;;  %7852 = vmatprep.subr.bf16.mxu0 (!%p4365_p13), %v8276_v0  ;;  %v8281_v5 = vld [vmem:[%s9742_s29 + $0xc8] sm:$0xff] (!%p4365_p13)   ;;  %v8285_v9 = vld [vmem:[%s9742_s29 + $0xd0] sm:$0xff] (!%p4365_p13)  }
 0x179   : > { %v8278_v2 = vld [vmem:[%s9742_s29] sm:$0xff] (!%p4365_p13)   ;;  %7874 = vmatprep.subr.bf16.mxu1 (!%p4365_p13), %v8277_v1  ;;  %v8282_v6 = vld [vmem:[%s9742_s29 + $0x8] sm:$0xff] (!%p4365_p13)   ;;  %v8286_v10 = vld [vmem:[%s9742_s29 + $0x10] sm:$0xff] (!%p4365_p13)  }
 0x17a   : > { %v8279_v3 = vld [vmem:[%s9742_s29 + $0x80] sm:$0xff] (!%p4365_p13)   ;;  %7853 = vmatpush3.bf16.msra.mxu0 (!%p4365_p13), %v8278_v2  ;;  %v8283_v7 = vld [vmem:[%s9742_s29 + $0x88] sm:$0xff] (!%p4365_p13)   ;;  %v8287_v11 = vld [vmem:[%s9742_s29 + $0x90] sm:$0xff] (!%p4365_p13)  }
 0x17b   : > { %7875 = vmatpush3.bf16.msra.mxu1 (!%p4365_p13), %v8279_v3  ;;  %7854 = vmatprep.subr.bf16.mxu0 (!%p4365_p13), %v8280_v4  ;;  %v8288_v12 = vld [vmem:[%s9742_s29 + $0x58] sm:$0xff] (!%p4365_p13)   ;;  %v8292_v16 = vld [vmem:[%s9742_s29 + $0x60] sm:$0xff] (!%p4365_p13)   ;;  %v8296_v20 = vld [vmem:[%s9742_s29 + $0x68] sm:$0xff] (!%p4365_p13)  }
 0x17c   : > { %7876 = vmatprep.subr.bf16.mxu1 %v8281_v5  ;;  %v8289_v13 = vld [vmem:[%s9742_s29 + $0xd8] sm:$0xff]   ;;  %v8293_v17 = vld [vmem:[%s9742_s29 + $0xe0] sm:$0xff]   ;;  %v8297_v21 = vld [vmem:[%s9742_s29 + $0xe8] sm:$0xff]   ;;  %s4407_s17 = scalar_select %p4406_p0, %s8592_s20, 1 }
 0x17d   : > { %v8290_v14 = vld [vmem:[%s9742_s29 + $0x18] sm:$0xff]   ;;  %v8294_v18 = vld [vmem:[%s9742_s29 + $0x20] sm:$0xff]   ;;  %v8298_v22 = vld [vmem:[%s9742_s29 + $0x28] sm:$0xff]   ;;  %s4412_s11 = scalar_select %p4411_p1, %s8588_s19, 3 }
 0x17e   : > { %7855 = vmatpush3.bf16.msra.mxu0 %v8282_v6  ;;  %v8291_v15 = vld [vmem:[%s9742_s29 + $0x98] sm:$0xff]   ;;  %v8295_v19 = vld [vmem:[%s9742_s29 + $0xa0] sm:$0xff]   ;;  %v8299_v23 = vld [vmem:[%s9742_s29 + $0xa8] sm:$0xff]   ;;  %s7844_s5 = sshll.u32 %s4407_s17, 8 }
 0x17f   : > { %7877 = vmatpush3.bf16.msra.mxu1 %v8283_v7  ;;  %7856 = vmatprep.subr.bf16.mxu0 %v8284_v8  ;;  %v8300_v24 = vld [vmem:[%s9742_s29 + $0x70] sm:$0xff]   ;;  %v8304_v28 = vld [vmem:[%s9742_s29 + $0x78] sm:$0xff]   ;;  %s9779_s10 = scalar_lea.vmem %s10082_s0, %s7844_s5  ;;  %v8308_v40 = vld [vmem:[%s9742_s29 + $0x140] sm:$0xff]   ;;  %s4413_s14 = scalar_lea.vmem %s10084_s2, %s4412_s11 }
 0x180   : > { %7878 = vmatprep.subr.bf16.mxu1 %v8285_v9  ;;  %v8301_v25 = vld [vmem:[%s9742_s29 + $0xf0] sm:$0xff]   ;;  %v8305_v29 = vld [vmem:[%s9742_s29 + $0xf8] sm:$0xff]   ;;  %v4418_v32 = vld [vmem:[%s9779_s10] sm:$0xff]  ;;  %s4416_s28 = scalar_lea.vmem %s10085_s3, %s4412_s11 }
 0x181   : > { %v8302_v26 = vld [vmem:[%s9742_s29 + $0x30] sm:$0xff]   ;;  %v8306_v30 = vld [vmem:[%s9742_s29 + $0x38] sm:$0xff]   ;;  %v4434_v33 = vld [vmem:[%s9779_s10 + $0x80] sm:$0xff] }
 0x182   : > { %7857 = vmatpush3.bf16.msra.mxu0 %v8286_v10  ;;  %v8303_v27 = vld [vmem:[%s9742_s29 + $0xb0] sm:$0xff]   ;;  %v8307_v31 = vld [vmem:[%s9742_s29 + $0xb8] sm:$0xff]   ;;  %v4419_v34 = vld [vmem:[%s9779_s10 + $0x8] sm:$0xff]  ;;  %v7547_v35 = vcombine.low %v4418_v32, %v4434_v33  ;;  %v7548_v36 = vcombine.high %v4418_v32, %v4434_v33 }
 0x183   : > { %7879 = vmatpush3.bf16.msra.mxu1 %v8287_v11  ;;  %7858 = vmatprep.subr.bf16.mxu0 %v8288_v12  ;;  %v4435_v37 = vld [vmem:[%s9779_s10 + $0x88] sm:$0xff]  ;;  %v8309_v41 = vld [vmem:[%s9742_s29 + $0x1c0] sm:$0xff]   ;;  %v8316_v48 = vld [vmem:[%s9742_s29 + $0x150] sm:$0xff]  }
 0x184   : > { %7880 = vmatprep.subr.bf16.mxu1 %v8289_v13  ;;  %v7549_v38 = vcombine.low %v4419_v34, %v4435_v37  ;;  %v7550_v39 = vcombine.high %v4419_v34, %v4435_v37  ;;  %6690 = vmatprep.mubr.bf16.mxu0 %v7548_v36  ;;  %v8310_v42 = vld [vmem:[%s9742_s29 + $0x100] sm:$0xff]   ;;  %v8312_v44 = vld [vmem:[%s9742_s29 + $0x148] sm:$0xff]   ;;  %v8317_v49 = vld [vmem:[%s9742_s29 + $0x1d0] sm:$0xff]  }
 0x185   : > { %v8311_v43 = vld [vmem:[%s9742_s29 + $0x180] sm:$0xff]   ;;  %v8313_v45 = vld [vmem:[%s9742_s29 + $0x1c8] sm:$0xff]   ;;  %v8318_v50 = vld [vmem:[%s9742_s29 + $0x110] sm:$0xff]  }
 0x186   : > { %7859 = vmatpush3.bf16.msra.mxu0 %v8290_v14  ;;  %6731 = vmatprep.mubr.bf16.mxu1 %v7550_v39  ;;  %v8314_v46 = vld [vmem:[%s9742_s29 + $0x108] sm:$0xff]   ;;  %v8319_v51 = vld [vmem:[%s9742_s29 + $0x190] sm:$0xff]   ;;  %v8320_v52 = vld [vmem:[%s9742_s29 + $0x158] sm:$0xff]  }
 0x187   : > { %7881 = vmatpush3.bf16.msra.mxu1 %v8291_v15  ;;  %7860 = vmatprep.subr.bf16.mxu0 %v8292_v16  ;;  %v8315_v47 = vld [vmem:[%s9742_s29 + $0x188] sm:$0xff]   ;;  %v8321_v53 = vld [vmem:[%s9742_s29 + $0x1d8] sm:$0xff]   ;;  %v8324_v56 = vld [vmem:[%s9742_s29 + $0x160] sm:$0xff]  }
 0x188   : > { %7882 = vmatprep.subr.bf16.mxu1 %v8293_v17  ;;  %v8322_v54 = vld [vmem:[%s9742_s29 + $0x118] sm:$0xff]   ;;  %v8325_v57 = vld [vmem:[%s9742_s29 + $0x1e0] sm:$0xff]   ;;  %v8328_v60 = vld [vmem:[%s9742_s29 + $0x168] sm:$0xff]  }
 0x189   : > { %v8323_v55 = vld [vmem:[%s9742_s29 + $0x198] sm:$0xff]   ;;  %v8326_v58 = vld [vmem:[%s9742_s29 + $0x120] sm:$0xff]   ;;  %v8329_v61 = vld [vmem:[%s9742_s29 + $0x1e8] sm:$0xff]  }
 0x18a   : > { %7861 = vmatpush3.bf16.msra.mxu0 %v8294_v18  ;;  %v8327_v59 = vld [vmem:[%s9742_s29 + $0x1a0] sm:$0xff]   ;;  %v8330_v62 = vld [vmem:[%s9742_s29 + $0x128] sm:$0xff]   ;;  %v8332_v0 = vld [vmem:[%s9742_s29 + $0x170] sm:$0xff]  }
 0x18b   : > { %7883 = vmatpush3.bf16.msra.mxu1 %v8295_v19  ;;  %7862 = vmatprep.subr.bf16.mxu0 %v8296_v20  ;;  %v8331_v63 = vld [vmem:[%s9742_s29 + $0x1a8] sm:$0xff]   ;;  %v8333_v1 = vld [vmem:[%s9742_s29 + $0x1f0] sm:$0xff]   ;;  %v8336_v4 = vld [vmem:[%s9742_s29 + $0x178] sm:$0xff]  }
 0x18c   : > { %7884 = vmatprep.subr.bf16.mxu1 %v8297_v21  ;;  %v8334_v2 = vld [vmem:[%s9742_s29 + $0x130] sm:$0xff]   ;;  %v8337_v5 = vld [vmem:[%s9742_s29 + $0x1f8] sm:$0xff]   ;;  %v8340_v16 = vld [vmem:[%s9742_s29 + $0x240] sm:$0xff]  }
 0x18d   : > { %v8335_v3 = vld [vmem:[%s9742_s29 + $0x1b0] sm:$0xff]   ;;  %v8338_v6 = vld [vmem:[%s9742_s29 + $0x138] sm:$0xff]   ;;  %v8341_v17 = vld [vmem:[%s9742_s29 + $0x2c0] sm:$0xff]  }
 0x18e   : > { %7863 = vmatpush3.bf16.msra.mxu0 %v8298_v22  ;;  %v8339_v7 = vld [vmem:[%s9742_s29 + $0x1b8] sm:$0xff]   ;;  %v4420_v8 = vld [vmem:[%s9779_s10 + $0x10] sm:$0xff]  ;;  %v8342_v18 = vld [vmem:[%s9742_s29 + $0x200] sm:$0xff]  }
 0x18f   : > { %7885 = vmatpush3.bf16.msra.mxu1 %v8299_v23  ;;  %7864 = vmatprep.subr.bf16.mxu0 %v8300_v24  ;;  %v4436_v9 = vld [vmem:[%s9779_s10 + $0x90] sm:$0xff]  ;;  %v4421_v12 = vld [vmem:[%s9779_s10 + $0x18] sm:$0xff]  ;;  %v8343_v19 = vld [vmem:[%s9742_s29 + $0x280] sm:$0xff]  }
 0x190   : > { %7886 = vmatprep.subr.bf16.mxu1 %v8301_v25  ;;  %v7551_v10 = vcombine.low %v4420_v8, %v4436_v9  ;;  %v7552_v11 = vcombine.high %v4420_v8, %v4436_v9  ;;  %v4437_v13 = vld [vmem:[%s9779_s10 + $0x98] sm:$0xff]  ;;  %v8344_v20 = vld [vmem:[%s9742_s29 + $0x248] sm:$0xff]   ;;  %v8348_v24 = vld [vmem:[%s9742_s29 + $0x250] sm:$0xff]  }
 0x191   : > { %v7553_v14 = vcombine.low %v4421_v12, %v4437_v13  ;;  %v7554_v15 = vcombine.high %v4421_v12, %v4437_v13  ;;  %v8345_v21 = vld [vmem:[%s9742_s29 + $0x2c8] sm:$0xff]   ;;  %v8349_v25 = vld [vmem:[%s9742_s29 + $0x2d0] sm:$0xff]   ;;  %v8356_v32 = vld [vmem:[%s9742_s29 + $0x260] sm:$0xff]  }
 0x192   : > { %7865 = vmatpush3.bf16.msra.mxu0 %v8302_v26  ;;  %v8346_v22 = vld [vmem:[%s9742_s29 + $0x208] sm:$0xff]   ;;  %v8350_v26 = vld [vmem:[%s9742_s29 + $0x210] sm:$0xff]   ;;  %v8357_v33 = vld [vmem:[%s9742_s29 + $0x2e0] sm:$0xff]  }
 0x193   : > { %7887 = vmatpush3.bf16.msra.mxu1 %v8303_v27  ;;  %7866 = vmatprep.subr.bf16.mxu0 %v8304_v28  ;;  %v8347_v23 = vld [vmem:[%s9742_s29 + $0x288] sm:$0xff]   ;;  %v8351_v27 = vld [vmem:[%s9742_s29 + $0x290] sm:$0xff]   ;;  %v8352_v28 = vld [vmem:[%s9742_s29 + $0x258] sm:$0xff]  }
 0x194   : > { %7888 = vmatprep.subr.bf16.mxu1 %v8305_v29  ;;  %v8353_v29 = vld [vmem:[%s9742_s29 + $0x2d8] sm:$0xff]   ;;  %v8358_v34 = vld [vmem:[%s9742_s29 + $0x220] sm:$0xff]   ;;  %v8360_v36 = vld [vmem:[%s9742_s29 + $0x268] sm:$0xff]  }
 0x195   : > { %v8361_v37 = vld [vmem:[%s9742_s29 + $0x2e8] sm:$0xff]   ;;  %v8388_v8 = vld [vmem:[%s9742_s29 + $0x360] sm:$0xff]  }
 0x196   : > { %7867 = vmatpush3.bf16.msra.mxu0 %v8306_v30  ;;  %v8354_v30 = vld [vmem:[%s9742_s29 + $0x218] sm:$0xff]   ;;  %v8363_v39 = vld [vmem:[%s9742_s29 + $0x2a8] sm:$0xff]   ;;  %v8389_v9 = vld [vmem:[%s9742_s29 + $0x3e0] sm:$0xff]  }
 0x197   : > { %7889 = vmatpush3.bf16.msra.mxu1 %v8307_v31  ;;  %7896 = vmatprep.subr.bf16.mxu0 %v8308_v40  ;;  %v8355_v31 = vld [vmem:[%s9742_s29 + $0x298] sm:$0xff]   ;;  %v8364_v40 = vld [vmem:[%s9742_s29 + $0x270] sm:$0xff]   ;;  %v8392_v12 = vld [vmem:[%s9742_s29 + $0x368] sm:$0xff]  }
 0x198   : > { %7918 = vmatprep.subr.bf16.mxu1 %v8309_v41  ;;  %v8365_v41 = vld [vmem:[%s9742_s29 + $0x2f0] sm:$0xff]   ;;  %v8393_v13 = vld [vmem:[%s9742_s29 + $0x3e8] sm:$0xff]  }
 0x199   : > { %6691 = vmatmul.mubr.bf16.vlgmr.msra.gmra.mrb[0].mxu0 %v7547_v35  ;;  %v8359_v35 = vld [vmem:[%s9742_s29 + $0x2a0] sm:$0xff]  }
 0x19a   : > { %6732 = vmatmul.mubr.bf16.vlgmr.msra.gmra.mrb[0].mxu1 %v7549_v38  ;;  %7897 = vmatpush3.bf16.msra.mxu0 %v8310_v42  ;;  %v8362_v38 = vld [vmem:[%s9742_s29 + $0x228] sm:$0xff]   ;;  %v8366_v42 = vld [vmem:[%s9742_s29 + $0x230] sm:$0xff]  }
 0x19b   : > { %7919 = vmatpush3.bf16.msra.mxu1 %v8311_v43  ;;  %7898 = vmatprep.subr.bf16.mxu0 %v8312_v44  ;;  %v8367_v43 = vld [vmem:[%s9742_s29 + $0x2b0] sm:$0xff]   ;;  %v8368_v44 = vld [vmem:[%s9742_s29 + $0x278] sm:$0xff]  }
 0x19c   : > { %7920 = vmatprep.subr.bf16.mxu1 %v8313_v45  ;;  %6772 = vmatprep.mubr.bf16.mxu0 %v7552_v11  ;;  %v8369_v45 = vld [vmem:[%s9742_s29 + $0x2f8] sm:$0xff]   ;;  %v8391_v11 = vld [vmem:[%s9742_s29 + $0x3a0] sm:$0xff]  }
 0x19d   : > { %6813 = vmatprep.mubr.bf16.mxu1 %v7554_v15  ;;  %v8395_v15 = vld [vmem:[%s9742_s29 + $0x3a8] sm:$0xff]  }
 0x19e   : > { %7899 = vmatpush3.bf16.msra.mxu0 %v8314_v46  ;;  %v8370_v46 = vld [vmem:[%s9742_s29 + $0x238] sm:$0xff]  }
 0x19f   : > { %7921 = vmatpush3.bf16.msra.mxu1 %v8315_v47  ;;  %7900 = vmatprep.subr.bf16.mxu0 %v8316_v48  ;;  %v8371_v47 = vld [vmem:[%s9742_s29 + $0x2b8] sm:$0xff]   ;;  %v4422_v48 = vld [vmem:[%s9779_s10 + $0x20] sm:$0xff] }
 0x1a0   : > { %7922 = vmatprep.subr.bf16.mxu1 %v8317_v49  ;;  %v4438_v49 = vld [vmem:[%s9779_s10 + $0xa0] sm:$0xff] }
 0x1a2   : > { %7901 = vmatpush3.bf16.msra.mxu0 %v8318_v50  ;;  %v4423_v50 = vld [vmem:[%s9779_s10 + $0x28] sm:$0xff] }
 0x1a3   : > { %7923 = vmatpush3.bf16.msra.mxu1 %v8319_v51  ;;  %7902 = vmatprep.subr.bf16.mxu0 %v8320_v52  ;;  %v4439_v51 = vld [vmem:[%s9779_s10 + $0xa8] sm:$0xff]  ;;  %v7555_v52 = vcombine.low %v4422_v48, %v4438_v49 }
 0x1a4   : > { %7924 = vmatprep.subr.bf16.mxu1 %v8321_v53  ;;  %v7556_v53 = vcombine.high %v4422_v48, %v4438_v49  ;;  %v8420_v48 = vld [vmem:[%s9742_s29 + $0x460] sm:$0xff]  }
 0x1a5   : > { %v8421_v49 = vld [vmem:[%s9742_s29 + $0x4e0] sm:$0xff]  }
 0x1a6   : > { %7903 = vmatpush3.bf16.msra.mxu0 %v8322_v54  ;;  %v7557_v54 = vcombine.low %v4423_v50, %v4439_v51 }
 0x1a7   : > { %7925 = vmatpush3.bf16.msra.mxu1 %v8323_v55  ;;  %7904 = vmatprep.subr.bf16.mxu0 %v8324_v56  ;;  %v7558_v55 = vcombine.high %v4423_v50, %v4439_v51  ;;  %v8372_v56 = vld [vmem:[%s9742_s29 + $0x340] sm:$0xff]  }
 0x1a8   : > { %7926 = vmatprep.subr.bf16.mxu1 %v8325_v57  ;;  %v8373_v57 = vld [vmem:[%s9742_s29 + $0x3c0] sm:$0xff]  }
 0x1a9   : > { %v8422_v50 = vld [vmem:[%s9742_s29 + $0x420] sm:$0xff]  }
 0x1aa   : > { %7905 = vmatpush3.bf16.msra.mxu0 %v8326_v58  ;;  %v8374_v58 = vld [vmem:[%s9742_s29 + $0x300] sm:$0xff]  }
 0x1ab   : > { %7927 = vmatpush3.bf16.msra.mxu1 %v8327_v59  ;;  %7906 = vmatprep.subr.bf16.mxu0 %v8328_v60  ;;  %v8375_v59 = vld [vmem:[%s9742_s29 + $0x380] sm:$0xff]   ;;  %v8376_v60 = vld [vmem:[%s9742_s29 + $0x348] sm:$0xff]  }
 0x1ac   : > { %7928 = vmatprep.subr.bf16.mxu1 %v8329_v61  ;;  %v8377_v61 = vld [vmem:[%s9742_s29 + $0x3c8] sm:$0xff]   ;;  %v8423_v51 = vld [vmem:[%s9742_s29 + $0x4a0] sm:$0xff]  }
 0x1ae   : > { %7907 = vmatpush3.bf16.msra.mxu0 %v8330_v62  ;;  %v8378_v62 = vld [vmem:[%s9742_s29 + $0x308] sm:$0xff]  }
 0x1af   : > { %7929 = vmatpush3.bf16.msra.mxu1 %v8331_v63  ;;  %7908 = vmatprep.subr.bf16.mxu0 %v8332_v0  ;;  %v8379_v63 = vld [vmem:[%s9742_s29 + $0x388] sm:$0xff]   ;;  %v8380_v0 = vld [vmem:[%s9742_s29 + $0x350] sm:$0xff]  }
 0x1b0   : > { %7930 = vmatprep.subr.bf16.mxu1 %v8333_v1  ;;  %v8381_v1 = vld [vmem:[%s9742_s29 + $0x3d0] sm:$0xff]  }
 0x1b2   : > { %7909 = vmatpush3.bf16.msra.mxu0 %v8334_v2  ;;  %v8382_v2 = vld [vmem:[%s9742_s29 + $0x310] sm:$0xff]  }
 0x1b3   : > { %7931 = vmatpush3.bf16.msra.mxu1 %v8335_v3  ;;  %7910 = vmatprep.subr.bf16.mxu0 %v8336_v4  ;;  %v8383_v3 = vld [vmem:[%s9742_s29 + $0x390] sm:$0xff]   ;;  %v8384_v4 = vld [vmem:[%s9742_s29 + $0x358] sm:$0xff]  }
 0x1b4   : > { %7932 = vmatprep.subr.bf16.mxu1 %v8337_v5  ;;  %v8385_v5 = vld [vmem:[%s9742_s29 + $0x3d8] sm:$0xff]  }
 0x1b6   : > { %7911 = vmatpush3.bf16.msra.mxu0 %v8338_v6  ;;  %v8386_v6 = vld [vmem:[%s9742_s29 + $0x318] sm:$0xff]  }
 0x1b7   : > { %7933 = vmatpush3.bf16.msra.mxu1 %v8339_v7  ;;  %7940 = vmatprep.subr.bf16.mxu0 %v8340_v16  ;;  %v8387_v7 = vld [vmem:[%s9742_s29 + $0x398] sm:$0xff]   ;;  %v8396_v16 = vld [vmem:[%s9742_s29 + $0x370] sm:$0xff]  }
 0x1b8   : > { %7962 = vmatprep.subr.bf16.mxu1 %v8341_v17  ;;  %v8397_v17 = vld [vmem:[%s9742_s29 + $0x3f0] sm:$0xff]  }
 0x1b9   : > { %6773 = vmatmul.mubr.bf16.vlgmr.msra.gmra.mrb[4].mxu0 %v7551_v10  ;;  %v8390_v10 = vld [vmem:[%s9742_s29 + $0x320] sm:$0xff]  }
 0x1ba   : > { %6814 = vmatmul.mubr.bf16.vlgmr.msra.gmra.mrb[4].mxu1 %v7553_v14  ;;  %7941 = vmatpush3.bf16.msra.mxu0 %v8342_v18  ;;  %v8394_v14 = vld [vmem:[%s9742_s29 + $0x328] sm:$0xff]   ;;  %v8398_v18 = vld [vmem:[%s9742_s29 + $0x330] sm:$0xff]  }
 0x1bb   : > { %7963 = vmatpush3.bf16.msra.mxu1 %v8343_v19  ;;  %7942 = vmatprep.subr.bf16.mxu0 %v8344_v20  ;;  %v8399_v19 = vld [vmem:[%s9742_s29 + $0x3b0] sm:$0xff]   ;;  %v8400_v20 = vld [vmem:[%s9742_s29 + $0x378] sm:$0xff]  }
 0x1bc   : > { %7964 = vmatprep.subr.bf16.mxu1 %v8345_v21  ;;  %6854 = vmatprep.mubr.bf16.mxu0 %v7556_v53  ;;  %v8401_v21 = vld [vmem:[%s9742_s29 + $0x3f8] sm:$0xff]   ;;  %v8425_v53 = vld [vmem:[%s9742_s29 + $0x4e8] sm:$0xff]  }
 0x1bd   : > { %6895 = vmatprep.mubr.bf16.mxu1 %v7558_v55  ;;  %v8427_v55 = vld [vmem:[%s9742_s29 + $0x4a8] sm:$0xff]  }
 0x1be   : > { %7943 = vmatpush3.bf16.msra.mxu0 %v8346_v22  ;;  %v8402_v22 = vld [vmem:[%s9742_s29 + $0x338] sm:$0xff]  }
 0x1bf   : > { %7965 = vmatpush3.bf16.msra.mxu1 %v8347_v23  ;;  %7944 = vmatprep.subr.bf16.mxu0 %v8348_v24  ;;  %v8403_v23 = vld [vmem:[%s9742_s29 + $0x3b8] sm:$0xff]   ;;  %v4424_v24 = vld [vmem:[%s9779_s10 + $0x30] sm:$0xff] }
 0x1c0   : > { %7966 = vmatprep.subr.bf16.mxu1 %v8349_v25  ;;  %v4440_v25 = vld [vmem:[%s9779_s10 + $0xb0] sm:$0xff] }
 0x1c2   : > { %7945 = vmatpush3.bf16.msra.mxu0 %v8350_v26  ;;  %v4425_v26 = vld [vmem:[%s9779_s10 + $0x38] sm:$0xff] }
 0x1c3   : > { %7967 = vmatpush3.bf16.msra.mxu1 %v8351_v27  ;;  %7946 = vmatprep.subr.bf16.mxu0 %v8352_v28  ;;  %v7559_v27 = vcombine.low %v4424_v24, %v4440_v25  ;;  %v7560_v28 = vcombine.high %v4424_v24, %v4440_v25  ;;  %v8452_v24 = vld [vmem:[%s9742_s29 + $0x560] sm:$0xff]  }
 0x1c4   : > { %7968 = vmatprep.subr.bf16.mxu1 %v8353_v29  ;;  %v4441_v29 = vld [vmem:[%s9779_s10 + $0xb8] sm:$0xff]  ;;  %v8453_v25 = vld [vmem:[%s9742_s29 + $0x5e0] sm:$0xff]  }
 0x1c6   : > { %7947 = vmatpush3.bf16.msra.mxu0 %v8354_v30  ;;  %v7561_v30 = vcombine.low %v4425_v26, %v4441_v29 }
 0x1c7   : > { %7969 = vmatpush3.bf16.msra.mxu1 %v8355_v31  ;;  %7948 = vmatprep.subr.bf16.mxu0 %v8356_v32  ;;  %v7562_v31 = vcombine.high %v4425_v26, %v4441_v29  ;;  %v8404_v32 = vld [vmem:[%s9742_s29 + $0x440] sm:$0xff]   ;;  %v8457_v29 = vld [vmem:[%s9742_s29 + $0x5e8] sm:$0xff]  }
 0x1c8   : > { %7970 = vmatprep.subr.bf16.mxu1 %v8357_v33  ;;  %v8405_v33 = vld [vmem:[%s9742_s29 + $0x4c0] sm:$0xff]  }
 0x1c9   : > { %v8454_v26 = vld [vmem:[%s9742_s29 + $0x520] sm:$0xff]  }
 0x1ca   : > { %7949 = vmatpush3.bf16.msra.mxu0 %v8358_v34  ;;  %v8406_v34 = vld [vmem:[%s9742_s29 + $0x400] sm:$0xff]  }
 0x1cb   : > { %7971 = vmatpush3.bf16.msra.mxu1 %v8359_v35  ;;  %7950 = vmatprep.subr.bf16.mxu0 %v8360_v36  ;;  %v8407_v35 = vld [vmem:[%s9742_s29 + $0x480] sm:$0xff]   ;;  %v8408_v36 = vld [vmem:[%s9742_s29 + $0x448] sm:$0xff]  }
 0x1cc   : > { %7972 = vmatprep.subr.bf16.mxu1 %v8361_v37  ;;  %v8409_v37 = vld [vmem:[%s9742_s29 + $0x4c8] sm:$0xff]  }
 0x1ce   : > { %7951 = vmatpush3.bf16.msra.mxu0 %v8362_v38  ;;  %v8410_v38 = vld [vmem:[%s9742_s29 + $0x408] sm:$0xff]  }
 0x1cf   : > { %7973 = vmatpush3.bf16.msra.mxu1 %v8363_v39  ;;  %7952 = vmatprep.subr.bf16.mxu0 %v8364_v40  ;;  %v8411_v39 = vld [vmem:[%s9742_s29 + $0x488] sm:$0xff]   ;;  %v8412_v40 = vld [vmem:[%s9742_s29 + $0x450] sm:$0xff]  }
 0x1d0   : > { %7974 = vmatprep.subr.bf16.mxu1 %v8365_v41  ;;  %v8413_v41 = vld [vmem:[%s9742_s29 + $0x4d0] sm:$0xff]  }
 0x1d2   : > { %7953 = vmatpush3.bf16.msra.mxu0 %v8366_v42  ;;  %v8414_v42 = vld [vmem:[%s9742_s29 + $0x410] sm:$0xff]  }
 0x1d3   : > { %7975 = vmatpush3.bf16.msra.mxu1 %v8367_v43  ;;  %7954 = vmatprep.subr.bf16.mxu0 %v8368_v44  ;;  %v8415_v43 = vld [vmem:[%s9742_s29 + $0x490] sm:$0xff]   ;;  %v8416_v44 = vld [vmem:[%s9742_s29 + $0x458] sm:$0xff]  }
 0x1d4   : > { %7976 = vmatprep.subr.bf16.mxu1 %v8369_v45  ;;  %v8417_v45 = vld [vmem:[%s9742_s29 + $0x4d8] sm:$0xff]  }
 0x1d6   : > { %7955 = vmatpush3.bf16.msra.mxu0 %v8370_v46  ;;  %v8418_v46 = vld [vmem:[%s9742_s29 + $0x418] sm:$0xff]  }
 0x1d7   : > { %7977 = vmatpush3.bf16.msra.mxu1 %v8371_v47  ;;  %7984 = vmatprep.subr.bf16.mxu0 %v8372_v56  ;;  %v8419_v47 = vld [vmem:[%s9742_s29 + $0x498] sm:$0xff]   ;;  %v8428_v56 = vld [vmem:[%s9742_s29 + $0x470] sm:$0xff]  }
 0x1d8   : > { %8006 = vmatprep.subr.bf16.mxu1 %v8373_v57  ;;  %v8429_v57 = vld [vmem:[%s9742_s29 + $0x4f0] sm:$0xff]  }
 0x1d9   : > { %6855 = vmatmul.mubr.bf16.vlgmr.msra.gmra.mrb[8].mxu0 %v7555_v52  ;;  %v8424_v52 = vld [vmem:[%s9742_s29 + $0x468] sm:$0xff]  }
 0x1da   : > { %6896 = vmatmul.mubr.bf16.vlgmr.msra.gmra.mrb[8].mxu1 %v7557_v54  ;;  %7985 = vmatpush3.bf16.msra.mxu0 %v8374_v58  ;;  %v8426_v54 = vld [vmem:[%s9742_s29 + $0x428] sm:$0xff]   ;;  %v8430_v58 = vld [vmem:[%s9742_s29 + $0x430] sm:$0xff]  }
 0x1db   : > { %8007 = vmatpush3.bf16.msra.mxu1 %v8375_v59  ;;  %7986 = vmatprep.subr.bf16.mxu0 %v8376_v60  ;;  %v8431_v59 = vld [vmem:[%s9742_s29 + $0x4b0] sm:$0xff]   ;;  %v8432_v60 = vld [vmem:[%s9742_s29 + $0x478] sm:$0xff]  }
 0x1dc   : > { %8008 = vmatprep.subr.bf16.mxu1 %v8377_v61  ;;  %6936 = vmatprep.mubr.bf16.mxu0 %v7560_v28  ;;  %v8433_v61 = vld [vmem:[%s9742_s29 + $0x4f8] sm:$0xff]   ;;  %v8456_v28 = vld [vmem:[%s9742_s29 + $0x568] sm:$0xff]  }
 0x1dd   : > { %6977 = vmatprep.mubr.bf16.mxu1 %v7562_v31  ;;  %v8459_v31 = vld [vmem:[%s9742_s29 + $0x5a8] sm:$0xff]  }
 0x1de   : > { %7987 = vmatpush3.bf16.msra.mxu0 %v8378_v62  ;;  %v8434_v62 = vld [vmem:[%s9742_s29 + $0x438] sm:$0xff]  }
 0x1df   : > { %8009 = vmatpush3.bf16.msra.mxu1 %v8379_v63  ;;  %7988 = vmatprep.subr.bf16.mxu0 %v8380_v0  ;;  %v8435_v63 = vld [vmem:[%s9742_s29 + $0x4b8] sm:$0xff]   ;;  %v4426_v0 = vld [vmem:[%s9779_s10 + $0x40] sm:$0xff] }
 0x1e0   : > { %8010 = vmatprep.subr.bf16.mxu1 %v8381_v1  ;;  %v4442_v1 = vld [vmem:[%s9779_s10 + $0xc0] sm:$0xff] }
 0x1e2   : > { %7989 = vmatpush3.bf16.msra.mxu0 %v8382_v2  ;;  %v7563_v2 = vcombine.low %v4426_v0, %v4442_v1 }
 0x1e3   : > { %8011 = vmatpush3.bf16.msra.mxu1 %v8383_v3  ;;  %7990 = vmatprep.subr.bf16.mxu0 %v8384_v4  ;;  %v7564_v3 = vcombine.high %v4426_v0, %v4442_v1  ;;  %v4427_v4 = vld [vmem:[%s9779_s10 + $0x48] sm:$0xff]  ;;  %v8484_v0 = vld [vmem:[%s9742_s29 + $0x660] sm:$0xff]  }
 0x1e4   : > { %8012 = vmatprep.subr.bf16.mxu1 %v8385_v5  ;;  %v4443_v5 = vld [vmem:[%s9779_s10 + $0xc8] sm:$0xff]  ;;  %v8485_v1 = vld [vmem:[%s9742_s29 + $0x6e0] sm:$0xff]  }
 0x1e6   : > { %7991 = vmatpush3.bf16.msra.mxu0 %v8386_v6  ;;  %v7565_v6 = vcombine.low %v4427_v4, %v4443_v5 }
 0x1e7   : > { %8013 = vmatpush3.bf16.msra.mxu1 %v8387_v7  ;;  %7992 = vmatprep.subr.bf16.mxu0 %v8388_v8  ;;  %v7566_v7 = vcombine.high %v4427_v4, %v4443_v5  ;;  %v8436_v8 = vld [vmem:[%s9742_s29 + $0x540] sm:$0xff]   ;;  %v8488_v4 = vld [vmem:[%s9742_s29 + $0x668] sm:$0xff]  }
 0x1e8   : > { %8014 = vmatprep.subr.bf16.mxu1 %v8389_v9  ;;  %v8437_v9 = vld [vmem:[%s9742_s29 + $0x5c0] sm:$0xff]   ;;  %v8489_v5 = vld [vmem:[%s9742_s29 + $0x6e8] sm:$0xff]  }
 0x1ea   : > { %7993 = vmatpush3.bf16.msra.mxu0 %v8390_v10  ;;  %v8438_v10 = vld [vmem:[%s9742_s29 + $0x500] sm:$0xff]  }
 0x1eb   : > { %8015 = vmatpush3.bf16.msra.mxu1 %v8391_v11  ;;  %7994 = vmatprep.subr.bf16.mxu0 %v8392_v12  ;;  %v8439_v11 = vld [vmem:[%s9742_s29 + $0x580] sm:$0xff]   ;;  %v8440_v12 = vld [vmem:[%s9742_s29 + $0x548] sm:$0xff]  }
 0x1ec   : > { %8016 = vmatprep.subr.bf16.mxu1 %v8393_v13  ;;  %v8441_v13 = vld [vmem:[%s9742_s29 + $0x5c8] sm:$0xff]  }
 0x1ee   : > { %7995 = vmatpush3.bf16.msra.mxu0 %v8394_v14  ;;  %v8442_v14 = vld [vmem:[%s9742_s29 + $0x508] sm:$0xff]  }
 0x1ef   : > { %8017 = vmatpush3.bf16.msra.mxu1 %v8395_v15  ;;  %7996 = vmatprep.subr.bf16.mxu0 %v8396_v16  ;;  %v8443_v15 = vld [vmem:[%s9742_s29 + $0x588] sm:$0xff]   ;;  %v8444_v16 = vld [vmem:[%s9742_s29 + $0x550] sm:$0xff]  }
 0x1f0   : > { %8018 = vmatprep.subr.bf16.mxu1 %v8397_v17  ;;  %v8445_v17 = vld [vmem:[%s9742_s29 + $0x5d0] sm:$0xff]  }
 0x1f2   : > { %7997 = vmatpush3.bf16.msra.mxu0 %v8398_v18  ;;  %v8446_v18 = vld [vmem:[%s9742_s29 + $0x510] sm:$0xff]  }
 0x1f3   : > { %8019 = vmatpush3.bf16.msra.mxu1 %v8399_v19  ;;  %7998 = vmatprep.subr.bf16.mxu0 %v8400_v20  ;;  %v8447_v19 = vld [vmem:[%s9742_s29 + $0x590] sm:$0xff]   ;;  %v8448_v20 = vld [vmem:[%s9742_s29 + $0x558] sm:$0xff]  }
 0x1f4   : > { %8020 = vmatprep.subr.bf16.mxu1 %v8401_v21  ;;  %v8449_v21 = vld [vmem:[%s9742_s29 + $0x5d8] sm:$0xff]  }
 0x1f6   : > { %7999 = vmatpush3.bf16.msra.mxu0 %v8402_v22  ;;  %v8450_v22 = vld [vmem:[%s9742_s29 + $0x518] sm:$0xff]  }
 0x1f7   : > { %8021 = vmatpush3.bf16.msra.mxu1 %v8403_v23  ;;  %8028 = vmatprep.subr.bf16.mxu0 %v8404_v32  ;;  %v8451_v23 = vld [vmem:[%s9742_s29 + $0x598] sm:$0xff]   ;;  %v8460_v32 = vld [vmem:[%s9742_s29 + $0x570] sm:$0xff]  }
 0x1f8   : > { %8050 = vmatprep.subr.bf16.mxu1 %v8405_v33  ;;  %v8461_v33 = vld [vmem:[%s9742_s29 + $0x5f0] sm:$0xff]  }
 0x1f9   : > { %6937 = vmatmul.mubr.bf16.vlgmr.msra.gmra.mrb[12].mxu0 %v7559_v27  ;;  %v8455_v27 = vld [vmem:[%s9742_s29 + $0x5a0] sm:$0xff]  }
 0x1fa   : > { %6978 = vmatmul.mubr.bf16.vlgmr.msra.gmra.mrb[12].mxu1 %v7561_v30  ;;  %8029 = vmatpush3.bf16.msra.mxu0 %v8406_v34  ;;  %v8458_v30 = vld [vmem:[%s9742_s29 + $0x528] sm:$0xff]   ;;  %v8462_v34 = vld [vmem:[%s9742_s29 + $0x530] sm:$0xff]  }
 0x1fb   : > { %8051 = vmatpush3.bf16.msra.mxu1 %v8407_v35  ;;  %8030 = vmatprep.subr.bf16.mxu0 %v8408_v36  ;;  %v8463_v35 = vld [vmem:[%s9742_s29 + $0x5b0] sm:$0xff]   ;;  %v8464_v36 = vld [vmem:[%s9742_s29 + $0x578] sm:$0xff]  }
 0x1fc   : > { %8052 = vmatprep.subr.bf16.mxu1 %v8409_v37  ;;  %7018 = vmatprep.mubr.bf16.mxu0 %v7564_v3  ;;  %v8465_v37 = vld [vmem:[%s9742_s29 + $0x5f8] sm:$0xff]   ;;  %v8487_v3 = vld [vmem:[%s9742_s29 + $0x6a0] sm:$0xff]  }
 0x1fd   : > { %7059 = vmatprep.mubr.bf16.mxu1 %v7566_v7  ;;  %v8491_v7 = vld [vmem:[%s9742_s29 + $0x6a8] sm:$0xff]  }
 0x1fe   : > { %8031 = vmatpush3.bf16.msra.mxu0 %v8410_v38  ;;  %v8466_v38 = vld [vmem:[%s9742_s29 + $0x538] sm:$0xff]  }
 0x1ff   : > { %8053 = vmatpush3.bf16.msra.mxu1 %v8411_v39  ;;  %8032 = vmatprep.subr.bf16.mxu0 %v8412_v40  ;;  %v8467_v39 = vld [vmem:[%s9742_s29 + $0x5b8] sm:$0xff]   ;;  %v4428_v40 = vld [vmem:[%s9779_s10 + $0x50] sm:$0xff] }
 0x200   : > { %8054 = vmatprep.subr.bf16.mxu1 %v8413_v41  ;;  %v4444_v41 = vld [vmem:[%s9779_s10 + $0xd0] sm:$0xff] }
 0x202   : > { %8033 = vmatpush3.bf16.msra.mxu0 %v8414_v42  ;;  %v4429_v42 = vld [vmem:[%s9779_s10 + $0x58] sm:$0xff] }
 0x203   : > { %8055 = vmatpush3.bf16.msra.mxu1 %v8415_v43  ;;  %8034 = vmatprep.subr.bf16.mxu0 %v8416_v44  ;;  %v4445_v43 = vld [vmem:[%s9779_s10 + $0xd8] sm:$0xff]  ;;  %v7567_v44 = vcombine.low %v4428_v40, %v4444_v41 }
 0x204   : > { %8056 = vmatprep.subr.bf16.mxu1 %v8417_v45  ;;  %v7568_v45 = vcombine.high %v4428_v40, %v4444_v41  ;;  %v8515_v41 = vld [vmem:[%s9742_s29 + $0x798] sm:$0xff]  }
 0x206   : > { %8035 = vmatpush3.bf16.msra.mxu0 %v8418_v46  ;;  %v7569_v46 = vcombine.low %v4429_v42, %v4445_v43 }
 0x207   : > { %8057 = vmatpush3.bf16.msra.mxu1 %v8419_v47  ;;  %8036 = vmatprep.subr.bf16.mxu0 %v8420_v48  ;;  %v7570_v47 = vcombine.high %v4429_v42, %v4445_v43  ;;  %v8468_v48 = vld [vmem:[%s9742_s29 + $0x640] sm:$0xff]  }
 0x208   : > { %8058 = vmatprep.subr.bf16.mxu1 %v8421_v49  ;;  %v8469_v49 = vld [vmem:[%s9742_s29 + $0x6c0] sm:$0xff]  }
 0x209   : > { %v8516_v43 = vld [vmem:[%s9742_s29 + $0x760] sm:$0xff]  }
 0x20a   : > { %8037 = vmatpush3.bf16.msra.mxu0 %v8422_v50  ;;  %v8470_v50 = vld [vmem:[%s9742_s29 + $0x600] sm:$0xff]  }
 0x20b   : > { %8059 = vmatpush3.bf16.msra.mxu1 %v8423_v51  ;;  %8038 = vmatprep.subr.bf16.mxu0 %v8424_v52  ;;  %v8471_v51 = vld [vmem:[%s9742_s29 + $0x680] sm:$0xff]   ;;  %v8472_v52 = vld [vmem:[%s9742_s29 + $0x648] sm:$0xff]  }
 0x20c   : > { %8060 = vmatprep.subr.bf16.mxu1 %v8425_v53  ;;  %v8473_v53 = vld [vmem:[%s9742_s29 + $0x6c8] sm:$0xff]  }
 0x20e   : > { %8039 = vmatpush3.bf16.msra.mxu0 %v8426_v54  ;;  %v8474_v54 = vld [vmem:[%s9742_s29 + $0x608] sm:$0xff]  }
 0x20f   : > { %8061 = vmatpush3.bf16.msra.mxu1 %v8427_v55  ;;  %8040 = vmatprep.subr.bf16.mxu0 %v8428_v56  ;;  %v8475_v55 = vld [vmem:[%s9742_s29 + $0x688] sm:$0xff]   ;;  %v8476_v56 = vld [vmem:[%s9742_s29 + $0x650] sm:$0xff]  }
 0x210   : > { %8062 = vmatprep.subr.bf16.mxu1 %v8429_v57  ;;  %v8477_v57 = vld [vmem:[%s9742_s29 + $0x6d0] sm:$0xff]  }
 0x212   : > { %8041 = vmatpush3.bf16.msra.mxu0 %v8430_v58  ;;  %v8478_v58 = vld [vmem:[%s9742_s29 + $0x610] sm:$0xff]  }
 0x213   : > { %8063 = vmatpush3.bf16.msra.mxu1 %v8431_v59  ;;  %8042 = vmatprep.subr.bf16.mxu0 %v8432_v60  ;;  %v8479_v59 = vld [vmem:[%s9742_s29 + $0x690] sm:$0xff]   ;;  %v8480_v60 = vld [vmem:[%s9742_s29 + $0x658] sm:$0xff]  }
 0x214   : > { %8064 = vmatprep.subr.bf16.mxu1 %v8433_v61  ;;  %v8481_v61 = vld [vmem:[%s9742_s29 + $0x6d8] sm:$0xff]  }
 0x216   : > { %8043 = vmatpush3.bf16.msra.mxu0 %v8434_v62  ;;  %v8482_v62 = vld [vmem:[%s9742_s29 + $0x618] sm:$0xff]  }
 0x217   : > { %8065 = vmatpush3.bf16.msra.mxu1 %v8435_v63  ;;  %8072 = vmatprep.subr.bf16.mxu0 %v8436_v8  ;;  %v8483_v63 = vld [vmem:[%s9742_s29 + $0x698] sm:$0xff]   ;;  %v8492_v8 = vld [vmem:[%s9742_s29 + $0x670] sm:$0xff]  }
 0x218   : > { %8094 = vmatprep.subr.bf16.mxu1 %v8437_v9  ;;  %v8493_v9 = vld [vmem:[%s9742_s29 + $0x6f0] sm:$0xff]  }
 0x219   : > { %7019 = vmatmul.mubr.bf16.vlgmr.msra.gmra.mrb[16].mxu0 %v7563_v2  ;;  %v8486_v2 = vld [vmem:[%s9742_s29 + $0x620] sm:$0xff]  }
 0x21a   : > { %7060 = vmatmul.mubr.bf16.vlgmr.msra.gmra.mrb[16].mxu1 %v7565_v6  ;;  %8073 = vmatpush3.bf16.msra.mxu0 %v8438_v10  ;;  %v8490_v6 = vld [vmem:[%s9742_s29 + $0x628] sm:$0xff]   ;;  %v8494_v10 = vld [vmem:[%s9742_s29 + $0x630] sm:$0xff]  }
 0x21b   : > { %8095 = vmatpush3.bf16.msra.mxu1 %v8439_v11  ;;  %8074 = vmatprep.subr.bf16.mxu0 %v8440_v12  ;;  %v8495_v11 = vld [vmem:[%s9742_s29 + $0x6b0] sm:$0xff]   ;;  %v8496_v12 = vld [vmem:[%s9742_s29 + $0x678] sm:$0xff]  }
 0x21c   : > { %8096 = vmatprep.subr.bf16.mxu1 %v8441_v13  ;;  %7100 = vmatprep.mubr.bf16.mxu0 %v7568_v45  ;;  %v8497_v13 = vld [vmem:[%s9742_s29 + $0x6f8] sm:$0xff]  }
 0x21d   : > { %7141 = vmatprep.mubr.bf16.mxu1 %v7570_v47 }
 0x21e   : > { %8075 = vmatpush3.bf16.msra.mxu0 %v8442_v14  ;;  %v8498_v14 = vld [vmem:[%s9742_s29 + $0x638] sm:$0xff]  }
 0x21f   : > { %8097 = vmatpush3.bf16.msra.mxu1 %v8443_v15  ;;  %8076 = vmatprep.subr.bf16.mxu0 %v8444_v16  ;;  %v8499_v15 = vld [vmem:[%s9742_s29 + $0x6b8] sm:$0xff]   ;;  %v4430_v16 = vld [vmem:[%s9779_s10 + $0x60] sm:$0xff] }
 0x220   : > { %8098 = vmatprep.subr.bf16.mxu1 %v8445_v17  ;;  %v4446_v17 = vld [vmem:[%s9779_s10 + $0xe0] sm:$0xff] }
 0x222   : > { %8077 = vmatpush3.bf16.msra.mxu0 %v8446_v18  ;;  %v4431_v18 = vld [vmem:[%s9779_s10 + $0x68] sm:$0xff] }
 0x223   : > { %8099 = vmatpush3.bf16.msra.mxu1 %v8447_v19  ;;  %8078 = vmatprep.subr.bf16.mxu0 %v8448_v20  ;;  %v7571_v19 = vcombine.low %v4430_v16, %v4446_v17  ;;  %v7572_v20 = vcombine.high %v4430_v16, %v4446_v17 }
 0x224   : > { %8100 = vmatprep.subr.bf16.mxu1 %v8449_v21  ;;  %v4447_v21 = vld [vmem:[%s9779_s10 + $0xe8] sm:$0xff] }
 0x226   : > { %8079 = vmatpush3.bf16.msra.mxu0 %v8450_v22  ;;  %v7573_v22 = vcombine.low %v4431_v18, %v4447_v21 }
 0x227   : > { %8101 = vmatpush3.bf16.msra.mxu1 %v8451_v23  ;;  %8080 = vmatprep.subr.bf16.mxu0 %v8452_v24  ;;  %v7574_v23 = vcombine.high %v4431_v18, %v4447_v21  ;;  %v8500_v24 = vld [vmem:[%s9742_s29 + $0x740] sm:$0xff]  }
 0x228   : > { %8102 = vmatprep.subr.bf16.mxu1 %v8453_v25  ;;  %v8501_v25 = vld [vmem:[%s9742_s29 + $0x7c0] sm:$0xff]  }
 0x22a   : > { %8081 = vmatpush3.bf16.msra.mxu0 %v8454_v26  ;;  %v8502_v26 = vld [vmem:[%s9742_s29 + $0x700] sm:$0xff]  }
 0x22b   : > { %8103 = vmatpush3.bf16.msra.mxu1 %v8455_v27  ;;  %8082 = vmatprep.subr.bf16.mxu0 %v8456_v28  ;;  %v8503_v27 = vld [vmem:[%s9742_s29 + $0x780] sm:$0xff]   ;;  %v8504_v28 = vld [vmem:[%s9742_s29 + $0x748] sm:$0xff]  }
 0x22c   : > { %8104 = vmatprep.subr.bf16.mxu1 %v8457_v29  ;;  %v8505_v29 = vld [vmem:[%s9742_s29 + $0x7c8] sm:$0xff]  }
 0x22e   : > { %8083 = vmatpush3.bf16.msra.mxu0 %v8458_v30  ;;  %v8506_v30 = vld [vmem:[%s9742_s29 + $0x708] sm:$0xff]  }
 0x22f   : > { %8105 = vmatpush3.bf16.msra.mxu1 %v8459_v31  ;;  %8084 = vmatprep.subr.bf16.mxu0 %v8460_v32  ;;  %v8507_v31 = vld [vmem:[%s9742_s29 + $0x788] sm:$0xff]   ;;  %v8508_v32 = vld [vmem:[%s9742_s29 + $0x750] sm:$0xff]  }
 0x230   : > { %8106 = vmatprep.subr.bf16.mxu1 %v8461_v33  ;;  %v8509_v33 = vld [vmem:[%s9742_s29 + $0x7d0] sm:$0xff]  }
 0x232   : > { %8085 = vmatpush3.bf16.msra.mxu0 %v8462_v34  ;;  %v8510_v34 = vld [vmem:[%s9742_s29 + $0x710] sm:$0xff]  }
 0x233   : > { %8107 = vmatpush3.bf16.msra.mxu1 %v8463_v35  ;;  %8086 = vmatprep.subr.bf16.mxu0 %v8464_v36  ;;  %v8511_v35 = vld [vmem:[%s9742_s29 + $0x790] sm:$0xff]   ;;  %v8512_v36 = vld [vmem:[%s9742_s29 + $0x758] sm:$0xff]  }
 0x234   : > { %8108 = vmatprep.subr.bf16.mxu1 %v8465_v37  ;;  %v8513_v37 = vld [vmem:[%s9742_s29 + $0x7d8] sm:$0xff]  }
 0x236   : > { %8087 = vmatpush3.bf16.msra.mxu0 %v8466_v38 }
 0x237   : > { %8109 = vmatpush3.bf16.msra.mxu1 %v8467_v39  ;;  %8116 = vmatprep.subr.bf16.mxu0 %v8468_v48  ;;  %v8514_v39 = vld [vmem:[%s9742_s29 + $0x718] sm:$0xff]  }
 0x238   : > { %8138 = vmatprep.subr.bf16.mxu1 %v8469_v49  ;;  %v8518_v49 = vld [vmem:[%s9742_s29 + $0x720] sm:$0xff]  }
 0x239   : > { %7101 = vmatmul.mubr.bf16.vlgmr.msra.gmra.mrb[20].mxu0 %v7567_v44 }
 0x23a   : > { %7142 = vmatmul.mubr.bf16.vlgmr.msra.gmra.mrb[20].mxu1 %v7569_v46  ;;  %8117 = vmatpush3.bf16.msra.mxu0 %v8470_v50  ;;  %v8517_v46 = vld [vmem:[%s9742_s29 + $0x7e0] sm:$0xff]  }
 0x23b   : > { %8139 = vmatpush3.bf16.msra.mxu1 %v8471_v51  ;;  %8118 = vmatprep.subr.bf16.mxu0 %v8472_v52  ;;  %v8519_v51 = vld [vmem:[%s9742_s29 + $0x7a0] sm:$0xff]  }
 0x23c   : > { %8140 = vmatprep.subr.bf16.mxu1 %v8473_v53  ;;  %7182 = vmatprep.mubr.bf16.mxu0 %v7572_v20 }
 0x23d   : > { %7223 = vmatprep.mubr.bf16.mxu1 %v7574_v23 }
 0x23e   : > { %8119 = vmatpush3.bf16.msra.mxu0 %v8474_v54  ;;  %v8520_v54 = vld [vmem:[%s9742_s29 + $0x768] sm:$0xff]  }
 0x23f   : > { %8141 = vmatpush3.bf16.msra.mxu1 %v8475_v55  ;;  %8120 = vmatprep.subr.bf16.mxu0 %v8476_v56 }
 0x240   : > { %8142 = vmatprep.subr.bf16.mxu1 %v8477_v57  ;;  %v8521_v57 = vld [vmem:[%s9742_s29 + $0x7e8] sm:$0xff]  }
 0x242   : > { %8121 = vmatpush3.bf16.msra.mxu0 %v8478_v58 }
 0x243   : > { %8143 = vmatpush3.bf16.msra.mxu1 %v8479_v59  ;;  %8122 = vmatprep.subr.bf16.mxu0 %v8480_v60  ;;  %v8522_v59 = vld [vmem:[%s9742_s29 + $0x728] sm:$0xff]  }
 0x244   : > { %8144 = vmatprep.subr.bf16.mxu1 %v8481_v61  ;;  %v8523_v60 = vld [vmem:[%s9742_s29 + $0x7a8] sm:$0xff]  }
 0x246   : > { %8123 = vmatpush3.bf16.msra.mxu0 %v8482_v62  ;;  %v8524_v62 = vld [vmem:[%s9742_s29 + $0x770] sm:$0xff]  }
 0x247   : > { %8145 = vmatpush3.bf16.msra.mxu1 %v8483_v63  ;;  %8124 = vmatprep.subr.bf16.mxu0 %v8484_v0  ;;  %v8525_v63 = vld [vmem:[%s9742_s29 + $0x7f0] sm:$0xff]  }
 0x248   : > { %8146 = vmatprep.subr.bf16.mxu1 %v8485_v1  ;;  %v8526_v0 = vld [vmem:[%s9742_s29 + $0x730] sm:$0xff]  }
 0x249   : > { %v8527_v1 = vld [vmem:[%s9742_s29 + $0x7b0] sm:$0xff]  }
 0x24a   : > { %8125 = vmatpush3.bf16.msra.mxu0 %v8486_v2  ;;  %v8528_v2 = vld [vmem:[%s9742_s29 + $0x778] sm:$0xff]  }
 0x24b   : > { %8147 = vmatpush3.bf16.msra.mxu1 %v8487_v3  ;;  %8126 = vmatprep.subr.bf16.mxu0 %v8488_v4  ;;  %v8529_v3 = vld [vmem:[%s9742_s29 + $0x7f8] sm:$0xff]  }
 0x24c   : > { %8148 = vmatprep.subr.bf16.mxu1 %v8489_v5  ;;  %v8530_v4 = vld [vmem:[%s9742_s29 + $0x738] sm:$0xff]  }
 0x24d   : > { %v8531_v5 = vld [vmem:[%s9742_s29 + $0x7b8] sm:$0xff]   ;;  %s4403_s29 = sand.u32 1, %s8572_s15   ;;  %s7840_s15 = sshll.u32 (%p8698_p9), %s8592_s20, 3 }
 0x24e   : > { %8127 = vmatpush3.bf16.msra.mxu0 %v8490_v6  ;;  %v4432_v6 = vld [vmem:[%s9779_s10 + $0x70] sm:$0xff]  ;;  %s7544_s17 = sshll.u32 %s4403_s29, 3  ;;  %s7382_s6 = sadd.s32 (%p8698_p9), %s8588_s19, %s7840_s15 }
 0x24f   : > { %8149 = vmatpush3.bf16.msra.mxu1 %v8491_v7  ;;  %8128 = vmatprep.subr.bf16.mxu0 %v8492_v8  ;;  %v4448_v7 = vld [vmem:[%s9779_s10 + $0xf0] sm:$0xff]  ;;  %s4405_s5 = scalar_lea.vmem [#allocation3], %s7544_s17  ;;  %s7841_s9 = sshll.u32 (%p8698_p9), %s7382_s6, 2 }
 0x250   : > { %8150 = vmatprep.subr.bf16.mxu1 %v8493_v9  ;;  %v7575_v8 = vcombine.low %v4432_v6, %v4448_v7  ;;  %v7576_v9 = vcombine.high %v4432_v6, %v4448_v7  ;;  %s7384_s12 = scalar_lea.vmem (%p8698_p9), %s10086_s4, %s7841_s9 }
 0x252   : > { %8129 = vmatpush3.bf16.msra.mxu0 %v8494_v10  ;;  %v4433_v10 = vld [vmem:[%s9779_s10 + $0x78] sm:$0xff] }
 0x253   : > { %8151 = vmatpush3.bf16.msra.mxu1 %v8495_v11  ;;  %8130 = vmatprep.subr.bf16.mxu0 %v8496_v12  ;;  %v4449_v11 = vld [vmem:[%s9779_s10 + $0xf8] sm:$0xff] }
 0x254   : > { %8152 = vmatprep.subr.bf16.mxu1 %v8497_v13  ;;  %v7577_v12 = vcombine.low %v4433_v10, %v4449_v11  ;;  %v7578_v13 = vcombine.high %v4433_v10, %v4449_v11 }
 0x256   : > { %8131 = vmatpush3.bf16.msra.mxu0 %v8498_v14 }
 0x257   : > { %8153 = vmatpush3.bf16.msra.mxu1 %v8499_v15  ;;  %8160 = vmatprep.subr.bf16.mxu0 %v8500_v24 }
 0x258   : > { %8182 = vmatprep.subr.bf16.mxu1 %v8501_v25 }
 0x259   : > { %7183 = vmatmul.mubr.bf16.vlgmr.msra.gmra.mrb[24].mxu0 %v7571_v19 }
 0x25a   : > { %7224 = vmatmul.mubr.bf16.vlgmr.msra.gmra.mrb[24].mxu1 %v7573_v22  ;;  %8161 = vmatpush3.bf16.msra.mxu0 %v8502_v26 }
 0x25b   : > { %8183 = vmatpush3.bf16.msra.mxu1 %v8503_v27  ;;  %8162 = vmatprep.subr.bf16.mxu0 %v8504_v28 }
 0x25c   : > { %8184 = vmatprep.subr.bf16.mxu1 %v8505_v29  ;;  %7264 = vmatprep.mubr.bf16.mxu0 %v7576_v9 }
 0x25d   : > { %7305 = vmatprep.mubr.bf16.mxu1 %v7578_v13 }
 0x25e   : > { %8163 = vmatpush3.bf16.msra.mxu0 %v8506_v30 }
 0x25f   : > { %8185 = vmatpush3.bf16.msra.mxu1 %v8507_v31  ;;  %8164 = vmatprep.subr.bf16.mxu0 %v8508_v32 }
 0x260   : > { %8186 = vmatprep.subr.bf16.mxu1 %v8509_v33 }
 0x262   : > { %8165 = vmatpush3.bf16.msra.mxu0 %v8510_v34 }
 0x263   : > { %8187 = vmatpush3.bf16.msra.mxu1 %v8511_v35  ;;  %8166 = vmatprep.subr.bf16.mxu0 %v8512_v36 }
 0x264   : > { %8188 = vmatprep.subr.bf16.mxu1 %v8513_v37 }
 0x266   : > { %8167 = vmatpush3.bf16.msra.mxu0 %v8514_v39 }
 0x267   : > { %8189 = vmatpush3.bf16.msra.mxu1 %v8515_v41  ;;  %8168 = vmatprep.subr.bf16.mxu0 %v8516_v43 }
 0x268   : > { %8190 = vmatprep.subr.bf16.mxu1 %v8517_v46 }
 0x26a   : > { %8169 = vmatpush3.bf16.msra.mxu0 %v8518_v49 }
 0x26b   : > { %8191 = vmatpush3.bf16.msra.mxu1 %v8519_v51  ;;  %8170 = vmatprep.subr.bf16.mxu0 %v8520_v54 }
 0x26c   : > { %v7868_v38 = vpop.f32.mrb[0].mxu0  ;;  %8192 = vmatprep.subr.bf16.mxu1 %v8521_v57 }
 0x26d   : > { %v7890_v40 = vpop.f32.mrb[0].mxu1  ;;  %v7869_v42 = vpop.f32.mrb[1].mxu0 }
 0x26e   : > { %v7870_v44 = vadd.f32 %v7869_v42, %v7868_v38  ;;  %v7891_v45 = vpop.f32.mrb[1].mxu1  ;;  %v7871_v48 = vpop.f32.mrb[2].mxu0  ;;  %8171 = vmatpush3.bf16.msra.mxu0 %v8522_v59 }
 0x26f   : > { %v7892_v47 = vadd.f32 %v7891_v45, %v7890_v40  ;;  %v7893_v50 = vpop.f32.mrb[2].mxu1  ;;  %v7872_v53 = vpop.f32.mrb[3].mxu0  ;;  %8193 = vmatpush3.bf16.msra.mxu1 %v8523_v60  ;;  %8172 = vmatprep.subr.bf16.mxu0 %v8524_v62 }
 0x270   : > { %v7873_v55 = vadd.f32 %v7872_v53, %v7871_v48  ;;  %v7894_v56 = vpop.f32.mrb[3].mxu1  ;;  %8194 = vmatprep.subr.bf16.mxu1 %v8525_v63 }
 0x271   : > { %v6734_v52 = vadd.f32 %v7892_v47, %v7870_v44  ;;  %v7895_v58 = vadd.f32 %v7894_v56, %v7893_v50 }
 0x272   : > { %8173 = vmatpush3.bf16.msra.mxu0 %v8526_v0 }
 0x273   : > { %v6737_v61 = vadd.f32 %v7895_v58, %v7873_v55  ;;  %8195 = vmatpush3.bf16.msra.mxu1 %v8527_v1  ;;  %8174 = vmatprep.subr.bf16.mxu0 %v8528_v2 }
 0x274   : > { %8196 = vmatprep.subr.bf16.mxu1 %v8529_v3 }
 0x276   : > { %8175 = vmatpush3.bf16.msra.mxu0 %v8530_v4 }
 0x277   : > { %8197 = vmatpush3.bf16.msra.mxu1 %v8531_v5 }
 0x279   : > { %7265 = vmatmul.mubr.bf16.vlgmr.msra.gmra.mrb[28].mxu0 %v7575_v8 }
 0x27a   : > { %7306 = vmatmul.mubr.bf16.vlgmr.msra.gmra.mrb[28].mxu1 %v7577_v12 }
 0x28c   : > { %v7912_v14 = vpop.f32.mrb[4].mxu0 }
 0x28d   : > { %v7934_v15 = vpop.f32.mrb[4].mxu1  ;;  %v7913_v16 = vpop.f32.mrb[5].mxu0 }
 0x28e   : > { %v7914_v17 = vadd.f32 %v7913_v16, %v7912_v14  ;;  %v7935_v18 = vpop.f32.mrb[5].mxu1  ;;  %v7915_v19 = vpop.f32.mrb[6].mxu0 }
 0x28f   : > { %v7936_v20 = vadd.f32 %v7935_v18, %v7934_v15  ;;  %v7937_v21 = vpop.f32.mrb[6].mxu1  ;;  %v7916_v22 = vpop.f32.mrb[7].mxu0 }
 0x290   : > { %v6775_v23 = vadd.f32 %v7914_v17, %v6734_v52  ;;  %v7917_v24 = vadd.f32 %v7916_v22, %v7915_v19  ;;  %v7938_v25 = vpop.f32.mrb[7].mxu1 }
 0x291   : > { %v7939_v26 = vadd.f32 %v7938_v25, %v7937_v21 }
 0x292   : > { %v6816_v27 = vadd.f32 %v7936_v20, %v6775_v23  ;;  %v6778_v28 = vadd.f32 %v7917_v24, %v6737_v61 }
 0x294   : > { %v6819_v29 = vadd.f32 %v7939_v26, %v6778_v28 }
 0x2ac   : > { %v7956_v30 = vpop.f32.mrb[8].mxu0 }
 0x2ad   : > { %v7978_v31 = vpop.f32.mrb[8].mxu1  ;;  %v7957_v32 = vpop.f32.mrb[9].mxu0 }
 0x2ae   : > { %v7979_v33 = vpop.f32.mrb[9].mxu1  ;;  %v7958_v34 = vadd.f32 %v7957_v32, %v7956_v30  ;;  %v7959_v36 = vpop.f32.mrb[10].mxu0 }
 0x2af   : > { %v7980_v35 = vadd.f32 %v7979_v33, %v7978_v31  ;;  %v7981_v37 = vpop.f32.mrb[10].mxu1  ;;  %v7960_v38 = vpop.f32.mrb[11].mxu0 }
 0x2b0   : > { %v7982_v39 = vpop.f32.mrb[11].mxu1  ;;  %v6857_v40 = vadd.f32 %v7958_v34, %v6816_v27  ;;  %v7961_v41 = vadd.f32 %v7960_v38, %v7959_v36 }
 0x2b1   : > { %v7983_v42 = vadd.f32 %v7982_v39, %v7981_v37 }
 0x2b2   : > { %v6898_v43 = vadd.f32 %v7980_v35, %v6857_v40  ;;  %v6860_v44 = vadd.f32 %v7961_v41, %v6819_v29 }
 0x2b4   : > { %v6901_v45 = vadd.f32 %v7983_v42, %v6860_v44 }
 0x2cc   : > { %v8000_v46 = vpop.f32.mrb[12].mxu0 }
 0x2cd   : > { %v8022_v47 = vpop.f32.mrb[12].mxu1  ;;  %v8001_v48 = vpop.f32.mrb[13].mxu0 }
 0x2ce   : > { %v8002_v49 = vadd.f32 %v8001_v48, %v8000_v46  ;;  %v8023_v50 = vpop.f32.mrb[13].mxu1  ;;  %v8003_v51 = vpop.f32.mrb[14].mxu0 }
 0x2cf   : > { %v8024_v52 = vadd.f32 %v8023_v50, %v8022_v47  ;;  %v8025_v53 = vpop.f32.mrb[14].mxu1  ;;  %v8004_v54 = vpop.f32.mrb[15].mxu0 }
 0x2d0   : > { %v6939_v55 = vadd.f32 %v8002_v49, %v6898_v43  ;;  %v8005_v56 = vadd.f32 %v8004_v54, %v8003_v51  ;;  %v8026_v57 = vpop.f32.mrb[15].mxu1 }
 0x2d1   : > { %v8027_v58 = vadd.f32 %v8026_v57, %v8025_v53 }
 0x2d2   : > { %v6980_v59 = vadd.f32 %v8024_v52, %v6939_v55  ;;  %v6942_v60 = vadd.f32 %v8005_v56, %v6901_v45 }
 0x2d4   : > { %v6983_v61 = vadd.f32 %v8027_v58, %v6942_v60 }
 0x2ec   : > { %v8044_v62 = vpop.f32.mrb[16].mxu0 }
 0x2ed   : > { %v8066_v63 = vpop.f32.mrb[16].mxu1  ;;  %v8045_v0 = vpop.f32.mrb[17].mxu0 }
 0x2ee   : > { %v8046_v1 = vadd.f32 %v8045_v0, %v8044_v62  ;;  %v8067_v2 = vpop.f32.mrb[17].mxu1  ;;  %v8047_v3 = vpop.f32.mrb[18].mxu0 }
 0x2ef   : > { %v8068_v4 = vadd.f32 %v8067_v2, %v8066_v63  ;;  %v8069_v5 = vpop.f32.mrb[18].mxu1  ;;  %v8048_v6 = vpop.f32.mrb[19].mxu0 }
 0x2f0   : > { %v7021_v7 = vadd.f32 %v8046_v1, %v6980_v59  ;;  %v8049_v8 = vadd.f32 %v8048_v6, %v8047_v3  ;;  %v8070_v9 = vpop.f32.mrb[19].mxu1 }
 0x2f1   : > { %v8071_v10 = vadd.f32 %v8070_v9, %v8069_v5 }
 0x2f2   : > { %v7062_v11 = vadd.f32 %v8068_v4, %v7021_v7  ;;  %v7024_v12 = vadd.f32 %v8049_v8, %v6983_v61 }
 0x2f4   : > { %v7065_v13 = vadd.f32 %v8071_v10, %v7024_v12 }
 0x30c   : > { %v8088_v14 = vpop.f32.mrb[20].mxu0 }
 0x30d   : > { %v8110_v15 = vpop.f32.mrb[20].mxu1  ;;  %v8089_v16 = vpop.f32.mrb[21].mxu0 }
 0x30e   : > { %v8111_v17 = vpop.f32.mrb[21].mxu1  ;;  %v8090_v18 = vadd.f32 %v8089_v16, %v8088_v14  ;;  %v8091_v20 = vpop.f32.mrb[22].mxu0 }
 0x30f   : > { %v8112_v19 = vadd.f32 %v8111_v17, %v8110_v15  ;;  %v8113_v21 = vpop.f32.mrb[22].mxu1  ;;  %v8092_v22 = vpop.f32.mrb[23].mxu0 }
 0x310   : > { %v8114_v23 = vpop.f32.mrb[23].mxu1  ;;  %v7103_v24 = vadd.f32 %v8090_v18, %v7062_v11  ;;  %v8093_v25 = vadd.f32 %v8092_v22, %v8091_v20  ;;  %v7835_v22 = vld [vmem:[%s4413_s14] ss:$0 sm:$0xff] }
 0x311   : > { %v8115_v26 = vadd.f32 %v8114_v23, %v8113_v21 }
 0x312   : > { %v7144_v27 = vadd.f32 %v8112_v19, %v7103_v24  ;;  %v7106_v28 = vadd.f32 %v8093_v25, %v7065_v13  ;;  %v7836_v25 = vld [vmem:[%s4416_s28] ss:$0 sm:$0xff] }
 0x314   : > { %v7147_v29 = vadd.f32 %v8115_v26, %v7106_v28 }
 0x32c   : > { %v8132_v30 = vpop.f32.mrb[24].mxu0 }
 0x32d   : > { %v8154_v31 = vpop.f32.mrb[24].mxu1  ;;  %v8133_v32 = vpop.f32.mrb[25].mxu0 }
 0x32e   : > { %v8134_v33 = vadd.f32 %v8133_v32, %v8132_v30  ;;  %v8155_v34 = vpop.f32.mrb[25].mxu1  ;;  %v8135_v35 = vpop.f32.mrb[26].mxu0 }
 0x32f   : > { %v8156_v36 = vadd.f32 %v8155_v34, %v8154_v31  ;;  %v8157_v37 = vpop.f32.mrb[26].mxu1  ;;  %v8136_v38 = vpop.f32.mrb[27].mxu0 }
 0x330   : > { %v7185_v39 = vadd.f32 %v8134_v33, %v7144_v27  ;;  %v8137_v40 = vadd.f32 %v8136_v38, %v8135_v35  ;;  %v8158_v41 = vpop.f32.mrb[27].mxu1 }
 0x331   : > { %v8159_v42 = vadd.f32 %v8158_v41, %v8157_v37 }
 0x332   : > { %v7226_v43 = vadd.f32 %v8156_v36, %v7185_v39  ;;  %v7188_v44 = vadd.f32 %v8137_v40, %v7147_v29 }
 0x334   : > { %v7229_v45 = vadd.f32 %v8159_v42, %v7188_v44 }
 0x34c   : > { %v8176_v46 = vpop.f32.mrb[28].mxu0 }
 0x34d   : > { %v8198_v47 = vpop.f32.mrb[28].mxu1  ;;  %v8177_v48 = vpop.f32.mrb[29].mxu0 }
 0x34e   : > { %v8178_v49 = vadd.f32 %v8177_v48, %v8176_v46  ;;  %v8199_v50 = vpop.f32.mrb[29].mxu1  ;;  %v8179_v51 = vpop.f32.mrb[30].mxu0 }
 0x34f   : > { %v8200_v52 = vadd.f32 %v8199_v50, %v8198_v47  ;;  %v8201_v53 = vpop.f32.mrb[30].mxu1  ;;  %v8180_v54 = vpop.f32.mrb[31].mxu0 }
 0x350   : > { %v7267_v55 = vadd.f32 %v8178_v49, %v7226_v43  ;;  %v8181_v56 = vadd.f32 %v8180_v54, %v8179_v51  ;;  %v8202_v57 = vpop.f32.mrb[31].mxu1 }
 0x351   : > { %v8203_v58 = vadd.f32 %v8202_v57, %v8201_v53 }
 0x352   : > { %v7308_v59 = vadd.f32 %v8200_v52, %v7267_v55  ;;  %v7270_v60 = vadd.f32 %v8181_v56, %v7229_v45 }
 0x354   : > { %v7311_v61 = vadd.f32 %v8203_v58, %v7270_v60  ;;  %v7322_v62 = vmul.f32 %v7308_v59, %v7308_v59 }
 0x356   : > { %v7314_v63 = vadd.f32 %v7311_v61, %v7308_v59  ;;  %v7323_v0 = vmul.f32 %v7311_v61, %v7311_v61 }
 0x358   : > { %v7315_v1 = vrot.slane %v7314_v63, 4  ;;  %v7324_v2 = vadd.f32 %v7323_v0, %v7322_v62 }
 0x35a   : > { %v7316_v3 = vadd.f32 %v7315_v1, %v7314_v63  ;;  %v7325_v4 = vrot.slane %v7324_v2, 4 }
 0x35c   : > { %v7317_v5 = vrot.slane %v7316_v3, 2  ;;  %v7326_v6 = vadd.f32 %v7325_v4, %v7324_v2 }
 0x35e   : > { %v7318_v7 = vadd.f32 %v7317_v5, %v7316_v3  ;;  %v7327_v8 = vrot.slane %v7326_v6, 2 }
 0x360   : > { %v7319_v9 = vrot.slane %v7318_v7, 1  ;;  %v7328_v10 = vadd.f32 %v7327_v8, %v7326_v6 }
 0x362   : > { %v7320_v11 = vadd.f32 %v7319_v9, %v7318_v7  ;;  %v7329_v12 = vrot.slane %v7328_v10, 1 }
 0x364   : > { %v7321_v13 = vmul.f32 0.0625, %v7320_v11  ;;  %v7330_v14 = vadd.f32 %v7329_v12, %v7328_v10 }
 0x366   : > { %v7331_v15 = vmul.f32 0.0625, %v7330_v14  ;;  %v7332_v16 = vmul.f32 %v7321_v13, %v7321_v13  ;;  %v7334_v17 = vsub.f32 %v7308_v59, %v7321_v13  ;;  %v7335_v18 = vsub.f32 %v7311_v61, %v7321_v13 }
 0x368   : > { %v7333_v19 = vsub.f32 %v7331_v15, %v7332_v16 }
 0x36a   : > { %v7336_v20 = vadd.f32 1e-05, %v7333_v19 }
 0x36c   : > { %8532 = vrsqrt.f32 %v7336_v20 }
 0x376   : > { %v8533_v21 = vpop.eup %8532 }
 0x377   : > { %v7338_v23 = vmul.f32 %v8533_v21, %v7334_v17  ;;  %v7339_v24 = vmul.f32 %v8533_v21, %v7335_v18 }
 0x379   : > { %v7347_v26 = vmul.f32 %v7835_v22, %v7338_v23  ;;  %v7348_v27 = vmul.f32 %v7835_v22, %v7339_v24 }
 0x37b   : > { %v7356_v28 = vadd.f32 %v7836_v25, %v7347_v26  ;;  %v7357_v29 = vadd.f32 %v7836_v25, %v7348_v27 }
 0x37c   : > { %7380 = sbr.rel (!%p8698_p9) target bundleno = 907 (0x38b), region = 92 }
 0x37d   : > { %vm7358_vm0 = vcmp.ge.f32.partialorder %v7356_v28, 0.0  ;;  %vm7359_vm1 = vcmp.ge.f32.partialorder %v7357_v29, 0.0  ;;  %v7360_v30 = vmul.f32 0.2, %v7356_v28  ;;  %v7361_v31 = vmul.f32 0.2, %v7357_v29 }
 0x37f   : > { %v7362_v32 = vsel %vm7358_vm0, %v7356_v28, %v7360_v30  ;;  %v7363_v33 = vsel %vm7359_vm1, %v7357_v29, %v7361_v31 }
 0x380   : > { %v7850_v34 = vpack.c.bf16 %v7363_v33, %v7362_v32 }
 0x382   : > { %7851 = vst [vmem:[%s4405_s5] sm:$0xff] %v7850_v34  }
 0x389   : > { %v7400_v35 = vld [vmem:[%s4405_s5] sm:$0xf]  ;;  %v7402_v36 = vld [vmem:[%s4405_s5 + $0x4] sm:$0xf] }
 0x38a   : > { %7401 = vst [vmem:[%s7384_s12] sm:$0xf] %v7400_v35  ;;  %7403 = vst [vmem:[%s7384_s12 + $0x10] sm:$0xf] %v7402_v36 }
 0x38b PF: > { %s14_s23 = sadd.s32 1, %s8604_s23   ;;  %s10088_s15 = smov %s8576_s16 }
 0x38c   : > { %p11_p2 = scmp.ge.s32.totalorder %s14_s23, 10   ;;  %s10089_s16 = smov %s8703_s8 }
 0x38d   : > { %s10090_s17 = smov %s8584_s18  ;;  %s10091_s18 = smov %s8692_s30 }
 0x38e   : > { %s10092_s19 = smov %s8596_s21  ;;  %s10093_s20 = smov %s8600_s22 }
 0x38f   : > { %s10094_s21 = smov %s10097_s25  ;;  %s10095_s22 = smov %s10101_s26 }
 0x390   :  { %13 = sbr.rel (!%p11_p2) target bundleno = 5 (0x5), region = 177 }

// kernel: discriminator_forward.9
= control target key start
LH: loop header
LB: loop body
LE: loop exit
PB: predicated region body
PF: predicated region fallthrough
CT: control target
= control target key end

     0   :  { %s10345_s1 = inlined_call_operand.vmem [shape: bf16[8192,128], index: 1, kind: input, shape index: {}]   ;;  %s10346_s0 = inlined_call_operand.vmem [shape: bf16[24,8192], index: 0, kind: input, shape index: {}]   ;;  %s10347_s2 = inlined_call_operand.vmem [shape: f32[1,128], index: 2, kind: input, shape index: {}]   ;;  %s10348_s3 = inlined_call_operand.vmem [shape: f32[24,128], index: 3, kind: output, shape index: {}]  }
   0x1   :  { %v7838_v0 = vld [vmem:[%s10345_s1 + $0x40] sm:$0xff]   ;;  %v7842_v4 = vld [vmem:[%s10345_s1 + $0x48] sm:$0xff]   ;;  %v7846_v8 = vld [vmem:[%s10345_s1 + $0x50] sm:$0xff]  }
   0x2   :  { %v7839_v1 = vld [vmem:[%s10345_s1 + $0xc0] sm:$0xff]   ;;  %6942 = vmatprep.subr.bf16.mxu0 %v7838_v0  ;;  %v7843_v5 = vld [vmem:[%s10345_s1 + $0xc8] sm:$0xff]   ;;  %v7847_v9 = vld [vmem:[%s10345_s1 + $0xd0] sm:$0xff]  }
   0x3   :  { %v7840_v2 = vld [vmem:[%s10345_s1] sm:$0xff]   ;;  %6970 = vmatprep.subr.bf16.mxu1 %v7839_v1  ;;  %v7844_v6 = vld [vmem:[%s10345_s1 + $0x8] sm:$0xff]   ;;  %v7848_v10 = vld [vmem:[%s10345_s1 + $0x10] sm:$0xff]  }
   0x4   :  { %v7841_v3 = vld [vmem:[%s10345_s1 + $0x80] sm:$0xff]   ;;  %6943 = vmatpush3.bf16.msra.mxu0 %v7840_v2  ;;  %v7845_v7 = vld [vmem:[%s10345_s1 + $0x88] sm:$0xff]   ;;  %v7849_v11 = vld [vmem:[%s10345_s1 + $0x90] sm:$0xff]  }
   0x5   :  { %6971 = vmatpush3.bf16.msra.mxu1 %v7841_v3  ;;  %6944 = vmatprep.subr.bf16.mxu0 %v7842_v4  ;;  %v7850_v12 = vld [vmem:[%s10345_s1 + $0x58] sm:$0xff]   ;;  %v7854_v16 = vld [vmem:[%s10345_s1 + $0x60] sm:$0xff]   ;;  %v7858_v20 = vld [vmem:[%s10345_s1 + $0x68] sm:$0xff]  }
   0x6   :  { %6972 = vmatprep.subr.bf16.mxu1 %v7843_v5  ;;  %v7851_v13 = vld [vmem:[%s10345_s1 + $0xd8] sm:$0xff]   ;;  %v7855_v17 = vld [vmem:[%s10345_s1 + $0xe0] sm:$0xff]   ;;  %v7859_v21 = vld [vmem:[%s10345_s1 + $0xe8] sm:$0xff]  }
   0x7   :  { %v7852_v14 = vld [vmem:[%s10345_s1 + $0x18] sm:$0xff]   ;;  %v7856_v18 = vld [vmem:[%s10345_s1 + $0x20] sm:$0xff]   ;;  %v7860_v22 = vld [vmem:[%s10345_s1 + $0x28] sm:$0xff]  }
   0x8   :  { %6945 = vmatpush3.bf16.msra.mxu0 %v7844_v6  ;;  %v7853_v15 = vld [vmem:[%s10345_s1 + $0x98] sm:$0xff]   ;;  %v7857_v19 = vld [vmem:[%s10345_s1 + $0xa0] sm:$0xff]   ;;  %v7861_v23 = vld [vmem:[%s10345_s1 + $0xa8] sm:$0xff]  }
   0x9   :  { %6973 = vmatpush3.bf16.msra.mxu1 %v7845_v7  ;;  %6946 = vmatprep.subr.bf16.mxu0 %v7846_v8  ;;  %v7862_v24 = vld [vmem:[%s10345_s1 + $0x70] sm:$0xff]   ;;  %v7866_v28 = vld [vmem:[%s10345_s1 + $0x78] sm:$0xff]   ;;  %v15_v32 = vld [vmem:[%s10346_s0] sm:$0xff] }
   0xa   :  { %6974 = vmatprep.subr.bf16.mxu1 %v7847_v9  ;;  %v7863_v25 = vld [vmem:[%s10345_s1 + $0xf0] sm:$0xff]   ;;  %v7867_v29 = vld [vmem:[%s10345_s1 + $0xf8] sm:$0xff]   ;;  %v47_v33 = vld [vmem:[%s10346_s0 + $0x100] sm:$0xff] }
   0xb   :  { %v7864_v26 = vld [vmem:[%s10345_s1 + $0x30] sm:$0xff]   ;;  %v7868_v30 = vld [vmem:[%s10345_s1 + $0x38] sm:$0xff]   ;;  %v16_v34 = vld [vmem:[%s10346_s0 + $0x8] sm:$0xff]  ;;  %v6302_v35 = vcombine.low %v15_v32, %v47_v33  ;;  %v6303_v36 = vcombine.high %v15_v32, %v47_v33 }
   0xc   :  { %6947 = vmatpush3.bf16.msra.mxu0 %v7848_v10  ;;  %v7865_v27 = vld [vmem:[%s10345_s1 + $0xb0] sm:$0xff]   ;;  %v7869_v31 = vld [vmem:[%s10345_s1 + $0xb8] sm:$0xff]   ;;  %v48_v37 = vld [vmem:[%s10346_s0 + $0x108] sm:$0xff] }
   0xd   :  { %6975 = vmatpush3.bf16.msra.mxu1 %v7849_v11  ;;  %6948 = vmatprep.subr.bf16.mxu0 %v7850_v12  ;;  %v6304_v38 = vcombine.low %v16_v34, %v48_v37  ;;  %v6305_v39 = vcombine.high %v16_v34, %v48_v37  ;;  %v7870_v40 = vld [vmem:[%s10345_s1 + $0x140] sm:$0xff]   ;;  %v7874_v44 = vld [vmem:[%s10345_s1 + $0x148] sm:$0xff]   ;;  %v7878_v48 = vld [vmem:[%s10345_s1 + $0x150] sm:$0xff]  }
   0xe   :  { %6976 = vmatprep.subr.bf16.mxu1 %v7851_v13  ;;  %4790 = vmatprep.mubr.bf16.mxu0 %v6303_v36  ;;  %v7871_v41 = vld [vmem:[%s10345_s1 + $0x1c0] sm:$0xff]   ;;  %v7875_v45 = vld [vmem:[%s10345_s1 + $0x1c8] sm:$0xff]   ;;  %v7879_v49 = vld [vmem:[%s10345_s1 + $0x1d0] sm:$0xff]  }
   0xf   :  { %4838 = vmatprep.mubr.bf16.mxu1 %v6305_v39  ;;  %v7872_v42 = vld [vmem:[%s10345_s1 + $0x100] sm:$0xff]   ;;  %v7876_v46 = vld [vmem:[%s10345_s1 + $0x108] sm:$0xff]   ;;  %v7880_v50 = vld [vmem:[%s10345_s1 + $0x110] sm:$0xff]  }
  0x10   :  { %6949 = vmatpush3.bf16.msra.mxu0 %v7852_v14  ;;  %v7873_v43 = vld [vmem:[%s10345_s1 + $0x180] sm:$0xff]   ;;  %v7877_v47 = vld [vmem:[%s10345_s1 + $0x188] sm:$0xff]   ;;  %v7881_v51 = vld [vmem:[%s10345_s1 + $0x190] sm:$0xff]  }
  0x11   :  { %6977 = vmatpush3.bf16.msra.mxu1 %v7853_v15  ;;  %6950 = vmatprep.subr.bf16.mxu0 %v7854_v16  ;;  %v7882_v52 = vld [vmem:[%s10345_s1 + $0x158] sm:$0xff]   ;;  %v7886_v56 = vld [vmem:[%s10345_s1 + $0x160] sm:$0xff]   ;;  %v7890_v60 = vld [vmem:[%s10345_s1 + $0x168] sm:$0xff]  }
  0x12   :  { %6978 = vmatprep.subr.bf16.mxu1 %v7855_v17  ;;  %v7883_v53 = vld [vmem:[%s10345_s1 + $0x1d8] sm:$0xff]   ;;  %v7887_v57 = vld [vmem:[%s10345_s1 + $0x1e0] sm:$0xff]   ;;  %v7891_v61 = vld [vmem:[%s10345_s1 + $0x1e8] sm:$0xff]  }
  0x13   :  { %v7884_v54 = vld [vmem:[%s10345_s1 + $0x118] sm:$0xff]   ;;  %v7888_v58 = vld [vmem:[%s10345_s1 + $0x120] sm:$0xff]   ;;  %v7893_v0 = vld [vmem:[%s10345_s1 + $0x128] sm:$0xff]  }
  0x14   :  { %6951 = vmatpush3.bf16.msra.mxu0 %v7856_v18  ;;  %v7885_v55 = vld [vmem:[%s10345_s1 + $0x198] sm:$0xff]   ;;  %v7889_v59 = vld [vmem:[%s10345_s1 + $0x1a0] sm:$0xff]   ;;  %v7894_v2 = vld [vmem:[%s10345_s1 + $0x1a8] sm:$0xff]  }
  0x15   :  { %6979 = vmatpush3.bf16.msra.mxu1 %v7857_v19  ;;  %6952 = vmatprep.subr.bf16.mxu0 %v7858_v20  ;;  %v79_v62 = vld [vmem:[%s10346_s0 + $0x200] sm:$0xff]  ;;  %v80_v3 = vld [vmem:[%s10346_s0 + $0x208] sm:$0xff]  ;;  %v7898_v6 = vld [vmem:[%s10345_s1 + $0x170] sm:$0xff]  }
  0x16   :  { %6980 = vmatprep.subr.bf16.mxu1 %v7859_v21  ;;  %v6367_v63 = vcombine.high %v79_v62, %v79_v62  ;;  %v6366_v1 = vcombine.low %v79_v62, %v79_v62  ;;  %v6369_v4 = vcombine.high %v80_v3, %v80_v3  ;;  %v6368_v5 = vcombine.low %v80_v3, %v80_v3  ;;  %v7899_v7 = vld [vmem:[%s10345_s1 + $0x1f0] sm:$0xff]   ;;  %v7902_v10 = vld [vmem:[%s10345_s1 + $0x178] sm:$0xff]   ;;  %v20_v62 = vld [vmem:[%s10346_s0 + $0x28] sm:$0xff] }
  0x17   :  { %v7900_v8 = vld [vmem:[%s10345_s1 + $0x130] sm:$0xff]   ;;  %v7903_v11 = vld [vmem:[%s10345_s1 + $0x1f8] sm:$0xff]  }
  0x18   :  { %6953 = vmatpush3.bf16.msra.mxu0 %v7860_v22  ;;  %v7901_v9 = vld [vmem:[%s10345_s1 + $0x1b0] sm:$0xff]   ;;  %v7904_v12 = vld [vmem:[%s10345_s1 + $0x138] sm:$0xff]   ;;  %v7906_v22 = vld [vmem:[%s10345_s1 + $0x240] sm:$0xff]  }
  0x19   :  { %6981 = vmatpush3.bf16.msra.mxu1 %v7861_v23  ;;  %6954 = vmatprep.subr.bf16.mxu0 %v7862_v24  ;;  %v7905_v13 = vld [vmem:[%s10345_s1 + $0x1b8] sm:$0xff]   ;;  %v17_v14 = vld [vmem:[%s10346_s0 + $0x10] sm:$0xff]  ;;  %v7907_v23 = vld [vmem:[%s10345_s1 + $0x2c0] sm:$0xff]  }
  0x1a   :  { %6982 = vmatprep.subr.bf16.mxu1 %v7863_v25  ;;  %v49_v15 = vld [vmem:[%s10346_s0 + $0x110] sm:$0xff]  ;;  %v18_v16 = vld [vmem:[%s10346_s0 + $0x18] sm:$0xff]  ;;  %v7908_v24 = vld [vmem:[%s10345_s1 + $0x200] sm:$0xff]  }
  0x1b   :  { %v6306_v17 = vcombine.low %v17_v14, %v49_v15  ;;  %v6307_v18 = vcombine.high %v17_v14, %v49_v15  ;;  %v50_v19 = vld [vmem:[%s10346_s0 + $0x118] sm:$0xff]  ;;  %v7909_v25 = vld [vmem:[%s10345_s1 + $0x280] sm:$0xff]   ;;  %v7916_v33 = vld [vmem:[%s10345_s1 + $0x250] sm:$0xff]  }
  0x1c   :  { %6955 = vmatpush3.bf16.msra.mxu0 %v7864_v26  ;;  %v6308_v20 = vcombine.low %v18_v16, %v50_v19  ;;  %v6309_v21 = vcombine.high %v18_v16, %v50_v19  ;;  %v7910_v26 = vld [vmem:[%s10345_s1 + $0x248] sm:$0xff]   ;;  %v7917_v34 = vld [vmem:[%s10345_s1 + $0x2d0] sm:$0xff]  }
  0x1d   :  { %6983 = vmatpush3.bf16.msra.mxu1 %v7865_v27  ;;  %6956 = vmatprep.subr.bf16.mxu0 %v7866_v28  ;;  %v7911_v27 = vld [vmem:[%s10345_s1 + $0x2c8] sm:$0xff]   ;;  %v7919_v37 = vld [vmem:[%s10345_s1 + $0x210] sm:$0xff]  }
  0x1e   :  { %6984 = vmatprep.subr.bf16.mxu1 %v7867_v29  ;;  %v7912_v28 = vld [vmem:[%s10345_s1 + $0x208] sm:$0xff]   ;;  %v7920_v39 = vld [vmem:[%s10345_s1 + $0x290] sm:$0xff]  }
  0x1f   :  { %v7913_v29 = vld [vmem:[%s10345_s1 + $0x288] sm:$0xff]   ;;  %v7952_v15 = vld [vmem:[%s10345_s1 + $0x350] sm:$0xff]  }
  0x20   :  { %6957 = vmatpush3.bf16.msra.mxu0 %v7868_v30  ;;  %v81_v30 = vld [vmem:[%s10346_s0 + $0x210] sm:$0xff] }
  0x21   :  { %6985 = vmatpush3.bf16.msra.mxu1 %v7869_v31  ;;  %6998 = vmatprep.subr.bf16.mxu0 %v7870_v40  ;;  %v6371_v31 = vcombine.high %v81_v30, %v81_v30  ;;  %v6370_v32 = vcombine.low %v81_v30, %v81_v30  ;;  %v7922_v40 = vld [vmem:[%s10345_s1 + $0x258] sm:$0xff]   ;;  %v7953_v16 = vld [vmem:[%s10345_s1 + $0x3d0] sm:$0xff]   ;;  %v7966_v30 = vld [vmem:[%s10345_s1 + $0x368] sm:$0xff]  }
  0x22   :  { %7026 = vmatprep.subr.bf16.mxu1 %v7871_v41  ;;  %v7923_v41 = vld [vmem:[%s10345_s1 + $0x2d8] sm:$0xff]   ;;  %v7955_v19 = vld [vmem:[%s10345_s1 + $0x310] sm:$0xff]  }
  0x23   :  { %4791 = vmatmul.mubr.bf16.vlgmr.msra.gmra.mrb[0].mxu0 %v6302_v35  ;;  %v82_v35 = vld [vmem:[%s10346_s0 + $0x218] sm:$0xff] }
  0x24   :  { %4839 = vmatmul.mubr.bf16.vlgmr.msra.gmra.mrb[0].mxu1 %v6304_v38  ;;  %6999 = vmatpush3.bf16.msra.mxu0 %v7872_v42  ;;  %v6373_v36 = vcombine.high %v82_v35, %v82_v35  ;;  %v6372_v38 = vcombine.low %v82_v35, %v82_v35  ;;  %v7924_v42 = vld [vmem:[%s10345_s1 + $0x218] sm:$0xff]   ;;  %v7971_v35 = vld [vmem:[%s10345_s1 + $0x3f0] sm:$0xff]  }
  0x25   :  { %7027 = vmatpush3.bf16.msra.mxu1 %v7873_v43  ;;  %7000 = vmatprep.subr.bf16.mxu0 %v7874_v44  ;;  %v7925_v43 = vld [vmem:[%s10345_s1 + $0x298] sm:$0xff]   ;;  %v7926_v44 = vld [vmem:[%s10345_s1 + $0x260] sm:$0xff]  }
  0x26   :  { %7028 = vmatprep.subr.bf16.mxu1 %v7875_v45  ;;  %4798 = vmatprep.mubr.bf16.mxu0 %v6367_v63  ;;  %v7927_v45 = vld [vmem:[%s10345_s1 + $0x2e0] sm:$0xff]  }
  0x27   :  { %4846 = vmatprep.mubr.bf16.mxu1 %v6369_v4  ;;  %v7942_v4 = vld [vmem:[%s10345_s1 + $0x340] sm:$0xff]  }
  0x28   :  { %7001 = vmatpush3.bf16.msra.mxu0 %v7876_v46  ;;  %v7928_v46 = vld [vmem:[%s10345_s1 + $0x220] sm:$0xff]  }
  0x29   :  { %7029 = vmatpush3.bf16.msra.mxu1 %v7877_v47  ;;  %7002 = vmatprep.subr.bf16.mxu0 %v7878_v48  ;;  %v7929_v47 = vld [vmem:[%s10345_s1 + $0x2a0] sm:$0xff]   ;;  %v7930_v48 = vld [vmem:[%s10345_s1 + $0x268] sm:$0xff]  }
  0x2a   :  { %7030 = vmatprep.subr.bf16.mxu1 %v7879_v49  ;;  %v7931_v49 = vld [vmem:[%s10345_s1 + $0x2e8] sm:$0xff]  }
  0x2b   :  { %4799 = vmatmul.mubr.bf16.gmra.mrb[4].mxu0 %v6366_v1  ;;  %v52_v1 = vld [vmem:[%s10346_s0 + $0x128] sm:$0xff] }
  0x2c   :  { %7003 = vmatpush3.bf16.msra.mxu0 %v7880_v50  ;;  %4847 = vmatmul.mubr.bf16.gmra.mrb[4].mxu1 %v6368_v5  ;;  %v7932_v50 = vld [vmem:[%s10345_s1 + $0x228] sm:$0xff]   ;;  %v6313_v3 = vcombine.high %v20_v62, %v52_v1  ;;  %v7943_v5 = vld [vmem:[%s10345_s1 + $0x3c0] sm:$0xff]  }
  0x2d   :  { %7031 = vmatpush3.bf16.msra.mxu1 %v7881_v51  ;;  %7004 = vmatprep.subr.bf16.mxu0 %v7882_v52  ;;  %v7933_v51 = vld [vmem:[%s10345_s1 + $0x2a8] sm:$0xff]   ;;  %v7934_v52 = vld [vmem:[%s10345_s1 + $0x270] sm:$0xff]  }
  0x2e   :  { %7032 = vmatprep.subr.bf16.mxu1 %v7883_v53  ;;  %4886 = vmatprep.mubr.bf16.mxu0 %v6307_v18  ;;  %v7935_v53 = vld [vmem:[%s10345_s1 + $0x2f0] sm:$0xff]  }
  0x2f   :  { %4934 = vmatprep.mubr.bf16.mxu1 %v6309_v21  ;;  %v7956_v21 = vld [vmem:[%s10345_s1 + $0x390] sm:$0xff]  }
  0x30   :  { %7005 = vmatpush3.bf16.msra.mxu0 %v7884_v54  ;;  %v7936_v54 = vld [vmem:[%s10345_s1 + $0x230] sm:$0xff]  }
  0x31   :  { %7033 = vmatpush3.bf16.msra.mxu1 %v7885_v55  ;;  %7006 = vmatprep.subr.bf16.mxu0 %v7886_v56  ;;  %v7937_v55 = vld [vmem:[%s10345_s1 + $0x2b0] sm:$0xff]   ;;  %v7938_v56 = vld [vmem:[%s10345_s1 + $0x278] sm:$0xff]  }
  0x32   :  { %7034 = vmatprep.subr.bf16.mxu1 %v7887_v57  ;;  %v7939_v57 = vld [vmem:[%s10345_s1 + $0x2f8] sm:$0xff]  }
  0x34   :  { %7007 = vmatpush3.bf16.msra.mxu0 %v7888_v58  ;;  %v7940_v58 = vld [vmem:[%s10345_s1 + $0x238] sm:$0xff]  }
  0x35   :  { %7035 = vmatpush3.bf16.msra.mxu1 %v7889_v59  ;;  %7008 = vmatprep.subr.bf16.mxu0 %v7890_v60  ;;  %v7941_v59 = vld [vmem:[%s10345_s1 + $0x2b8] sm:$0xff]   ;;  %v19_v60 = vld [vmem:[%s10346_s0 + $0x20] sm:$0xff] }
  0x36   :  { %7036 = vmatprep.subr.bf16.mxu1 %v7891_v61  ;;  %v51_v61 = vld [vmem:[%s10346_s0 + $0x120] sm:$0xff] }
  0x37   :  { %v6310_v63 = vcombine.low %v19_v60, %v51_v61 }
  0x38   :  { %7009 = vmatpush3.bf16.msra.mxu0 %v7893_v0  ;;  %v6311_v0 = vcombine.high %v19_v60, %v51_v61  ;;  %v7988_v61 = vld [vmem:[%s10345_s1 + $0x450] sm:$0xff]  }
  0x39   :  { %7037 = vmatpush3.bf16.msra.mxu1 %v7894_v2  ;;  %7010 = vmatprep.subr.bf16.mxu0 %v7898_v6  ;;  %v6312_v2 = vcombine.low %v20_v62, %v52_v1  ;;  %v7944_v6 = vld [vmem:[%s10345_s1 + $0x300] sm:$0xff]   ;;  %v7989_v62 = vld [vmem:[%s10345_s1 + $0x4d0] sm:$0xff]  }
  0x3a   :  { %7038 = vmatprep.subr.bf16.mxu1 %v7899_v7  ;;  %v7945_v7 = vld [vmem:[%s10345_s1 + $0x380] sm:$0xff]   ;;  %v7991_v1 = vld [vmem:[%s10345_s1 + $0x410] sm:$0xff]  }
  0x3c   :  { %7011 = vmatpush3.bf16.msra.mxu0 %v7900_v8  ;;  %v7946_v8 = vld [vmem:[%s10345_s1 + $0x348] sm:$0xff]  }
  0x3d   :  { %7039 = vmatpush3.bf16.msra.mxu1 %v7901_v9  ;;  %7012 = vmatprep.subr.bf16.mxu0 %v7902_v10  ;;  %v7947_v9 = vld [vmem:[%s10345_s1 + $0x3c8] sm:$0xff]  }
  0x3e   :  { %7040 = vmatprep.subr.bf16.mxu1 %v7903_v11  ;;  %v7948_v10 = vld [vmem:[%s10345_s1 + $0x308] sm:$0xff]  }
  0x3f   :  { %v7949_v11 = vld [vmem:[%s10345_s1 + $0x388] sm:$0xff]  }
  0x40   :  { %7013 = vmatpush3.bf16.msra.mxu0 %v7904_v12  ;;  %v83_v12 = vld [vmem:[%s10346_s0 + $0x220] sm:$0xff] }
  0x41   :  { %7041 = vmatpush3.bf16.msra.mxu1 %v7905_v13  ;;  %7054 = vmatprep.subr.bf16.mxu0 %v7906_v22  ;;  %v6375_v13 = vcombine.high %v83_v12, %v83_v12  ;;  %v6374_v14 = vcombine.low %v83_v12, %v83_v12  ;;  %v7958_v22 = vld [vmem:[%s10345_s1 + $0x358] sm:$0xff]   ;;  %v8002_v12 = vld [vmem:[%s10345_s1 + $0x468] sm:$0xff]  }
  0x42   :  { %7082 = vmatprep.subr.bf16.mxu1 %v7907_v23  ;;  %v7959_v23 = vld [vmem:[%s10345_s1 + $0x3d8] sm:$0xff]  }
  0x43   :  { %4887 = vmatmul.mubr.bf16.vlgmr.msra.gmra.mrb[8].mxu0 %v6306_v17  ;;  %v84_v17 = vld [vmem:[%s10346_s0 + $0x228] sm:$0xff] }
  0x44   :  { %4935 = vmatmul.mubr.bf16.vlgmr.msra.gmra.mrb[8].mxu1 %v6308_v20  ;;  %7055 = vmatpush3.bf16.msra.mxu0 %v7908_v24  ;;  %v6377_v18 = vcombine.high %v84_v17, %v84_v17  ;;  %v6376_v20 = vcombine.low %v84_v17, %v84_v17  ;;  %v7960_v24 = vld [vmem:[%s10345_s1 + $0x318] sm:$0xff]   ;;  %v8007_v17 = vld [vmem:[%s10345_s1 + $0x4f0] sm:$0xff]  }
  0x45   :  { %7083 = vmatpush3.bf16.msra.mxu1 %v7909_v25  ;;  %7056 = vmatprep.subr.bf16.mxu0 %v7910_v26  ;;  %v7961_v25 = vld [vmem:[%s10345_s1 + $0x398] sm:$0xff]   ;;  %v7962_v26 = vld [vmem:[%s10345_s1 + $0x360] sm:$0xff]  }
  0x46   :  { %7084 = vmatprep.subr.bf16.mxu1 %v7911_v27  ;;  %4894 = vmatprep.mubr.bf16.mxu0 %v6371_v31  ;;  %v7963_v27 = vld [vmem:[%s10345_s1 + $0x3e0] sm:$0xff]   ;;  %v7967_v31 = vld [vmem:[%s10345_s1 + $0x3e8] sm:$0xff]  }
  0x47   :  { %4942 = vmatprep.mubr.bf16.mxu1 %v6373_v36  ;;  %v7972_v36 = vld [vmem:[%s10345_s1 + $0x330] sm:$0xff]  }
  0x48   :  { %7057 = vmatpush3.bf16.msra.mxu0 %v7912_v28  ;;  %v7964_v28 = vld [vmem:[%s10345_s1 + $0x320] sm:$0xff]  }
  0x49   :  { %7085 = vmatpush3.bf16.msra.mxu1 %v7913_v29  ;;  %7058 = vmatprep.subr.bf16.mxu0 %v7916_v33  ;;  %v7965_v29 = vld [vmem:[%s10345_s1 + $0x3a0] sm:$0xff]   ;;  %v7969_v33 = vld [vmem:[%s10345_s1 + $0x3a8] sm:$0xff]  }
  0x4a   :  { %7086 = vmatprep.subr.bf16.mxu1 %v7917_v34  ;;  %v7970_v34 = vld [vmem:[%s10345_s1 + $0x370] sm:$0xff]  }
  0x4b   :  { %4895 = vmatmul.mubr.bf16.gmra.mrb[12].mxu0 %v6370_v32  ;;  %v7968_v32 = vld [vmem:[%s10345_s1 + $0x328] sm:$0xff]  }
  0x4c   :  { %7059 = vmatpush3.bf16.msra.mxu0 %v7919_v37  ;;  %4943 = vmatmul.mubr.bf16.gmra.mrb[12].mxu1 %v6372_v38  ;;  %v7973_v37 = vld [vmem:[%s10345_s1 + $0x3b0] sm:$0xff]   ;;  %v7974_v38 = vld [vmem:[%s10345_s1 + $0x378] sm:$0xff]  }
  0x4d   :  { %7087 = vmatpush3.bf16.msra.mxu1 %v7920_v39  ;;  %7060 = vmatprep.subr.bf16.mxu0 %v7922_v40  ;;  %v7975_v39 = vld [vmem:[%s10345_s1 + $0x3f8] sm:$0xff]  }
  0x4e   :  { %7088 = vmatprep.subr.bf16.mxu1 %v7923_v41  ;;  %4982 = vmatprep.mubr.bf16.mxu0 %v6311_v0  ;;  %v7976_v40 = vld [vmem:[%s10345_s1 + $0x338] sm:$0xff]  }
  0x4f   :  { %5030 = vmatprep.mubr.bf16.mxu1 %v6313_v3  ;;  %v7977_v41 = vld [vmem:[%s10345_s1 + $0x3b8] sm:$0xff]   ;;  %v7992_v3 = vld [vmem:[%s10345_s1 + $0x490] sm:$0xff]  }
  0x50   :  { %7061 = vmatpush3.bf16.msra.mxu0 %v7924_v42  ;;  %v21_v42 = vld [vmem:[%s10346_s0 + $0x30] sm:$0xff] }
  0x51   :  { %7089 = vmatpush3.bf16.msra.mxu1 %v7925_v43  ;;  %7062 = vmatprep.subr.bf16.mxu0 %v7926_v44  ;;  %v53_v43 = vld [vmem:[%s10346_s0 + $0x130] sm:$0xff]  ;;  %v22_v44 = vld [vmem:[%s10346_s0 + $0x38] sm:$0xff] }
  0x52   :  { %7090 = vmatprep.subr.bf16.mxu1 %v7927_v45  ;;  %v6314_v45 = vcombine.low %v21_v42, %v53_v43 }
  0x54   :  { %7063 = vmatpush3.bf16.msra.mxu0 %v7928_v46  ;;  %v6315_v46 = vcombine.high %v21_v42, %v53_v43  ;;  %v8024_v43 = vld [vmem:[%s10345_s1 + $0x550] sm:$0xff]  }
  0x55   :  { %7091 = vmatpush3.bf16.msra.mxu1 %v7929_v47  ;;  %7064 = vmatprep.subr.bf16.mxu0 %v7930_v48  ;;  %v54_v47 = vld [vmem:[%s10346_s0 + $0x138] sm:$0xff] }
  0x56   :  { %7092 = vmatprep.subr.bf16.mxu1 %v7931_v49  ;;  %v6316_v48 = vcombine.low %v22_v44, %v54_v47  ;;  %v6317_v49 = vcombine.high %v22_v44, %v54_v47  ;;  %v8025_v44 = vld [vmem:[%s10345_s1 + $0x5d0] sm:$0xff]  }
  0x57   :  { %v8027_v47 = vld [vmem:[%s10345_s1 + $0x510] sm:$0xff]  }
  0x58   :  { %7065 = vmatpush3.bf16.msra.mxu0 %v7932_v50  ;;  %v7978_v50 = vld [vmem:[%s10345_s1 + $0x440] sm:$0xff]  }
  0x59   :  { %7093 = vmatpush3.bf16.msra.mxu1 %v7933_v51  ;;  %7066 = vmatprep.subr.bf16.mxu0 %v7934_v52  ;;  %v7979_v51 = vld [vmem:[%s10345_s1 + $0x4c0] sm:$0xff]  }
  0x5a   :  { %7094 = vmatprep.subr.bf16.mxu1 %v7935_v53  ;;  %v7980_v52 = vld [vmem:[%s10345_s1 + $0x400] sm:$0xff]  }
  0x5b   :  { %v7981_v53 = vld [vmem:[%s10345_s1 + $0x480] sm:$0xff]  }
  0x5c   :  { %7067 = vmatpush3.bf16.msra.mxu0 %v7936_v54  ;;  %v7982_v54 = vld [vmem:[%s10345_s1 + $0x448] sm:$0xff]  }
  0x5d   :  { %7095 = vmatpush3.bf16.msra.mxu1 %v7937_v55  ;;  %7068 = vmatprep.subr.bf16.mxu0 %v7938_v56  ;;  %v7983_v55 = vld [vmem:[%s10345_s1 + $0x4c8] sm:$0xff]  }
  0x5e   :  { %7096 = vmatprep.subr.bf16.mxu1 %v7939_v57  ;;  %v7984_v56 = vld [vmem:[%s10345_s1 + $0x408] sm:$0xff]  }
  0x5f   :  { %v7985_v57 = vld [vmem:[%s10345_s1 + $0x488] sm:$0xff]  }
  0x60   :  { %7069 = vmatpush3.bf16.msra.mxu0 %v7940_v58  ;;  %v85_v58 = vld [vmem:[%s10346_s0 + $0x230] sm:$0xff] }
  0x61   :  { %7097 = vmatpush3.bf16.msra.mxu1 %v7941_v59  ;;  %7110 = vmatprep.subr.bf16.mxu0 %v7942_v4  ;;  %v6379_v59 = vcombine.high %v85_v58, %v85_v58  ;;  %v6378_v60 = vcombine.low %v85_v58, %v85_v58  ;;  %v7994_v4 = vld [vmem:[%s10345_s1 + $0x458] sm:$0xff]   ;;  %v8038_v58 = vld [vmem:[%s10345_s1 + $0x568] sm:$0xff]  }
  0x62   :  { %7138 = vmatprep.subr.bf16.mxu1 %v7943_v5  ;;  %v7995_v5 = vld [vmem:[%s10345_s1 + $0x4d8] sm:$0xff]  }
  0x63   :  { %4983 = vmatmul.mubr.bf16.vlgmr.msra.gmra.mrb[16].mxu0 %v6310_v63  ;;  %v86_v63 = vld [vmem:[%s10346_s0 + $0x238] sm:$0xff] }
  0x64   :  { %5031 = vmatmul.mubr.bf16.vlgmr.msra.gmra.mrb[16].mxu1 %v6312_v2  ;;  %7111 = vmatpush3.bf16.msra.mxu0 %v7944_v6  ;;  %v6381_v0 = vcombine.high %v86_v63, %v86_v63  ;;  %v6380_v2 = vcombine.low %v86_v63, %v86_v63  ;;  %v7996_v6 = vld [vmem:[%s10345_s1 + $0x418] sm:$0xff]   ;;  %v8043_v63 = vld [vmem:[%s10345_s1 + $0x5f0] sm:$0xff]  }
  0x65   :  { %7139 = vmatpush3.bf16.msra.mxu1 %v7945_v7  ;;  %7112 = vmatprep.subr.bf16.mxu0 %v7946_v8  ;;  %v7997_v7 = vld [vmem:[%s10345_s1 + $0x498] sm:$0xff]   ;;  %v7998_v8 = vld [vmem:[%s10345_s1 + $0x460] sm:$0xff]  }
  0x66   :  { %7140 = vmatprep.subr.bf16.mxu1 %v7947_v9  ;;  %4990 = vmatprep.mubr.bf16.mxu0 %v6375_v13  ;;  %v7999_v9 = vld [vmem:[%s10345_s1 + $0x4e0] sm:$0xff]   ;;  %v8003_v13 = vld [vmem:[%s10345_s1 + $0x4e8] sm:$0xff]  }
  0x67   :  { %5038 = vmatprep.mubr.bf16.mxu1 %v6377_v18  ;;  %v8008_v18 = vld [vmem:[%s10345_s1 + $0x430] sm:$0xff]  }
  0x68   :  { %7113 = vmatpush3.bf16.msra.mxu0 %v7948_v10  ;;  %v8000_v10 = vld [vmem:[%s10345_s1 + $0x420] sm:$0xff]  }
  0x69   :  { %7141 = vmatpush3.bf16.msra.mxu1 %v7949_v11  ;;  %7114 = vmatprep.subr.bf16.mxu0 %v7952_v15  ;;  %v8001_v11 = vld [vmem:[%s10345_s1 + $0x4a0] sm:$0xff]   ;;  %v8005_v15 = vld [vmem:[%s10345_s1 + $0x4a8] sm:$0xff]  }
  0x6a   :  { %7142 = vmatprep.subr.bf16.mxu1 %v7953_v16  ;;  %v8006_v16 = vld [vmem:[%s10345_s1 + $0x470] sm:$0xff]  }
  0x6b   :  { %4991 = vmatmul.mubr.bf16.gmra.mrb[20].mxu0 %v6374_v14  ;;  %v8004_v14 = vld [vmem:[%s10345_s1 + $0x428] sm:$0xff]  }
  0x6c   :  { %7115 = vmatpush3.bf16.msra.mxu0 %v7955_v19  ;;  %5039 = vmatmul.mubr.bf16.gmra.mrb[20].mxu1 %v6376_v20  ;;  %v8009_v19 = vld [vmem:[%s10345_s1 + $0x4b0] sm:$0xff]   ;;  %v8010_v20 = vld [vmem:[%s10345_s1 + $0x478] sm:$0xff]  }
  0x6d   :  { %7143 = vmatpush3.bf16.msra.mxu1 %v7956_v21  ;;  %7116 = vmatprep.subr.bf16.mxu0 %v7958_v22  ;;  %v8011_v21 = vld [vmem:[%s10345_s1 + $0x4f8] sm:$0xff]  }
  0x6e   :  { %7144 = vmatprep.subr.bf16.mxu1 %v7959_v23  ;;  %5078 = vmatprep.mubr.bf16.mxu0 %v6315_v46  ;;  %v8012_v22 = vld [vmem:[%s10345_s1 + $0x438] sm:$0xff]  }
  0x6f   :  { %5126 = vmatprep.mubr.bf16.mxu1 %v6317_v49  ;;  %v8013_v23 = vld [vmem:[%s10345_s1 + $0x4b8] sm:$0xff]   ;;  %v8028_v49 = vld [vmem:[%s10345_s1 + $0x590] sm:$0xff]  }
  0x70   :  { %7117 = vmatpush3.bf16.msra.mxu0 %v7960_v24  ;;  %v23_v24 = vld [vmem:[%s10346_s0 + $0x40] sm:$0xff] }
  0x71   :  { %7145 = vmatpush3.bf16.msra.mxu1 %v7961_v25  ;;  %7118 = vmatprep.subr.bf16.mxu0 %v7962_v26  ;;  %v55_v25 = vld [vmem:[%s10346_s0 + $0x140] sm:$0xff]  ;;  %v24_v26 = vld [vmem:[%s10346_s0 + $0x48] sm:$0xff] }
  0x72   :  { %7146 = vmatprep.subr.bf16.mxu1 %v7963_v27  ;;  %v6318_v27 = vcombine.low %v23_v24, %v55_v25 }
  0x74   :  { %7119 = vmatpush3.bf16.msra.mxu0 %v7964_v28  ;;  %v6319_v28 = vcombine.high %v23_v24, %v55_v25  ;;  %v8060_v25 = vld [vmem:[%s10345_s1 + $0x650] sm:$0xff]  }
  0x75   :  { %7147 = vmatpush3.bf16.msra.mxu1 %v7965_v29  ;;  %7120 = vmatprep.subr.bf16.mxu0 %v7966_v30  ;;  %v56_v29 = vld [vmem:[%s10346_s0 + $0x148] sm:$0xff] }
  0x76   :  { %7148 = vmatprep.subr.bf16.mxu1 %v7967_v31  ;;  %v6320_v30 = vcombine.low %v24_v26, %v56_v29  ;;  %v6321_v31 = vcombine.high %v24_v26, %v56_v29  ;;  %v8061_v26 = vld [vmem:[%s10345_s1 + $0x6d0] sm:$0xff]  }
  0x77   :  { %v8063_v29 = vld [vmem:[%s10345_s1 + $0x610] sm:$0xff]  }
  0x78   :  { %7121 = vmatpush3.bf16.msra.mxu0 %v7968_v32  ;;  %v8014_v32 = vld [vmem:[%s10345_s1 + $0x540] sm:$0xff]  }
  0x79   :  { %7149 = vmatpush3.bf16.msra.mxu1 %v7969_v33  ;;  %7122 = vmatprep.subr.bf16.mxu0 %v7970_v34  ;;  %v8015_v33 = vld [vmem:[%s10345_s1 + $0x5c0] sm:$0xff]  }
  0x7a   :  { %7150 = vmatprep.subr.bf16.mxu1 %v7971_v35  ;;  %v8016_v34 = vld [vmem:[%s10345_s1 + $0x500] sm:$0xff]  }
  0x7b   :  { %v8017_v35 = vld [vmem:[%s10345_s1 + $0x580] sm:$0xff]  }
  0x7c   :  { %7123 = vmatpush3.bf16.msra.mxu0 %v7972_v36  ;;  %v8018_v36 = vld [vmem:[%s10345_s1 + $0x548] sm:$0xff]  }
  0x7d   :  { %7151 = vmatpush3.bf16.msra.mxu1 %v7973_v37  ;;  %7124 = vmatprep.subr.bf16.mxu0 %v7974_v38  ;;  %v8019_v37 = vld [vmem:[%s10345_s1 + $0x5c8] sm:$0xff]  }
  0x7e   :  { %7152 = vmatprep.subr.bf16.mxu1 %v7975_v39  ;;  %v8020_v38 = vld [vmem:[%s10345_s1 + $0x508] sm:$0xff]  }
  0x7f   :  { %v8021_v39 = vld [vmem:[%s10345_s1 + $0x588] sm:$0xff]  }
  0x80   :  { %7125 = vmatpush3.bf16.msra.mxu0 %v7976_v40  ;;  %v87_v40 = vld [vmem:[%s10346_s0 + $0x240] sm:$0xff] }
  0x81   :  { %7153 = vmatpush3.bf16.msra.mxu1 %v7977_v41  ;;  %7166 = vmatprep.subr.bf16.mxu0 %v7978_v50  ;;  %v6383_v41 = vcombine.high %v87_v40, %v87_v40  ;;  %v6382_v42 = vcombine.low %v87_v40, %v87_v40  ;;  %v8030_v50 = vld [vmem:[%s10345_s1 + $0x558] sm:$0xff]   ;;  %v8074_v40 = vld [vmem:[%s10345_s1 + $0x668] sm:$0xff]  }
  0x82   :  { %7194 = vmatprep.subr.bf16.mxu1 %v7979_v51  ;;  %v8031_v51 = vld [vmem:[%s10345_s1 + $0x5d8] sm:$0xff]  }
  0x83   :  { %5079 = vmatmul.mubr.bf16.vlgmr.msra.gmra.mrb[24].mxu0 %v6314_v45  ;;  %v88_v45 = vld [vmem:[%s10346_s0 + $0x248] sm:$0xff] }
  0x84   :  { %5127 = vmatmul.mubr.bf16.vlgmr.msra.gmra.mrb[24].mxu1 %v6316_v48  ;;  %7167 = vmatpush3.bf16.msra.mxu0 %v7980_v52  ;;  %v6385_v46 = vcombine.high %v88_v45, %v88_v45  ;;  %v6384_v48 = vcombine.low %v88_v45, %v88_v45  ;;  %v8032_v52 = vld [vmem:[%s10345_s1 + $0x518] sm:$0xff]   ;;  %v8079_v45 = vld [vmem:[%s10345_s1 + $0x6f0] sm:$0xff]  }
  0x85   :  { %7195 = vmatpush3.bf16.msra.mxu1 %v7981_v53  ;;  %7168 = vmatprep.subr.bf16.mxu0 %v7982_v54  ;;  %v8033_v53 = vld [vmem:[%s10345_s1 + $0x598] sm:$0xff]   ;;  %v8034_v54 = vld [vmem:[%s10345_s1 + $0x560] sm:$0xff]  }
  0x86   :  { %7196 = vmatprep.subr.bf16.mxu1 %v7983_v55  ;;  %5086 = vmatprep.mubr.bf16.mxu0 %v6379_v59  ;;  %v8035_v55 = vld [vmem:[%s10345_s1 + $0x5e0] sm:$0xff]   ;;  %v8039_v59 = vld [vmem:[%s10345_s1 + $0x5e8] sm:$0xff]  }
  0x87   :  { %5134 = vmatprep.mubr.bf16.mxu1 %v6381_v0  ;;  %v8044_v0 = vld [vmem:[%s10345_s1 + $0x530] sm:$0xff]  }
  0x88   :  { %7169 = vmatpush3.bf16.msra.mxu0 %v7984_v56  ;;  %v8036_v56 = vld [vmem:[%s10345_s1 + $0x520] sm:$0xff]  }
  0x89   :  { %7197 = vmatpush3.bf16.msra.mxu1 %v7985_v57  ;;  %7170 = vmatprep.subr.bf16.mxu0 %v7988_v61  ;;  %v8037_v57 = vld [vmem:[%s10345_s1 + $0x5a0] sm:$0xff]   ;;  %v8041_v61 = vld [vmem:[%s10345_s1 + $0x5a8] sm:$0xff]  }
  0x8a   :  { %7198 = vmatprep.subr.bf16.mxu1 %v7989_v62  ;;  %v8042_v62 = vld [vmem:[%s10345_s1 + $0x570] sm:$0xff]  }
  0x8b   :  { %5087 = vmatmul.mubr.bf16.gmra.mrb[28].mxu0 %v6378_v60  ;;  %v8040_v60 = vld [vmem:[%s10345_s1 + $0x528] sm:$0xff]  }
  0x8c   :  { %7171 = vmatpush3.bf16.msra.mxu0 %v7991_v1  ;;  %5135 = vmatmul.mubr.bf16.gmra.mrb[28].mxu1 %v6380_v2  ;;  %v8045_v1 = vld [vmem:[%s10345_s1 + $0x5b0] sm:$0xff]   ;;  %v8046_v2 = vld [vmem:[%s10345_s1 + $0x578] sm:$0xff]  }
  0x8d   :  { %7199 = vmatpush3.bf16.msra.mxu1 %v7992_v3  ;;  %7172 = vmatprep.subr.bf16.mxu0 %v7994_v4  ;;  %v8047_v3 = vld [vmem:[%s10345_s1 + $0x5f8] sm:$0xff]  }
  0x8e   :  { %7200 = vmatprep.subr.bf16.mxu1 %v7995_v5  ;;  %5174 = vmatprep.mubr.bf16.mxu0 %v6319_v28  ;;  %v8048_v4 = vld [vmem:[%s10345_s1 + $0x538] sm:$0xff]  }
  0x8f   :  { %5222 = vmatprep.mubr.bf16.mxu1 %v6321_v31  ;;  %v8049_v5 = vld [vmem:[%s10345_s1 + $0x5b8] sm:$0xff]   ;;  %v8064_v31 = vld [vmem:[%s10345_s1 + $0x690] sm:$0xff]  }
  0x90   :  { %7173 = vmatpush3.bf16.msra.mxu0 %v7996_v6  ;;  %v25_v6 = vld [vmem:[%s10346_s0 + $0x50] sm:$0xff] }
  0x91   :  { %7201 = vmatpush3.bf16.msra.mxu1 %v7997_v7  ;;  %7174 = vmatprep.subr.bf16.mxu0 %v7998_v8  ;;  %v57_v7 = vld [vmem:[%s10346_s0 + $0x150] sm:$0xff]  ;;  %v26_v8 = vld [vmem:[%s10346_s0 + $0x58] sm:$0xff] }
  0x92   :  { %7202 = vmatprep.subr.bf16.mxu1 %v7999_v9  ;;  %v6322_v9 = vcombine.low %v25_v6, %v57_v7 }
  0x94   :  { %7175 = vmatpush3.bf16.msra.mxu0 %v8000_v10  ;;  %v6323_v10 = vcombine.high %v25_v6, %v57_v7  ;;  %v8096_v7 = vld [vmem:[%s10345_s1 + $0x750] sm:$0xff]  }
  0x95   :  { %7203 = vmatpush3.bf16.msra.mxu1 %v8001_v11  ;;  %7176 = vmatprep.subr.bf16.mxu0 %v8002_v12  ;;  %v58_v11 = vld [vmem:[%s10346_s0 + $0x158] sm:$0xff] }
  0x96   :  { %7204 = vmatprep.subr.bf16.mxu1 %v8003_v13  ;;  %v6324_v12 = vcombine.low %v26_v8, %v58_v11  ;;  %v6325_v13 = vcombine.high %v26_v8, %v58_v11  ;;  %v8097_v8 = vld [vmem:[%s10345_s1 + $0x7d0] sm:$0xff]  }
  0x98   :  { %7177 = vmatpush3.bf16.msra.mxu0 %v8004_v14  ;;  %v8050_v14 = vld [vmem:[%s10345_s1 + $0x640] sm:$0xff]  }
  0x99   :  { %7205 = vmatpush3.bf16.msra.mxu1 %v8005_v15  ;;  %7178 = vmatprep.subr.bf16.mxu0 %v8006_v16  ;;  %v8051_v15 = vld [vmem:[%s10345_s1 + $0x6c0] sm:$0xff]  }
  0x9a   :  { %7206 = vmatprep.subr.bf16.mxu1 %v8007_v17  ;;  %v8052_v16 = vld [vmem:[%s10345_s1 + $0x600] sm:$0xff]  }
  0x9b   :  { %v8053_v17 = vld [vmem:[%s10345_s1 + $0x680] sm:$0xff]  }
  0x9c   :  { %7179 = vmatpush3.bf16.msra.mxu0 %v8008_v18  ;;  %v8054_v18 = vld [vmem:[%s10345_s1 + $0x648] sm:$0xff]  }
  0x9d   :  { %7207 = vmatpush3.bf16.msra.mxu1 %v8009_v19  ;;  %7180 = vmatprep.subr.bf16.mxu0 %v8010_v20  ;;  %v8055_v19 = vld [vmem:[%s10345_s1 + $0x6c8] sm:$0xff]  }
  0x9e   :  { %7208 = vmatprep.subr.bf16.mxu1 %v8011_v21  ;;  %v8056_v20 = vld [vmem:[%s10345_s1 + $0x608] sm:$0xff]  }
  0x9f   :  { %v8057_v21 = vld [vmem:[%s10345_s1 + $0x688] sm:$0xff]  }
  0xa0   :  { %7181 = vmatpush3.bf16.msra.mxu0 %v8012_v22  ;;  %v89_v22 = vld [vmem:[%s10346_s0 + $0x250] sm:$0xff] }
  0xa1   :  { %7209 = vmatpush3.bf16.msra.mxu1 %v8013_v23  ;;  %7222 = vmatprep.subr.bf16.mxu0 %v8014_v32  ;;  %v6387_v23 = vcombine.high %v89_v22, %v89_v22  ;;  %v6386_v24 = vcombine.low %v89_v22, %v89_v22  ;;  %v8066_v32 = vld [vmem:[%s10345_s1 + $0x658] sm:$0xff]  }
  0xa2   :  { %7250 = vmatprep.subr.bf16.mxu1 %v8015_v33  ;;  %v8067_v33 = vld [vmem:[%s10345_s1 + $0x6d8] sm:$0xff]  }
  0xa3   :  { %5175 = vmatmul.mubr.bf16.vlgmr.msra.gmra.mrb[32].mxu0 %v6318_v27  ;;  %v90_v27 = vld [vmem:[%s10346_s0 + $0x258] sm:$0xff] }
  0xa4   :  { %5223 = vmatmul.mubr.bf16.vlgmr.msra.gmra.mrb[32].mxu1 %v6320_v30  ;;  %7223 = vmatpush3.bf16.msra.mxu0 %v8016_v34  ;;  %v6389_v28 = vcombine.high %v90_v27, %v90_v27  ;;  %v6388_v30 = vcombine.low %v90_v27, %v90_v27  ;;  %v8068_v34 = vld [vmem:[%s10345_s1 + $0x618] sm:$0xff]   ;;  %v8106_v27 = vld [vmem:[%s10345_s1 + $0x760] sm:$0xff]  }
  0xa5   :  { %7251 = vmatpush3.bf16.msra.mxu1 %v8017_v35  ;;  %7224 = vmatprep.subr.bf16.mxu0 %v8018_v36  ;;  %v8069_v35 = vld [vmem:[%s10345_s1 + $0x698] sm:$0xff]   ;;  %v8070_v36 = vld [vmem:[%s10345_s1 + $0x660] sm:$0xff]  }
  0xa6   :  { %7252 = vmatprep.subr.bf16.mxu1 %v8019_v37  ;;  %5182 = vmatprep.mubr.bf16.mxu0 %v6383_v41  ;;  %v8071_v37 = vld [vmem:[%s10345_s1 + $0x6e0] sm:$0xff]   ;;  %v8075_v41 = vld [vmem:[%s10345_s1 + $0x6e8] sm:$0xff]  }
  0xa7   :  { %5230 = vmatprep.mubr.bf16.mxu1 %v6385_v46  ;;  %v8080_v46 = vld [vmem:[%s10345_s1 + $0x630] sm:$0xff]  }
  0xa8   :  { %7225 = vmatpush3.bf16.msra.mxu0 %v8020_v38  ;;  %v8072_v38 = vld [vmem:[%s10345_s1 + $0x620] sm:$0xff]  }
  0xa9   :  { %7253 = vmatpush3.bf16.msra.mxu1 %v8021_v39  ;;  %7226 = vmatprep.subr.bf16.mxu0 %v8024_v43  ;;  %v8073_v39 = vld [vmem:[%s10345_s1 + $0x6a0] sm:$0xff]   ;;  %v8077_v43 = vld [vmem:[%s10345_s1 + $0x6a8] sm:$0xff]  }
  0xaa   :  { %7254 = vmatprep.subr.bf16.mxu1 %v8025_v44  ;;  %v8078_v44 = vld [vmem:[%s10345_s1 + $0x670] sm:$0xff]  }
  0xab   :  { %5183 = vmatmul.mubr.bf16.gmra.mrb[36].mxu0 %v6382_v42  ;;  %v8076_v42 = vld [vmem:[%s10345_s1 + $0x628] sm:$0xff]  }
  0xac   :  { %7227 = vmatpush3.bf16.msra.mxu0 %v8027_v47  ;;  %5231 = vmatmul.mubr.bf16.gmra.mrb[36].mxu1 %v6384_v48  ;;  %v8081_v47 = vld [vmem:[%s10345_s1 + $0x6b0] sm:$0xff]   ;;  %v8082_v48 = vld [vmem:[%s10345_s1 + $0x678] sm:$0xff]  }
  0xad   :  { %7255 = vmatpush3.bf16.msra.mxu1 %v8028_v49  ;;  %7228 = vmatprep.subr.bf16.mxu0 %v8030_v50  ;;  %v8083_v49 = vld [vmem:[%s10345_s1 + $0x6f8] sm:$0xff]  }
  0xae   :  { %7256 = vmatprep.subr.bf16.mxu1 %v8031_v51  ;;  %5270 = vmatprep.mubr.bf16.mxu0 %v6323_v10  ;;  %v8084_v50 = vld [vmem:[%s10345_s1 + $0x638] sm:$0xff]  }
  0xaf   :  { %5318 = vmatprep.mubr.bf16.mxu1 %v6325_v13  ;;  %v8085_v51 = vld [vmem:[%s10345_s1 + $0x6b8] sm:$0xff]  }
  0xb0   :  { %7229 = vmatpush3.bf16.msra.mxu0 %v8032_v52  ;;  %v27_v52 = vld [vmem:[%s10346_s0 + $0x60] sm:$0xff] }
  0xb1   :  { %7257 = vmatpush3.bf16.msra.mxu1 %v8033_v53  ;;  %7230 = vmatprep.subr.bf16.mxu0 %v8034_v54  ;;  %v59_v53 = vld [vmem:[%s10346_s0 + $0x160] sm:$0xff]  ;;  %v28_v54 = vld [vmem:[%s10346_s0 + $0x68] sm:$0xff] }
  0xb2   :  { %7258 = vmatprep.subr.bf16.mxu1 %v8035_v55  ;;  %v6326_v55 = vcombine.low %v27_v52, %v59_v53 }
  0xb4   :  { %7231 = vmatpush3.bf16.msra.mxu0 %v8036_v56  ;;  %v6327_v56 = vcombine.high %v27_v52, %v59_v53  ;;  %v61_v52 = vld [vmem:[%s10346_s0 + $0x170] sm:$0xff] }
  0xb5   :  { %7259 = vmatpush3.bf16.msra.mxu1 %v8037_v57  ;;  %7232 = vmatprep.subr.bf16.mxu0 %v8038_v58  ;;  %v60_v57 = vld [vmem:[%s10346_s0 + $0x168] sm:$0xff] }
  0xb6   :  { %7260 = vmatprep.subr.bf16.mxu1 %v8039_v59  ;;  %v6328_v58 = vcombine.low %v28_v54, %v60_v57  ;;  %v6329_v59 = vcombine.high %v28_v54, %v60_v57  ;;  %v62_v57 = vld [vmem:[%s10346_s0 + $0x178] sm:$0xff] }
  0xb8   :  { %7233 = vmatpush3.bf16.msra.mxu0 %v8040_v60  ;;  %v8086_v60 = vld [vmem:[%s10345_s1 + $0x740] sm:$0xff]  }
  0xb9   :  { %7261 = vmatpush3.bf16.msra.mxu1 %v8041_v61  ;;  %7234 = vmatprep.subr.bf16.mxu0 %v8042_v62  ;;  %v8087_v61 = vld [vmem:[%s10345_s1 + $0x7c0] sm:$0xff]  }
  0xba   :  { %7262 = vmatprep.subr.bf16.mxu1 %v8043_v63  ;;  %v8088_v62 = vld [vmem:[%s10345_s1 + $0x700] sm:$0xff]  }
  0xbb   :  { %v8089_v63 = vld [vmem:[%s10345_s1 + $0x780] sm:$0xff]  }
  0xbc   :  { %7235 = vmatpush3.bf16.msra.mxu0 %v8044_v0  ;;  %v8090_v0 = vld [vmem:[%s10345_s1 + $0x748] sm:$0xff]  }
  0xbd   :  { %7263 = vmatpush3.bf16.msra.mxu1 %v8045_v1  ;;  %7236 = vmatprep.subr.bf16.mxu0 %v8046_v2  ;;  %v8091_v1 = vld [vmem:[%s10345_s1 + $0x7c8] sm:$0xff]  }
  0xbe   :  { %7264 = vmatprep.subr.bf16.mxu1 %v8047_v3  ;;  %v8092_v2 = vld [vmem:[%s10345_s1 + $0x708] sm:$0xff]  }
  0xbf   :  { %v8093_v3 = vld [vmem:[%s10345_s1 + $0x788] sm:$0xff]  }
  0xc0   :  { %7237 = vmatpush3.bf16.msra.mxu0 %v8048_v4  ;;  %v91_v4 = vld [vmem:[%s10346_s0 + $0x260] sm:$0xff] }
  0xc1   :  { %7265 = vmatpush3.bf16.msra.mxu1 %v8049_v5  ;;  %7278 = vmatprep.subr.bf16.mxu0 %v8050_v14  ;;  %v6391_v5 = vcombine.high %v91_v4, %v91_v4  ;;  %v6390_v6 = vcombine.low %v91_v4, %v91_v4 }
  0xc2   :  { %7306 = vmatprep.subr.bf16.mxu1 %v8051_v15  ;;  %v8100_v15 = vld [vmem:[%s10345_s1 + $0x790] sm:$0xff]  }
  0xc3   :  { %5271 = vmatmul.mubr.bf16.vlgmr.msra.gmra.mrb[40].mxu0 %v6322_v9  ;;  %v92_v9 = vld [vmem:[%s10346_s0 + $0x268] sm:$0xff] }
  0xc4   :  { %5319 = vmatmul.mubr.bf16.vlgmr.msra.gmra.mrb[40].mxu1 %v6324_v12  ;;  %7279 = vmatpush3.bf16.msra.mxu0 %v8052_v16  ;;  %v6393_v11 = vcombine.high %v92_v9, %v92_v9  ;;  %v8099_v12 = vld [vmem:[%s10345_s1 + $0x710] sm:$0xff]   ;;  %v6392_v13 = vcombine.low %v92_v9, %v92_v9 }
  0xc5   :  { %7307 = vmatpush3.bf16.msra.mxu1 %v8053_v17  ;;  %7280 = vmatprep.subr.bf16.mxu0 %v8054_v18  ;;  %v8102_v17 = vld [vmem:[%s10345_s1 + $0x758] sm:$0xff]  }
  0xc6   :  { %7308 = vmatprep.subr.bf16.mxu1 %v8055_v19  ;;  %5278 = vmatprep.mubr.bf16.mxu0 %v6387_v23  ;;  %v8104_v23 = vld [vmem:[%s10345_s1 + $0x718] sm:$0xff]  }
  0xc7   :  { %5326 = vmatprep.mubr.bf16.mxu1 %v6389_v28 }
  0xc8   :  { %7281 = vmatpush3.bf16.msra.mxu0 %v8056_v20  ;;  %v8103_v20 = vld [vmem:[%s10345_s1 + $0x7d8] sm:$0xff]  }
  0xc9   :  { %7309 = vmatpush3.bf16.msra.mxu1 %v8057_v21  ;;  %7282 = vmatprep.subr.bf16.mxu0 %v8060_v25  ;;  %v8105_v25 = vld [vmem:[%s10345_s1 + $0x798] sm:$0xff]  }
  0xca   :  { %7310 = vmatprep.subr.bf16.mxu1 %v8061_v26 }
  0xcb   :  { %5279 = vmatmul.mubr.bf16.gmra.mrb[44].mxu0 %v6386_v24 }
  0xcc   :  { %7283 = vmatpush3.bf16.msra.mxu0 %v8063_v29  ;;  %5327 = vmatmul.mubr.bf16.gmra.mrb[44].mxu1 %v6388_v30  ;;  %v8107_v30 = vld [vmem:[%s10345_s1 + $0x7e0] sm:$0xff]  }
  0xcd   :  { %7311 = vmatpush3.bf16.msra.mxu1 %v8064_v31  ;;  %7284 = vmatprep.subr.bf16.mxu0 %v8066_v32  ;;  %v8108_v32 = vld [vmem:[%s10345_s1 + $0x720] sm:$0xff]  }
  0xce   :  { %7312 = vmatprep.subr.bf16.mxu1 %v8067_v33  ;;  %5366 = vmatprep.mubr.bf16.mxu0 %v6327_v56  ;;  %v8109_v33 = vld [vmem:[%s10345_s1 + $0x7a0] sm:$0xff]   ;;  %v30_v56 = vld [vmem:[%s10346_s0 + $0x78] sm:$0xff] }
  0xcf   :  { %5414 = vmatprep.mubr.bf16.mxu1 %v6329_v59  ;;  %v6332_v59 = vcombine.low %v30_v56, %v62_v57 }
  0xd0   :  { %7285 = vmatpush3.bf16.msra.mxu0 %v8068_v34  ;;  %v6301_v34 = vld [vmem:[%s10347_s2] ss:$0 sm:$0xff] }
  0xd1   :  { %7313 = vmatpush3.bf16.msra.mxu1 %v8069_v35  ;;  %7286 = vmatprep.subr.bf16.mxu0 %v8070_v36  ;;  %v8110_v36 = vld [vmem:[%s10345_s1 + $0x768] sm:$0xff]  }
  0xd2   :  { %7314 = vmatprep.subr.bf16.mxu1 %v8071_v37 }
  0xd4   :  { %7287 = vmatpush3.bf16.msra.mxu0 %v8072_v38  ;;  %v8111_v38 = vld [vmem:[%s10345_s1 + $0x7e8] sm:$0xff]  }
  0xd5   :  { %7315 = vmatpush3.bf16.msra.mxu1 %v8073_v39  ;;  %7288 = vmatprep.subr.bf16.mxu0 %v8074_v40  ;;  %v8112_v40 = vld [vmem:[%s10345_s1 + $0x728] sm:$0xff]  }
  0xd6   :  { %7316 = vmatprep.subr.bf16.mxu1 %v8075_v41 }
  0xd8   :  { %7289 = vmatpush3.bf16.msra.mxu0 %v8076_v42  ;;  %v8113_v42 = vld [vmem:[%s10345_s1 + $0x7a8] sm:$0xff]  }
  0xd9   :  { %7317 = vmatpush3.bf16.msra.mxu1 %v8077_v43  ;;  %7290 = vmatprep.subr.bf16.mxu0 %v8078_v44  ;;  %v8114_v43 = vld [vmem:[%s10345_s1 + $0x770] sm:$0xff]  }
  0xda   :  { %7318 = vmatprep.subr.bf16.mxu1 %v8079_v45  ;;  %v8115_v44 = vld [vmem:[%s10345_s1 + $0x7f0] sm:$0xff]  }
  0xdb   :  { %v8116_v45 = vld [vmem:[%s10345_s1 + $0x730] sm:$0xff]  }
  0xdc   :  { %7291 = vmatpush3.bf16.msra.mxu0 %v8080_v46  ;;  %v8117_v46 = vld [vmem:[%s10345_s1 + $0x7b0] sm:$0xff]  }
  0xdd   :  { %7319 = vmatpush3.bf16.msra.mxu1 %v8081_v47  ;;  %7292 = vmatprep.subr.bf16.mxu0 %v8082_v48  ;;  %v8118_v47 = vld [vmem:[%s10345_s1 + $0x778] sm:$0xff]  }
  0xde   :  { %7320 = vmatprep.subr.bf16.mxu1 %v8083_v49  ;;  %v8119_v48 = vld [vmem:[%s10345_s1 + $0x7f8] sm:$0xff]  }
  0xdf   :  { %v8120_v49 = vld [vmem:[%s10345_s1 + $0x738] sm:$0xff]  }
  0xe0   :  { %7293 = vmatpush3.bf16.msra.mxu0 %v8084_v50  ;;  %v8121_v50 = vld [vmem:[%s10345_s1 + $0x7b8] sm:$0xff]  }
  0xe1   :  { %7321 = vmatpush3.bf16.msra.mxu1 %v8085_v51  ;;  %7334 = vmatprep.subr.bf16.mxu0 %v8086_v60  ;;  %v29_v51 = vld [vmem:[%s10346_s0 + $0x70] sm:$0xff]  ;;  %v6333_v60 = vcombine.high %v30_v56, %v62_v57 }
  0xe2   :  { %7362 = vmatprep.subr.bf16.mxu1 %v8087_v61  ;;  %v6330_v54 = vcombine.low %v29_v51, %v61_v52  ;;  %v8122_v61 = vld [vmem:[%s10345_s1 + $0x840] sm:$0xff]  }
  0xe3   :  { %5367 = vmatmul.mubr.bf16.vlgmr.msra.gmra.mrb[48].mxu0 %v6326_v55  ;;  %v6331_v55 = vcombine.high %v29_v51, %v61_v52 }
  0xe4   :  { %5415 = vmatmul.mubr.bf16.vlgmr.msra.gmra.mrb[48].mxu1 %v6328_v58  ;;  %7335 = vmatpush3.bf16.msra.mxu0 %v8088_v62 }
  0xe5   :  { %7363 = vmatpush3.bf16.msra.mxu1 %v8089_v63  ;;  %7336 = vmatprep.subr.bf16.mxu0 %v8090_v0  ;;  %v8123_v0 = vld [vmem:[%s10345_s1 + $0x8c0] sm:$0xff]  }
  0xe6   :  { %7364 = vmatprep.subr.bf16.mxu1 %v8091_v1  ;;  %5374 = vmatprep.mubr.bf16.mxu0 %v6391_v5  ;;  %v8125_v5 = vld [vmem:[%s10345_s1 + $0x880] sm:$0xff]  }
  0xe7   :  { %5422 = vmatprep.mubr.bf16.mxu1 %v6393_v11 }
  0xe8   :  { %7337 = vmatpush3.bf16.msra.mxu0 %v8092_v2  ;;  %v8124_v2 = vld [vmem:[%s10345_s1 + $0x800] sm:$0xff]  }
  0xe9   :  { %7365 = vmatpush3.bf16.msra.mxu1 %v8093_v3  ;;  %7338 = vmatprep.subr.bf16.mxu0 %v8096_v7  ;;  %v8126_v7 = vld [vmem:[%s10345_s1 + $0x848] sm:$0xff]  }
  0xea   :  { %7366 = vmatprep.subr.bf16.mxu1 %v8097_v8 }
  0xeb   :  { %5375 = vmatmul.mubr.bf16.gmra.mrb[52].mxu0 %v6390_v6 }
  0xec   :  { %7339 = vmatpush3.bf16.msra.mxu0 %v8099_v12  ;;  %5423 = vmatmul.mubr.bf16.gmra.mrb[52].mxu1 %v6392_v13  ;;  %v8128_v12 = vld [vmem:[%s10345_s1 + $0x808] sm:$0xff]  }
  0xed   :  { %7367 = vmatpush3.bf16.msra.mxu1 %v8100_v15  ;;  %7340 = vmatprep.subr.bf16.mxu0 %v8102_v17  ;;  %v93_v15 = vld [vmem:[%s10346_s0 + $0x270] sm:$0xff] }
  0xee   :  { %7368 = vmatprep.subr.bf16.mxu1 %v8103_v20  ;;  %5462 = vmatprep.mubr.bf16.mxu0 %v6331_v55  ;;  %v6394_v17 = vcombine.low %v93_v15, %v93_v15  ;;  %v8147_v55 = vld [vmem:[%s10345_s1 + $0x8e8] sm:$0xff]  }
  0xef   :  { %5510 = vmatprep.mubr.bf16.mxu1 %v6333_v60 }
  0xf0   :  { %7341 = vmatpush3.bf16.msra.mxu0 %v8104_v23 }
  0xf1   :  { %7369 = vmatpush3.bf16.msra.mxu1 %v8105_v25  ;;  %7342 = vmatprep.subr.bf16.mxu0 %v8106_v27  ;;  %v8136_v27 = vld [vmem:[%s10345_s1 + $0x890] sm:$0xff]  }
  0xf2   :  { %7370 = vmatprep.subr.bf16.mxu1 %v8107_v30  ;;  %v8138_v30 = vld [vmem:[%s10345_s1 + $0x858] sm:$0xff]  }
  0xf4   :  { %7343 = vmatpush3.bf16.msra.mxu0 %v8108_v32 }
  0xf5   :  { %7371 = vmatpush3.bf16.msra.mxu1 %v8109_v33  ;;  %7344 = vmatprep.subr.bf16.mxu0 %v8110_v36  ;;  %v8139_v33 = vld [vmem:[%s10345_s1 + $0x8d8] sm:$0xff]  }
  0xf6   :  { %v6958_v10 = vpop.f32.mrb[0].mxu0  ;;  %7372 = vmatprep.subr.bf16.mxu1 %v8111_v38  ;;  %v8140_v36 = vld [vmem:[%s10345_s1 + $0x818] sm:$0xff]  }
  0xf7   :  { %v6986_v14 = vpop.f32.mrb[0].mxu1  ;;  %v6959_v16 = vpop.f32.mrb[1].mxu0  ;;  %v8141_v38 = vld [vmem:[%s10345_s1 + $0x898] sm:$0xff]  }
  0xf8   :  { %v6960_v18 = vadd.f32 %v6959_v16, %v6958_v10  ;;  %v6987_v19 = vpop.f32.mrb[1].mxu1  ;;  %v6961_v22 = vpop.f32.mrb[2].mxu0  ;;  %7345 = vmatpush3.bf16.msra.mxu0 %v8112_v40  ;;  %v8127_v10 = vld [vmem:[%s10345_s1 + $0x8c8] sm:$0xff]   ;;  %v6395_v16 = vcombine.high %v93_v15, %v93_v15 }
  0xf9   :  { %v6988_v21 = vadd.f32 %v6987_v19, %v6986_v14  ;;  %v6989_v24 = vpop.f32.mrb[2].mxu1  ;;  %v6962_v26 = vpop.f32.mrb[3].mxu0  ;;  %7373 = vmatpush3.bf16.msra.mxu1 %v8113_v42  ;;  %7346 = vmatprep.subr.bf16.mxu0 %v8114_v43  ;;  %v8129_v14 = vld [vmem:[%s10345_s1 + $0x888] sm:$0xff]   ;;  %v8133_v19 = vld [vmem:[%s10345_s1 + $0x8d0] sm:$0xff]  }
  0xfa   :  { %v6963_v28 = vadd.f32 %v6962_v26, %v6961_v22  ;;  %v6990_v29 = vpop.f32.mrb[3].mxu1  ;;  %v4793_v35 = vadd.f32 %v6960_v18, %v6301_v34  ;;  %7374 = vmatprep.subr.bf16.mxu1 %v8115_v44  ;;  %v8132_v18 = vld [vmem:[%s10345_s1 + $0x850] sm:$0xff]  }
  0xfb   :  { %v6991_v31 = vadd.f32 %v6990_v29, %v6989_v24  ;;  %v8135_v24 = vld [vmem:[%s10345_s1 + $0x810] sm:$0xff]  }
  0xfc   :  { %v4796_v37 = vadd.f32 %v6963_v28, %v6301_v34  ;;  %v9301_v39 = vadd.f32 %v6988_v21, %v4793_v35  ;;  %7347 = vmatpush3.bf16.msra.mxu0 %v8116_v45  ;;  %v94_v21 = vld [vmem:[%s10346_s0 + $0x278] sm:$0xff]  ;;  %v8143_v45 = vld [vmem:[%s10345_s1 + $0x8e0] sm:$0xff]  }
  0xfd   :  { %7375 = vmatpush3.bf16.msra.mxu1 %v8117_v46  ;;  %7348 = vmatprep.subr.bf16.mxu0 %v8118_v47  ;;  %v6397_v23 = vcombine.high %v94_v21, %v94_v21  ;;  %v6396_v25 = vcombine.low %v94_v21, %v94_v21  ;;  %v8162_v21 = vld [vmem:[%s10345_s1 + $0x948] sm:$0xff]  }
  0xfe   :  { %v9306_v41 = vadd.f32 %v6991_v31, %v4796_v37  ;;  %7376 = vmatprep.subr.bf16.mxu1 %v8119_v48  ;;  %v6964_v53 = vpop.f32.mrb[4].mxu0  ;;  %v8144_v48 = vld [vmem:[%s10345_s1 + $0x820] sm:$0xff]  }
  0xff   :  { %v6965_v58 = vpop.f32.mrb[5].mxu0  ;;  %v6992_v1 = vpop.f32.mrb[4].mxu1 }
 0x100   :  { %7349 = vmatpush3.bf16.msra.mxu0 %v8120_v49  ;;  %v6966_v62 = vadd.f32 %v6965_v58, %v6964_v53  ;;  %v6967_v63 = vpop.f32.mrb[6].mxu0  ;;  %v6993_v6 = vpop.f32.mrb[5].mxu1  ;;  %v8148_v58 = vld [vmem:[%s10345_s1 + $0x828] sm:$0xff]  }
 0x101   :  { %7377 = vmatpush3.bf16.msra.mxu1 %v8121_v50  ;;  %v6968_v4 = vpop.f32.mrb[7].mxu0  ;;  %7390 = vmatprep.subr.bf16.mxu0 %v8122_v61  ;;  %v6994_v8 = vadd.f32 %v6993_v6, %v6992_v1  ;;  %v6995_v9 = vpop.f32.mrb[6].mxu1  ;;  %v8145_v50 = vld [vmem:[%s10345_s1 + $0x8a0] sm:$0xff]   ;;  %v8149_v61 = vld [vmem:[%s10345_s1 + $0x8a8] sm:$0xff]   ;;  %v8150_v63 = vld [vmem:[%s10345_s1 + $0x870] sm:$0xff]  }
 0x102   :  { %v4801_v3 = vadd.f32 %v6966_v62, %v6301_v34  ;;  %7418 = vmatprep.subr.bf16.mxu1 %v8123_v0  ;;  %v6996_v11 = vpop.f32.mrb[7].mxu1  ;;  %v8153_v4 = vld [vmem:[%s10345_s1 + $0x8b0] sm:$0xff]   ;;  %v8155_v6 = vld [vmem:[%s10345_s1 + $0x8f8] sm:$0xff]   ;;  %v31_v9 = vld [vmem:[%s10346_s0 + $0x80] sm:$0xff] }
 0x103   :  { %5463 = vmatmul.mubr.bf16.vlgmr.msra.gmra.mrb[56].mxu0 %v6330_v54 }
 0x104   :  { %5511 = vmatmul.mubr.bf16.vlgmr.msra.gmra.mrb[56].mxu1 %v6332_v59  ;;  %7391 = vmatpush3.bf16.msra.mxu0 %v8124_v2  ;;  %v4849_v13 = vadd.f32 %v6994_v8, %v4801_v3  ;;  %v8151_v2 = vld [vmem:[%s10345_s1 + $0x8f0] sm:$0xff]   ;;  %v8157_v8 = vld [vmem:[%s10345_s1 + $0x8b8] sm:$0xff]  }
 0x105   :  { %7419 = vmatpush3.bf16.msra.mxu1 %v8125_v5  ;;  %7392 = vmatprep.subr.bf16.mxu0 %v8126_v7  ;;  %v8152_v3 = vld [vmem:[%s10345_s1 + $0x830] sm:$0xff]   ;;  %v8154_v5 = vld [vmem:[%s10345_s1 + $0x878] sm:$0xff]  }
 0x106   :  { %7420 = vmatprep.subr.bf16.mxu1 %v8127_v10  ;;  %5470 = vmatprep.mubr.bf16.mxu0 %v6395_v16  ;;  %v8156_v7 = vld [vmem:[%s10345_s1 + $0x838] sm:$0xff]   ;;  %v63_v10 = vld [vmem:[%s10346_s0 + $0x180] sm:$0xff] }
 0x107   :  { %5518 = vmatprep.mubr.bf16.mxu1 %v6397_v23  ;;  %v6334_v11 = vcombine.low %v31_v9, %v63_v10  ;;  %v8164_v23 = vld [vmem:[%s10345_s1 + $0x908] sm:$0xff]  }
 0x108   :  { %7393 = vmatpush3.bf16.msra.mxu0 %v8128_v12  ;;  %v6335_v12 = vcombine.high %v31_v9, %v63_v10  ;;  %v8186_v10 = vld [vmem:[%s10345_s1 + $0x970] sm:$0xff]  }
 0x109   :  { %7421 = vmatpush3.bf16.msra.mxu1 %v8129_v14  ;;  %7394 = vmatprep.subr.bf16.mxu0 %v8132_v18  ;;  %v64_v14 = vld [vmem:[%s10346_s0 + $0x188] sm:$0xff]  ;;  %v8159_v18 = vld [vmem:[%s10345_s1 + $0x9c0] sm:$0xff]  }
 0x10a   :  { %7422 = vmatprep.subr.bf16.mxu1 %v8133_v19  ;;  %v8160_v19 = vld [vmem:[%s10345_s1 + $0x900] sm:$0xff]  }
 0x10b   :  { %5471 = vmatmul.mubr.bf16.gmra.mrb[60].mxu0 %v6394_v17  ;;  %v8158_v17 = vld [vmem:[%s10345_s1 + $0x940] sm:$0xff]  }
 0x10c   :  { %7395 = vmatpush3.bf16.msra.mxu0 %v8135_v24  ;;  %5519 = vmatmul.mubr.bf16.gmra.mrb[60].mxu1 %v6396_v25  ;;  %v8165_v24 = vld [vmem:[%s10345_s1 + $0x988] sm:$0xff]   ;;  %v95_v25 = vld [vmem:[%s10346_s0 + $0x280] sm:$0xff] }
 0x10d   :  { %7423 = vmatpush3.bf16.msra.mxu1 %v8136_v27  ;;  %7396 = vmatprep.subr.bf16.mxu0 %v8138_v30  ;;  %v6398_v27 = vcombine.low %v95_v25, %v95_v25 }
 0x10e   :  { %7424 = vmatprep.subr.bf16.mxu1 %v8139_v33  ;;  %5558 = vmatprep.mubr.bf16.mxu0 %v6335_v12  ;;  %v8187_v12 = vld [vmem:[%s10345_s1 + $0x9f0] sm:$0xff]  }
 0x110   :  { %7397 = vmatpush3.bf16.msra.mxu0 %v8140_v36 }
 0x111   :  { %7425 = vmatpush3.bf16.msra.mxu1 %v8141_v38 }
 0x112   :  { %7426 = vmatprep.subr.bf16.mxu1 %v8143_v45  ;;  %v8175_v45 = vld [vmem:[%s10345_s1 + $0x9d8] sm:$0xff]  }
 0x115   :  { %7427 = vmatpush3.bf16.msra.mxu1 %v8145_v50  ;;  %v8177_v50 = vld [vmem:[%s10345_s1 + $0x998] sm:$0xff]  }
 0x116   :  { %v7014_v20 = vpop.f32.mrb[8].mxu0  ;;  %7428 = vmatprep.subr.bf16.mxu1 %v8147_v55  ;;  %v8179_v55 = vld [vmem:[%s10345_s1 + $0x9e0] sm:$0xff]  }
 0x117   :  { %v7042_v22 = vpop.f32.mrb[8].mxu1  ;;  %v7015_v26 = vpop.f32.mrb[9].mxu0 }
 0x118   :  { %v7016_v28 = vadd.f32 %v7015_v26, %v7014_v20  ;;  %v7043_v29 = vpop.f32.mrb[9].mxu1  ;;  %v7017_v32 = vpop.f32.mrb[10].mxu0  ;;  %v8161_v20 = vld [vmem:[%s10345_s1 + $0x980] sm:$0xff]   ;;  %v6399_v26 = vcombine.high %v95_v25, %v95_v25 }
 0x119   :  { %v7044_v31 = vadd.f32 %v7043_v29, %v7042_v22  ;;  %v7045_v35 = vpop.f32.mrb[10].mxu1  ;;  %v7018_v37 = vpop.f32.mrb[11].mxu0  ;;  %7429 = vmatpush3.bf16.msra.mxu1 %v8149_v61  ;;  %v8163_v22 = vld [vmem:[%s10345_s1 + $0x9c8] sm:$0xff]   ;;  %v8169_v29 = vld [vmem:[%s10345_s1 + $0x9d0] sm:$0xff]  }
 0x11a   :  { %v4889_v34 = vadd.f32 %v7016_v28, %v9301_v39  ;;  %v7019_v42 = vadd.f32 %v7018_v37, %v7017_v32  ;;  %v7046_v43 = vpop.f32.mrb[11].mxu1  ;;  %v8142_v39 = vld [vmem:[%s10345_s1 + $0x860] sm:$0xff]   ;;  %7430 = vmatprep.subr.bf16.mxu1 %v8151_v2  ;;  %v8168_v28 = vld [vmem:[%s10345_s1 + $0x950] sm:$0xff]   ;;  %v8183_v2 = vld [vmem:[%s10345_s1 + $0x9e8] sm:$0xff]  }
 0x11b   :  { %v7047_v44 = vadd.f32 %v7046_v43, %v7045_v35  ;;  %7398 = vmatprep.subr.bf16.mxu0 %v8142_v39  ;;  %v8172_v37 = vld [vmem:[%s10345_s1 + $0x990] sm:$0xff]   ;;  %v8174_v43 = vld [vmem:[%s10345_s1 + $0x958] sm:$0xff]  }
 0x11c   :  { %v9402_v40 = vadd.f32 %v7044_v31, %v4889_v34  ;;  %v4892_v46 = vadd.f32 %v7019_v42, %v9306_v41  ;;  %7399 = vmatpush3.bf16.msra.mxu0 %v8144_v48  ;;  %v8146_v41 = vld [vmem:[%s10345_s1 + $0x868] sm:$0xff]   ;;  %v8171_v34 = vld [vmem:[%s10345_s1 + $0x910] sm:$0xff]   ;;  %v8176_v48 = vld [vmem:[%s10345_s1 + $0x918] sm:$0xff]  }
 0x11d   :  { %7400 = vmatprep.subr.bf16.mxu0 %v8146_v41  ;;  %7431 = vmatpush3.bf16.msra.mxu1 %v8153_v4  ;;  %v96_v31 = vld [vmem:[%s10346_s0 + $0x288] sm:$0xff] }
 0x11e   :  { %v7020_v47 = vpop.f32.mrb[12].mxu0  ;;  %v9417_v51 = vadd.f32 %v7047_v44, %v4892_v46  ;;  %7432 = vmatprep.subr.bf16.mxu1 %v8155_v6  ;;  %v6401_v33 = vcombine.high %v96_v31, %v96_v31  ;;  %v6400_v35 = vcombine.low %v96_v31, %v96_v31  ;;  %v8198_v31 = vld [vmem:[%s10345_s1 + $0xa48] sm:$0xff]  }
 0x11f   :  { %v7021_v49 = vpop.f32.mrb[13].mxu0  ;;  %v7048_v54 = vpop.f32.mrb[12].mxu1 }
 0x120   :  { %v7022_v52 = vadd.f32 %v7021_v49, %v7020_v47  ;;  %v7023_v53 = vpop.f32.mrb[14].mxu0  ;;  %v7049_v57 = vpop.f32.mrb[13].mxu1  ;;  %7401 = vmatpush3.bf16.msra.mxu0 %v8148_v58  ;;  %v8180_v58 = vld [vmem:[%s10345_s1 + $0x920] sm:$0xff]  }
 0x121   :  { %v7050_v59 = vadd.f32 %v7049_v57, %v7048_v54  ;;  %v7024_v60 = vpop.f32.mrb[15].mxu0  ;;  %v7051_v62 = vpop.f32.mrb[14].mxu1  ;;  %7402 = vmatprep.subr.bf16.mxu0 %v8150_v63  ;;  %7433 = vmatpush3.bf16.msra.mxu1 %v8157_v8  ;;  %v8185_v8 = vld [vmem:[%s10345_s1 + $0x9a8] sm:$0xff]  }
 0x122   :  { %v4897_v56 = vadd.f32 %v7022_v52, %v4849_v13  ;;  %v7052_v1 = vpop.f32.mrb[15].mxu1  ;;  %v32_v13 = vld [vmem:[%s10346_s0 + $0x88] sm:$0xff]  ;;  %7474 = vmatprep.subr.bf16.mxu1 %v8159_v18  ;;  %v8181_v60 = vld [vmem:[%s10345_s1 + $0x9a0] sm:$0xff]   ;;  %v8193_v18 = vld [vmem:[%s10345_s1 + $0x9b8] sm:$0xff]  }
 0x123   :  { %v6336_v15 = vcombine.low %v32_v13, %v64_v14  ;;  %v6337_v16 = vcombine.high %v32_v13, %v64_v14  ;;  %v8188_v13 = vld [vmem:[%s10345_s1 + $0x930] sm:$0xff]  }
 0x124   :  { %v9434_v0 = vadd.f32 %v7050_v59, %v4897_v56  ;;  %7403 = vmatpush3.bf16.msra.mxu0 %v8152_v3  ;;  %v8189_v14 = vld [vmem:[%s10345_s1 + $0x9b0] sm:$0xff]  }
 0x125   :  { %7404 = vmatprep.subr.bf16.mxu0 %v8154_v5  ;;  %5606 = vmatprep.mubr.bf16.mxu1 %v6337_v16  ;;  %v8184_v5 = vld [vmem:[%s10345_s1 + $0x928] sm:$0xff]   ;;  %v8191_v16 = vld [vmem:[%s10345_s1 + $0x9f8] sm:$0xff]  }
 0x126   :  { %5607 = vmatmul.mubr.bf16.vlgmr.msra.gmra.mrb[64].mxu1 %v6336_v15  ;;  %v8190_v15 = vld [vmem:[%s10345_s1 + $0x978] sm:$0xff]  }
 0x127   :  { %7475 = vmatpush3.bf16.msra.mxu1 %v8161_v20  ;;  %5614 = vmatprep.mubr.bf16.mxu1 %v6401_v33  ;;  %v65_v20 = vld [vmem:[%s10346_s0 + $0x190] sm:$0xff]  ;;  %v8200_v33 = vld [vmem:[%s10345_s1 + $0xa08] sm:$0xff]  }
 0x128   :  { %7405 = vmatpush3.bf16.msra.mxu0 %v8156_v7  ;;  %7476 = vmatprep.subr.bf16.mxu1 %v8163_v22 }
 0x129   :  { %7446 = vmatprep.subr.bf16.mxu0 %v8158_v17  ;;  %v8192_v17 = vld [vmem:[%s10345_s1 + $0x938] sm:$0xff]  }
 0x12b   :  { %5559 = vmatmul.mubr.bf16.vlgmr.msra.gmra.mrb[64].mxu0 %v6334_v11  ;;  %7477 = vmatpush3.bf16.msra.mxu1 %v8165_v24  ;;  %v66_v24 = vld [vmem:[%s10346_s0 + $0x198] sm:$0xff] }
 0x12c   :  { %7447 = vmatpush3.bf16.msra.mxu0 %v8160_v19  ;;  %5566 = vmatprep.mubr.bf16.mxu0 %v6399_v26  ;;  %v33_v19 = vld [vmem:[%s10346_s0 + $0x90] sm:$0xff] }
 0x12d   :  { %7448 = vmatprep.subr.bf16.mxu0 %v8162_v21  ;;  %7478 = vmatprep.subr.bf16.mxu1 %v8169_v29  ;;  %v6338_v21 = vcombine.low %v33_v19, %v65_v20  ;;  %v6339_v22 = vcombine.high %v33_v19, %v65_v20  ;;  %v8196_v29 = vld [vmem:[%s10345_s1 + $0xa00] sm:$0xff]   ;;  %v8222_v20 = vld [vmem:[%s10345_s1 + $0xa70] sm:$0xff]  }
 0x12e   :  { %5615 = vmatmul.mubr.bf16.gmra.mrb[68].mxu1 %v6400_v35  ;;  %v97_v35 = vld [vmem:[%s10346_s0 + $0x290] sm:$0xff] }
 0x12f   :  { %7479 = vmatpush3.bf16.msra.mxu1 %v8172_v37  ;;  %v6402_v37 = vcombine.low %v97_v35, %v97_v35 }
 0x130   :  { %7449 = vmatpush3.bf16.msra.mxu0 %v8164_v23  ;;  %7480 = vmatprep.subr.bf16.mxu1 %v8175_v45  ;;  %v34_v23 = vld [vmem:[%s10346_s0 + $0x98] sm:$0xff] }
 0x131   :  { %7450 = vmatprep.subr.bf16.mxu0 %v8168_v28  ;;  %v6340_v25 = vcombine.low %v34_v23, %v66_v24  ;;  %v6341_v26 = vcombine.high %v34_v23, %v66_v24  ;;  %v8195_v28 = vld [vmem:[%s10345_s1 + $0xac0] sm:$0xff]   ;;  %v8224_v23 = vld [vmem:[%s10345_s1 + $0xa30] sm:$0xff]  }
 0x132   :  { %v8225_v24 = vld [vmem:[%s10345_s1 + $0xab0] sm:$0xff]  }
 0x133   :  { %5567 = vmatmul.mubr.bf16.gmra.mrb[68].mxu0 %v6398_v27  ;;  %7481 = vmatpush3.bf16.msra.mxu1 %v8177_v50  ;;  %v8194_v27 = vld [vmem:[%s10345_s1 + $0xa40] sm:$0xff]  }
 0x134   :  { %7451 = vmatpush3.bf16.msra.mxu0 %v8171_v34  ;;  %7482 = vmatprep.subr.bf16.mxu1 %v8179_v55  ;;  %v8201_v34 = vld [vmem:[%s10345_s1 + $0xa88] sm:$0xff]   ;;  %v8211_v55 = vld [vmem:[%s10345_s1 + $0xad8] sm:$0xff]  }
 0x135   :  { %7452 = vmatprep.subr.bf16.mxu0 %v8174_v43  ;;  %5654 = vmatprep.mubr.bf16.mxu0 %v6339_v22  ;;  %v8223_v22 = vld [vmem:[%s10345_s1 + $0xaf0] sm:$0xff]  }
 0x136   :  { %v7070_v30 = vpop.f32.mrb[16].mxu0  ;;  %5702 = vmatprep.mubr.bf16.mxu1 %v6341_v26  ;;  %v8227_v26 = vld [vmem:[%s10345_s1 + $0xaf8] sm:$0xff]  }
 0x137   :  { %v7098_v32 = vpop.f32.mrb[16].mxu1  ;;  %v7071_v36 = vpop.f32.mrb[17].mxu0  ;;  %7483 = vmatpush3.bf16.msra.mxu1 %v8181_v60  ;;  %v8213_v60 = vld [vmem:[%s10345_s1 + $0xa98] sm:$0xff]  }
 0x138   :  { %v7072_v38 = vadd.f32 %v7071_v36, %v7070_v30  ;;  %v7099_v42 = vpop.f32.mrb[17].mxu1  ;;  %v7073_v44 = vpop.f32.mrb[18].mxu0  ;;  %7453 = vmatpush3.bf16.msra.mxu0 %v8176_v48  ;;  %7484 = vmatprep.subr.bf16.mxu1 %v8183_v2  ;;  %v8197_v30 = vld [vmem:[%s10345_s1 + $0xa80] sm:$0xff]   ;;  %v6403_v36 = vcombine.high %v97_v35, %v97_v35 }
 0x139   :  { %v7100_v39 = vadd.f32 %v7099_v42, %v7098_v32  ;;  %v7101_v47 = vpop.f32.mrb[18].mxu1  ;;  %v7074_v49 = vpop.f32.mrb[19].mxu0  ;;  %v8199_v32 = vld [vmem:[%s10345_s1 + $0xac8] sm:$0xff]   ;;  %v8205_v42 = vld [vmem:[%s10345_s1 + $0xad0] sm:$0xff]   ;;  %v8215_v2 = vld [vmem:[%s10345_s1 + $0xae0] sm:$0xff]  }
 0x13a   :  { %v4985_v46 = vadd.f32 %v7072_v38, %v9402_v40  ;;  %v7075_v53 = vadd.f32 %v7074_v49, %v7073_v44  ;;  %v7102_v41 = vpop.f32.mrb[19].mxu1  ;;  %v8178_v40 = vld [vmem:[%s10345_s1 + $0x960] sm:$0xff]   ;;  %v8204_v38 = vld [vmem:[%s10345_s1 + $0xa50] sm:$0xff]  }
 0x13b   :  { %v7103_v54 = vadd.f32 %v7102_v41, %v7101_v47  ;;  %7454 = vmatprep.subr.bf16.mxu0 %v8178_v40  ;;  %7485 = vmatpush3.bf16.msra.mxu1 %v8185_v8  ;;  %v8208_v49 = vld [vmem:[%s10345_s1 + $0xa90] sm:$0xff]   ;;  %v8210_v41 = vld [vmem:[%s10345_s1 + $0xa58] sm:$0xff]  }
 0x13c   :  { %v9524_v52 = vadd.f32 %v7100_v39, %v4985_v46  ;;  %v4988_v56 = vadd.f32 %v7075_v53, %v9417_v51  ;;  %7455 = vmatpush3.bf16.msra.mxu0 %v8180_v58  ;;  %v8182_v51 = vld [vmem:[%s10345_s1 + $0x968] sm:$0xff]   ;;  %7486 = vmatprep.subr.bf16.mxu1 %v8187_v12  ;;  %v98_v39 = vld [vmem:[%s10346_s0 + $0x298] sm:$0xff]  ;;  %v8207_v46 = vld [vmem:[%s10345_s1 + $0xa10] sm:$0xff]  }
 0x13d   :  { %7456 = vmatprep.subr.bf16.mxu0 %v8182_v51  ;;  %v6405_v45 = vcombine.high %v98_v39, %v98_v39  ;;  %v6404_v47 = vcombine.low %v98_v39, %v98_v39  ;;  %v8212_v58 = vld [vmem:[%s10345_s1 + $0xa18] sm:$0xff]   ;;  %v8219_v12 = vld [vmem:[%s10345_s1 + $0xae8] sm:$0xff]  }
 0x13e   :  { %v7076_v57 = vpop.f32.mrb[20].mxu0  ;;  %v9539_v61 = vadd.f32 %v7103_v54, %v4988_v56  ;;  %v8234_v39 = vld [vmem:[%s10345_s1 + $0xb48] sm:$0xff]  }
 0x13f   :  { %v7077_v59 = vpop.f32.mrb[21].mxu0  ;;  %v7104_v1 = vpop.f32.mrb[20].mxu1  ;;  %7487 = vmatpush3.bf16.msra.mxu1 %v8189_v14 }
 0x140   :  { %v7078_v62 = vadd.f32 %v7077_v59, %v7076_v57  ;;  %v7079_v63 = vpop.f32.mrb[22].mxu0  ;;  %v7105_v4 = vpop.f32.mrb[21].mxu1  ;;  %7457 = vmatpush3.bf16.msra.mxu0 %v8184_v5  ;;  %7488 = vmatprep.subr.bf16.mxu1 %v8191_v16  ;;  %v8216_v5 = vld [vmem:[%s10345_s1 + $0xa20] sm:$0xff]  }
 0x141   :  { %v7106_v6 = vadd.f32 %v7105_v4, %v7104_v1  ;;  %v7080_v7 = vpop.f32.mrb[23].mxu0  ;;  %v7107_v9 = vpop.f32.mrb[22].mxu1  ;;  %7458 = vmatprep.subr.bf16.mxu0 %v8186_v10 }
 0x142   :  { %v4993_v3 = vadd.f32 %v7078_v62, %v9434_v0  ;;  %v7108_v11 = vpop.f32.mrb[23].mxu1  ;;  %v8217_v7 = vld [vmem:[%s10345_s1 + $0xaa0] sm:$0xff]  }
 0x143   :  { %7489 = vmatpush3.bf16.msra.mxu1 %v8193_v18  ;;  %v8221_v18 = vld [vmem:[%s10345_s1 + $0xaa8] sm:$0xff]  }
 0x144   :  { %v9557_v0 = vadd.f32 %v7106_v6, %v4993_v3  ;;  %7459 = vmatpush3.bf16.msra.mxu0 %v8188_v13  ;;  %7530 = vmatprep.subr.bf16.mxu1 %v8195_v28  ;;  %v8229_v28 = vld [vmem:[%s10345_s1 + $0xab8] sm:$0xff]  }
 0x145   :  { %7460 = vmatprep.subr.bf16.mxu0 %v8190_v15  ;;  %v8220_v15 = vld [vmem:[%s10345_s1 + $0xa28] sm:$0xff]  }
 0x146   :  { %5703 = vmatmul.mubr.bf16.vlgmr.msra.gmra.mrb[72].mxu1 %v6340_v25  ;;  %v8226_v25 = vld [vmem:[%s10345_s1 + $0xa78] sm:$0xff]  }
 0x147   :  { %7531 = vmatpush3.bf16.msra.mxu1 %v8197_v30  ;;  %5710 = vmatprep.mubr.bf16.mxu1 %v6405_v45  ;;  %v67_v30 = vld [vmem:[%s10346_s0 + $0x1a0] sm:$0xff]  ;;  %v8236_v45 = vld [vmem:[%s10345_s1 + $0xb08] sm:$0xff]  }
 0x148   :  { %7461 = vmatpush3.bf16.msra.mxu0 %v8192_v17  ;;  %7532 = vmatprep.subr.bf16.mxu1 %v8199_v32 }
 0x149   :  { %7502 = vmatprep.subr.bf16.mxu0 %v8194_v27  ;;  %v8228_v27 = vld [vmem:[%s10345_s1 + $0xa38] sm:$0xff]  }
 0x14b   :  { %5655 = vmatmul.mubr.bf16.vlgmr.msra.gmra.mrb[72].mxu0 %v6338_v21  ;;  %7533 = vmatpush3.bf16.msra.mxu1 %v8201_v34  ;;  %v68_v34 = vld [vmem:[%s10346_s0 + $0x1a8] sm:$0xff] }
 0x14c   :  { %7503 = vmatpush3.bf16.msra.mxu0 %v8196_v29  ;;  %5662 = vmatprep.mubr.bf16.mxu0 %v6403_v36  ;;  %v35_v29 = vld [vmem:[%s10346_s0 + $0xa0] sm:$0xff] }
 0x14d   :  { %7504 = vmatprep.subr.bf16.mxu0 %v8198_v31  ;;  %7534 = vmatprep.subr.bf16.mxu1 %v8205_v42  ;;  %v6342_v31 = vcombine.low %v35_v29, %v67_v30  ;;  %v6343_v32 = vcombine.high %v35_v29, %v67_v30  ;;  %v8232_v42 = vld [vmem:[%s10345_s1 + $0xb00] sm:$0xff]   ;;  %v8258_v30 = vld [vmem:[%s10345_s1 + $0xb70] sm:$0xff]  }
 0x14e   :  { %5711 = vmatmul.mubr.bf16.gmra.mrb[76].mxu1 %v6404_v47  ;;  %v99_v47 = vld [vmem:[%s10346_s0 + $0x2a0] sm:$0xff] }
 0x14f   :  { %7535 = vmatpush3.bf16.msra.mxu1 %v8208_v49  ;;  %v6406_v49 = vcombine.low %v99_v47, %v99_v47 }
 0x150   :  { %7505 = vmatpush3.bf16.msra.mxu0 %v8200_v33  ;;  %7536 = vmatprep.subr.bf16.mxu1 %v8211_v55  ;;  %v36_v33 = vld [vmem:[%s10346_s0 + $0xa8] sm:$0xff] }
 0x151   :  { %7506 = vmatprep.subr.bf16.mxu0 %v8204_v38  ;;  %v6344_v35 = vcombine.low %v36_v33, %v68_v34  ;;  %v6345_v36 = vcombine.high %v36_v33, %v68_v34  ;;  %v8231_v38 = vld [vmem:[%s10345_s1 + $0xbc0] sm:$0xff]   ;;  %v8260_v33 = vld [vmem:[%s10345_s1 + $0xb30] sm:$0xff]  }
 0x152   :  { %v8261_v34 = vld [vmem:[%s10345_s1 + $0xbb0] sm:$0xff]  }
 0x153   :  { %5663 = vmatmul.mubr.bf16.gmra.mrb[76].mxu0 %v6402_v37  ;;  %7537 = vmatpush3.bf16.msra.mxu1 %v8213_v60  ;;  %v8230_v37 = vld [vmem:[%s10345_s1 + $0xb40] sm:$0xff]  }
 0x154   :  { %7507 = vmatpush3.bf16.msra.mxu0 %v8207_v46  ;;  %7538 = vmatprep.subr.bf16.mxu1 %v8215_v2  ;;  %v8237_v46 = vld [vmem:[%s10345_s1 + $0xb88] sm:$0xff]   ;;  %v8247_v2 = vld [vmem:[%s10345_s1 + $0xbd8] sm:$0xff]  }
 0x155   :  { %7508 = vmatprep.subr.bf16.mxu0 %v8210_v41  ;;  %5750 = vmatprep.mubr.bf16.mxu0 %v6343_v32  ;;  %v8259_v32 = vld [vmem:[%s10345_s1 + $0xbf0] sm:$0xff]  }
 0x156   :  { %v7126_v43 = vpop.f32.mrb[24].mxu0  ;;  %5798 = vmatprep.mubr.bf16.mxu1 %v6345_v36  ;;  %v8263_v36 = vld [vmem:[%s10345_s1 + $0xbf8] sm:$0xff]  }
 0x157   :  { %v7154_v44 = vpop.f32.mrb[24].mxu1  ;;  %v7127_v48 = vpop.f32.mrb[25].mxu0  ;;  %7539 = vmatpush3.bf16.msra.mxu1 %v8217_v7  ;;  %v8249_v7 = vld [vmem:[%s10345_s1 + $0xb98] sm:$0xff]  }
 0x158   :  { %v7128_v50 = vadd.f32 %v7127_v48, %v7126_v43  ;;  %v7155_v53 = vpop.f32.mrb[25].mxu1  ;;  %v7129_v54 = vpop.f32.mrb[26].mxu0  ;;  %7509 = vmatpush3.bf16.msra.mxu0 %v8212_v58  ;;  %7540 = vmatprep.subr.bf16.mxu1 %v8219_v12  ;;  %v8233_v43 = vld [vmem:[%s10345_s1 + $0xb80] sm:$0xff]   ;;  %v6407_v48 = vcombine.high %v99_v47, %v99_v47 }
 0x159   :  { %v7156_v40 = vadd.f32 %v7155_v53, %v7154_v44  ;;  %v7157_v57 = vpop.f32.mrb[26].mxu1  ;;  %v7130_v59 = vpop.f32.mrb[27].mxu0  ;;  %v8235_v44 = vld [vmem:[%s10345_s1 + $0xbc8] sm:$0xff]   ;;  %v8241_v53 = vld [vmem:[%s10345_s1 + $0xbd0] sm:$0xff]   ;;  %v8251_v12 = vld [vmem:[%s10345_s1 + $0xbe0] sm:$0xff]  }
 0x15a   :  { %v5081_v56 = vadd.f32 %v7128_v50, %v9524_v52  ;;  %v7131_v63 = vadd.f32 %v7130_v59, %v7129_v54  ;;  %v7158_v51 = vpop.f32.mrb[27].mxu1  ;;  %v8214_v52 = vld [vmem:[%s10345_s1 + $0xa60] sm:$0xff]   ;;  %v8240_v50 = vld [vmem:[%s10345_s1 + $0xb50] sm:$0xff]  }
 0x15b   :  { %v7159_v1 = vadd.f32 %v7158_v51, %v7157_v57  ;;  %7510 = vmatprep.subr.bf16.mxu0 %v8214_v52  ;;  %7541 = vmatpush3.bf16.msra.mxu1 %v8221_v18  ;;  %v8244_v59 = vld [vmem:[%s10345_s1 + $0xb90] sm:$0xff]   ;;  %v8246_v51 = vld [vmem:[%s10345_s1 + $0xb58] sm:$0xff]  }
 0x15c   :  { %v9647_v62 = vadd.f32 %v7156_v40, %v5081_v56  ;;  %v5084_v3 = vadd.f32 %v7131_v63, %v9539_v61  ;;  %7511 = vmatpush3.bf16.msra.mxu0 %v8216_v5  ;;  %v8218_v61 = vld [vmem:[%s10345_s1 + $0xa68] sm:$0xff]   ;;  %7542 = vmatprep.subr.bf16.mxu1 %v8223_v22  ;;  %v8243_v56 = vld [vmem:[%s10345_s1 + $0xb10] sm:$0xff]   ;;  %v8248_v5 = vld [vmem:[%s10345_s1 + $0xb18] sm:$0xff]  }
 0x15d   :  { %7512 = vmatprep.subr.bf16.mxu0 %v8218_v61  ;;  %v100_v40 = vld [vmem:[%s10346_s0 + $0x2a8] sm:$0xff] }
 0x15e   :  { %v7132_v4 = vpop.f32.mrb[28].mxu0  ;;  %v9662_v8 = vadd.f32 %v7159_v1, %v5084_v3  ;;  %v6409_v55 = vcombine.high %v100_v40, %v100_v40  ;;  %v6408_v57 = vcombine.low %v100_v40, %v100_v40  ;;  %v8255_v22 = vld [vmem:[%s10345_s1 + $0xbe8] sm:$0xff]  }
 0x15f   :  { %v7133_v6 = vpop.f32.mrb[29].mxu0  ;;  %v7160_v11 = vpop.f32.mrb[28].mxu1  ;;  %7543 = vmatpush3.bf16.msra.mxu1 %v8225_v24  ;;  %v8270_v40 = vld [vmem:[%s10345_s1 + $0xc48] sm:$0xff]  }
 0x160   :  { %v7134_v9 = vadd.f32 %v7133_v6, %v7132_v4  ;;  %v7135_v10 = vpop.f32.mrb[30].mxu0  ;;  %v7161_v14 = vpop.f32.mrb[29].mxu1  ;;  %7513 = vmatpush3.bf16.msra.mxu0 %v8220_v15  ;;  %7544 = vmatprep.subr.bf16.mxu1 %v8227_v26  ;;  %v8252_v15 = vld [vmem:[%s10345_s1 + $0xb20] sm:$0xff]  }
 0x161   :  { %v7162_v16 = vadd.f32 %v7161_v14, %v7160_v11  ;;  %v7136_v17 = vpop.f32.mrb[31].mxu0  ;;  %v7163_v19 = vpop.f32.mrb[30].mxu1  ;;  %7514 = vmatprep.subr.bf16.mxu0 %v8222_v20 }
 0x162   :  { %v5089_v13 = vadd.f32 %v7134_v9, %v9557_v0  ;;  %v7164_v21 = vpop.f32.mrb[31].mxu1  ;;  %v8253_v17 = vld [vmem:[%s10345_s1 + $0xba0] sm:$0xff]  }
 0x163   :  { %7545 = vmatpush3.bf16.msra.mxu1 %v8229_v28  ;;  %v8257_v28 = vld [vmem:[%s10345_s1 + $0xba8] sm:$0xff]  }
 0x164   :  { %v9680_v0 = vadd.f32 %v7162_v16, %v5089_v13  ;;  %7515 = vmatpush3.bf16.msra.mxu0 %v8224_v23  ;;  %7586 = vmatprep.subr.bf16.mxu1 %v8231_v38  ;;  %v8265_v38 = vld [vmem:[%s10345_s1 + $0xbb8] sm:$0xff]  }
 0x165   :  { %7516 = vmatprep.subr.bf16.mxu0 %v8226_v25  ;;  %v8256_v25 = vld [vmem:[%s10345_s1 + $0xb28] sm:$0xff]  }
 0x166   :  { %5799 = vmatmul.mubr.bf16.vlgmr.msra.gmra.mrb[80].mxu1 %v6344_v35  ;;  %v8262_v35 = vld [vmem:[%s10345_s1 + $0xb78] sm:$0xff]  }
 0x167   :  { %7587 = vmatpush3.bf16.msra.mxu1 %v8233_v43  ;;  %5806 = vmatprep.mubr.bf16.mxu1 %v6409_v55  ;;  %v69_v43 = vld [vmem:[%s10346_s0 + $0x1b0] sm:$0xff]  ;;  %v8272_v55 = vld [vmem:[%s10345_s1 + $0xc08] sm:$0xff]  }
 0x168   :  { %7517 = vmatpush3.bf16.msra.mxu0 %v8228_v27  ;;  %7588 = vmatprep.subr.bf16.mxu1 %v8235_v44 }
 0x169   :  { %7558 = vmatprep.subr.bf16.mxu0 %v8230_v37  ;;  %v8264_v37 = vld [vmem:[%s10345_s1 + $0xb38] sm:$0xff]  }
 0x16b   :  { %5751 = vmatmul.mubr.bf16.vlgmr.msra.gmra.mrb[80].mxu0 %v6342_v31  ;;  %7589 = vmatpush3.bf16.msra.mxu1 %v8237_v46  ;;  %v70_v46 = vld [vmem:[%s10346_s0 + $0x1b8] sm:$0xff] }
 0x16c   :  { %7559 = vmatpush3.bf16.msra.mxu0 %v8232_v42  ;;  %5758 = vmatprep.mubr.bf16.mxu0 %v6407_v48  ;;  %v37_v42 = vld [vmem:[%s10346_s0 + $0xb0] sm:$0xff] }
 0x16d   :  { %7560 = vmatprep.subr.bf16.mxu0 %v8234_v39  ;;  %7590 = vmatprep.subr.bf16.mxu1 %v8241_v53  ;;  %v6346_v39 = vcombine.low %v37_v42, %v69_v43  ;;  %v6347_v44 = vcombine.high %v37_v42, %v69_v43  ;;  %v8268_v53 = vld [vmem:[%s10345_s1 + $0xc00] sm:$0xff]   ;;  %v8294_v43 = vld [vmem:[%s10345_s1 + $0xc70] sm:$0xff]  }
 0x16e   :  { %5807 = vmatmul.mubr.bf16.gmra.mrb[84].mxu1 %v6408_v57  ;;  %v101_v57 = vld [vmem:[%s10346_s0 + $0x2b0] sm:$0xff] }
 0x16f   :  { %7591 = vmatpush3.bf16.msra.mxu1 %v8244_v59  ;;  %v6410_v59 = vcombine.low %v101_v57, %v101_v57 }
 0x170   :  { %7561 = vmatpush3.bf16.msra.mxu0 %v8236_v45  ;;  %7592 = vmatprep.subr.bf16.mxu1 %v8247_v2  ;;  %v38_v45 = vld [vmem:[%s10346_s0 + $0xb8] sm:$0xff] }
 0x171   :  { %7562 = vmatprep.subr.bf16.mxu0 %v8240_v50  ;;  %v6348_v47 = vcombine.low %v38_v45, %v70_v46  ;;  %v6349_v48 = vcombine.high %v38_v45, %v70_v46  ;;  %v8267_v50 = vld [vmem:[%s10345_s1 + $0xcc0] sm:$0xff]   ;;  %v8296_v45 = vld [vmem:[%s10345_s1 + $0xc30] sm:$0xff]  }
 0x172   :  { %v8297_v46 = vld [vmem:[%s10345_s1 + $0xcb0] sm:$0xff]  }
 0x173   :  { %5759 = vmatmul.mubr.bf16.gmra.mrb[84].mxu0 %v6406_v49  ;;  %7593 = vmatpush3.bf16.msra.mxu1 %v8249_v7  ;;  %v8266_v49 = vld [vmem:[%s10345_s1 + $0xc40] sm:$0xff]  }
 0x174   :  { %7563 = vmatpush3.bf16.msra.mxu0 %v8243_v56  ;;  %7594 = vmatprep.subr.bf16.mxu1 %v8251_v12  ;;  %v8273_v56 = vld [vmem:[%s10345_s1 + $0xc88] sm:$0xff]   ;;  %v8283_v12 = vld [vmem:[%s10345_s1 + $0xcd8] sm:$0xff]  }
 0x175   :  { %7564 = vmatprep.subr.bf16.mxu0 %v8246_v51  ;;  %5846 = vmatprep.mubr.bf16.mxu0 %v6347_v44  ;;  %v8295_v44 = vld [vmem:[%s10345_s1 + $0xcf0] sm:$0xff]  }
 0x176   :  { %v7182_v41 = vpop.f32.mrb[32].mxu0  ;;  %5894 = vmatprep.mubr.bf16.mxu1 %v6349_v48  ;;  %v8299_v48 = vld [vmem:[%s10345_s1 + $0xcf8] sm:$0xff]  }
 0x177   :  { %v7210_v54 = vpop.f32.mrb[32].mxu1  ;;  %v7183_v58 = vpop.f32.mrb[33].mxu0  ;;  %7595 = vmatpush3.bf16.msra.mxu1 %v8253_v17  ;;  %v8285_v17 = vld [vmem:[%s10345_s1 + $0xc98] sm:$0xff]  }
 0x178   :  { %v7184_v60 = vadd.f32 %v7183_v58, %v7182_v41  ;;  %v7211_v63 = vpop.f32.mrb[33].mxu1  ;;  %v7185_v1 = vpop.f32.mrb[34].mxu0  ;;  %7565 = vmatpush3.bf16.msra.mxu0 %v8248_v5  ;;  %7596 = vmatprep.subr.bf16.mxu1 %v8255_v22  ;;  %v8269_v41 = vld [vmem:[%s10345_s1 + $0xc80] sm:$0xff]   ;;  %v6411_v58 = vcombine.high %v101_v57, %v101_v57 }
 0x179   :  { %v7212_v52 = vadd.f32 %v7211_v63, %v7210_v54  ;;  %v7213_v4 = vpop.f32.mrb[34].mxu1  ;;  %v7186_v6 = vpop.f32.mrb[35].mxu0  ;;  %v8271_v54 = vld [vmem:[%s10345_s1 + $0xcc8] sm:$0xff]   ;;  %v8277_v63 = vld [vmem:[%s10345_s1 + $0xcd0] sm:$0xff]   ;;  %v8287_v22 = vld [vmem:[%s10345_s1 + $0xce0] sm:$0xff]  }
 0x17a   :  { %v5177_v3 = vadd.f32 %v7184_v60, %v9647_v62  ;;  %v7187_v10 = vadd.f32 %v7186_v6, %v7185_v1  ;;  %v7214_v61 = vpop.f32.mrb[35].mxu1  ;;  %v8250_v62 = vld [vmem:[%s10345_s1 + $0xb60] sm:$0xff]   ;;  %v8276_v60 = vld [vmem:[%s10345_s1 + $0xc50] sm:$0xff]  }
 0x17b   :  { %v7215_v11 = vadd.f32 %v7214_v61, %v7213_v4  ;;  %7566 = vmatprep.subr.bf16.mxu0 %v8250_v62  ;;  %7597 = vmatpush3.bf16.msra.mxu1 %v8257_v28  ;;  %v8280_v6 = vld [vmem:[%s10345_s1 + $0xc90] sm:$0xff]   ;;  %v8282_v61 = vld [vmem:[%s10345_s1 + $0xc58] sm:$0xff]  }
 0x17c   :  { %v9770_v9 = vadd.f32 %v7212_v52, %v5177_v3  ;;  %v5180_v13 = vadd.f32 %v7187_v10, %v9662_v8  ;;  %7567 = vmatpush3.bf16.msra.mxu0 %v8252_v15  ;;  %v8254_v8 = vld [vmem:[%s10345_s1 + $0xb68] sm:$0xff]   ;;  %7598 = vmatprep.subr.bf16.mxu1 %v8259_v32  ;;  %v102_v52 = vld [vmem:[%s10346_s0 + $0x2b8] sm:$0xff]  ;;  %v8279_v3 = vld [vmem:[%s10345_s1 + $0xc10] sm:$0xff]  }
 0x17d   :  { %7568 = vmatprep.subr.bf16.mxu0 %v8254_v8  ;;  %v6413_v2 = vcombine.high %v102_v52, %v102_v52  ;;  %v6412_v4 = vcombine.low %v102_v52, %v102_v52  ;;  %v8284_v15 = vld [vmem:[%s10345_s1 + $0xc18] sm:$0xff]   ;;  %v8291_v32 = vld [vmem:[%s10345_s1 + $0xce8] sm:$0xff]  }
 0x17e   :  { %v7188_v14 = vpop.f32.mrb[36].mxu0  ;;  %v9785_v18 = vadd.f32 %v7215_v11, %v5180_v13  ;;  %v8306_v52 = vld [vmem:[%s10345_s1 + $0xd48] sm:$0xff]  }
 0x17f   :  { %v7189_v16 = vpop.f32.mrb[37].mxu0  ;;  %v7216_v21 = vpop.f32.mrb[36].mxu1  ;;  %7599 = vmatpush3.bf16.msra.mxu1 %v8261_v34 }
 0x180   :  { %v7190_v19 = vadd.f32 %v7189_v16, %v7188_v14  ;;  %v7191_v20 = vpop.f32.mrb[38].mxu0  ;;  %v7217_v24 = vpop.f32.mrb[37].mxu1  ;;  %7569 = vmatpush3.bf16.msra.mxu0 %v8256_v25  ;;  %7600 = vmatprep.subr.bf16.mxu1 %v8263_v36  ;;  %v8288_v25 = vld [vmem:[%s10345_s1 + $0xc20] sm:$0xff]  }
 0x181   :  { %v7218_v26 = vadd.f32 %v7217_v24, %v7216_v21  ;;  %v7192_v27 = vpop.f32.mrb[39].mxu0  ;;  %v7219_v29 = vpop.f32.mrb[38].mxu1  ;;  %7570 = vmatprep.subr.bf16.mxu0 %v8258_v30 }
 0x182   :  { %v5185_v23 = vadd.f32 %v7190_v19, %v9680_v0  ;;  %v7220_v31 = vpop.f32.mrb[39].mxu1  ;;  %v8289_v27 = vld [vmem:[%s10345_s1 + $0xca0] sm:$0xff]  }
 0x183   :  { %7601 = vmatpush3.bf16.msra.mxu1 %v8265_v38  ;;  %v8293_v38 = vld [vmem:[%s10345_s1 + $0xca8] sm:$0xff]  }
 0x184   :  { %v9803_v0 = vadd.f32 %v7218_v26, %v5185_v23  ;;  %7571 = vmatpush3.bf16.msra.mxu0 %v8260_v33  ;;  %7642 = vmatprep.subr.bf16.mxu1 %v8267_v50  ;;  %v8301_v50 = vld [vmem:[%s10345_s1 + $0xcb8] sm:$0xff]  }
 0x185   :  { %7572 = vmatprep.subr.bf16.mxu0 %v8262_v35  ;;  %v8292_v35 = vld [vmem:[%s10345_s1 + $0xc28] sm:$0xff]  }
 0x186   :  { %5895 = vmatmul.mubr.bf16.vlgmr.msra.gmra.mrb[88].mxu1 %v6348_v47  ;;  %v8298_v47 = vld [vmem:[%s10345_s1 + $0xc78] sm:$0xff]  }
 0x187   :  { %7643 = vmatpush3.bf16.msra.mxu1 %v8269_v41  ;;  %5902 = vmatprep.mubr.bf16.mxu1 %v6413_v2  ;;  %v71_v41 = vld [vmem:[%s10346_s0 + $0x1c0] sm:$0xff]  ;;  %v8308_v2 = vld [vmem:[%s10345_s1 + $0xd08] sm:$0xff]  }
 0x188   :  { %7573 = vmatpush3.bf16.msra.mxu0 %v8264_v37  ;;  %7644 = vmatprep.subr.bf16.mxu1 %v8271_v54 }
 0x189   :  { %7614 = vmatprep.subr.bf16.mxu0 %v8266_v49  ;;  %v8300_v49 = vld [vmem:[%s10345_s1 + $0xc38] sm:$0xff]  }
 0x18b   :  { %5847 = vmatmul.mubr.bf16.vlgmr.msra.gmra.mrb[88].mxu0 %v6346_v39  ;;  %7645 = vmatpush3.bf16.msra.mxu1 %v8273_v56  ;;  %v72_v56 = vld [vmem:[%s10346_s0 + $0x1c8] sm:$0xff] }
 0x18c   :  { %7615 = vmatpush3.bf16.msra.mxu0 %v8268_v53  ;;  %5854 = vmatprep.mubr.bf16.mxu0 %v6411_v58  ;;  %v39_v53 = vld [vmem:[%s10346_s0 + $0xc0] sm:$0xff] }
 0x18d   :  { %7616 = vmatprep.subr.bf16.mxu0 %v8270_v40  ;;  %7646 = vmatprep.subr.bf16.mxu1 %v8277_v63  ;;  %v6350_v40 = vcombine.low %v39_v53, %v71_v41  ;;  %v6351_v54 = vcombine.high %v39_v53, %v71_v41  ;;  %v8304_v63 = vld [vmem:[%s10345_s1 + $0xd00] sm:$0xff]   ;;  %v8330_v41 = vld [vmem:[%s10345_s1 + $0xd70] sm:$0xff]  }
 0x18e   :  { %5903 = vmatmul.mubr.bf16.gmra.mrb[92].mxu1 %v6412_v4  ;;  %v103_v4 = vld [vmem:[%s10346_s0 + $0x2c0] sm:$0xff] }
 0x18f   :  { %7647 = vmatpush3.bf16.msra.mxu1 %v8280_v6  ;;  %v6414_v6 = vcombine.low %v103_v4, %v103_v4 }
 0x190   :  { %7617 = vmatpush3.bf16.msra.mxu0 %v8272_v55  ;;  %7648 = vmatprep.subr.bf16.mxu1 %v8283_v12  ;;  %v40_v55 = vld [vmem:[%s10346_s0 + $0xc8] sm:$0xff] }
 0x191   :  { %7618 = vmatprep.subr.bf16.mxu0 %v8276_v60  ;;  %v6352_v57 = vcombine.low %v40_v55, %v72_v56  ;;  %v6353_v58 = vcombine.high %v40_v55, %v72_v56  ;;  %v8303_v60 = vld [vmem:[%s10345_s1 + $0xdc0] sm:$0xff]   ;;  %v8332_v55 = vld [vmem:[%s10345_s1 + $0xd30] sm:$0xff]  }
 0x192   :  { %v8333_v56 = vld [vmem:[%s10345_s1 + $0xdb0] sm:$0xff]  }
 0x193   :  { %5855 = vmatmul.mubr.bf16.gmra.mrb[92].mxu0 %v6410_v59  ;;  %7649 = vmatpush3.bf16.msra.mxu1 %v8285_v17  ;;  %v8302_v59 = vld [vmem:[%s10345_s1 + $0xd40] sm:$0xff]  }
 0x194   :  { %7619 = vmatpush3.bf16.msra.mxu0 %v8279_v3  ;;  %7650 = vmatprep.subr.bf16.mxu1 %v8287_v22  ;;  %v8309_v3 = vld [vmem:[%s10345_s1 + $0xd88] sm:$0xff]   ;;  %v8319_v22 = vld [vmem:[%s10345_s1 + $0xdd8] sm:$0xff]  }
 0x195   :  { %7620 = vmatprep.subr.bf16.mxu0 %v8282_v61  ;;  %5942 = vmatprep.mubr.bf16.mxu0 %v6351_v54  ;;  %v8331_v54 = vld [vmem:[%s10345_s1 + $0xdf0] sm:$0xff]  }
 0x196   :  { %v7238_v51 = vpop.f32.mrb[40].mxu0  ;;  %5990 = vmatprep.mubr.bf16.mxu1 %v6353_v58  ;;  %v8335_v58 = vld [vmem:[%s10345_s1 + $0xdf8] sm:$0xff]  }
 0x197   :  { %v7266_v1 = vpop.f32.mrb[40].mxu1  ;;  %v7239_v5 = vpop.f32.mrb[41].mxu0  ;;  %7651 = vmatpush3.bf16.msra.mxu1 %v8289_v27  ;;  %v8321_v27 = vld [vmem:[%s10345_s1 + $0xd98] sm:$0xff]  }
 0x198   :  { %v7240_v7 = vadd.f32 %v7239_v5, %v7238_v51  ;;  %v7267_v10 = vpop.f32.mrb[41].mxu1  ;;  %v7241_v11 = vpop.f32.mrb[42].mxu0  ;;  %7621 = vmatpush3.bf16.msra.mxu0 %v8284_v15  ;;  %7652 = vmatprep.subr.bf16.mxu1 %v8291_v32  ;;  %v8305_v51 = vld [vmem:[%s10345_s1 + $0xd80] sm:$0xff]   ;;  %v6415_v5 = vcombine.high %v103_v4, %v103_v4 }
 0x199   :  { %v7268_v62 = vadd.f32 %v7267_v10, %v7266_v1  ;;  %v7269_v14 = vpop.f32.mrb[42].mxu1  ;;  %v7242_v16 = vpop.f32.mrb[43].mxu0  ;;  %v8307_v1 = vld [vmem:[%s10345_s1 + $0xdc8] sm:$0xff]   ;;  %v8313_v10 = vld [vmem:[%s10345_s1 + $0xdd0] sm:$0xff]   ;;  %v8323_v32 = vld [vmem:[%s10345_s1 + $0xde0] sm:$0xff]  }
 0x19a   :  { %v5273_v13 = vadd.f32 %v7240_v7, %v9770_v9  ;;  %v7243_v20 = vadd.f32 %v7242_v16, %v7241_v11  ;;  %v7270_v8 = vpop.f32.mrb[43].mxu1  ;;  %v8286_v9 = vld [vmem:[%s10345_s1 + $0xc60] sm:$0xff]   ;;  %v8312_v7 = vld [vmem:[%s10345_s1 + $0xd50] sm:$0xff]  }
 0x19b   :  { %v7271_v21 = vadd.f32 %v7270_v8, %v7269_v14  ;;  %7622 = vmatprep.subr.bf16.mxu0 %v8286_v9  ;;  %7653 = vmatpush3.bf16.msra.mxu1 %v8293_v38  ;;  %v8316_v16 = vld [vmem:[%s10345_s1 + $0xd90] sm:$0xff]   ;;  %v8318_v8 = vld [vmem:[%s10345_s1 + $0xd58] sm:$0xff]  }
 0x19c   :  { %v9893_v19 = vadd.f32 %v7268_v62, %v5273_v13  ;;  %v5276_v23 = vadd.f32 %v7243_v20, %v9785_v18  ;;  %7623 = vmatpush3.bf16.msra.mxu0 %v8288_v25  ;;  %v8290_v18 = vld [vmem:[%s10345_s1 + $0xc68] sm:$0xff]   ;;  %7654 = vmatprep.subr.bf16.mxu1 %v8295_v44  ;;  %v8315_v13 = vld [vmem:[%s10345_s1 + $0xd10] sm:$0xff]   ;;  %v8320_v25 = vld [vmem:[%s10345_s1 + $0xd18] sm:$0xff]  }
 0x19d   :  { %7624 = vmatprep.subr.bf16.mxu0 %v8290_v18  ;;  %v104_v62 = vld [vmem:[%s10346_s0 + $0x2c8] sm:$0xff] }
 0x19e   :  { %v7244_v24 = vpop.f32.mrb[44].mxu0  ;;  %v9908_v28 = vadd.f32 %v7271_v21, %v5276_v23  ;;  %v6417_v12 = vcombine.high %v104_v62, %v104_v62  ;;  %v6416_v14 = vcombine.low %v104_v62, %v104_v62  ;;  %v8327_v44 = vld [vmem:[%s10345_s1 + $0xde8] sm:$0xff]  }
 0x19f   :  { %v7245_v26 = vpop.f32.mrb[45].mxu0  ;;  %v7272_v31 = vpop.f32.mrb[44].mxu1  ;;  %7655 = vmatpush3.bf16.msra.mxu1 %v8297_v46  ;;  %v8342_v62 = vld [vmem:[%s10345_s1 + $0xe48] sm:$0xff]  }
 0x1a0   :  { %v7246_v29 = vadd.f32 %v7245_v26, %v7244_v24  ;;  %v7247_v30 = vpop.f32.mrb[46].mxu0  ;;  %v7273_v34 = vpop.f32.mrb[45].mxu1  ;;  %7625 = vmatpush3.bf16.msra.mxu0 %v8292_v35  ;;  %7656 = vmatprep.subr.bf16.mxu1 %v8299_v48  ;;  %v8324_v35 = vld [vmem:[%s10345_s1 + $0xd20] sm:$0xff]  }
 0x1a1   :  { %v7274_v36 = vadd.f32 %v7273_v34, %v7272_v31  ;;  %v7248_v37 = vpop.f32.mrb[47].mxu0  ;;  %v7275_v42 = vpop.f32.mrb[46].mxu1  ;;  %7626 = vmatprep.subr.bf16.mxu0 %v8294_v43 }
 0x1a2   :  { %v5281_v33 = vadd.f32 %v7246_v29, %v9803_v0  ;;  %v7276_v39 = vpop.f32.mrb[47].mxu1  ;;  %v8325_v37 = vld [vmem:[%s10345_s1 + $0xda0] sm:$0xff]  }
 0x1a3   :  { %7657 = vmatpush3.bf16.msra.mxu1 %v8301_v50  ;;  %v8329_v50 = vld [vmem:[%s10345_s1 + $0xda8] sm:$0xff]  }
 0x1a4   :  { %v9926_v0 = vadd.f32 %v7274_v36, %v5281_v33  ;;  %7627 = vmatpush3.bf16.msra.mxu0 %v8296_v45  ;;  %7698 = vmatprep.subr.bf16.mxu1 %v8303_v60  ;;  %v8337_v60 = vld [vmem:[%s10345_s1 + $0xdb8] sm:$0xff]  }
 0x1a5   :  { %7628 = vmatprep.subr.bf16.mxu0 %v8298_v47  ;;  %v8328_v47 = vld [vmem:[%s10345_s1 + $0xd28] sm:$0xff]  }
 0x1a6   :  { %5991 = vmatmul.mubr.bf16.vlgmr.msra.gmra.mrb[96].mxu1 %v6352_v57  ;;  %v8334_v57 = vld [vmem:[%s10345_s1 + $0xd78] sm:$0xff]  }
 0x1a7   :  { %7699 = vmatpush3.bf16.msra.mxu1 %v8305_v51  ;;  %5998 = vmatprep.mubr.bf16.mxu1 %v6417_v12  ;;  %v73_v51 = vld [vmem:[%s10346_s0 + $0x1d0] sm:$0xff]  ;;  %v8344_v12 = vld [vmem:[%s10345_s1 + $0xe08] sm:$0xff]  }
 0x1a8   :  { %7629 = vmatpush3.bf16.msra.mxu0 %v8300_v49  ;;  %7700 = vmatprep.subr.bf16.mxu1 %v8307_v1 }
 0x1a9   :  { %7670 = vmatprep.subr.bf16.mxu0 %v8302_v59  ;;  %v8336_v59 = vld [vmem:[%s10345_s1 + $0xd38] sm:$0xff]  }
 0x1ab   :  { %5943 = vmatmul.mubr.bf16.vlgmr.msra.gmra.mrb[96].mxu0 %v6350_v40  ;;  %7701 = vmatpush3.bf16.msra.mxu1 %v8309_v3  ;;  %v74_v3 = vld [vmem:[%s10346_s0 + $0x1d8] sm:$0xff] }
 0x1ac   :  { %7671 = vmatpush3.bf16.msra.mxu0 %v8304_v63  ;;  %5950 = vmatprep.mubr.bf16.mxu0 %v6415_v5  ;;  %v41_v63 = vld [vmem:[%s10346_s0 + $0xd0] sm:$0xff] }
 0x1ad   :  { %7672 = vmatprep.subr.bf16.mxu0 %v8306_v52  ;;  %7702 = vmatprep.subr.bf16.mxu1 %v8313_v10  ;;  %v6354_v52 = vcombine.low %v41_v63, %v73_v51  ;;  %v6355_v1 = vcombine.high %v41_v63, %v73_v51  ;;  %v8340_v10 = vld [vmem:[%s10345_s1 + $0xe00] sm:$0xff]   ;;  %v8366_v51 = vld [vmem:[%s10345_s1 + $0xe70] sm:$0xff]  }
 0x1ae   :  { %5999 = vmatmul.mubr.bf16.gmra.mrb[100].mxu1 %v6416_v14  ;;  %v105_v14 = vld [vmem:[%s10346_s0 + $0x2d0] sm:$0xff] }
 0x1af   :  { %7703 = vmatpush3.bf16.msra.mxu1 %v8316_v16  ;;  %v6418_v16 = vcombine.low %v105_v14, %v105_v14 }
 0x1b0   :  { %7673 = vmatpush3.bf16.msra.mxu0 %v8308_v2  ;;  %7704 = vmatprep.subr.bf16.mxu1 %v8319_v22  ;;  %v42_v2 = vld [vmem:[%s10346_s0 + $0xd8] sm:$0xff] }
 0x1b1   :  { %7674 = vmatprep.subr.bf16.mxu0 %v8312_v7  ;;  %v6356_v4 = vcombine.low %v42_v2, %v74_v3  ;;  %v6357_v5 = vcombine.high %v42_v2, %v74_v3  ;;  %v8339_v7 = vld [vmem:[%s10345_s1 + $0xec0] sm:$0xff]   ;;  %v8368_v2 = vld [vmem:[%s10345_s1 + $0xe30] sm:$0xff]  }
 0x1b2   :  { %v8369_v3 = vld [vmem:[%s10345_s1 + $0xeb0] sm:$0xff]  }
 0x1b3   :  { %5951 = vmatmul.mubr.bf16.gmra.mrb[100].mxu0 %v6414_v6  ;;  %7705 = vmatpush3.bf16.msra.mxu1 %v8321_v27  ;;  %v8338_v6 = vld [vmem:[%s10345_s1 + $0xe40] sm:$0xff]  }
 0x1b4   :  { %7675 = vmatpush3.bf16.msra.mxu0 %v8315_v13  ;;  %7706 = vmatprep.subr.bf16.mxu1 %v8323_v32  ;;  %v8345_v13 = vld [vmem:[%s10345_s1 + $0xe88] sm:$0xff]   ;;  %v8355_v32 = vld [vmem:[%s10345_s1 + $0xed8] sm:$0xff]  }
 0x1b5   :  { %7676 = vmatprep.subr.bf16.mxu0 %v8318_v8  ;;  %6038 = vmatprep.mubr.bf16.mxu0 %v6355_v1 }
 0x1b6   :  { %v7294_v61 = vpop.f32.mrb[48].mxu0  ;;  %6086 = vmatprep.mubr.bf16.mxu1 %v6357_v5  ;;  %v8371_v5 = vld [vmem:[%s10345_s1 + $0xef8] sm:$0xff]  }
 0x1b7   :  { %v7322_v11 = vpop.f32.mrb[48].mxu1  ;;  %v7295_v15 = vpop.f32.mrb[49].mxu0  ;;  %7707 = vmatpush3.bf16.msra.mxu1 %v8325_v37  ;;  %v8357_v37 = vld [vmem:[%s10345_s1 + $0xe98] sm:$0xff]  }
 0x1b8   :  { %v7296_v17 = vadd.f32 %v7295_v15, %v7294_v61  ;;  %v7323_v20 = vpop.f32.mrb[49].mxu1  ;;  %v7297_v21 = vpop.f32.mrb[50].mxu0  ;;  %7677 = vmatpush3.bf16.msra.mxu0 %v8320_v25  ;;  %7708 = vmatprep.subr.bf16.mxu1 %v8327_v44  ;;  %v8341_v61 = vld [vmem:[%s10345_s1 + $0xe80] sm:$0xff]   ;;  %v6419_v15 = vcombine.high %v105_v14, %v105_v14 }
 0x1b9   :  { %v7324_v9 = vadd.f32 %v7323_v20, %v7322_v11  ;;  %v7325_v24 = vpop.f32.mrb[50].mxu1  ;;  %v7298_v26 = vpop.f32.mrb[51].mxu0  ;;  %v8343_v11 = vld [vmem:[%s10345_s1 + $0xec8] sm:$0xff]   ;;  %v8349_v20 = vld [vmem:[%s10345_s1 + $0xed0] sm:$0xff]   ;;  %v8359_v44 = vld [vmem:[%s10345_s1 + $0xee0] sm:$0xff]  }
 0x1ba   :  { %v5369_v23 = vadd.f32 %v7296_v17, %v9893_v19  ;;  %v7299_v30 = vadd.f32 %v7298_v26, %v7297_v21  ;;  %v7326_v18 = vpop.f32.mrb[51].mxu1  ;;  %v8322_v19 = vld [vmem:[%s10345_s1 + $0xd60] sm:$0xff]   ;;  %v8348_v17 = vld [vmem:[%s10345_s1 + $0xe50] sm:$0xff]  }
 0x1bb   :  { %v7327_v31 = vadd.f32 %v7326_v18, %v7325_v24  ;;  %7678 = vmatprep.subr.bf16.mxu0 %v8322_v19  ;;  %7709 = vmatpush3.bf16.msra.mxu1 %v8329_v50  ;;  %v8352_v26 = vld [vmem:[%s10345_s1 + $0xe90] sm:$0xff]   ;;  %v8354_v18 = vld [vmem:[%s10345_s1 + $0xe58] sm:$0xff]  }
 0x1bc   :  { %v10016_v29 = vadd.f32 %v7324_v9, %v5369_v23  ;;  %v5372_v33 = vadd.f32 %v7299_v30, %v9908_v28  ;;  %7679 = vmatpush3.bf16.msra.mxu0 %v8324_v35  ;;  %v8326_v28 = vld [vmem:[%s10345_s1 + $0xd68] sm:$0xff]   ;;  %7710 = vmatprep.subr.bf16.mxu1 %v8331_v54  ;;  %v106_v9 = vld [vmem:[%s10346_s0 + $0x2d8] sm:$0xff]  ;;  %v8351_v23 = vld [vmem:[%s10345_s1 + $0xe10] sm:$0xff]  }
 0x1bd   :  { %7680 = vmatprep.subr.bf16.mxu0 %v8326_v28  ;;  %v6421_v22 = vcombine.high %v106_v9, %v106_v9  ;;  %v6420_v24 = vcombine.low %v106_v9, %v106_v9  ;;  %v8356_v35 = vld [vmem:[%s10345_s1 + $0xe18] sm:$0xff]   ;;  %v8363_v54 = vld [vmem:[%s10345_s1 + $0xee8] sm:$0xff]  }
 0x1be   :  { %v7300_v34 = vpop.f32.mrb[52].mxu0  ;;  %v10031_v38 = vadd.f32 %v7327_v31, %v5372_v33  ;;  %v8378_v9 = vld [vmem:[%s10345_s1 + $0xf48] sm:$0xff]  }
 0x1bf   :  { %v7301_v36 = vpop.f32.mrb[53].mxu0  ;;  %v7328_v39 = vpop.f32.mrb[52].mxu1  ;;  %7711 = vmatpush3.bf16.msra.mxu1 %v8333_v56 }
 0x1c0   :  { %v7302_v42 = vadd.f32 %v7301_v36, %v7300_v34  ;;  %v7303_v43 = vpop.f32.mrb[54].mxu0  ;;  %v7329_v46 = vpop.f32.mrb[53].mxu1  ;;  %7681 = vmatpush3.bf16.msra.mxu0 %v8328_v47  ;;  %7712 = vmatprep.subr.bf16.mxu1 %v8335_v58  ;;  %v8360_v47 = vld [vmem:[%s10345_s1 + $0xe20] sm:$0xff]  }
 0x1c1   :  { %v7330_v48 = vadd.f32 %v7329_v46, %v7328_v39  ;;  %v7304_v49 = vpop.f32.mrb[55].mxu0  ;;  %v7331_v53 = vpop.f32.mrb[54].mxu1  ;;  %7682 = vmatprep.subr.bf16.mxu0 %v8330_v41 }
 0x1c2   :  { %v5377_v45 = vadd.f32 %v7302_v42, %v9926_v0  ;;  %v7332_v40 = vpop.f32.mrb[55].mxu1  ;;  %v8361_v49 = vld [vmem:[%s10345_s1 + $0xea0] sm:$0xff]  }
 0x1c3   :  { %7713 = vmatpush3.bf16.msra.mxu1 %v8337_v60 }
 0x1c4   :  { %v10049_v0 = vadd.f32 %v7330_v48, %v5377_v45  ;;  %7683 = vmatpush3.bf16.msra.mxu0 %v8332_v55  ;;  %7754 = vmatprep.subr.bf16.mxu1 %v8339_v7  ;;  %v8373_v7 = vld [vmem:[%s10345_s1 + $0xeb8] sm:$0xff]  }
 0x1c5   :  { %7684 = vmatprep.subr.bf16.mxu0 %v8334_v57  ;;  %v8364_v57 = vld [vmem:[%s10345_s1 + $0xe28] sm:$0xff]  }
 0x1c6   :  { %6087 = vmatmul.mubr.bf16.vlgmr.msra.gmra.mrb[104].mxu1 %v6356_v4  ;;  %v8370_v4 = vld [vmem:[%s10345_s1 + $0xe78] sm:$0xff]  }
 0x1c7   :  { %7755 = vmatpush3.bf16.msra.mxu1 %v8341_v61  ;;  %6094 = vmatprep.mubr.bf16.mxu1 %v6421_v22  ;;  %v75_v61 = vld [vmem:[%s10346_s0 + $0x1e0] sm:$0xff]  ;;  %v8380_v22 = vld [vmem:[%s10345_s1 + $0xf08] sm:$0xff]  }
 0x1c8   :  { %7685 = vmatpush3.bf16.msra.mxu0 %v8336_v59  ;;  %7756 = vmatprep.subr.bf16.mxu1 %v8343_v11  ;;  %v8365_v59 = vld [vmem:[%s10345_s1 + $0xea8] sm:$0xff]  }
 0x1c9   :  { %7726 = vmatprep.subr.bf16.mxu0 %v8338_v6  ;;  %v8372_v6 = vld [vmem:[%s10345_s1 + $0xe38] sm:$0xff]  }
 0x1cb   :  { %6039 = vmatmul.mubr.bf16.vlgmr.msra.gmra.mrb[104].mxu0 %v6354_v52  ;;  %7757 = vmatpush3.bf16.msra.mxu1 %v8345_v13  ;;  %v8367_v52 = vld [vmem:[%s10345_s1 + $0xef0] sm:$0xff]   ;;  %v76_v13 = vld [vmem:[%s10346_s0 + $0x1e8] sm:$0xff] }
 0x1cc   :  { %7727 = vmatpush3.bf16.msra.mxu0 %v8340_v10  ;;  %6046 = vmatprep.mubr.bf16.mxu0 %v6419_v15  ;;  %v43_v10 = vld [vmem:[%s10346_s0 + $0xe0] sm:$0xff] }
 0x1cd   :  { %7728 = vmatprep.subr.bf16.mxu0 %v8342_v62  ;;  %7758 = vmatprep.subr.bf16.mxu1 %v8349_v20  ;;  %v6358_v62 = vcombine.low %v43_v10, %v75_v61  ;;  %v6359_v11 = vcombine.high %v43_v10, %v75_v61  ;;  %v8376_v20 = vld [vmem:[%s10345_s1 + $0xf00] sm:$0xff]   ;;  %v8402_v61 = vld [vmem:[%s10345_s1 + $0xf70] sm:$0xff]  }
 0x1ce   :  { %6095 = vmatmul.mubr.bf16.gmra.mrb[108].mxu1 %v6420_v24  ;;  %v107_v24 = vld [vmem:[%s10346_s0 + $0x2e0] sm:$0xff] }
 0x1cf   :  { %7759 = vmatpush3.bf16.msra.mxu1 %v8352_v26  ;;  %v6422_v26 = vcombine.low %v107_v24, %v107_v24 }
 0x1d0   :  { %7729 = vmatpush3.bf16.msra.mxu0 %v8344_v12  ;;  %7760 = vmatprep.subr.bf16.mxu1 %v8355_v32  ;;  %v44_v12 = vld [vmem:[%s10346_s0 + $0xe8] sm:$0xff] }
 0x1d1   :  { %7730 = vmatprep.subr.bf16.mxu0 %v8348_v17  ;;  %v6360_v14 = vcombine.low %v44_v12, %v76_v13  ;;  %v6361_v15 = vcombine.high %v44_v12, %v76_v13  ;;  %v8375_v17 = vld [vmem:[%s10345_s1 + $0xfc0] sm:$0xff]   ;;  %v8404_v12 = vld [vmem:[%s10345_s1 + $0xf30] sm:$0xff]  }
 0x1d2   :  { %v8405_v13 = vld [vmem:[%s10345_s1 + $0xfb0] sm:$0xff]  }
 0x1d3   :  { %6047 = vmatmul.mubr.bf16.gmra.mrb[108].mxu0 %v6418_v16  ;;  %7761 = vmatpush3.bf16.msra.mxu1 %v8357_v37  ;;  %v8374_v16 = vld [vmem:[%s10345_s1 + $0xf40] sm:$0xff]  }
 0x1d4   :  { %7731 = vmatpush3.bf16.msra.mxu0 %v8351_v23  ;;  %7762 = vmatprep.subr.bf16.mxu1 %v8359_v44  ;;  %v8381_v23 = vld [vmem:[%s10345_s1 + $0xf88] sm:$0xff]   ;;  %v8391_v44 = vld [vmem:[%s10345_s1 + $0xfd8] sm:$0xff]  }
 0x1d5   :  { %7732 = vmatprep.subr.bf16.mxu0 %v8354_v18  ;;  %6134 = vmatprep.mubr.bf16.mxu0 %v6359_v11 }
 0x1d6   :  { %v7350_v8 = vpop.f32.mrb[56].mxu0  ;;  %6182 = vmatprep.mubr.bf16.mxu1 %v6361_v15  ;;  %v8407_v15 = vld [vmem:[%s10345_s1 + $0xff8] sm:$0xff]  }
 0x1d7   :  { %v7378_v21 = vpop.f32.mrb[56].mxu1  ;;  %v7351_v25 = vpop.f32.mrb[57].mxu0  ;;  %7763 = vmatpush3.bf16.msra.mxu1 %v8361_v49  ;;  %v8393_v49 = vld [vmem:[%s10345_s1 + $0xf98] sm:$0xff]  }
 0x1d8   :  { %v7352_v27 = vadd.f32 %v7351_v25, %v7350_v8  ;;  %v7379_v30 = vpop.f32.mrb[57].mxu1  ;;  %v7353_v31 = vpop.f32.mrb[58].mxu0  ;;  %7733 = vmatpush3.bf16.msra.mxu0 %v8356_v35  ;;  %7764 = vmatprep.subr.bf16.mxu1 %v8363_v54  ;;  %v8377_v8 = vld [vmem:[%s10345_s1 + $0xf80] sm:$0xff]   ;;  %v6423_v25 = vcombine.high %v107_v24, %v107_v24  ;;  %v109_v24 = vld [vmem:[%s10346_s0 + $0x2f0] sm:$0xff] }
 0x1d9   :  { %v7380_v19 = vadd.f32 %v7379_v30, %v7378_v21  ;;  %v7381_v34 = vpop.f32.mrb[58].mxu1  ;;  %v7354_v36 = vpop.f32.mrb[59].mxu0  ;;  %v8379_v21 = vld [vmem:[%s10345_s1 + $0xfc8] sm:$0xff]   ;;  %v8385_v30 = vld [vmem:[%s10345_s1 + $0xfd0] sm:$0xff]   ;;  %v8395_v54 = vld [vmem:[%s10345_s1 + $0xfe0] sm:$0xff]  }
 0x1da   :  { %v5465_v33 = vadd.f32 %v7352_v27, %v10016_v29  ;;  %v7355_v43 = vadd.f32 %v7354_v36, %v7353_v31  ;;  %v7382_v28 = vpop.f32.mrb[59].mxu1  ;;  %v8358_v29 = vld [vmem:[%s10345_s1 + $0xe60] sm:$0xff]   ;;  %v8384_v27 = vld [vmem:[%s10345_s1 + $0xf50] sm:$0xff]  }
 0x1db   :  { %v7383_v39 = vadd.f32 %v7382_v28, %v7381_v34  ;;  %7734 = vmatprep.subr.bf16.mxu0 %v8358_v29  ;;  %7765 = vmatpush3.bf16.msra.mxu1 %v8365_v59  ;;  %v8388_v36 = vld [vmem:[%s10345_s1 + $0xf90] sm:$0xff]   ;;  %v8390_v28 = vld [vmem:[%s10345_s1 + $0xf58] sm:$0xff]   ;;  %v8397_v59 = vld [vmem:[%s10345_s1 + $0xfa0] sm:$0xff]  }
 0x1dc   :  { %v10139_v42 = vadd.f32 %v7380_v19, %v5465_v33  ;;  %v5468_v45 = vadd.f32 %v7355_v43, %v10031_v38  ;;  %7735 = vmatpush3.bf16.msra.mxu0 %v8360_v47  ;;  %v8362_v38 = vld [vmem:[%s10345_s1 + $0xe68] sm:$0xff]   ;;  %7766 = vmatprep.subr.bf16.mxu1 %v8367_v52  ;;  %v8387_v33 = vld [vmem:[%s10345_s1 + $0xf10] sm:$0xff]   ;;  %v8392_v47 = vld [vmem:[%s10345_s1 + $0xf18] sm:$0xff]  }
 0x1dd   :  { %7736 = vmatprep.subr.bf16.mxu0 %v8362_v38  ;;  %v108_v19 = vld [vmem:[%s10346_s0 + $0x2e8] sm:$0xff] }
 0x1de   :  { %v7356_v46 = vpop.f32.mrb[60].mxu0  ;;  %v10154_v50 = vadd.f32 %v7383_v39, %v5468_v45  ;;  %v6425_v32 = vcombine.high %v108_v19, %v108_v19  ;;  %v6424_v34 = vcombine.low %v108_v19, %v108_v19  ;;  %v8399_v52 = vld [vmem:[%s10345_s1 + $0xfe8] sm:$0xff]   ;;  %v6426_v19 = vcombine.low %v109_v24, %v109_v24 }
 0x1df   :  { %v7357_v48 = vpop.f32.mrb[61].mxu0  ;;  %v7384_v56 = vpop.f32.mrb[60].mxu1  ;;  %7767 = vmatpush3.bf16.msra.mxu1 %v8369_v3 }
 0x1e0   :  { %v7358_v53 = vadd.f32 %v7357_v48, %v7356_v46  ;;  %v7359_v41 = vpop.f32.mrb[62].mxu0  ;;  %v7385_v58 = vpop.f32.mrb[61].mxu1  ;;  %7737 = vmatpush3.bf16.msra.mxu0 %v8364_v57  ;;  %7768 = vmatprep.subr.bf16.mxu1 %v8371_v5  ;;  %v8396_v57 = vld [vmem:[%s10345_s1 + $0xf20] sm:$0xff]  }
 0x1e1   :  { %v7360_v40 = vpop.f32.mrb[63].mxu0  ;;  %v7386_v60 = vadd.f32 %v7385_v58, %v7384_v56  ;;  %v7387_v63 = vpop.f32.mrb[62].mxu1  ;;  %7738 = vmatprep.subr.bf16.mxu0 %v8366_v51 }
 0x1e2   :  { %v5473_v55 = vadd.f32 %v7358_v53, %v10049_v0  ;;  %v7388_v0 = vpop.f32.mrb[63].mxu1 }
 0x1e3   :  { %7769 = vmatpush3.bf16.msra.mxu1 %v8373_v7 }
 0x1e4   :  { %v10175_v1 = vadd.f32 %v7386_v60, %v5473_v55  ;;  %7739 = vmatpush3.bf16.msra.mxu0 %v8368_v2  ;;  %7810 = vmatprep.subr.bf16.mxu1 %v8375_v17  ;;  %v8409_v17 = vld [vmem:[%s10345_s1 + $0xfb8] sm:$0xff]  }
 0x1e5   :  { %7740 = vmatprep.subr.bf16.mxu0 %v8370_v4  ;;  %v8400_v4 = vld [vmem:[%s10345_s1 + $0xf28] sm:$0xff]  }
 0x1e6   :  { %6183 = vmatmul.mubr.bf16.vlgmr.msra.gmra.mrb[112].mxu1 %v6360_v14  ;;  %v8406_v14 = vld [vmem:[%s10345_s1 + $0xf78] sm:$0xff]  }
 0x1e7   :  { %7811 = vmatpush3.bf16.msra.mxu1 %v8377_v8  ;;  %6190 = vmatprep.mubr.bf16.mxu1 %v6425_v32  ;;  %v77_v8 = vld [vmem:[%s10346_s0 + $0x1f0] sm:$0xff] }
 0x1e8   :  { %7741 = vmatpush3.bf16.msra.mxu0 %v8372_v6  ;;  %7812 = vmatprep.subr.bf16.mxu1 %v8379_v21  ;;  %v8401_v6 = vld [vmem:[%s10345_s1 + $0xfa8] sm:$0xff]  }
 0x1e9   :  { %7782 = vmatprep.subr.bf16.mxu0 %v8374_v16  ;;  %v8408_v16 = vld [vmem:[%s10345_s1 + $0xf38] sm:$0xff]  }
 0x1eb   :  { %6135 = vmatmul.mubr.bf16.vlgmr.msra.gmra.mrb[112].mxu0 %v6358_v62  ;;  %7813 = vmatpush3.bf16.msra.mxu1 %v8381_v23  ;;  %v8403_v62 = vld [vmem:[%s10345_s1 + $0xff0] sm:$0xff]   ;;  %v78_v23 = vld [vmem:[%s10346_s0 + $0x1f8] sm:$0xff] }
 0x1ec   :  { %7783 = vmatpush3.bf16.msra.mxu0 %v8376_v20  ;;  %6142 = vmatprep.mubr.bf16.mxu0 %v6423_v25  ;;  %v45_v20 = vld [vmem:[%s10346_s0 + $0xf0] sm:$0xff] }
 0x1ed   :  { %7784 = vmatprep.subr.bf16.mxu0 %v8378_v9  ;;  %7814 = vmatprep.subr.bf16.mxu1 %v8385_v30  ;;  %v6362_v9 = vcombine.low %v45_v20, %v77_v8  ;;  %v6363_v21 = vcombine.high %v45_v20, %v77_v8  ;;  %v110_v30 = vld [vmem:[%s10346_s0 + $0x2f8] sm:$0xff] }
 0x1ee   :  { %6191 = vmatmul.mubr.bf16.gmra.mrb[116].mxu1 %v6424_v34 }
 0x1ef   :  { %7815 = vmatpush3.bf16.msra.mxu1 %v8388_v36 }
 0x1f0   :  { %7785 = vmatpush3.bf16.msra.mxu0 %v8380_v22  ;;  %7816 = vmatprep.subr.bf16.mxu1 %v8391_v44  ;;  %v46_v22 = vld [vmem:[%s10346_s0 + $0xf8] sm:$0xff] }
 0x1f1   :  { %7786 = vmatprep.subr.bf16.mxu0 %v8384_v27  ;;  %v6364_v25 = vcombine.low %v46_v22, %v78_v23  ;;  %v6427_v27 = vcombine.high %v109_v24, %v109_v24 }
 0x1f3   :  { %6143 = vmatmul.mubr.bf16.gmra.mrb[116].mxu0 %v6422_v26  ;;  %7817 = vmatpush3.bf16.msra.mxu1 %v8393_v49  ;;  %v6365_v26 = vcombine.high %v46_v22, %v78_v23 }
 0x1f4   :  { %7787 = vmatpush3.bf16.msra.mxu0 %v8387_v33  ;;  %7818 = vmatprep.subr.bf16.mxu1 %v8395_v54 }
 0x1f5   :  { %7788 = vmatprep.subr.bf16.mxu0 %v8390_v28  ;;  %6230 = vmatprep.mubr.bf16.mxu0 %v6363_v21 }
 0x1f6   :  { %6278 = vmatprep.mubr.bf16.mxu1 %v6365_v26 }
 0x1f7   :  { %7819 = vmatpush3.bf16.msra.mxu1 %v8397_v59 }
 0x1f8   :  { %7789 = vmatpush3.bf16.msra.mxu0 %v8392_v47  ;;  %7820 = vmatprep.subr.bf16.mxu1 %v8399_v52 }
 0x1f9   :  { %v7434_v31 = vpop.f32.mrb[64].mxu1 }
 0x1fa   :  { %v7435_v43 = vpop.f32.mrb[65].mxu1 }
 0x1fb   :  { %v7436_v29 = vadd.f32 %v7435_v43, %v7434_v31  ;;  %v7437_v46 = vpop.f32.mrb[66].mxu1  ;;  %7821 = vmatpush3.bf16.msra.mxu1 %v8401_v6  ;;  %v6428_v31 = vcombine.low %v110_v30, %v110_v30 }
 0x1fc   :  { %v7438_v38 = vpop.f32.mrb[67].mxu1  ;;  %7822 = vmatprep.subr.bf16.mxu1 %v8403_v62 }
 0x1fd   :  { %v7439_v40 = vadd.f32 %v7438_v38, %v7437_v46 }
 0x1fe   :  { %v7406_v18 = vpop.f32.mrb[64].mxu0 }
 0x1ff   :  { %v7407_v35 = vpop.f32.mrb[65].mxu0  ;;  %7823 = vmatpush3.bf16.msra.mxu1 %v8405_v13 }
 0x200   :  { %v7408_v37 = vadd.f32 %v7407_v35, %v7406_v18  ;;  %v7409_v39 = vpop.f32.mrb[66].mxu0  ;;  %7824 = vmatprep.subr.bf16.mxu1 %v8407_v15  ;;  %v6429_v18 = vcombine.high %v110_v30, %v110_v30 }
 0x201   :  { %v7410_v48 = vpop.f32.mrb[67].mxu0  ;;  %v7440_v3 = vpop.f32.mrb[68].mxu1 }
 0x202   :  { %v5561_v45 = vadd.f32 %v7408_v37, %v10139_v42  ;;  %v7411_v41 = vadd.f32 %v7410_v48, %v7409_v39  ;;  %v8394_v42 = vld [vmem:[%s10345_s1 + $0xf60] sm:$0xff]   ;;  %v7441_v5 = vpop.f32.mrb[69].mxu1 }
 0x203   :  { %7790 = vmatprep.subr.bf16.mxu0 %v8394_v42  ;;  %v7442_v7 = vadd.f32 %v7441_v5, %v7440_v3  ;;  %v7443_v10 = vpop.f32.mrb[70].mxu1  ;;  %7825 = vmatpush3.bf16.msra.mxu1 %v8409_v17 }
 0x204   :  { %v10262_v53 = vadd.f32 %v7436_v29, %v5561_v45  ;;  %v5564_v55 = vadd.f32 %v7411_v41, %v10154_v50  ;;  %7791 = vmatpush3.bf16.msra.mxu0 %v8396_v57  ;;  %v8398_v50 = vld [vmem:[%s10345_s1 + $0xf68] sm:$0xff]  }
 0x205   :  { %7792 = vmatprep.subr.bf16.mxu0 %v8398_v50 }
 0x206   :  { %v7412_v56 = vpop.f32.mrb[68].mxu0  ;;  %v10277_v60 = vadd.f32 %v7439_v40, %v5564_v55  ;;  %6279 = vmatmul.mubr.bf16.vlgmr.msra.gmra.mrb[120].mxu1 %v6364_v25 }
 0x207   :  { %v7413_v58 = vpop.f32.mrb[69].mxu0  ;;  %6286 = vmatprep.mubr.bf16.mxu1 %v6429_v18 }
 0x208   :  { %v7414_v63 = vadd.f32 %v7413_v58, %v7412_v56  ;;  %v7415_v51 = vpop.f32.mrb[70].mxu0  ;;  %7793 = vmatpush3.bf16.msra.mxu0 %v8400_v4 }
 0x209   :  { %v7416_v0 = vpop.f32.mrb[71].mxu0  ;;  %7794 = vmatprep.subr.bf16.mxu0 %v8402_v61 }
 0x20a   :  { %v5569_v2 = vadd.f32 %v7414_v63, %v10175_v1  ;;  %v7444_v1 = vpop.f32.mrb[71].mxu1 }
 0x20c   :  { %v5617_v11 = vadd.f32 %v7442_v7, %v5569_v2  ;;  %7795 = vmatpush3.bf16.msra.mxu0 %v8404_v12 }
 0x20d   :  { %7796 = vmatprep.subr.bf16.mxu0 %v8406_v14 }
 0x20e   :  { %6287 = vmatmul.mubr.bf16.gmra.mrb[124].mxu1 %v6428_v31 }
 0x210   :  { %7797 = vmatpush3.bf16.msra.mxu0 %v8408_v16 }
 0x213   :  { %6231 = vmatmul.mubr.bf16.vlgmr.msra.gmra.mrb[120].mxu0 %v6362_v9 }
 0x214   :  { %6238 = vmatprep.mubr.bf16.mxu0 %v6427_v27 }
 0x219   :  { %v7490_v33 = vpop.f32.mrb[72].mxu1 }
 0x21a   :  { %v7491_v36 = vpop.f32.mrb[73].mxu1 }
 0x21b   :  { %6239 = vmatmul.mubr.bf16.gmra.mrb[124].mxu0 %v6426_v19  ;;  %v7492_v43 = vadd.f32 %v7491_v36, %v7490_v33  ;;  %v7493_v28 = vpop.f32.mrb[74].mxu1 }
 0x21c   :  { %v7494_v45 = vpop.f32.mrb[75].mxu1 }
 0x21d   :  { %v7495_v46 = vadd.f32 %v7494_v45, %v7493_v28 }
 0x21e   :  { %v7462_v32 = vpop.f32.mrb[72].mxu0 }
 0x21f   :  { %v7463_v34 = vpop.f32.mrb[73].mxu0 }
 0x220   :  { %v7464_v35 = vadd.f32 %v7463_v34, %v7462_v32  ;;  %v7465_v37 = vpop.f32.mrb[74].mxu0 }
 0x221   :  { %v7466_v29 = vpop.f32.mrb[75].mxu0  ;;  %v7496_v56 = vpop.f32.mrb[76].mxu1 }
 0x222   :  { %v5657_v39 = vadd.f32 %v7464_v35, %v10262_v53  ;;  %v7467_v44 = vadd.f32 %v7466_v29, %v7465_v37  ;;  %v7497_v57 = vpop.f32.mrb[77].mxu1 }
 0x223   :  { %v7498_v58 = vadd.f32 %v7497_v57, %v7496_v56  ;;  %v7499_v59 = vpop.f32.mrb[78].mxu1 }
 0x224   :  { %v5705_v47 = vadd.f32 %v7492_v43, %v5657_v39  ;;  %v5660_v48 = vadd.f32 %v7467_v44, %v10277_v60  ;;  %v7500_v63 = vpop.f32.mrb[79].mxu1 }
 0x226   :  { %v5708_v49 = vadd.f32 %v7495_v46, %v5660_v48  ;;  %v7468_v41 = vpop.f32.mrb[76].mxu0 }
 0x227   :  { %v7469_v38 = vpop.f32.mrb[77].mxu0 }
 0x228   :  { %v7470_v42 = vadd.f32 %v7469_v38, %v7468_v41  ;;  %v7471_v40 = vpop.f32.mrb[78].mxu0 }
 0x229   :  { %v7472_v54 = vpop.f32.mrb[79].mxu0 }
 0x22a   :  { %v5665_v55 = vadd.f32 %v7470_v42, %v5617_v11 }
 0x22c   :  { %v5713_v51 = vadd.f32 %v7498_v58, %v5665_v55 }
 0x239   :  { %v7546_v50 = vpop.f32.mrb[80].mxu1 }
 0x23a   :  { %v7547_v2 = vpop.f32.mrb[81].mxu1 }
 0x23b   :  { %v7548_v60 = vadd.f32 %v7547_v2, %v7546_v50  ;;  %v7549_v4 = vpop.f32.mrb[82].mxu1 }
 0x23c   :  { %v7550_v10 = vpop.f32.mrb[83].mxu1 }
 0x23d   :  { %v7551_v61 = vadd.f32 %v7550_v10, %v7549_v4 }
 0x23e   :  { %v7518_v53 = vpop.f32.mrb[80].mxu0 }
 0x23f   :  { %v7519_v0 = vpop.f32.mrb[81].mxu0 }
 0x240   :  { %v7520_v52 = vadd.f32 %v7519_v0, %v7518_v53  ;;  %v7521_v3 = vpop.f32.mrb[82].mxu0 }
 0x241   :  { %v7522_v5 = vpop.f32.mrb[83].mxu0  ;;  %v7552_v20 = vpop.f32.mrb[84].mxu1 }
 0x242   :  { %v5753_v6 = vadd.f32 %v7520_v52, %v5705_v47  ;;  %v7523_v7 = vadd.f32 %v7522_v5, %v7521_v3  ;;  %v7553_v8 = vpop.f32.mrb[85].mxu1 }
 0x243   :  { %v7554_v9 = vadd.f32 %v7553_v8, %v7552_v20  ;;  %v7555_v21 = vpop.f32.mrb[86].mxu1 }
 0x244   :  { %v5801_v1 = vadd.f32 %v7548_v60, %v5753_v6  ;;  %v5756_v62 = vadd.f32 %v7523_v7, %v5708_v49  ;;  %v7556_v22 = vpop.f32.mrb[87].mxu1 }
 0x246   :  { %v5804_v11 = vadd.f32 %v7551_v61, %v5756_v62  ;;  %v7524_v12 = vpop.f32.mrb[84].mxu0 }
 0x247   :  { %v7525_v13 = vpop.f32.mrb[85].mxu0 }
 0x248   :  { %v7526_v14 = vadd.f32 %v7525_v13, %v7524_v12  ;;  %v7527_v15 = vpop.f32.mrb[86].mxu0 }
 0x249   :  { %v7528_v16 = vpop.f32.mrb[87].mxu0 }
 0x24a   :  { %v5761_v17 = vadd.f32 %v7526_v14, %v5713_v51 }
 0x24c   :  { %v5809_v23 = vadd.f32 %v7554_v9, %v5761_v17 }
 0x259   :  { %v7602_v25 = vpop.f32.mrb[88].mxu1 }
 0x25a   :  { %v7603_v30 = vpop.f32.mrb[89].mxu1 }
 0x25b   :  { %v7604_v19 = vadd.f32 %v7603_v30, %v7602_v25  ;;  %v7605_v31 = vpop.f32.mrb[90].mxu1 }
 0x25c   :  { %v7606_v35 = vpop.f32.mrb[91].mxu1 }
 0x25d   :  { %v7607_v36 = vadd.f32 %v7606_v35, %v7605_v31 }
 0x25e   :  { %v7574_v24 = vpop.f32.mrb[88].mxu0 }
 0x25f   :  { %v7575_v26 = vpop.f32.mrb[89].mxu0 }
 0x260   :  { %v7576_v27 = vadd.f32 %v7575_v26, %v7574_v24  ;;  %v7577_v18 = vpop.f32.mrb[90].mxu0 }
 0x261   :  { %v7578_v32 = vpop.f32.mrb[91].mxu0  ;;  %v7608_v48 = vpop.f32.mrb[92].mxu1 }
 0x262   :  { %v5849_v33 = vadd.f32 %v7576_v27, %v5801_v1  ;;  %v7579_v34 = vadd.f32 %v7578_v32, %v7577_v18  ;;  %v7609_v49 = vpop.f32.mrb[93].mxu1 }
 0x263   :  { %v7610_v41 = vadd.f32 %v7609_v49, %v7608_v48  ;;  %v7611_v38 = vpop.f32.mrb[94].mxu1 }
 0x264   :  { %v5897_v37 = vadd.f32 %v7604_v19, %v5849_v33  ;;  %v5852_v43 = vadd.f32 %v7579_v34, %v5804_v11  ;;  %v7612_v42 = vpop.f32.mrb[95].mxu1 }
 0x266   :  { %v5900_v28 = vadd.f32 %v7607_v36, %v5852_v43  ;;  %v7580_v29 = vpop.f32.mrb[92].mxu0 }
 0x267   :  { %v7581_v39 = vpop.f32.mrb[93].mxu0 }
 0x268   :  { %v7582_v44 = vadd.f32 %v7581_v39, %v7580_v29  ;;  %v7583_v45 = vpop.f32.mrb[94].mxu0 }
 0x269   :  { %v7584_v46 = vpop.f32.mrb[95].mxu0 }
 0x26a   :  { %v5857_v47 = vadd.f32 %v7582_v44, %v5809_v23 }
 0x26c   :  { %v5905_v40 = vadd.f32 %v7610_v41, %v5857_v47 }
 0x279   :  { %v7658_v55 = vpop.f32.mrb[96].mxu1 }
 0x27a   :  { %v7659_v58 = vpop.f32.mrb[97].mxu1 }
 0x27b   :  { %v7660_v63 = vadd.f32 %v7659_v58, %v7658_v55  ;;  %v7661_v51 = vpop.f32.mrb[98].mxu1 }
 0x27c   :  { %v7662_v52 = vpop.f32.mrb[99].mxu1 }
 0x27d   :  { %v7663_v2 = vadd.f32 %v7662_v52, %v7661_v51 }
 0x27e   :  { %v7630_v54 = vpop.f32.mrb[96].mxu0 }
 0x27f   :  { %v7631_v56 = vpop.f32.mrb[97].mxu0 }
 0x280   :  { %v7632_v57 = vadd.f32 %v7631_v56, %v7630_v54  ;;  %v7633_v59 = vpop.f32.mrb[98].mxu0 }
 0x281   :  { %v7634_v53 = vpop.f32.mrb[99].mxu0  ;;  %v7664_v62 = vpop.f32.mrb[100].mxu1 }
 0x282   :  { %v5945_v50 = vadd.f32 %v7632_v57, %v5897_v37  ;;  %v7635_v0 = vadd.f32 %v7634_v53, %v7633_v59  ;;  %v7665_v11 = vpop.f32.mrb[101].mxu1 }
 0x283   :  { %v7666_v12 = vadd.f32 %v7665_v11, %v7664_v62  ;;  %v7667_v13 = vpop.f32.mrb[102].mxu1 }
 0x284   :  { %v5993_v3 = vadd.f32 %v7660_v63, %v5945_v50  ;;  %v5948_v60 = vadd.f32 %v7635_v0, %v5900_v28  ;;  %v7668_v14 = vpop.f32.mrb[103].mxu1 }
 0x286   :  { %v5996_v4 = vadd.f32 %v7663_v2, %v5948_v60  ;;  %v7636_v5 = vpop.f32.mrb[100].mxu0 }
 0x287   :  { %v7637_v6 = vpop.f32.mrb[101].mxu0 }
 0x288   :  { %v7638_v7 = vadd.f32 %v7637_v6, %v7636_v5  ;;  %v7639_v10 = vpop.f32.mrb[102].mxu0 }
 0x289   :  { %v7640_v61 = vpop.f32.mrb[103].mxu0 }
 0x28a   :  { %v5953_v1 = vadd.f32 %v7638_v7, %v5905_v40 }
 0x28c   :  { %v6001_v15 = vadd.f32 %v7666_v12, %v5953_v1 }
 0x299   :  { %v7714_v17 = vpop.f32.mrb[104].mxu1 }
 0x29a   :  { %v7715_v9 = vpop.f32.mrb[105].mxu1 }
 0x29b   :  { %v7716_v22 = vadd.f32 %v7715_v9, %v7714_v17  ;;  %v7717_v23 = vpop.f32.mrb[106].mxu1 }
 0x29c   :  { %v7718_v27 = vpop.f32.mrb[107].mxu1 }
 0x29d   :  { %v7719_v30 = vadd.f32 %v7718_v27, %v7717_v23 }
 0x29e   :  { %v7686_v16 = vpop.f32.mrb[104].mxu0 }
 0x29f   :  { %v7687_v20 = vpop.f32.mrb[105].mxu0 }
 0x2a0   :  { %v7688_v8 = vadd.f32 %v7687_v20, %v7686_v16  ;;  %v7689_v21 = vpop.f32.mrb[106].mxu0 }
 0x2a1   :  { %v7690_v24 = vpop.f32.mrb[107].mxu0  ;;  %v7720_v43 = vpop.f32.mrb[108].mxu1 }
 0x2a2   :  { %v6041_v25 = vadd.f32 %v7688_v8, %v5993_v3  ;;  %v7691_v26 = vadd.f32 %v7690_v24, %v7689_v21  ;;  %v7721_v28 = vpop.f32.mrb[109].mxu1 }
 0x2a3   :  { %v7722_v29 = vadd.f32 %v7721_v28, %v7720_v43  ;;  %v7723_v39 = vpop.f32.mrb[110].mxu1 }
 0x2a4   :  { %v6089_v18 = vadd.f32 %v7716_v22, %v6041_v25  ;;  %v6044_v19 = vadd.f32 %v7691_v26, %v5996_v4  ;;  %v7724_v44 = vpop.f32.mrb[111].mxu1 }
 0x2a6   :  { %v6092_v31 = vadd.f32 %v7719_v30, %v6044_v19  ;;  %v7692_v32 = vpop.f32.mrb[108].mxu0 }
 0x2a7   :  { %v7693_v33 = vpop.f32.mrb[109].mxu0 }
 0x2a8   :  { %v7694_v34 = vadd.f32 %v7693_v33, %v7692_v32  ;;  %v7695_v35 = vpop.f32.mrb[110].mxu0 }
 0x2a9   :  { %v7696_v36 = vpop.f32.mrb[111].mxu0 }
 0x2aa   :  { %v6049_v37 = vadd.f32 %v7694_v34, %v6001_v15 }
 0x2ac   :  { %v6097_v45 = vadd.f32 %v7722_v29, %v6049_v37 }
 0x2b9   :  { %v7770_v47 = vpop.f32.mrb[112].mxu1 }
 0x2ba   :  { %v7771_v41 = vpop.f32.mrb[113].mxu1 }
 0x2bb   :  { %v7772_v42 = vadd.f32 %v7771_v41, %v7770_v47  ;;  %v7773_v40 = vpop.f32.mrb[114].mxu1 }
 0x2bc   :  { %v7774_v57 = vpop.f32.mrb[115].mxu1 }
 0x2bd   :  { %v7775_v58 = vadd.f32 %v7774_v57, %v7773_v40 }
 0x2be   :  { %v7742_v46 = vpop.f32.mrb[112].mxu0 }
 0x2bf   :  { %v7743_v48 = vpop.f32.mrb[113].mxu0 }
 0x2c0   :  { %v7744_v49 = vadd.f32 %v7743_v48, %v7742_v46  ;;  %v7745_v38 = vpop.f32.mrb[114].mxu0 }
 0x2c1   :  { %v7746_v54 = vpop.f32.mrb[115].mxu0  ;;  %v7776_v60 = vpop.f32.mrb[116].mxu1 }
 0x2c2   :  { %v6137_v55 = vadd.f32 %v7744_v49, %v6089_v18  ;;  %v7747_v56 = vadd.f32 %v7746_v54, %v7745_v38  ;;  %v7777_v4 = vpop.f32.mrb[117].mxu1 }
 0x2c3   :  { %v7778_v5 = vadd.f32 %v7777_v4, %v7776_v60  ;;  %v7779_v6 = vpop.f32.mrb[118].mxu1 }
 0x2c4   :  { %v6185_v59 = vadd.f32 %v7772_v42, %v6137_v55  ;;  %v6140_v63 = vadd.f32 %v7747_v56, %v6092_v31  ;;  %v7780_v7 = vpop.f32.mrb[119].mxu1 }
 0x2c6   :  { %v6188_v51 = vadd.f32 %v7775_v58, %v6140_v63  ;;  %v7748_v53 = vpop.f32.mrb[116].mxu0 }
 0x2c7   :  { %v7749_v50 = vpop.f32.mrb[117].mxu0 }
 0x2c8   :  { %v7750_v0 = vadd.f32 %v7749_v50, %v7748_v53  ;;  %v7751_v52 = vpop.f32.mrb[118].mxu0 }
 0x2c9   :  { %v7752_v2 = vpop.f32.mrb[119].mxu0 }
 0x2ca   :  { %v6145_v3 = vadd.f32 %v7750_v0, %v6097_v45 }
 0x2cc   :  { %v6193_v10 = vadd.f32 %v7778_v5, %v6145_v3 }
 0x2d9   :  { %v7826_v1 = vpop.f32.mrb[120].mxu1 }
 0x2da   :  { %v7827_v12 = vpop.f32.mrb[121].mxu1 }
 0x2db   :  { %v7828_v14 = vadd.f32 %v7827_v12, %v7826_v1  ;;  %v7829_v15 = vpop.f32.mrb[122].mxu1 }
 0x2dc   :  { %v7830_v8 = vpop.f32.mrb[123].mxu1 }
 0x2dd   :  { %v7831_v9 = vadd.f32 %v7830_v8, %v7829_v15 }
 0x2e1   :  { %v7832_v25 = vpop.f32.mrb[124].mxu1 }
 0x2e2   :  { %v7833_v30 = vpop.f32.mrb[125].mxu1 }
 0x2e3   :  { %v7834_v19 = vadd.f32 %v7833_v30, %v7832_v25  ;;  %v7835_v31 = vpop.f32.mrb[126].mxu1 }
 0x2e4   :  { %v7836_v34 = vpop.f32.mrb[127].mxu1 }
 0x2e6   :  { %v7798_v61 = vpop.f32.mrb[120].mxu0 }
 0x2e7   :  { %v7799_v62 = vpop.f32.mrb[121].mxu0 }
 0x2e8   :  { %v7800_v11 = vadd.f32 %v7799_v62, %v7798_v61  ;;  %v7801_v13 = vpop.f32.mrb[122].mxu0 }
 0x2e9   :  { %v7802_v16 = vpop.f32.mrb[123].mxu0 }
 0x2ea   :  { %v6233_v17 = vadd.f32 %v7800_v11, %v6185_v59  ;;  %v7803_v20 = vadd.f32 %v7802_v16, %v7801_v13 }
 0x2ec   :  { %v6281_v21 = vadd.f32 %v7828_v14, %v6233_v17  ;;  %v6236_v22 = vadd.f32 %v7803_v20, %v6188_v51 }
 0x2ee   :  { %6294 = vst [vmem:[%s10348_s3] sm:$0xff] %v6281_v21  ;;  %v6284_v23 = vadd.f32 %v7831_v9, %v6236_v22  ;;  %v7804_v24 = vpop.f32.mrb[124].mxu0 }
 0x2ef   :  { %v7805_v26 = vpop.f32.mrb[125].mxu0 }
 0x2f0   :  { %6295 = vst [vmem:[%s10348_s3 + $0x8] sm:$0xff] %v6284_v23  ;;  %v7806_v27 = vadd.f32 %v7805_v26, %v7804_v24  ;;  %v7807_v18 = vpop.f32.mrb[126].mxu0 }
 0x2f1   :  { %v7808_v32 = vpop.f32.mrb[127].mxu0 }
 0x2f2   :  { %v6241_v33 = vadd.f32 %v7806_v27, %v6193_v10 }
 0x2f4   :  { %v6289_v35 = vadd.f32 %v7834_v19, %v6241_v33 }
 0x2f6   :  { %6296 = vst [vmem:[%s10348_s3 + $0x10] sm:$0xff] %v6289_v35 }

</bundles_post_ra>
